<compile_context>
chip_gen: v5e
topology: v5e:2x2
jax: 0.10.0
libtpu: 0.0.40
codegen_flags: <defaults>
</compile_context>

<pallas_src>
import functools
import jax
import jax.numpy as jnp
from jax import lax
from jax.experimental import pallas as pl
from jax.experimental.pallas import tpu as pltpu


NODE_PAD = 512                      # node counts padded to this -> tm never collapses to 128
EDGE_PAD = 512                      # label-edge count padding for the decoder
VMEM_LIMIT = 48 * 1024 * 1024       # safe on v5e/v6e (128 MiB) and v7x (64 MiB physical)
XW_RESIDENT_BYTES = 8 * 1024 * 1024 # keep resident-xw (x2 buffers) well inside VMEM budget


# ----------------------------------------------------------------------------
# small helpers
# ----------------------------------------------------------------------------
def _round_up(x, m):
    return ((x + m - 1) // m) * m


def _pick_tile(n_padded, max_tile):
    """Largest power-of-two tile <= max_tile (>=128) that divides n_padded (mult of 128)."""
    t = max_tile
    while t > 128 and n_padded % t:
        t //= 2
    return t


def _pad2(x, rows, cols):
    return jnp.pad(x, ((0, rows - x.shape[0]), (0, cols - x.shape[1])))


# ----------------------------------------------------------------------------
# Pallas kernels
# ----------------------------------------------------------------------------
def _dual_linear_kernel(x_ref, w_ref, b_ref, xw_ref, xdp_ref):
    """y = x @ [W_l | W_r]; first half -> bf16 xw (source projection for the other type's
    aggregation), second half (+ b_l of this type's incoming edge) -> f32 self path."""
    y = jnp.dot(x_ref[...], w_ref[...], preferred_element_type=jnp.float32)
    h = xw_ref.shape[1]
    xw_ref[...] = y[:, :h].astype(xw_ref.dtype)
    xdp_ref[...] = y[:, h:] + b_ref[...]


def _agg_kernel(a_ref, xw_ref, invd_ref, xdp_ref, o_ref, acc_ref,
                *, apply_relu, xw_resident):
    """out = (1/deg) * (A_counts @ (x_src @ W_l)) + (x_dst @ W_r + b_l), K-tiled.
    A is int8 counts, upcast to bf16 right before the MXU dot."""
    k = pl.program_id(1)
    tk = a_ref.shape[1]

    @pl.when(k == 0)
    def _():
        acc_ref[...] = jnp.zeros_like(acc_ref)

    a = a_ref[...].astype(jnp.bfloat16)
    if xw_resident:
        xw = xw_ref[pl.ds(pl.multiple_of(k * tk, tk), tk), :]
    else:
        xw = xw_ref[...]
    acc_ref[...] += jnp.dot(a, xw, preferred_element_type=jnp.float32)

    @pl.when(k == pl.num_programs(1) - 1)
    def _():
        out = acc_ref[...] * invd_ref[...] + xdp_ref[...]
        if apply_relu:
            out = jnp.maximum(out, 0.0)
        o_ref[...] = out.astype(o_ref.dtype)


def _decoder_kernel(zu_ref, zm_ref, w1a_ref, w1b_ref, b1_ref, w2_ref, b2_ref, o_ref):
    """relu(cat([zu, zm]) @ W1 + b1) @ W2 + b2 ; concat fused via W1 split.
    Last projection done as W2^T . h^T -> lane-dense (1, te) score row."""
    h = (jnp.dot(zu_ref[...], w1a_ref[...], preferred_element_type=jnp.float32)
         + jnp.dot(zm_ref[...], w1b_ref[...], preferred_element_type=jnp.float32)
         + b1_ref[...])
    h = jnp.maximum(h, 0.0)
    s = lax.dot_general(w2_ref[...], h.astype(w2_ref.dtype),
                        (((1,), (1,)), ((), ())),
                        preferred_element_type=jnp.float32)      # (1, te)
    o_ref[...] = s + b2_ref[0, 0]


# ----------------------------------------------------------------------------
# pallas_call wrappers
# ----------------------------------------------------------------------------
def _dual_linear(x, w_cat, b, h_p):
    n, cin = x.shape
    tr = _pick_tile(n, 512)
    return pl.pallas_call(
        _dual_linear_kernel,
        out_shape=(jax.ShapeDtypeStruct((n, h_p), jnp.bfloat16),
                   jax.ShapeDtypeStruct((n, h_p), jnp.float32)),
        grid_spec=pltpu.PrefetchScalarGridSpec(
            num_scalar_prefetch=0,
            grid=(n // tr,),
            in_specs=[pl.BlockSpec((tr, cin), lambda i: (i, 0)),
                      pl.BlockSpec((cin, 2 * h_p), lambda i: (0, 0)),
                      pl.BlockSpec((1, h_p), lambda i: (0, 0))],
            out_specs=(pl.BlockSpec((tr, h_p), lambda i: (i, 0)),
                       pl.BlockSpec((tr, h_p), lambda i: (i, 0)))),
        compiler_params=pltpu.CompilerParams(
            dimension_semantics=("parallel",),
            vmem_limit_bytes=VMEM_LIMIT),
    )(x, w_cat, b)


def _sage_aggregate(a8, xw, inv_deg, xdp, *, relu, out_dtype=jnp.bfloat16):
    n_dst, n_src = a8.shape
    h = xw.shape[1]
    tm = _pick_tile(n_dst, 512)
    tk = _pick_tile(n_src, 1024)

    xw_resident = (n_src * h * xw.dtype.itemsize) <= XW_RESIDENT_BYTES
    if xw_resident:
        xw_spec = pl.BlockSpec((n_src, h), lambda i, k: (0, 0))   # DMA'd once, VMEM-resident
    else:
        xw_spec = pl.BlockSpec((tk, h), lambda i, k: (k, 0))      # streaming fallback

    return pl.pallas_call(
        functools.partial(_agg_kernel, apply_relu=relu, xw_resident=xw_resident),
        out_shape=jax.ShapeDtypeStruct((n_dst, h), out_dtype),
        grid_spec=pltpu.PrefetchScalarGridSpec(
            num_scalar_prefetch=0,
            grid=(n_dst // tm, n_src // tk),
            in_specs=[pl.BlockSpec((tm, tk), lambda i, k: (i, k)),   # A counts (int8)
                      xw_spec,                                       # x_src @ W_l (bf16)
                      pl.BlockSpec((tm, 1), lambda i, k: (i, 0)),    # 1/deg (f32)
                      pl.BlockSpec((tm, h), lambda i, k: (i, 0))],   # x_dst @ W_r + b_l (f32)
            out_specs=pl.BlockSpec((tm, h), lambda i, k: (i, 0)),
            scratch_shapes=[pltpu.VMEM((tm, h), jnp.float32)]),
        compiler_params=pltpu.CompilerParams(
            dimension_semantics=("parallel", "arbitrary"),
            vmem_limit_bytes=VMEM_LIMIT),
    )(a8, xw, inv_deg, xdp)


def _edge_decoder(zu, zm, w1a, w1b, b1, w2, b2):
    e, h = zu.shape
    te = _pick_tile(e, 512)
    return pl.pallas_call(
        _decoder_kernel,
        out_shape=jax.ShapeDtypeStruct((1, e), jnp.float32),
        grid_spec=pltpu.PrefetchScalarGridSpec(
            num_scalar_prefetch=0,
            grid=(e // te,),
            in_specs=[pl.BlockSpec((te, h), lambda i: (i, 0)),
                      pl.BlockSpec((te, h), lambda i: (i, 0)),
                      pl.BlockSpec((h, h), lambda i: (0, 0)),
                      pl.BlockSpec((h, h), lambda i: (0, 0)),
                      pl.BlockSpec((1, h), lambda i: (0, 0)),
                      pl.BlockSpec((1, h), lambda i: (0, 0)),       # W2^T row (1, h)
                      pl.BlockSpec(memory_space=pltpu.MemorySpace.SMEM)],  # b2 scalar
            out_specs=pl.BlockSpec((1, te), lambda i: (0, i))),
        compiler_params=pltpu.CompilerParams(
            dimension_semantics=("parallel",),
            vmem_limit_bytes=VMEM_LIMIT),
    )(zu, zm, w1a, w1b, b1, w2, b2)


# ----------------------------------------------------------------------------
# Glue (plain JAX): incidence construction (one-time), padding, gathers, params
# ----------------------------------------------------------------------------
def preprocess_graph(edge_index_dict, num_users, num_movies):
    """Build int8 count incidence matrices + 1/deg vectors ONCE (edge_index is static)."""
    nu_p = _round_up(num_users, NODE_PAD)
    nm_p = _round_up(num_movies, NODE_PAD)

    def build(edge_index, n_src_p, n_dst_p):
        src, dst = edge_index[0], edge_index[1]
        counts = jnp.zeros((n_dst_p, n_src_p), jnp.float32).at[dst, src].add(1.0)
        deg = counts.sum(axis=1, keepdims=True)
        inv_deg = 1.0 / jnp.clip(deg, 1.0, None)
        # int8 counts assume < 128 parallel edges per (src, dst) pair (exact for 0/1 graphs)
        return counts.astype(jnp.int8), inv_deg

    a_um, invdeg_m = build(edge_index_dict[("user", "rates", "movie")], nu_p, nm_p)
    a_mu, invdeg_u = build(edge_index_dict[("movie", "rev_rates", "user")], nm_p, nu_p)
    return {"a_um": a_um, "invdeg_m": invdeg_m, "a_mu": a_mu, "invdeg_u": invdeg_u}


def init_params(key, in_user, in_movie, hidden):
    ks = iter(jax.random.split(key, 32))

    def lin(k, fan_in, fan_out):
        return jax.random.normal(k, (fan_in, fan_out), jnp.float32) * (1.0 / jnp.sqrt(fan_in))

    p = {}
    # conv1, edge type (user -> movie): src=user feats, dst=movie feats
    p["c1_um_wl"] = lin(next(ks), in_user, hidden)
    p["c1_um_bl"] = jnp.zeros((hidden,), jnp.float32)
    p["c1_um_wr"] = lin(next(ks), in_movie, hidden)
    # conv1, edge type (movie -> user)
    p["c1_mu_wl"] = lin(next(ks), in_movie, hidden)
    p["c1_mu_bl"] = jnp.zeros((hidden,), jnp.float32)
    p["c1_mu_wr"] = lin(next(ks), in_user, hidden)
    # conv2, edge type (user -> movie)
    p["c2_um_wl"] = lin(next(ks), hidden, hidden)
    p["c2_um_bl"] = jnp.zeros((hidden,), jnp.float32)
    p["c2_um_wr"] = lin(next(ks), hidden, hidden)
    # conv2, edge type (movie -> user)
    p["c2_mu_wl"] = lin(next(ks), hidden, hidden)
    p["c2_mu_bl"] = jnp.zeros((hidden,), jnp.float32)
    p["c2_mu_wr"] = lin(next(ks), hidden, hidden)
    # decoder: lin1 (2H -> H) split into user-half / movie-half, lin2 (H -> 1)
    p["d_w1a"] = lin(next(ks), hidden, hidden)
    p["d_w1b"] = lin(next(ks), hidden, hidden)
    p["d_b1"] = jnp.zeros((hidden,), jnp.float32)
    p["d_w2"] = lin(next(ks), hidden, 1)
    p["d_b2"] = jnp.zeros((1,), jnp.float32)
    return p


def _prepare_params(p, cu_p, cm_p, h_p):
    """Pad to (8,128)-aligned shapes; concat the two per-type projections column-wise."""
    def wcat(wl_name, wr_name, rin):
        wl = _pad2(p[wl_name], rin, h_p)
        wr = _pad2(p[wr_name], rin, h_p)
        return jnp.concatenate([wl, wr], axis=1).astype(jnp.bfloat16)

    def b(name):
        return _pad2(p[name].reshape(1, -1), 1, h_p).astype(jnp.float32)

    return {
        # layer 1: x_user projected by [W_l(user->movie) | W_r(self, movie->user edge)]
        "w1_u": wcat("c1_um_wl", "c1_mu_wr", cu_p), "b1_u": b("c1_mu_bl"),
        "w1_m": wcat("c1_mu_wl", "c1_um_wr", cm_p), "b1_m": b("c1_um_bl"),
        # layer 2
        "w2_u": wcat("c2_um_wl", "c2_mu_wr", h_p), "b2_u": b("c2_mu_bl"),
        "w2_m": wcat("c2_mu_wl", "c2_um_wr", h_p), "b2_m": b("c2_um_bl"),
        # decoder
        "d_w1a": _pad2(p["d_w1a"], h_p, h_p).astype(jnp.bfloat16),
        "d_w1b": _pad2(p["d_w1b"], h_p, h_p).astype(jnp.bfloat16),
        "d_b1": b("d_b1"),
        "d_w2": _pad2(p["d_w2"].T, 1, h_p).astype(jnp.bfloat16),   # (1, h_p) row
        "d_b2": p["d_b2"].reshape(1, 1).astype(jnp.float32),
    }


def model_forward(params, x_dict, graph, edge_label_index):
    x_user, x_movie = x_dict["user"], x_dict["movie"]
    nu, cu = x_user.shape
    nm, cm = x_movie.shape
    hidden = params["c2_um_wl"].shape[1]

    h_p = _round_up(hidden, 128)
    cu_p = _round_up(cu, 128)
    cm_p = _round_up(cm, 128)
    nu_p = _round_up(nu, NODE_PAD)
    nm_p = _round_up(nm, NODE_PAD)

    pp = _prepare_params(params, cu_p, cm_p, h_p)

    xu = _pad2(x_user, nu_p, cu_p).astype(jnp.bfloat16)
    xm = _pad2(x_movie, nm_p, cm_p).astype(jnp.bfloat16)

    a_um, invdeg_m = graph["a_um"], graph["invdeg_m"]
    a_mu, invdeg_u = graph["a_mu"], graph["invdeg_u"]

    # --- encoder layer 1 (relu) ---
    xw_u, xdp_u = _dual_linear(xu, pp["w1_u"], pp["b1_u"], h_p)
    xw_m, xdp_m = _dual_linear(xm, pp["w1_m"], pp["b1_m"], h_p)
    h_movie = _sage_aggregate(a_um, xw_u, invdeg_m, xdp_m, relu=True)
    h_user = _sage_aggregate(a_mu, xw_m, invdeg_u, xdp_u, relu=True)

    # --- encoder layer 2 (no relu) ---
    xw_u2, xdp_u2 = _dual_linear(h_user, pp["w2_u"], pp["b2_u"], h_p)
    xw_m2, xdp_m2 = _dual_linear(h_movie, pp["w2_m"], pp["b2_m"], h_p)
    z_movie = _sage_aggregate(a_um, xw_u2, invdeg_m, xdp_m2, relu=False)
    z_user = _sage_aggregate(a_mu, xw_m2, invdeg_u, xdp_u2, relu=False)

    # --- decoder ---
    row, col = edge_label_index[0], edge_label_index[1]
    e = row.shape[0]
    e_p = _round_up(e, EDGE_PAD)
    row_p = jnp.pad(row, (0, e_p - e))
    col_p = jnp.pad(col, (0, e_p - e))
    # TODO(synk): fuse this gather into the decoder kernel (scalar-prefetched indices + DMA)
    zu = jnp.take(z_user, row_p, axis=0)
    zm = jnp.take(z_movie, col_p, axis=0)
    out = _edge_decoder(zu, zm, pp["d_w1a"], pp["d_w1b"], pp["d_b1"],
                        pp["d_w2"], pp["d_b2"])
    return out.reshape(-1)[:e]   # .view(-1)


model_forward = jax.jit(model_forward)


# ----------------------------------------------------------------------------
if __name__ == "__main__":
    key = jax.random.PRNGKey(0)
    k_xu, k_xm, k_e, k_lbl, k_p = jax.random.split(key, 5)

    num_users, num_movies = 12, 10
    in_user, in_movie = 20, 28
    hidden = 32
    num_graph_edges = 40
    num_label_edges = 16

    x_dict = {
        "user": jax.random.normal(k_xu, (num_users, in_user), jnp.float32),
        "movie": jax.random.normal(k_xm, (num_movies, in_movie), jnp.float32),
    }

    ke1, ke2 = jax.random.split(k_e)
    e_src = jax.random.randint(ke1, (num_graph_edges,), 0, num_users)
    e_dst = jax.random.randint(ke2, (num_graph_edges,), 0, num_movies)
    edge_index_dict = {
        ("user", "rates", "movie"): jnp.stack([e_src, e_dst]),
        ("movie", "rev_rates", "user"): jnp.stack([e_dst, e_src]),
    }

    kl1, kl2 = jax.random.split(k_lbl)
    edge_label_index = jnp.stack([
        jax.random.randint(kl1, (num_label_edges,), 0, num_users),
        jax.random.randint(kl2, (num_label_edges,), 0, num_movies),
    ])

    params = init_params(k_p, in_user, in_movie, hidden)

    # one-time graph preprocessing (outside the jitted forward)
    graph = preprocess_graph(edge_index_dict, num_users, num_movies)
    graph = jax.tree_util.tree_map(jax.block_until_ready, graph)

    out = model_forward(params, x_dict, graph, edge_label_index)
    jax.block_until_ready(out)
    assert out.shape == (num_label_edges,), out.shape
    assert bool(jnp.all(jnp.isfinite(out)))
    print("KERNEL_OK")
</pallas_src>

<mosaic_0001>
module attributes {stable_mosaic.version = 11 : i64} {
  func.func @_dual_linear_kernel(%arg0: i32, %arg1: memref<512x128xbf16, #tpu.memory_space<vmem>>, %arg2: memref<128x256xbf16, #tpu.memory_space<vmem>>, %arg3: memref<1x128xf32, #tpu.memory_space<vmem>>, %arg4: memref<512x128xbf16, #tpu.memory_space<vmem>>, %arg5: memref<512x128xf32, #tpu.memory_space<vmem>>) attributes {dimension_semantics = [#tpu.dimension_semantics<parallel>], iteration_bounds = array<i64: 1>, scalar_prefetch = 0 : i64, scratch_operands = 0 : i64, tpu.core_type = #tpu.core_type<tc>, window_params = [{transform_indices = @transform_0, window_bounds = array<i64: 512, 128>}, {pipeline_mode = #tpu.pipeline_mode<synchronous>, transform_indices = @transform_1, window_bounds = array<i64: 128, 256>}, {pipeline_mode = #tpu.pipeline_mode<synchronous>, transform_indices = @transform_2, window_bounds = array<i64: 1, 128>}, {transform_indices = @transform_3, window_bounds = array<i64: 512, 128>}, {transform_indices = @transform_4, window_bounds = array<i64: 512, 128>}]} {
    %c0 = arith.constant 0 : index
    %c0_0 = arith.constant 0 : index
    %0 = vector.load %arg1[%c0, %c0_0] : memref<512x128xbf16, #tpu.memory_space<vmem>>, vector<512x128xbf16>
    %c0_1 = arith.constant 0 : index
    %c0_2 = arith.constant 0 : index
    %1 = vector.load %arg2[%c0_1, %c0_2] : memref<128x256xbf16, #tpu.memory_space<vmem>>, vector<128x256xbf16>
    %cst = arith.constant dense<0.000000e+00> : vector<512x256xf32>
    %2 = tpu.matmul %0, %1, %cst {dimension_numbers = #tpu.dot_dimension_numbers<[1], [0], [0], [1], [0, 0, 1, 1], [], []>} : vector<512x128xbf16>, vector<128x256xbf16>, vector<512x256xf32> -> vector<512x256xf32>
    %3 = vector.extract_strided_slice %2 {offsets = [0, 0], sizes = [512, 128], strides = [1, 1]} : vector<512x256xf32> to vector<512x128xf32>
    %4 = arith.truncf %3 : vector<512x128xf32> to vector<512x128xbf16>
    %c0_3 = arith.constant 0 : index
    %c0_4 = arith.constant 0 : index
    %5 = vector.load %arg4[%c0_3, %c0_4] : memref<512x128xbf16, #tpu.memory_space<vmem>>, vector<512x128xbf16>
    tpu.vector_store %arg4[%c0_3, %c0_4], %4 {strides = array<i32>} : memref<512x128xbf16, #tpu.memory_space<vmem>>, vector<512x128xbf16>,
    %6 = vector.extract_strided_slice %2 {offsets = [0, 128], sizes = [512, 128], strides = [1, 1]} : vector<512x256xf32> to vector<512x128xf32>
    %c0_5 = arith.constant 0 : index
    %c0_6 = arith.constant 0 : index
    %7 = vector.load %arg3[%c0_5, %c0_6] : memref<1x128xf32, #tpu.memory_space<vmem>>, vector<1x128xf32>
    %8 = vector.broadcast %7 : vector<1x128xf32> to vector<512x128xf32>
    %9 = arith.addf %6, %8 : vector<512x128xf32>
    %c0_7 = arith.constant 0 : index
    %c0_8 = arith.constant 0 : index
    %10 = vector.load %arg5[%c0_7, %c0_8] : memref<512x128xf32, #tpu.memory_space<vmem>>, vector<512x128xf32>
    tpu.vector_store %arg5[%c0_7, %c0_8], %9 {strides = array<i32>} : memref<512x128xf32, #tpu.memory_space<vmem>>, vector<512x128xf32>,
    return
  }
  func.func @transform_0(%arg0: i32) -> (i32, i32) {
    %c0_i32 = arith.constant 0 : i32
    %c0_i32_0 = arith.constant 0 : i32
    return %arg0, %c0_i32 : i32, i32
  }
  func.func @transform_1(%arg0: i32) -> (i32, i32) {
    %c0_i32 = arith.constant 0 : i32
    %c0_i32_0 = arith.constant 0 : i32
    %c0_i32_1 = arith.constant 0 : i32
    return %c0_i32, %c0_i32_0 : i32, i32
  }
  func.func @transform_2(%arg0: i32) -> (i32, i32) {
    %c0_i32 = arith.constant 0 : i32
    %c0_i32_0 = arith.constant 0 : i32
    %c0_i32_1 = arith.constant 0 : i32
    return %c0_i32, %c0_i32_0 : i32, i32
  }
  func.func @transform_3(%arg0: i32) -> (i32, i32) {
    %c0_i32 = arith.constant 0 : i32
    %c0_i32_0 = arith.constant 0 : i32
    return %arg0, %c0_i32 : i32, i32
  }
  func.func @transform_4(%arg0: i32) -> (i32, i32) {
    %c0_i32 = arith.constant 0 : i32
    %c0_i32_0 = arith.constant 0 : i32
    return %arg0, %c0_i32 : i32, i32
  }
}

module attributes {stable_mosaic.version = 11 : i64} {
  func.func @_agg_kernel(%arg0: i32, %arg1: i32, %arg2: memref<512x512xi8, #tpu.memory_space<vmem>>, %arg3: memref<512x128xbf16, #tpu.memory_space<vmem>>, %arg4: memref<512x1xf32, #tpu.memory_space<vmem>>, %arg5: memref<512x128xf32, #tpu.memory_space<vmem>>, %arg6: memref<512x128xbf16, #tpu.memory_space<vmem>>, %arg7: memref<512x128xf32, #tpu.memory_space<vmem>>) attributes {dimension_semantics = [#tpu.dimension_semantics<parallel>, #tpu.dimension_semantics<arbitrary>], iteration_bounds = array<i64: 1, 1>, scalar_prefetch = 0 : i64, scratch_operands = 1 : i64, tpu.core_type = #tpu.core_type<tc>, window_params = [{transform_indices = @transform_0, window_bounds = array<i64: 512, 512>}, {pipeline_mode = #tpu.pipeline_mode<synchronous>, transform_indices = @transform_1, window_bounds = array<i64: 512, 128>}, {transform_indices = @transform_2, window_bounds = array<i64: 512, 1>}, {transform_indices = @transform_3, window_bounds = array<i64: 512, 128>}, {transform_indices = @transform_4, window_bounds = array<i64: 512, 128>}]} {
    %c0_i32 = arith.constant 0 : i32
    %0 = arith.cmpi eq, %arg1, %c0_i32 : i32
    %1 = arith.extui %0 : i1 to i32
    %c0_i32_0 = arith.constant 0 : i32
    %2 = arith.cmpi ne, %1, %c0_i32_0 : i32
    scf.if %2 {
      %cst_9 = arith.constant 0.000000e+00 : f32
      %16 = vector.broadcast %cst_9 : f32 to vector<512x128xf32>
      %c0_10 = arith.constant 0 : index
      %c0_11 = arith.constant 0 : index
      %17 = vector.load %arg7[%c0_10, %c0_11] : memref<512x128xf32, #tpu.memory_space<vmem>>, vector<512x128xf32>
      tpu.vector_store %arg7[%c0_10, %c0_11], %16 {strides = array<i32>} : memref<512x128xf32, #tpu.memory_space<vmem>>, vector<512x128xf32>,
    } else {
    }
    %c0 = arith.constant 0 : index
    %c0_1 = arith.constant 0 : index
    %3 = vector.load %arg2[%c0, %c0_1] : memref<512x512xi8, #tpu.memory_space<vmem>>, vector<512x512xi8>
    %4 = arith.sitofp %3 : vector<512x512xi8> to vector<512x512xbf16>
    %c512_i32 = arith.constant 512 : i32
    %5 = arith.muli %arg1, %c512_i32 : i32
    %6 = tpu.assume_multiple %5, 512 : i32
    %7 = arith.index_cast %6 : i32 to index
    %c0_2 = arith.constant 0 : index
    %8 = vector.load %arg3[%7, %c0_2] : memref<512x128xbf16, #tpu.memory_space<vmem>>, vector<512x128xbf16>
    %c0_3 = arith.constant 0 : index
    %c0_4 = arith.constant 0 : index
    %9 = vector.load %arg7[%c0_3, %c0_4] : memref<512x128xf32, #tpu.memory_space<vmem>>, vector<512x128xf32>
    %cst = arith.constant dense<0.000000e+00> : vector<512x128xf32>
    %10 = tpu.matmul %4, %8, %cst {dimension_numbers = #tpu.dot_dimension_numbers<[1], [0], [0], [1], [0, 0, 1, 1], [], []>} : vector<512x512xbf16>, vector<512x128xbf16>, vector<512x128xf32> -> vector<512x128xf32>
    %11 = arith.addf %9, %10 : vector<512x128xf32>
    %c0_5 = arith.constant 0 : index
    %c0_6 = arith.constant 0 : index
    %12 = vector.load %arg7[%c0_5, %c0_6] : memref<512x128xf32, #tpu.memory_space<vmem>>, vector<512x128xf32>
    tpu.vector_store %arg7[%c0_5, %c0_6], %11 {strides = array<i32>} : memref<512x128xf32, #tpu.memory_space<vmem>>, vector<512x128xf32>,
    %c0_i32_7 = arith.constant 0 : i32
    %13 = arith.cmpi eq, %arg1, %c0_i32_7 : i32
    %14 = arith.extui %13 : i1 to i32
    %c0_i32_8 = arith.constant 0 : i32
    %15 = arith.cmpi ne, %14, %c0_i32_8 : i32
    scf.if %15 {
      %c0_9 = arith.constant 0 : index
      %c0_10 = arith.constant 0 : index
      %16 = vector.load %arg7[%c0_9, %c0_10] : memref<512x128xf32, #tpu.memory_space<vmem>>, vector<512x128xf32>
      %c0_11 = arith.constant 0 : index
      %c0_12 = arith.constant 0 : index
      %17 = vector.load %arg4[%c0_11, %c0_12] : memref<512x1xf32, #tpu.memory_space<vmem>>, vector<512x1xf32>
      %18 = vector.broadcast %17 : vector<512x1xf32> to vector<512x128xf32>
      %19 = arith.mulf %16, %18 : vector<512x128xf32>
      %c0_13 = arith.constant 0 : index
      %c0_14 = arith.constant 0 : index
      %20 = vector.load %arg5[%c0_13, %c0_14] : memref<512x128xf32, #tpu.memory_space<vmem>>, vector<512x128xf32>
      %21 = arith.addf %19, %20 : vector<512x128xf32>
      %cst_15 = arith.constant 0.000000e+00 : f32
      %22 = vector.broadcast %cst_15 : f32 to vector<512x128xf32>
      %23 = arith.maximumf %21, %22 : vector<512x128xf32>
      %24 = arith.truncf %23 : vector<512x128xf32> to vector<512x128xbf16>
      %c0_16 = arith.constant 0 : index
      %c0_17 = arith.constant 0 : index
      %25 = vector.load %arg6[%c0_16, %c0_17] : memref<512x128xbf16, #tpu.memory_space<vmem>>, vector<512x128xbf16>
      tpu.vector_store %arg6[%c0_16, %c0_17], %24 {strides = array<i32>} : memref<512x128xbf16, #tpu.memory_space<vmem>>, vector<512x128xbf16>,
    } else {
    }
    return
  }
  func.func @transform_0(%arg0: i32, %arg1: i32) -> (i32, i32) {
    %c0_i32 = arith.constant 0 : i32
    return %arg0, %arg1 : i32, i32
  }
  func.func @transform_1(%arg0: i32, %arg1: i32) -> (i32, i32) {
    %c0_i32 = arith.constant 0 : i32
    %c0_i32_0 = arith.constant 0 : i32
    %c0_i32_1 = arith.constant 0 : i32
    return %c0_i32, %c0_i32_0 : i32, i32
  }
  func.func @transform_2(%arg0: i32, %arg1: i32) -> (i32, i32) {
    %c0_i32 = arith.constant 0 : i32
    %c0_i32_0 = arith.constant 0 : i32
    return %arg0, %c0_i32 : i32, i32
  }
  func.func @transform_3(%arg0: i32, %arg1: i32) -> (i32, i32) {
    %c0_i32 = arith.constant 0 : i32
    %c0_i32_0 = arith.constant 0 : i32
    return %arg0, %c0_i32 : i32, i32
  }
  func.func @transform_4(%arg0: i32, %arg1: i32) -> (i32, i32) {
    %c0_i32 = arith.constant 0 : i32
    %c0_i32_0 = arith.constant 0 : i32
    return %arg0, %c0_i32 : i32, i32
  }
}

module attributes {stable_mosaic.version = 11 : i64} {
  func.func @_agg_kernel(%arg0: i32, %arg1: i32, %arg2: memref<512x512xi8, #tpu.memory_space<vmem>>, %arg3: memref<512x128xbf16, #tpu.memory_space<vmem>>, %arg4: memref<512x1xf32, #tpu.memory_space<vmem>>, %arg5: memref<512x128xf32, #tpu.memory_space<vmem>>, %arg6: memref<512x128xbf16, #tpu.memory_space<vmem>>, %arg7: memref<512x128xf32, #tpu.memory_space<vmem>>) attributes {dimension_semantics = [#tpu.dimension_semantics<parallel>, #tpu.dimension_semantics<arbitrary>], iteration_bounds = array<i64: 1, 1>, scalar_prefetch = 0 : i64, scratch_operands = 1 : i64, tpu.core_type = #tpu.core_type<tc>, window_params = [{transform_indices = @transform_0, window_bounds = array<i64: 512, 512>}, {pipeline_mode = #tpu.pipeline_mode<synchronous>, transform_indices = @transform_1, window_bounds = array<i64: 512, 128>}, {transform_indices = @transform_2, window_bounds = array<i64: 512, 1>}, {transform_indices = @transform_3, window_bounds = array<i64: 512, 128>}, {transform_indices = @transform_4, window_bounds = array<i64: 512, 128>}]} {
    %c0_i32 = arith.constant 0 : i32
    %0 = arith.cmpi eq, %arg1, %c0_i32 : i32
    %1 = arith.extui %0 : i1 to i32
    %c0_i32_0 = arith.constant 0 : i32
    %2 = arith.cmpi ne, %1, %c0_i32_0 : i32
    scf.if %2 {
      %cst_9 = arith.constant 0.000000e+00 : f32
      %16 = vector.broadcast %cst_9 : f32 to vector<512x128xf32>
      %c0_10 = arith.constant 0 : index
      %c0_11 = arith.constant 0 : index
      %17 = vector.load %arg7[%c0_10, %c0_11] : memref<512x128xf32, #tpu.memory_space<vmem>>, vector<512x128xf32>
      tpu.vector_store %arg7[%c0_10, %c0_11], %16 {strides = array<i32>} : memref<512x128xf32, #tpu.memory_space<vmem>>, vector<512x128xf32>,
    } else {
    }
    %c0 = arith.constant 0 : index
    %c0_1 = arith.constant 0 : index
    %3 = vector.load %arg2[%c0, %c0_1] : memref<512x512xi8, #tpu.memory_space<vmem>>, vector<512x512xi8>
    %4 = arith.sitofp %3 : vector<512x512xi8> to vector<512x512xbf16>
    %c512_i32 = arith.constant 512 : i32
    %5 = arith.muli %arg1, %c512_i32 : i32
    %6 = tpu.assume_multiple %5, 512 : i32
    %7 = arith.index_cast %6 : i32 to index
    %c0_2 = arith.constant 0 : index
    %8 = vector.load %arg3[%7, %c0_2] : memref<512x128xbf16, #tpu.memory_space<vmem>>, vector<512x128xbf16>
    %c0_3 = arith.constant 0 : index
    %c0_4 = arith.constant 0 : index
    %9 = vector.load %arg7[%c0_3, %c0_4] : memref<512x128xf32, #tpu.memory_space<vmem>>, vector<512x128xf32>
    %cst = arith.constant dense<0.000000e+00> : vector<512x128xf32>
    %10 = tpu.matmul %4, %8, %cst {dimension_numbers = #tpu.dot_dimension_numbers<[1], [0], [0], [1], [0, 0, 1, 1], [], []>} : vector<512x512xbf16>, vector<512x128xbf16>, vector<512x128xf32> -> vector<512x128xf32>
    %11 = arith.addf %9, %10 : vector<512x128xf32>
    %c0_5 = arith.constant 0 : index
    %c0_6 = arith.constant 0 : index
    %12 = vector.load %arg7[%c0_5, %c0_6] : memref<512x128xf32, #tpu.memory_space<vmem>>, vector<512x128xf32>
    tpu.vector_store %arg7[%c0_5, %c0_6], %11 {strides = array<i32>} : memref<512x128xf32, #tpu.memory_space<vmem>>, vector<512x128xf32>,
    %c0_i32_7 = arith.constant 0 : i32
    %13 = arith.cmpi eq, %arg1, %c0_i32_7 : i32
    %14 = arith.extui %13 : i1 to i32
    %c0_i32_8 = arith.constant 0 : i32
    %15 = arith.cmpi ne, %14, %c0_i32_8 : i32
    scf.if %15 {
      %c0_9 = arith.constant 0 : index
      %c0_10 = arith.constant 0 : index
      %16 = vector.load %arg7[%c0_9, %c0_10] : memref<512x128xf32, #tpu.memory_space<vmem>>, vector<512x128xf32>
      %c0_11 = arith.constant 0 : index
      %c0_12 = arith.constant 0 : index
      %17 = vector.load %arg4[%c0_11, %c0_12] : memref<512x1xf32, #tpu.memory_space<vmem>>, vector<512x1xf32>
      %18 = vector.broadcast %17 : vector<512x1xf32> to vector<512x128xf32>
      %19 = arith.mulf %16, %18 : vector<512x128xf32>
      %c0_13 = arith.constant 0 : index
      %c0_14 = arith.constant 0 : index
      %20 = vector.load %arg5[%c0_13, %c0_14] : memref<512x128xf32, #tpu.memory_space<vmem>>, vector<512x128xf32>
      %21 = arith.addf %19, %20 : vector<512x128xf32>
      %22 = arith.truncf %21 : vector<512x128xf32> to vector<512x128xbf16>
      %c0_15 = arith.constant 0 : index
      %c0_16 = arith.constant 0 : index
      %23 = vector.load %arg6[%c0_15, %c0_16] : memref<512x128xbf16, #tpu.memory_space<vmem>>, vector<512x128xbf16>
      tpu.vector_store %arg6[%c0_15, %c0_16], %22 {strides = array<i32>} : memref<512x128xbf16, #tpu.memory_space<vmem>>, vector<512x128xbf16>,
    } else {
    }
    return
  }
  func.func @transform_0(%arg0: i32, %arg1: i32) -> (i32, i32) {
    %c0_i32 = arith.constant 0 : i32
    return %arg0, %arg1 : i32, i32
  }
  func.func @transform_1(%arg0: i32, %arg1: i32) -> (i32, i32) {
    %c0_i32 = arith.constant 0 : i32
    %c0_i32_0 = arith.constant 0 : i32
    %c0_i32_1 = arith.constant 0 : i32
    return %c0_i32, %c0_i32_0 : i32, i32
  }
  func.func @transform_2(%arg0: i32, %arg1: i32) -> (i32, i32) {
    %c0_i32 = arith.constant 0 : i32
    %c0_i32_0 = arith.constant 0 : i32
    return %arg0, %c0_i32 : i32, i32
  }
  func.func @transform_3(%arg0: i32, %arg1: i32) -> (i32, i32) {
    %c0_i32 = arith.constant 0 : i32
    %c0_i32_0 = arith.constant 0 : i32
    return %arg0, %c0_i32 : i32, i32
  }
  func.func @transform_4(%arg0: i32, %arg1: i32) -> (i32, i32) {
    %c0_i32 = arith.constant 0 : i32
    %c0_i32_0 = arith.constant 0 : i32
    return %arg0, %c0_i32 : i32, i32
  }
}

module attributes {stable_mosaic.version = 11 : i64} {
  func.func @_agg_kernel(%arg0: i32, %arg1: i32, %arg2: memref<512x512xi8, #tpu.memory_space<vmem>>, %arg3: memref<512x128xbf16, #tpu.memory_space<vmem>>, %arg4: memref<512x1xf32, #tpu.memory_space<vmem>>, %arg5: memref<512x128xf32, #tpu.memory_space<vmem>>, %arg6: memref<512x128xbf16, #tpu.memory_space<vmem>>, %arg7: memref<512x128xf32, #tpu.memory_space<vmem>>) attributes {dimension_semantics = [#tpu.dimension_semantics<parallel>, #tpu.dimension_semantics<arbitrary>], iteration_bounds = array<i64: 1, 1>, scalar_prefetch = 0 : i64, scratch_operands = 1 : i64, tpu.core_type = #tpu.core_type<tc>, window_params = [{transform_indices = @transform_0, window_bounds = array<i64: 512, 512>}, {pipeline_mode = #tpu.pipeline_mode<synchronous>, transform_indices = @transform_1, window_bounds = array<i64: 512, 128>}, {transform_indices = @transform_2, window_bounds = array<i64: 512, 1>}, {transform_indices = @transform_3, window_bounds = array<i64: 512, 128>}, {transform_indices = @transform_4, window_bounds = array<i64: 512, 128>}]} {
    %c0_i32 = arith.constant 0 : i32
    %0 = arith.cmpi eq, %arg1, %c0_i32 : i32
    %1 = arith.extui %0 : i1 to i32
    %c0_i32_0 = arith.constant 0 : i32
    %2 = arith.cmpi ne, %1, %c0_i32_0 : i32
    scf.if %2 {
      %cst_9 = arith.constant 0.000000e+00 : f32
      %16 = vector.broadcast %cst_9 : f32 to vector<512x128xf32>
      %c0_10 = arith.constant 0 : index
      %c0_11 = arith.constant 0 : index
      %17 = vector.load %arg7[%c0_10, %c0_11] : memref<512x128xf32, #tpu.memory_space<vmem>>, vector<512x128xf32>
      tpu.vector_store %arg7[%c0_10, %c0_11], %16 {strides = array<i32>} : memref<512x128xf32, #tpu.memory_space<vmem>>, vector<512x128xf32>,
    } else {
    }
    %c0 = arith.constant 0 : index
    %c0_1 = arith.constant 0 : index
    %3 = vector.load %arg2[%c0, %c0_1] : memref<512x512xi8, #tpu.memory_space<vmem>>, vector<512x512xi8>
    %4 = arith.sitofp %3 : vector<512x512xi8> to vector<512x512xbf16>
    %c512_i32 = arith.constant 512 : i32
    %5 = arith.muli %arg1, %c512_i32 : i32
    %6 = tpu.assume_multiple %5, 512 : i32
    %7 = arith.index_cast %6 : i32 to index
    %c0_2 = arith.constant 0 : index
    %8 = vector.load %arg3[%7, %c0_2] : memref<512x128xbf16, #tpu.memory_space<vmem>>, vector<512x128xbf16>
    %c0_3 = arith.constant 0 : index
    %c0_4 = arith.constant 0 : index
    %9 = vector.load %arg7[%c0_3, %c0_4] : memref<512x128xf32, #tpu.memory_space<vmem>>, vector<512x128xf32>
    %cst = arith.constant dense<0.000000e+00> : vector<512x128xf32>
    %10 = tpu.matmul %4, %8, %cst {dimension_numbers = #tpu.dot_dimension_numbers<[1], [0], [0], [1], [0, 0, 1, 1], [], []>} : vector<512x512xbf16>, vector<512x128xbf16>, vector<512x128xf32> -> vector<512x128xf32>
    %11 = arith.addf %9, %10 : vector<512x128xf32>
    %c0_5 = arith.constant 0 : index
    %c0_6 = arith.constant 0 : index
    %12 = vector.load %arg7[%c0_5, %c0_6] : memref<512x128xf32, #tpu.memory_space<vmem>>, vector<512x128xf32>
    tpu.vector_store %arg7[%c0_5, %c0_6], %11 {strides = array<i32>} : memref<512x128xf32, #tpu.memory_space<vmem>>, vector<512x128xf32>,
    %c0_i32_7 = arith.constant 0 : i32
    %13 = arith.cmpi eq, %arg1, %c0_i32_7 : i32
    %14 = arith.extui %13 : i1 to i32
    %c0_i32_8 = arith.constant 0 : i32
    %15 = arith.cmpi ne, %14, %c0_i32_8 : i32
    scf.if %15 {
      %c0_9 = arith.constant 0 : index
      %c0_10 = arith.constant 0 : index
      %16 = vector.load %arg7[%c0_9, %c0_10] : memref<512x128xf32, #tpu.memory_space<vmem>>, vector<512x128xf32>
      %c0_11 = arith.constant 0 : index
      %c0_12 = arith.constant 0 : index
      %17 = vector.load %arg4[%c0_11, %c0_12] : memref<512x1xf32, #tpu.memory_space<vmem>>, vector<512x1xf32>
      %18 = vector.broadcast %17 : vector<512x1xf32> to vector<512x128xf32>
      %19 = arith.mulf %16, %18 : vector<512x128xf32>
      %c0_13 = arith.constant 0 : index
      %c0_14 = arith.constant 0 : index
      %20 = vector.load %arg5[%c0_13, %c0_14] : memref<512x128xf32, #tpu.memory_space<vmem>>, vector<512x128xf32>
      %21 = arith.addf %19, %20 : vector<512x128xf32>
      %22 = arith.truncf %21 : vector<512x128xf32> to vector<512x128xbf16>
      %c0_15 = arith.constant 0 : index
      %c0_16 = arith.constant 0 : index
      %23 = vector.load %arg6[%c0_15, %c0_16] : memref<512x128xbf16, #tpu.memory_space<vmem>>, vector<512x128xbf16>
      tpu.vector_store %arg6[%c0_15, %c0_16], %22 {strides = array<i32>} : memref<512x128xbf16, #tpu.memory_space<vmem>>, vector<512x128xbf16>,
    } else {
    }
    return
  }
  func.func @transform_0(%arg0: i32, %arg1: i32) -> (i32, i32) {
    %c0_i32 = arith.constant 0 : i32
    return %arg0, %arg1 : i32, i32
  }
  func.func @transform_1(%arg0: i32, %arg1: i32) -> (i32, i32) {
    %c0_i32 = arith.constant 0 : i32
    %c0_i32_0 = arith.constant 0 : i32
    %c0_i32_1 = arith.constant 0 : i32
    return %c0_i32, %c0_i32_0 : i32, i32
  }
  func.func @transform_2(%arg0: i32, %arg1: i32) -> (i32, i32) {
    %c0_i32 = arith.constant 0 : i32
    %c0_i32_0 = arith.constant 0 : i32
    return %arg0, %c0_i32 : i32, i32
  }
  func.func @transform_3(%arg0: i32, %arg1: i32) -> (i32, i32) {
    %c0_i32 = arith.constant 0 : i32
    %c0_i32_0 = arith.constant 0 : i32
    return %arg0, %c0_i32 : i32, i32
  }
  func.func @transform_4(%arg0: i32, %arg1: i32) -> (i32, i32) {
    %c0_i32 = arith.constant 0 : i32
    %c0_i32_0 = arith.constant 0 : i32
    return %arg0, %c0_i32 : i32, i32
  }
}

module attributes {stable_mosaic.version = 11 : i64} {
  func.func @_decoder_kernel(%arg0: i32, %arg1: memref<512x128xbf16, #tpu.memory_space<vmem>>, %arg2: memref<512x128xbf16, #tpu.memory_space<vmem>>, %arg3: memref<128x128xbf16, #tpu.memory_space<vmem>>, %arg4: memref<128x128xbf16, #tpu.memory_space<vmem>>, %arg5: memref<1x128xf32, #tpu.memory_space<vmem>>, %arg6: memref<1x128xbf16, #tpu.memory_space<vmem>>, %arg7: memref<1x1xf32, #tpu.memory_space<smem>>, %arg8: memref<1x512xf32, #tpu.memory_space<vmem>>) attributes {dimension_semantics = [#tpu.dimension_semantics<parallel>], iteration_bounds = array<i64: 1>, scalar_prefetch = 0 : i64, scratch_operands = 0 : i64, tpu.core_type = #tpu.core_type<tc>, window_params = [{transform_indices = @transform_0, window_bounds = array<i64: 512, 128>}, {transform_indices = @transform_1, window_bounds = array<i64: 512, 128>}, {pipeline_mode = #tpu.pipeline_mode<synchronous>, transform_indices = @transform_2, window_bounds = array<i64: 128, 128>}, {pipeline_mode = #tpu.pipeline_mode<synchronous>, transform_indices = @transform_3, window_bounds = array<i64: 128, 128>}, {pipeline_mode = #tpu.pipeline_mode<synchronous>, transform_indices = @transform_4, window_bounds = array<i64: 1, 128>}, {pipeline_mode = #tpu.pipeline_mode<synchronous>, transform_indices = @transform_5, window_bounds = array<i64: 1, 128>}, {transform_indices = @transform_6, window_bounds = array<i64: 1, 1>}, {transform_indices = @transform_7, window_bounds = array<i64: 1, 512>}]} {
    %c0 = arith.constant 0 : index
    %c0_0 = arith.constant 0 : index
    %0 = vector.load %arg1[%c0, %c0_0] : memref<512x128xbf16, #tpu.memory_space<vmem>>, vector<512x128xbf16>
    %c0_1 = arith.constant 0 : index
    %c0_2 = arith.constant 0 : index
    %1 = vector.load %arg3[%c0_1, %c0_2] : memref<128x128xbf16, #tpu.memory_space<vmem>>, vector<128x128xbf16>
    %cst = arith.constant dense<0.000000e+00> : vector<512x128xf32>
    %2 = tpu.matmul %0, %1, %cst {dimension_numbers = #tpu.dot_dimension_numbers<[1], [0], [0], [1], [0, 0, 1, 1], [], []>} : vector<512x128xbf16>, vector<128x128xbf16>, vector<512x128xf32> -> vector<512x128xf32>
    %c0_3 = arith.constant 0 : index
    %c0_4 = arith.constant 0 : index
    %3 = vector.load %arg2[%c0_3, %c0_4] : memref<512x128xbf16, #tpu.memory_space<vmem>>, vector<512x128xbf16>
    %c0_5 = arith.constant 0 : index
    %c0_6 = arith.constant 0 : index
    %4 = vector.load %arg4[%c0_5, %c0_6] : memref<128x128xbf16, #tpu.memory_space<vmem>>, vector<128x128xbf16>
    %cst_7 = arith.constant dense<0.000000e+00> : vector<512x128xf32>
    %5 = tpu.matmul %3, %4, %cst_7 {dimension_numbers = #tpu.dot_dimension_numbers<[1], [0], [0], [1], [0, 0, 1, 1], [], []>} : vector<512x128xbf16>, vector<128x128xbf16>, vector<512x128xf32> -> vector<512x128xf32>
    %6 = arith.addf %2, %5 : vector<512x128xf32>
    %c0_8 = arith.constant 0 : index
    %c0_9 = arith.constant 0 : index
    %7 = vector.load %arg5[%c0_8, %c0_9] : memref<1x128xf32, #tpu.memory_space<vmem>>, vector<1x128xf32>
    %8 = vector.broadcast %7 : vector<1x128xf32> to vector<512x128xf32>
    %9 = arith.addf %6, %8 : vector<512x128xf32>
    %cst_10 = arith.constant 0.000000e+00 : f32
    %10 = vector.broadcast %cst_10 : f32 to vector<512x128xf32>
    %11 = arith.maximumf %9, %10 : vector<512x128xf32>
    %c0_11 = arith.constant 0 : index
    %c0_12 = arith.constant 0 : index
    %12 = vector.load %arg6[%c0_11, %c0_12] : memref<1x128xbf16, #tpu.memory_space<vmem>>, vector<1x128xbf16>
    %13 = arith.truncf %11 : vector<512x128xf32> to vector<512x128xbf16>
    %cst_13 = arith.constant dense<0.000000e+00> : vector<1x512xf32>
    %14 = tpu.matmul %12, %13, %cst_13 {dimension_numbers = #tpu.dot_dimension_numbers<[1], [1], [0], [0], [0, 0, 1, 0], [], []>} : vector<1x128xbf16>, vector<512x128xbf16>, vector<1x512xf32> -> vector<1x512xf32>
    %c0_14 = arith.constant 0 : index
    %c0_15 = arith.constant 0 : index
    %15 = memref.load %arg7[%c0_14, %c0_15] : memref<1x1xf32, #tpu.memory_space<smem>>
    %16 = vector.broadcast %15 : f32 to vector<1x512xf32>
    %17 = arith.addf %14, %16 : vector<1x512xf32>
    %c0_16 = arith.constant 0 : index
    %c0_17 = arith.constant 0 : index
    %18 = vector.load %arg8[%c0_16, %c0_17] : memref<1x512xf32, #tpu.memory_space<vmem>>, vector<1x512xf32>
    tpu.vector_store %arg8[%c0_16, %c0_17], %17 {strides = array<i32>} : memref<1x512xf32, #tpu.memory_space<vmem>>, vector<1x512xf32>,
    return
  }
  func.func @transform_0(%arg0: i32) -> (i32, i32) {
    %c0_i32 = arith.constant 0 : i32
    %c0_i32_0 = arith.constant 0 : i32
    return %arg0, %c0_i32 : i32, i32
  }
  func.func @transform_1(%arg0: i32) -> (i32, i32) {
    %c0_i32 = arith.constant 0 : i32
    %c0_i32_0 = arith.constant 0 : i32
    return %arg0, %c0_i32 : i32, i32
  }
  func.func @transform_2(%arg0: i32) -> (i32, i32) {
    %c0_i32 = arith.constant 0 : i32
    %c0_i32_0 = arith.constant 0 : i32
    %c0_i32_1 = arith.constant 0 : i32
    return %c0_i32, %c0_i32_0 : i32, i32
  }
  func.func @transform_3(%arg0: i32) -> (i32, i32) {
    %c0_i32 = arith.constant 0 : i32
    %c0_i32_0 = arith.constant 0 : i32
    %c0_i32_1 = arith.constant 0 : i32
    return %c0_i32, %c0_i32_0 : i32, i32
  }
  func.func @transform_4(%arg0: i32) -> (i32, i32) {
    %c0_i32 = arith.constant 0 : i32
    %c0_i32_0 = arith.constant 0 : i32
    %c0_i32_1 = arith.constant 0 : i32
    return %c0_i32, %c0_i32_0 : i32, i32
  }
  func.func @transform_5(%arg0: i32) -> (i32, i32) {
    %c0_i32 = arith.constant 0 : i32
    %c0_i32_0 = arith.constant 0 : i32
    %c0_i32_1 = arith.constant 0 : i32
    return %c0_i32, %c0_i32_0 : i32, i32
  }
  func.func @transform_6(%arg0: i32) -> (i32, i32) {
    %c0_i32 = arith.constant 0 : i32
    %c0_i32_0 = arith.constant 0 : i32
    %c0_i32_1 = arith.constant 0 : i32
    return %c0_i32, %c0_i32_0 : i32, i32
  }
  func.func @transform_7(%arg0: i32) -> (i32, i32) {
    %c0_i32 = arith.constant 0 : i32
    %c0_i32_0 = arith.constant 0 : i32
    return %c0_i32, %arg0 : i32, i32
  }
}

</mosaic_0001>

<bundles_post_ra>
// kernel: model_forward.10
= control target key start
LH: loop header
LB: loop body
LE: loop exit
PB: predicated region body
PF: predicated region fallthrough
CT: control target
= control target key end

     0   :  { %s1996_s1 = inlined_call_operand.vmem [shape: bf16[128,256], index: 1, kind: input, shape index: {}]   ;;  %s1997_s0 = inlined_call_operand.vmem [shape: bf16[512,128], index: 0, kind: input, shape index: {}]   ;;  %s1998_s2 = inlined_call_operand.vmem [shape: f32[1,128], index: 2, kind: input, shape index: {}]   ;;  %s1999_s4 = inlined_call_operand.vmem [shape: f32[512,128], index: 4, kind: output, shape index: {1}]   ;;  %s2000_s3 = inlined_call_operand.vmem [shape: bf16[512,128], index: 3, kind: output, shape index: {0}]  }
   0x1   :  { %v1160_v0 = vld [vmem:[%s1996_s1 + $0x70] sm:$0xf]  ;;  %v1213_v1 = vld [vmem:[%s1996_s1 + $0x74] sm:$0xf0]  ;;  %v1212_v2 = vld [vmem:[%s1996_s1 + $0x74] sm:$0xf] }
   0x2   :  { %v1161_v3 = vor.u32 %v1213_v1, %v1160_v0  ;;  %v1162_v4 = vld [vmem:[%s1996_s1 + $0x78] sm:$0xf0]  ;;  %v1152_v5 = vld [vmem:[%s1996_s1 + $0x60] sm:$0xf]  ;;  %v1211_v6 = vld [vmem:[%s1996_s1 + $0x64] sm:$0xf0] }
   0x3   :  { %v1165_v7 = vor.u32 %v1212_v2, %v1162_v4  ;;  %v1210_v8 = vld [vmem:[%s1996_s1 + $0x64] sm:$0xf]  ;;  %v1154_v9 = vld [vmem:[%s1996_s1 + $0x68] sm:$0xf0]  ;;  %v1153_v10 = vor.u32 %v1211_v6, %v1152_v5  ;;  %v1144_v12 = vld [vmem:[%s1996_s1 + $0x50] sm:$0xf] }
   0x4   :  { %368 = vmatpush.bf16.msra.mxu0 %v1161_v3  ;;  %1405 = vmatpush.bf16.msra.mxu2 %v1161_v3  ;;  %v1157_v11 = vor.u32 %v1210_v8, %v1154_v9  ;;  %v1209_v13 = vld [vmem:[%s1996_s1 + $0x54] sm:$0xf0]  ;;  %v1208_v14 = vld [vmem:[%s1996_s1 + $0x54] sm:$0xf]  ;;  %v1146_v15 = vld [vmem:[%s1996_s1 + $0x58] sm:$0xf0] }
   0x5   :  { %537 = vmatpush.bf16.msra.mxu1 %v1165_v7  ;;  %1413 = vmatpush.bf16.msra.mxu3 %v1165_v7  ;;  %v1145_v16 = vor.u32 %v1209_v13, %v1144_v12  ;;  %v1149_v17 = vor.u32 %v1208_v14, %v1146_v15  ;;  %v1136_v18 = vld [vmem:[%s1996_s1 + $0x40] sm:$0xf]  ;;  %v1207_v19 = vld [vmem:[%s1996_s1 + $0x44] sm:$0xf0]  ;;  %v1206_v20 = vld [vmem:[%s1996_s1 + $0x44] sm:$0xf] }
   0x6   :  { %v1138_v21 = vld [vmem:[%s1996_s1 + $0x48] sm:$0xf0]  ;;  %v1137_v22 = vor.u32 %v1207_v19, %v1136_v18  ;;  %v1128_v24 = vld [vmem:[%s1996_s1 + $0x30] sm:$0xf]  ;;  %v1205_v25 = vld [vmem:[%s1996_s1 + $0x34] sm:$0xf0] }
   0x7   :  { %v1141_v23 = vor.u32 %v1206_v20, %v1138_v21  ;;  %v1204_v26 = vld [vmem:[%s1996_s1 + $0x34] sm:$0xf]  ;;  %v1130_v27 = vld [vmem:[%s1996_s1 + $0x38] sm:$0xf0]  ;;  %v1129_v28 = vor.u32 %v1205_v25, %v1128_v24  ;;  %v1120_v30 = vld [vmem:[%s1996_s1 + $0x20] sm:$0xf] }
   0x8   :  { %369 = vmatpush.bf16.msra.mxu0 %v1153_v10  ;;  %1406 = vmatpush.bf16.msra.mxu2 %v1153_v10  ;;  %v1133_v29 = vor.u32 %v1204_v26, %v1130_v27  ;;  %v1203_v31 = vld [vmem:[%s1996_s1 + $0x24] sm:$0xf0]  ;;  %v1202_v32 = vld [vmem:[%s1996_s1 + $0x24] sm:$0xf]  ;;  %v1122_v33 = vld [vmem:[%s1996_s1 + $0x28] sm:$0xf0] }
   0x9   :  { %538 = vmatpush.bf16.msra.mxu1 %v1157_v11  ;;  %1414 = vmatpush.bf16.msra.mxu3 %v1157_v11  ;;  %v1121_v34 = vor.u32 %v1203_v31, %v1120_v30  ;;  %v1125_v35 = vor.u32 %v1202_v32, %v1122_v33  ;;  %v1112_v36 = vld [vmem:[%s1996_s1 + $0x10] sm:$0xf]  ;;  %v1201_v37 = vld [vmem:[%s1996_s1 + $0x14] sm:$0xf0]  ;;  %v1200_v38 = vld [vmem:[%s1996_s1 + $0x14] sm:$0xf] }
   0xa   :  { %v1114_v39 = vld [vmem:[%s1996_s1 + $0x18] sm:$0xf0]  ;;  %v1113_v40 = vor.u32 %v1201_v37, %v1112_v36  ;;  %v1104_v42 = vld [vmem:[%s1996_s1] sm:$0xf]  ;;  %v1199_v43 = vld [vmem:[%s1996_s1 + $0x4] sm:$0xf0] }
   0xb   :  { %v1117_v41 = vor.u32 %v1200_v38, %v1114_v39  ;;  %v1198_v44 = vld [vmem:[%s1996_s1 + $0x4] sm:$0xf]  ;;  %v1106_v45 = vld [vmem:[%s1996_s1 + $0x8] sm:$0xf0]  ;;  %v1105_v46 = vor.u32 %v1199_v43, %v1104_v42  ;;  %v1168_v52 = vld [vmem:[%s1997_s0 + $0x10] sm:$0xff] }
   0xc   :  { %370 = vmatpush.bf16.msra.mxu0 %v1145_v16  ;;  %1407 = vmatpush.bf16.msra.mxu2 %v1145_v16  ;;  %v1109_v47 = vor.u32 %v1198_v44, %v1106_v45  ;;  %v1166_v48 = vld [vmem:[%s1997_s0] sm:$0xff]  ;;  %v1167_v50 = vld [vmem:[%s1997_s0 + $0x8] sm:$0xff]  ;;  %v1184_v53 = vld [vmem:[%s1997_s0 + $0x90] sm:$0xff] }
   0xd   :  { %539 = vmatpush.bf16.msra.mxu1 %v1149_v17  ;;  %1415 = vmatpush.bf16.msra.mxu3 %v1149_v17  ;;  %v1182_v49 = vld [vmem:[%s1997_s0 + $0x80] sm:$0xff]  ;;  %v1183_v51 = vld [vmem:[%s1997_s0 + $0x88] sm:$0xff]  ;;  %v1169_v54 = vld [vmem:[%s1997_s0 + $0x18] sm:$0xff] }
   0xe   :  { %v1185_v55 = vld [vmem:[%s1997_s0 + $0x98] sm:$0xff]  ;;  %v1170_v56 = vld [vmem:[%s1997_s0 + $0x20] sm:$0xff]  ;;  %v1171_v58 = vld [vmem:[%s1997_s0 + $0x28] sm:$0xff] }
   0xf   :  { %v1186_v57 = vld [vmem:[%s1997_s0 + $0xa0] sm:$0xff]  ;;  %v1187_v59 = vld [vmem:[%s1997_s0 + $0xa8] sm:$0xff]  ;;  %v1172_v60 = vld [vmem:[%s1997_s0 + $0x30] sm:$0xff] }
  0x10   :  { %371 = vmatpush.bf16.msra.mxu0 %v1137_v22  ;;  %1408 = vmatpush.bf16.msra.mxu2 %v1137_v22  ;;  %v1188_v61 = vld [vmem:[%s1997_s0 + $0xb0] sm:$0xff]  ;;  %v1173_v62 = vld [vmem:[%s1997_s0 + $0x38] sm:$0xff]  ;;  %v1594_v0 = vld [vmem:[%s1998_s2] ss:$0 sm:$0xff] }
  0x11   :  { %540 = vmatpush.bf16.msra.mxu1 %v1141_v23  ;;  %1416 = vmatpush.bf16.msra.mxu3 %v1141_v23  ;;  %v1189_v63 = vld [vmem:[%s1997_s0 + $0xb8] sm:$0xff]  ;;  %v1174_v1 = vld [vmem:[%s1997_s0 + $0x40] sm:$0xff]  ;;  %v1175_v16 = vld [vmem:[%s1997_s0 + $0x48] sm:$0xff] }
  0x12   :  { %v1190_v2 = vld [vmem:[%s1997_s0 + $0xc0] sm:$0xff]  ;;  %v1191_v17 = vld [vmem:[%s1997_s0 + $0xc8] sm:$0xff]  ;;  %v1176_v32 = vld [vmem:[%s1997_s0 + $0x50] sm:$0xff] }
  0x13   :  { %v1192_v33 = vld [vmem:[%s1997_s0 + $0xd0] sm:$0xff] }
  0x14   :  { %372 = vmatpush.bf16.msra.mxu0 %v1129_v28  ;;  %1409 = vmatpush.bf16.msra.mxu2 %v1129_v28 }
  0x15   :  { %541 = vmatpush.bf16.msra.mxu1 %v1133_v29  ;;  %1417 = vmatpush.bf16.msra.mxu3 %v1133_v29 }
  0x18   :  { %373 = vmatpush.bf16.msra.mxu0 %v1121_v34  ;;  %1410 = vmatpush.bf16.msra.mxu2 %v1121_v34 }
  0x19   :  { %542 = vmatpush.bf16.msra.mxu1 %v1125_v35  ;;  %1418 = vmatpush.bf16.msra.mxu3 %v1125_v35 }
  0x1c   :  { %374 = vmatpush.bf16.msra.mxu0 %v1113_v40  ;;  %1411 = vmatpush.bf16.msra.mxu2 %v1113_v40 }
  0x1d   :  { %543 = vmatpush.bf16.msra.mxu1 %v1117_v41  ;;  %1419 = vmatpush.bf16.msra.mxu3 %v1117_v41 }
  0x20   :  { %375 = vmatpush.bf16.msra.mxu0 %v1105_v46  ;;  %1412 = vmatpush.bf16.msra.mxu2 %v1105_v46 }
  0x21   :  { %544 = vmatpush.bf16.msra.mxu1 %v1109_v47  ;;  %1420 = vmatpush.bf16.msra.mxu3 %v1109_v47 }
  0x23   :  { %376 = vmatmul.bf16.vlgmr.msra.gmra.mxu0 %v1166_v48  ;;  %456 = vmatmul.bf16.vlgmr.msra.gmra.mxu2 %v1182_v49 }
  0x24   :  { %545 = vmatmul.bf16.vlgmr.msra.gmra.mxu1 %v1166_v48  ;;  %625 = vmatmul.bf16.vlgmr.msra.gmra.mxu3 %v1182_v49  ;;  %v1177_v48 = vld [vmem:[%s1997_s0 + $0x58] sm:$0xff] }
  0x25   :  { %v1193_v49 = vld [vmem:[%s1997_s0 + $0xd8] sm:$0xff] }
  0x33   :  { %381 = vmatmul.bf16.gmra.mxu0 %v1167_v50  ;;  %461 = vmatmul.bf16.gmra.mxu2 %v1183_v51 }
  0x34   :  { %550 = vmatmul.bf16.gmra.mxu1 %v1167_v50  ;;  %630 = vmatmul.bf16.gmra.mxu3 %v1183_v51 }
  0x43   :  { %386 = vmatmul.bf16.gmra.mxu0 %v1168_v52  ;;  %466 = vmatmul.bf16.gmra.mxu2 %v1184_v53 }
  0x44   :  { %555 = vmatmul.bf16.gmra.mxu1 %v1168_v52  ;;  %635 = vmatmul.bf16.gmra.mxu3 %v1184_v53 }
  0x53   :  { %391 = vmatmul.bf16.gmra.mxu0 %v1169_v54  ;;  %471 = vmatmul.bf16.gmra.mxu2 %v1185_v55 }
  0x54   :  { %560 = vmatmul.bf16.gmra.mxu1 %v1169_v54  ;;  %640 = vmatmul.bf16.gmra.mxu3 %v1185_v55 }
  0x63   :  { %396 = vmatmul.bf16.gmra.mxu0 %v1170_v56  ;;  %476 = vmatmul.bf16.gmra.mxu2 %v1186_v57 }
  0x64   :  { %565 = vmatmul.bf16.gmra.mxu1 %v1170_v56  ;;  %645 = vmatmul.bf16.gmra.mxu3 %v1186_v57 }
  0x73   :  { %401 = vmatmul.bf16.gmra.mxu0 %v1171_v58  ;;  %481 = vmatmul.bf16.gmra.mxu2 %v1187_v59 }
  0x74   :  { %570 = vmatmul.bf16.gmra.mxu1 %v1171_v58  ;;  %650 = vmatmul.bf16.gmra.mxu3 %v1187_v59 }
  0x83   :  { %406 = vmatmul.bf16.gmra.mxu0 %v1172_v60  ;;  %486 = vmatmul.bf16.gmra.mxu2 %v1188_v61 }
  0x84   :  { %575 = vmatmul.bf16.gmra.mxu1 %v1172_v60  ;;  %655 = vmatmul.bf16.gmra.mxu3 %v1188_v61 }
  0x93   :  { %411 = vmatmul.bf16.gmra.mxu0 %v1173_v62  ;;  %491 = vmatmul.bf16.gmra.mxu2 %v1189_v63 }
  0x94   :  { %580 = vmatmul.bf16.gmra.mxu1 %v1173_v62  ;;  %660 = vmatmul.bf16.gmra.mxu3 %v1189_v63 }
  0xa0   :  { %v377_v3 = vpop.f32.mrf.mxu0 }
  0xa1   :  { %v546_v4 = vpop.f32.mrf.mxu1 }
  0xa2   :  { %v838_v5 = vadd.f32 %v1594_v0, %v546_v4 }
  0xa3   :  { %416 = vmatmul.bf16.gmra.mxu0 %v1174_v1  ;;  %496 = vmatmul.bf16.gmra.mxu2 %v1190_v2 }
  0xa4   :  { %902 = vst [vmem:[%s1999_s4] sm:$0xff] %v838_v5  ;;  %585 = vmatmul.bf16.gmra.mxu1 %v1174_v1  ;;  %665 = vmatmul.bf16.gmra.mxu3 %v1190_v2  ;;  %v1178_v1 = vld [vmem:[%s1997_s0 + $0x60] sm:$0xff] }
  0xa5   :  { %v1194_v2 = vld [vmem:[%s1997_s0 + $0xe0] sm:$0xff] }
  0xa6   :  { %v457_v6 = vpop.f32.mrf.mxu2 }
  0xa7   :  { %v626_v7 = vpop.f32.mrf.mxu3 }
  0xa8   :  { %v870_v8 = vadd.f32 %v1594_v0, %v626_v7  ;;  %v379_v9 = vpop.f32.mrf.mxu0 }
  0xa9   :  { %v1217_v10 = vpack.c.bf16 %v379_v9, %v377_v3  ;;  %v548_v11 = vpop.f32.mrf.mxu1 }
  0xaa   :  { %934 = vst [vmem:[%s1999_s4 + $0x100] sm:$0xff] %v870_v8  ;;  %v839_v12 = vadd.f32 %v1594_v0, %v548_v11 }
  0xab   :  { %1218 = vst [vmem:[%s2000_s3] sm:$0xff] %v1217_v10  }
  0xac   :  { %903 = vst [vmem:[%s1999_s4 + $0x8] sm:$0xff] %v839_v12 }
  0xae   :  { %v459_v13 = vpop.f32.mrf.mxu2 }
  0xaf   :  { %v1297_v14 = vpack.c.bf16 %v459_v13, %v457_v6  ;;  %v628_v15 = vpop.f32.mrf.mxu3 }
  0xb0   :  { %v871_v18 = vadd.f32 %v1594_v0, %v628_v15  ;;  %v382_v19 = vpop.f32.mrf.mxu0 }
  0xb1   :  { %1389 = vst [vmem:[%s2000_s3 + $0x80] sm:$0xff] %v1297_v14   ;;  %v551_v20 = vpop.f32.mrf.mxu1 }
  0xb2   :  { %935 = vst [vmem:[%s1999_s4 + $0x108] sm:$0xff] %v871_v18  ;;  %v840_v21 = vadd.f32 %v1594_v0, %v551_v20  ;;  %v1195_v18 = vld [vmem:[%s1997_s0 + $0xe8] sm:$0xff] }
  0xb3   :  { %421 = vmatmul.bf16.gmra.mxu0 %v1175_v16  ;;  %501 = vmatmul.bf16.gmra.mxu2 %v1191_v17 }
  0xb4   :  { %904 = vst [vmem:[%s1999_s4 + $0x10] sm:$0xff] %v840_v21  ;;  %590 = vmatmul.bf16.gmra.mxu1 %v1175_v16  ;;  %670 = vmatmul.bf16.gmra.mxu3 %v1191_v17  ;;  %v1179_v17 = vld [vmem:[%s1997_s0 + $0x68] sm:$0xff] }
  0xb6   :  { %v462_v22 = vpop.f32.mrf.mxu2 }
  0xb7   :  { %v631_v23 = vpop.f32.mrf.mxu3 }
  0xb8   :  { %v872_v24 = vadd.f32 %v1594_v0, %v631_v23  ;;  %v384_v25 = vpop.f32.mrf.mxu0 }
  0xb9   :  { %v1222_v26 = vpack.c.bf16 %v384_v25, %v382_v19  ;;  %v553_v27 = vpop.f32.mrf.mxu1 }
  0xba   :  { %936 = vst [vmem:[%s1999_s4 + $0x110] sm:$0xff] %v872_v24  ;;  %v841_v28 = vadd.f32 %v1594_v0, %v553_v27 }
  0xbb   :  { %1374 = vst [vmem:[%s2000_s3 + $0x8] sm:$0xff] %v1222_v26  }
  0xbc   :  { %905 = vst [vmem:[%s1999_s4 + $0x18] sm:$0xff] %v841_v28 }
  0xbe   :  { %v464_v29 = vpop.f32.mrf.mxu2 }
  0xbf   :  { %v1302_v30 = vpack.c.bf16 %v464_v29, %v462_v22  ;;  %v633_v31 = vpop.f32.mrf.mxu3 }
  0xc0   :  { %v873_v34 = vadd.f32 %v1594_v0, %v633_v31  ;;  %v387_v35 = vpop.f32.mrf.mxu0 }
  0xc1   :  { %1390 = vst [vmem:[%s2000_s3 + $0x88] sm:$0xff] %v1302_v30   ;;  %v556_v36 = vpop.f32.mrf.mxu1 }
  0xc2   :  { %937 = vst [vmem:[%s1999_s4 + $0x118] sm:$0xff] %v873_v34  ;;  %v842_v37 = vadd.f32 %v1594_v0, %v556_v36  ;;  %v1196_v34 = vld [vmem:[%s1997_s0 + $0xf0] sm:$0xff] }
  0xc3   :  { %426 = vmatmul.bf16.gmra.mxu0 %v1176_v32  ;;  %506 = vmatmul.bf16.gmra.mxu2 %v1192_v33 }
  0xc4   :  { %906 = vst [vmem:[%s1999_s4 + $0x20] sm:$0xff] %v842_v37  ;;  %595 = vmatmul.bf16.gmra.mxu1 %v1176_v32  ;;  %675 = vmatmul.bf16.gmra.mxu3 %v1192_v33  ;;  %v1180_v33 = vld [vmem:[%s1997_s0 + $0x70] sm:$0xff] }
  0xc6   :  { %v467_v38 = vpop.f32.mrf.mxu2 }
  0xc7   :  { %v636_v39 = vpop.f32.mrf.mxu3 }
  0xc8   :  { %v874_v40 = vadd.f32 %v1594_v0, %v636_v39  ;;  %v389_v41 = vpop.f32.mrf.mxu0 }
  0xc9   :  { %v1227_v42 = vpack.c.bf16 %v389_v41, %v387_v35  ;;  %v558_v43 = vpop.f32.mrf.mxu1 }
  0xca   :  { %938 = vst [vmem:[%s1999_s4 + $0x120] sm:$0xff] %v874_v40  ;;  %v843_v44 = vadd.f32 %v1594_v0, %v558_v43 }
  0xcb   :  { %1375 = vst [vmem:[%s2000_s3 + $0x10] sm:$0xff] %v1227_v42  }
  0xcc   :  { %907 = vst [vmem:[%s1999_s4 + $0x28] sm:$0xff] %v843_v44 }
  0xce   :  { %v469_v45 = vpop.f32.mrf.mxu2 }
  0xcf   :  { %v1307_v46 = vpack.c.bf16 %v469_v45, %v467_v38  ;;  %v638_v47 = vpop.f32.mrf.mxu3 }
  0xd0   :  { %v875_v50 = vadd.f32 %v1594_v0, %v638_v47  ;;  %v392_v51 = vpop.f32.mrf.mxu0 }
  0xd1   :  { %1391 = vst [vmem:[%s2000_s3 + $0x90] sm:$0xff] %v1307_v46   ;;  %v561_v52 = vpop.f32.mrf.mxu1 }
  0xd2   :  { %939 = vst [vmem:[%s1999_s4 + $0x128] sm:$0xff] %v875_v50  ;;  %v844_v53 = vadd.f32 %v1594_v0, %v561_v52  ;;  %v1197_v50 = vld [vmem:[%s1997_s0 + $0xf8] sm:$0xff] }
  0xd3   :  { %431 = vmatmul.bf16.gmra.mxu0 %v1177_v48  ;;  %511 = vmatmul.bf16.gmra.mxu2 %v1193_v49 }
  0xd4   :  { %908 = vst [vmem:[%s1999_s4 + $0x30] sm:$0xff] %v844_v53  ;;  %600 = vmatmul.bf16.gmra.mxu1 %v1177_v48  ;;  %680 = vmatmul.bf16.gmra.mxu3 %v1193_v49  ;;  %v1181_v49 = vld [vmem:[%s1997_s0 + $0x78] sm:$0xff] }
  0xd6   :  { %v472_v54 = vpop.f32.mrf.mxu2 }
  0xd7   :  { %v641_v55 = vpop.f32.mrf.mxu3 }
  0xd8   :  { %v876_v56 = vadd.f32 %v1594_v0, %v641_v55  ;;  %v394_v57 = vpop.f32.mrf.mxu0 }
  0xd9   :  { %v1232_v58 = vpack.c.bf16 %v394_v57, %v392_v51  ;;  %v563_v59 = vpop.f32.mrf.mxu1 }
  0xda   :  { %940 = vst [vmem:[%s1999_s4 + $0x130] sm:$0xff] %v876_v56  ;;  %v845_v60 = vadd.f32 %v1594_v0, %v563_v59 }
  0xdb   :  { %1376 = vst [vmem:[%s2000_s3 + $0x18] sm:$0xff] %v1232_v58  }
  0xdc   :  { %909 = vst [vmem:[%s1999_s4 + $0x38] sm:$0xff] %v845_v60 }
  0xde   :  { %v474_v61 = vpop.f32.mrf.mxu2 }
  0xdf   :  { %v1312_v62 = vpack.c.bf16 %v474_v61, %v472_v54  ;;  %v643_v63 = vpop.f32.mrf.mxu3 }
  0xe0   :  { %v877_v3 = vadd.f32 %v1594_v0, %v643_v63  ;;  %v397_v4 = vpop.f32.mrf.mxu0 }
  0xe1   :  { %1392 = vst [vmem:[%s2000_s3 + $0x98] sm:$0xff] %v1312_v62   ;;  %v566_v5 = vpop.f32.mrf.mxu1 }
  0xe2   :  { %941 = vst [vmem:[%s1999_s4 + $0x138] sm:$0xff] %v877_v3  ;;  %v846_v6 = vadd.f32 %v1594_v0, %v566_v5 }
  0xe3   :  { %436 = vmatmul.bf16.gmra.mxu0 %v1178_v1  ;;  %516 = vmatmul.bf16.gmra.mxu2 %v1194_v2 }
  0xe4   :  { %910 = vst [vmem:[%s1999_s4 + $0x40] sm:$0xff] %v846_v6  ;;  %605 = vmatmul.bf16.gmra.mxu1 %v1178_v1  ;;  %685 = vmatmul.bf16.gmra.mxu3 %v1194_v2 }
  0xe6   :  { %v477_v7 = vpop.f32.mrf.mxu2 }
  0xe7   :  { %v646_v8 = vpop.f32.mrf.mxu3 }
  0xe8   :  { %v878_v9 = vadd.f32 %v1594_v0, %v646_v8  ;;  %v399_v10 = vpop.f32.mrf.mxu0 }
  0xe9   :  { %v1237_v11 = vpack.c.bf16 %v399_v10, %v397_v4  ;;  %v568_v12 = vpop.f32.mrf.mxu1 }
  0xea   :  { %942 = vst [vmem:[%s1999_s4 + $0x140] sm:$0xff] %v878_v9  ;;  %v847_v13 = vadd.f32 %v1594_v0, %v568_v12 }
  0xeb   :  { %1377 = vst [vmem:[%s2000_s3 + $0x20] sm:$0xff] %v1237_v11  }
  0xec   :  { %911 = vst [vmem:[%s1999_s4 + $0x48] sm:$0xff] %v847_v13 }
  0xee   :  { %v479_v14 = vpop.f32.mrf.mxu2 }
  0xef   :  { %v1317_v15 = vpack.c.bf16 %v479_v14, %v477_v7  ;;  %v648_v16 = vpop.f32.mrf.mxu3 }
  0xf0   :  { %v879_v19 = vadd.f32 %v1594_v0, %v648_v16  ;;  %v402_v20 = vpop.f32.mrf.mxu0 }
  0xf1   :  { %1393 = vst [vmem:[%s2000_s3 + $0xa0] sm:$0xff] %v1317_v15   ;;  %v571_v21 = vpop.f32.mrf.mxu1 }
  0xf2   :  { %943 = vst [vmem:[%s1999_s4 + $0x148] sm:$0xff] %v879_v19  ;;  %v848_v22 = vadd.f32 %v1594_v0, %v571_v21 }
  0xf3   :  { %441 = vmatmul.bf16.gmra.mxu0 %v1179_v17  ;;  %521 = vmatmul.bf16.gmra.mxu2 %v1195_v18 }
  0xf4   :  { %912 = vst [vmem:[%s1999_s4 + $0x50] sm:$0xff] %v848_v22  ;;  %610 = vmatmul.bf16.gmra.mxu1 %v1179_v17  ;;  %690 = vmatmul.bf16.gmra.mxu3 %v1195_v18 }
  0xf6   :  { %v482_v23 = vpop.f32.mrf.mxu2 }
  0xf7   :  { %v651_v24 = vpop.f32.mrf.mxu3 }
  0xf8   :  { %v880_v25 = vadd.f32 %v1594_v0, %v651_v24  ;;  %v404_v26 = vpop.f32.mrf.mxu0 }
  0xf9   :  { %v1242_v27 = vpack.c.bf16 %v404_v26, %v402_v20  ;;  %v573_v28 = vpop.f32.mrf.mxu1 }
  0xfa   :  { %944 = vst [vmem:[%s1999_s4 + $0x150] sm:$0xff] %v880_v25  ;;  %v849_v29 = vadd.f32 %v1594_v0, %v573_v28 }
  0xfb   :  { %1378 = vst [vmem:[%s2000_s3 + $0x28] sm:$0xff] %v1242_v27  }
  0xfc   :  { %913 = vst [vmem:[%s1999_s4 + $0x58] sm:$0xff] %v849_v29 }
  0xfe   :  { %v484_v30 = vpop.f32.mrf.mxu2 }
  0xff   :  { %v1322_v31 = vpack.c.bf16 %v484_v30, %v482_v23  ;;  %v653_v32 = vpop.f32.mrf.mxu3 }
 0x100   :  { %v881_v35 = vadd.f32 %v1594_v0, %v653_v32  ;;  %v407_v36 = vpop.f32.mrf.mxu0 }
 0x101   :  { %1394 = vst [vmem:[%s2000_s3 + $0xa8] sm:$0xff] %v1322_v31   ;;  %v576_v37 = vpop.f32.mrf.mxu1 }
 0x102   :  { %945 = vst [vmem:[%s1999_s4 + $0x158] sm:$0xff] %v881_v35  ;;  %v850_v38 = vadd.f32 %v1594_v0, %v576_v37 }
 0x103   :  { %446 = vmatmul.bf16.gmra.mxu0 %v1180_v33  ;;  %526 = vmatmul.bf16.gmra.mxu2 %v1196_v34 }
 0x104   :  { %914 = vst [vmem:[%s1999_s4 + $0x60] sm:$0xff] %v850_v38  ;;  %615 = vmatmul.bf16.gmra.mxu1 %v1180_v33  ;;  %695 = vmatmul.bf16.gmra.mxu3 %v1196_v34 }
 0x106   :  { %v487_v39 = vpop.f32.mrf.mxu2 }
 0x107   :  { %v656_v40 = vpop.f32.mrf.mxu3 }
 0x108   :  { %v882_v41 = vadd.f32 %v1594_v0, %v656_v40  ;;  %v409_v42 = vpop.f32.mrf.mxu0 }
 0x109   :  { %v1247_v43 = vpack.c.bf16 %v409_v42, %v407_v36  ;;  %v578_v44 = vpop.f32.mrf.mxu1 }
 0x10a   :  { %946 = vst [vmem:[%s1999_s4 + $0x160] sm:$0xff] %v882_v41  ;;  %v851_v45 = vadd.f32 %v1594_v0, %v578_v44 }
 0x10b   :  { %1379 = vst [vmem:[%s2000_s3 + $0x30] sm:$0xff] %v1247_v43  }
 0x10c   :  { %915 = vst [vmem:[%s1999_s4 + $0x68] sm:$0xff] %v851_v45 }
 0x10e   :  { %v489_v46 = vpop.f32.mrf.mxu2 }
 0x10f   :  { %v1327_v47 = vpack.c.bf16 %v489_v46, %v487_v39  ;;  %v658_v48 = vpop.f32.mrf.mxu3 }
 0x110   :  { %v883_v51 = vadd.f32 %v1594_v0, %v658_v48  ;;  %v412_v52 = vpop.f32.mrf.mxu0 }
 0x111   :  { %1395 = vst [vmem:[%s2000_s3 + $0xb0] sm:$0xff] %v1327_v47   ;;  %v581_v53 = vpop.f32.mrf.mxu1 }
 0x112   :  { %947 = vst [vmem:[%s1999_s4 + $0x168] sm:$0xff] %v883_v51  ;;  %v852_v54 = vadd.f32 %v1594_v0, %v581_v53 }
 0x113   :  { %451 = vmatmul.bf16.gmra.mxu0 %v1181_v49  ;;  %531 = vmatmul.bf16.gmra.mxu2 %v1197_v50 }
 0x114   :  { %916 = vst [vmem:[%s1999_s4 + $0x70] sm:$0xff] %v852_v54  ;;  %620 = vmatmul.bf16.gmra.mxu1 %v1181_v49  ;;  %700 = vmatmul.bf16.gmra.mxu3 %v1197_v50 }
 0x116   :  { %v492_v55 = vpop.f32.mrf.mxu2 }
 0x117   :  { %v661_v56 = vpop.f32.mrf.mxu3 }
 0x118   :  { %v884_v57 = vadd.f32 %v1594_v0, %v661_v56  ;;  %v414_v58 = vpop.f32.mrf.mxu0 }
 0x119   :  { %v1252_v59 = vpack.c.bf16 %v414_v58, %v412_v52  ;;  %v583_v60 = vpop.f32.mrf.mxu1 }
 0x11a   :  { %948 = vst [vmem:[%s1999_s4 + $0x170] sm:$0xff] %v884_v57  ;;  %v853_v61 = vadd.f32 %v1594_v0, %v583_v60 }
 0x11b   :  { %1380 = vst [vmem:[%s2000_s3 + $0x38] sm:$0xff] %v1252_v59  }
 0x11c   :  { %917 = vst [vmem:[%s1999_s4 + $0x78] sm:$0xff] %v853_v61 }
 0x11e   :  { %v494_v62 = vpop.f32.mrf.mxu2 }
 0x11f   :  { %v1332_v63 = vpack.c.bf16 %v494_v62, %v492_v55  ;;  %v663_v1 = vpop.f32.mrf.mxu3 }
 0x120   :  { %v885_v2 = vadd.f32 %v1594_v0, %v663_v1  ;;  %v417_v3 = vpop.f32.mrf.mxu0 }
 0x121   :  { %1396 = vst [vmem:[%s2000_s3 + $0xb8] sm:$0xff] %v1332_v63   ;;  %v586_v4 = vpop.f32.mrf.mxu1 }
 0x122   :  { %949 = vst [vmem:[%s1999_s4 + $0x178] sm:$0xff] %v885_v2  ;;  %v854_v5 = vadd.f32 %v1594_v0, %v586_v4 }
 0x124   :  { %918 = vst [vmem:[%s1999_s4 + $0x80] sm:$0xff] %v854_v5 }
 0x126   :  { %v497_v6 = vpop.f32.mrf.mxu2 }
 0x127   :  { %v666_v7 = vpop.f32.mrf.mxu3 }
 0x128   :  { %v886_v8 = vadd.f32 %v1594_v0, %v666_v7  ;;  %v419_v9 = vpop.f32.mrf.mxu0 }
 0x129   :  { %v1257_v10 = vpack.c.bf16 %v419_v9, %v417_v3  ;;  %v588_v11 = vpop.f32.mrf.mxu1 }
 0x12a   :  { %950 = vst [vmem:[%s1999_s4 + $0x180] sm:$0xff] %v886_v8  ;;  %v855_v12 = vadd.f32 %v1594_v0, %v588_v11 }
 0x12b   :  { %1381 = vst [vmem:[%s2000_s3 + $0x40] sm:$0xff] %v1257_v10  }
 0x12c   :  { %919 = vst [vmem:[%s1999_s4 + $0x88] sm:$0xff] %v855_v12 }
 0x12e   :  { %v499_v13 = vpop.f32.mrf.mxu2 }
 0x12f   :  { %v1337_v14 = vpack.c.bf16 %v499_v13, %v497_v6  ;;  %v668_v15 = vpop.f32.mrf.mxu3 }
 0x130   :  { %v887_v16 = vadd.f32 %v1594_v0, %v668_v15  ;;  %v422_v17 = vpop.f32.mrf.mxu0 }
 0x131   :  { %1397 = vst [vmem:[%s2000_s3 + $0xc0] sm:$0xff] %v1337_v14   ;;  %v591_v18 = vpop.f32.mrf.mxu1 }
 0x132   :  { %951 = vst [vmem:[%s1999_s4 + $0x188] sm:$0xff] %v887_v16  ;;  %v856_v19 = vadd.f32 %v1594_v0, %v591_v18 }
 0x134   :  { %920 = vst [vmem:[%s1999_s4 + $0x90] sm:$0xff] %v856_v19 }
 0x136   :  { %v502_v20 = vpop.f32.mrf.mxu2 }
 0x137   :  { %v671_v21 = vpop.f32.mrf.mxu3 }
 0x138   :  { %v888_v22 = vadd.f32 %v1594_v0, %v671_v21  ;;  %v424_v23 = vpop.f32.mrf.mxu0 }
 0x139   :  { %v1262_v24 = vpack.c.bf16 %v424_v23, %v422_v17  ;;  %v593_v25 = vpop.f32.mrf.mxu1 }
 0x13a   :  { %952 = vst [vmem:[%s1999_s4 + $0x190] sm:$0xff] %v888_v22  ;;  %v857_v26 = vadd.f32 %v1594_v0, %v593_v25 }
 0x13b   :  { %1382 = vst [vmem:[%s2000_s3 + $0x48] sm:$0xff] %v1262_v24  }
 0x13c   :  { %921 = vst [vmem:[%s1999_s4 + $0x98] sm:$0xff] %v857_v26 }
 0x13e   :  { %v504_v27 = vpop.f32.mrf.mxu2 }
 0x13f   :  { %v1342_v28 = vpack.c.bf16 %v504_v27, %v502_v20  ;;  %v673_v29 = vpop.f32.mrf.mxu3 }
 0x140   :  { %v889_v30 = vadd.f32 %v1594_v0, %v673_v29  ;;  %v427_v31 = vpop.f32.mrf.mxu0 }
 0x141   :  { %1398 = vst [vmem:[%s2000_s3 + $0xc8] sm:$0xff] %v1342_v28   ;;  %v596_v32 = vpop.f32.mrf.mxu1 }
 0x142   :  { %953 = vst [vmem:[%s1999_s4 + $0x198] sm:$0xff] %v889_v30  ;;  %v858_v33 = vadd.f32 %v1594_v0, %v596_v32 }
 0x144   :  { %922 = vst [vmem:[%s1999_s4 + $0xa0] sm:$0xff] %v858_v33 }
 0x146   :  { %v507_v34 = vpop.f32.mrf.mxu2 }
 0x147   :  { %v676_v35 = vpop.f32.mrf.mxu3 }
 0x148   :  { %v890_v36 = vadd.f32 %v1594_v0, %v676_v35  ;;  %v429_v37 = vpop.f32.mrf.mxu0 }
 0x149   :  { %v1267_v38 = vpack.c.bf16 %v429_v37, %v427_v31  ;;  %v598_v39 = vpop.f32.mrf.mxu1 }
 0x14a   :  { %954 = vst [vmem:[%s1999_s4 + $0x1a0] sm:$0xff] %v890_v36  ;;  %v859_v40 = vadd.f32 %v1594_v0, %v598_v39 }
 0x14b   :  { %1383 = vst [vmem:[%s2000_s3 + $0x50] sm:$0xff] %v1267_v38  }
 0x14c   :  { %923 = vst [vmem:[%s1999_s4 + $0xa8] sm:$0xff] %v859_v40 }
 0x14e   :  { %v509_v41 = vpop.f32.mrf.mxu2 }
 0x14f   :  { %v1347_v42 = vpack.c.bf16 %v509_v41, %v507_v34  ;;  %v678_v43 = vpop.f32.mrf.mxu3 }
 0x150   :  { %v891_v44 = vadd.f32 %v1594_v0, %v678_v43  ;;  %v432_v45 = vpop.f32.mrf.mxu0 }
 0x151   :  { %1399 = vst [vmem:[%s2000_s3 + $0xd0] sm:$0xff] %v1347_v42   ;;  %v601_v46 = vpop.f32.mrf.mxu1 }
 0x152   :  { %955 = vst [vmem:[%s1999_s4 + $0x1a8] sm:$0xff] %v891_v44  ;;  %v860_v47 = vadd.f32 %v1594_v0, %v601_v46 }
 0x154   :  { %924 = vst [vmem:[%s1999_s4 + $0xb0] sm:$0xff] %v860_v47 }
 0x156   :  { %v512_v48 = vpop.f32.mrf.mxu2 }
 0x157   :  { %v681_v49 = vpop.f32.mrf.mxu3 }
 0x158   :  { %v892_v50 = vadd.f32 %v1594_v0, %v681_v49  ;;  %v434_v51 = vpop.f32.mrf.mxu0 }
 0x159   :  { %v1272_v52 = vpack.c.bf16 %v434_v51, %v432_v45  ;;  %v603_v53 = vpop.f32.mrf.mxu1 }
 0x15a   :  { %956 = vst [vmem:[%s1999_s4 + $0x1b0] sm:$0xff] %v892_v50  ;;  %v861_v54 = vadd.f32 %v1594_v0, %v603_v53 }
 0x15b   :  { %1384 = vst [vmem:[%s2000_s3 + $0x58] sm:$0xff] %v1272_v52  }
 0x15c   :  { %925 = vst [vmem:[%s1999_s4 + $0xb8] sm:$0xff] %v861_v54 }
 0x15e   :  { %v514_v55 = vpop.f32.mrf.mxu2 }
 0x15f   :  { %v1352_v56 = vpack.c.bf16 %v514_v55, %v512_v48  ;;  %v683_v57 = vpop.f32.mrf.mxu3 }
 0x160   :  { %v893_v58 = vadd.f32 %v1594_v0, %v683_v57  ;;  %v437_v59 = vpop.f32.mrf.mxu0 }
 0x161   :  { %1400 = vst [vmem:[%s2000_s3 + $0xd8] sm:$0xff] %v1352_v56   ;;  %v606_v60 = vpop.f32.mrf.mxu1 }
 0x162   :  { %957 = vst [vmem:[%s1999_s4 + $0x1b8] sm:$0xff] %v893_v58  ;;  %v862_v61 = vadd.f32 %v1594_v0, %v606_v60 }
 0x164   :  { %926 = vst [vmem:[%s1999_s4 + $0xc0] sm:$0xff] %v862_v61 }
 0x166   :  { %v517_v62 = vpop.f32.mrf.mxu2 }
 0x167   :  { %v686_v63 = vpop.f32.mrf.mxu3 }
 0x168   :  { %v894_v1 = vadd.f32 %v1594_v0, %v686_v63  ;;  %v439_v2 = vpop.f32.mrf.mxu0 }
 0x169   :  { %v1277_v3 = vpack.c.bf16 %v439_v2, %v437_v59  ;;  %v608_v4 = vpop.f32.mrf.mxu1 }
 0x16a   :  { %958 = vst [vmem:[%s1999_s4 + $0x1c0] sm:$0xff] %v894_v1  ;;  %v863_v5 = vadd.f32 %v1594_v0, %v608_v4 }
 0x16b   :  { %1385 = vst [vmem:[%s2000_s3 + $0x60] sm:$0xff] %v1277_v3  }
 0x16c   :  { %927 = vst [vmem:[%s1999_s4 + $0xc8] sm:$0xff] %v863_v5 }
 0x16e   :  { %v519_v6 = vpop.f32.mrf.mxu2 }
 0x16f   :  { %v1357_v7 = vpack.c.bf16 %v519_v6, %v517_v62  ;;  %v688_v8 = vpop.f32.mrf.mxu3 }
 0x170   :  { %v895_v9 = vadd.f32 %v1594_v0, %v688_v8  ;;  %v442_v10 = vpop.f32.mrf.mxu0 }
 0x171   :  { %1401 = vst [vmem:[%s2000_s3 + $0xe0] sm:$0xff] %v1357_v7   ;;  %v611_v11 = vpop.f32.mrf.mxu1 }
 0x172   :  { %959 = vst [vmem:[%s1999_s4 + $0x1c8] sm:$0xff] %v895_v9  ;;  %v864_v12 = vadd.f32 %v1594_v0, %v611_v11 }
 0x174   :  { %928 = vst [vmem:[%s1999_s4 + $0xd0] sm:$0xff] %v864_v12 }
 0x176   :  { %v522_v13 = vpop.f32.mrf.mxu2 }
 0x177   :  { %v691_v14 = vpop.f32.mrf.mxu3 }
 0x178   :  { %v896_v15 = vadd.f32 %v1594_v0, %v691_v14  ;;  %v444_v16 = vpop.f32.mrf.mxu0 }
 0x179   :  { %v1282_v17 = vpack.c.bf16 %v444_v16, %v442_v10  ;;  %v613_v18 = vpop.f32.mrf.mxu1 }
 0x17a   :  { %960 = vst [vmem:[%s1999_s4 + $0x1d0] sm:$0xff] %v896_v15  ;;  %v865_v19 = vadd.f32 %v1594_v0, %v613_v18 }
 0x17b   :  { %1386 = vst [vmem:[%s2000_s3 + $0x68] sm:$0xff] %v1282_v17  }
 0x17c   :  { %929 = vst [vmem:[%s1999_s4 + $0xd8] sm:$0xff] %v865_v19 }
 0x17e   :  { %v524_v20 = vpop.f32.mrf.mxu2 }
 0x17f   :  { %v1362_v21 = vpack.c.bf16 %v524_v20, %v522_v13  ;;  %v693_v22 = vpop.f32.mrf.mxu3 }
 0x180   :  { %v897_v23 = vadd.f32 %v1594_v0, %v693_v22  ;;  %v447_v24 = vpop.f32.mrf.mxu0 }
 0x181   :  { %1402 = vst [vmem:[%s2000_s3 + $0xe8] sm:$0xff] %v1362_v21   ;;  %v616_v25 = vpop.f32.mrf.mxu1 }
 0x182   :  { %961 = vst [vmem:[%s1999_s4 + $0x1d8] sm:$0xff] %v897_v23  ;;  %v866_v26 = vadd.f32 %v1594_v0, %v616_v25 }
 0x184   :  { %930 = vst [vmem:[%s1999_s4 + $0xe0] sm:$0xff] %v866_v26 }
 0x186   :  { %v527_v27 = vpop.f32.mrf.mxu2 }
 0x187   :  { %v696_v28 = vpop.f32.mrf.mxu3 }
 0x188   :  { %v898_v29 = vadd.f32 %v1594_v0, %v696_v28  ;;  %v449_v30 = vpop.f32.mrf.mxu0 }
 0x189   :  { %v1287_v31 = vpack.c.bf16 %v449_v30, %v447_v24  ;;  %v618_v32 = vpop.f32.mrf.mxu1 }
 0x18a   :  { %962 = vst [vmem:[%s1999_s4 + $0x1e0] sm:$0xff] %v898_v29  ;;  %v867_v33 = vadd.f32 %v1594_v0, %v618_v32 }
 0x18b   :  { %1387 = vst [vmem:[%s2000_s3 + $0x70] sm:$0xff] %v1287_v31  }
 0x18c   :  { %931 = vst [vmem:[%s1999_s4 + $0xe8] sm:$0xff] %v867_v33 }
 0x18e   :  { %v529_v34 = vpop.f32.mrf.mxu2 }
 0x18f   :  { %v1367_v35 = vpack.c.bf16 %v529_v34, %v527_v27  ;;  %v698_v36 = vpop.f32.mrf.mxu3 }
 0x190   :  { %v899_v37 = vadd.f32 %v1594_v0, %v698_v36  ;;  %v452_v38 = vpop.f32.mrf.mxu0 }
 0x191   :  { %1403 = vst [vmem:[%s2000_s3 + $0xf0] sm:$0xff] %v1367_v35   ;;  %v621_v39 = vpop.f32.mrf.mxu1 }
 0x192   :  { %963 = vst [vmem:[%s1999_s4 + $0x1e8] sm:$0xff] %v899_v37  ;;  %v868_v40 = vadd.f32 %v1594_v0, %v621_v39 }
 0x194   :  { %932 = vst [vmem:[%s1999_s4 + $0xf0] sm:$0xff] %v868_v40 }
 0x196   :  { %v532_v41 = vpop.f32.mrf.mxu2 }
 0x197   :  { %v701_v42 = vpop.f32.mrf.mxu3 }
 0x198   :  { %v900_v43 = vadd.f32 %v1594_v0, %v701_v42  ;;  %v454_v44 = vpop.f32.mrf.mxu0 }
 0x199   :  { %v1292_v45 = vpack.c.bf16 %v454_v44, %v452_v38  ;;  %v623_v46 = vpop.f32.mrf.mxu1 }
 0x19a   :  { %964 = vst [vmem:[%s1999_s4 + $0x1f0] sm:$0xff] %v900_v43  ;;  %v869_v47 = vadd.f32 %v1594_v0, %v623_v46 }
 0x19b   :  { %1388 = vst [vmem:[%s2000_s3 + $0x78] sm:$0xff] %v1292_v45  }
 0x19c   :  { %933 = vst [vmem:[%s1999_s4 + $0xf8] sm:$0xff] %v869_v47 }
 0x19e   :  { %v534_v48 = vpop.f32.mrf.mxu2 }
 0x19f   :  { %v1372_v49 = vpack.c.bf16 %v534_v48, %v532_v41  ;;  %v703_v50 = vpop.f32.mrf.mxu3 }
 0x1a0   :  { %v901_v51 = vadd.f32 %v1594_v0, %v703_v50 }
 0x1a1   :  { %1404 = vst [vmem:[%s2000_s3 + $0xf8] sm:$0xff] %v1372_v49  }
 0x1a2   :  { %965 = vst [vmem:[%s1999_s4 + $0x1f8] sm:$0xff] %v901_v51 }

// kernel: model_forward.12
= control target key start
LH: loop header
LB: loop body
LE: loop exit
PB: predicated region body
PF: predicated region fallthrough
CT: control target
= control target key end

     0   :  { %9 = vsyncpa [#allocation4], 0  ;;  %s3160_s18 = smov [#allocation3]   ;;  %s3161_s20 = smov 512   ;;  %s4056_s0 = inlined_call_operand.hbm [shape: s8[512,512], index: 0, kind: input, shape index: {}]   ;;  %s4057_s1 = inlined_call_operand.vmem [shape: bf16[512,128], index: 1, kind: input, shape index: {}]   ;;  %s4058_s2 = inlined_call_operand.vmem [shape: f32[512,1], index: 2, kind: input, shape index: {}]   ;;  %s4059_s3 = inlined_call_operand.vmem [shape: f32[512,128], index: 3, kind: input, shape index: {}]   ;;  %s4060_s4 = inlined_call_operand.vmem [shape: bf16[512,128], index: 4, kind: output, shape index: {}]  }
   0x1   :  { %s14_s17 = sshll.u32 %s4056_s0, 4  ;;  %s16_s19 = sshll.u32 %s3160_s18, 4  ;;  %s15_s17 = int_to_ptr.hbm [resolvable:$true] %s14_s17  ;;  %s17_s19 = int_to_ptr.vmem [resolvable:$true] %s16_s19 }
   0x2   :  { %s3162_s21 = smov 32  }
   0x3   :  { %22 = dma.hbm_to_vmem [thread:$0]  %s15_s17, 8192, %s17_s19, [#allocation4], %s3161_s20, %s3161_s20, %s3162_s21  }
   0x4   :  { %3158 = dma.done.wait [#allocation4], 8192  }
   0x5   :  { %3159 = vsyncadd [#allocation4], 4294959104  ;;  %v2911_v0 = vld [vmem:[%s4057_s1 + $0x38] sm:$0xff]  ;;  %v2910_v4 = vld [vmem:[%s4057_s1 + $0x30] sm:$0xff]  ;;  %v3163_v29 = vmov 0  }
   0x6   :  { %v2919_v1 = vld [vmem:[%s4057_s1 + $0x78] sm:$0xff]  ;;  %1130 = vmatpush.bf16.msra.mxu0 %v2911_v0  ;;  %v2918_v5 = vld [vmem:[%s4057_s1 + $0x70] sm:$0xff]  ;;  %v2909_v8 = vld [vmem:[%s4057_s1 + $0x28] sm:$0xff]  ;;  %3131 = vset.pattern.permute.xlu0 %v3163_v29 }
   0x7   :  { %v2927_v2 = vld [vmem:[%s4057_s1 + $0xb8] sm:$0xff]  ;;  %1299 = vmatpush.bf16.msra.mxu1 %v2919_v1  ;;  %v2926_v6 = vld [vmem:[%s4057_s1 + $0xb0] sm:$0xff]  ;;  %v2917_v9 = vld [vmem:[%s4057_s1 + $0x68] sm:$0xff]  ;;  %3132 = vset.pattern.permute.xlu1 %v3163_v29 }
   0x8   :  { %v2935_v3 = vld [vmem:[%s4057_s1 + $0xf8] sm:$0xff]  ;;  %1468 = vmatpush.bf16.msra.mxu2 %v2927_v2  ;;  %v2934_v7 = vld [vmem:[%s4057_s1 + $0xf0] sm:$0xff]  ;;  %v2925_v10 = vld [vmem:[%s4057_s1 + $0xa8] sm:$0xff]  ;;  %3133 = vset.pattern.permute.xlu2 %v3163_v29 }
   0x9   :  { %1637 = vmatpush.bf16.msra.mxu3 %v2935_v3  ;;  %v2933_v11 = vld [vmem:[%s4057_s1 + $0xe8] sm:$0xff]  ;;  %v2908_v12 = vld [vmem:[%s4057_s1 + $0x20] sm:$0xff]  ;;  %v2907_v16 = vld [vmem:[%s4057_s1 + $0x18] sm:$0xff] }
   0xa   :  { %1131 = vmatpush.bf16.msra.mxu0 %v2910_v4  ;;  %v2916_v13 = vld [vmem:[%s4057_s1 + $0x60] sm:$0xff]  ;;  %v2915_v17 = vld [vmem:[%s4057_s1 + $0x58] sm:$0xff]  ;;  %v2906_v20 = vld [vmem:[%s4057_s1 + $0x10] sm:$0xff] }
   0xb   :  { %1300 = vmatpush.bf16.msra.mxu1 %v2918_v5  ;;  %v2924_v14 = vld [vmem:[%s4057_s1 + $0xa0] sm:$0xff]  ;;  %v2923_v18 = vld [vmem:[%s4057_s1 + $0x98] sm:$0xff]  ;;  %v2914_v21 = vld [vmem:[%s4057_s1 + $0x50] sm:$0xff] }
   0xc   :  { %1469 = vmatpush.bf16.msra.mxu2 %v2926_v6  ;;  %v2932_v15 = vld [vmem:[%s4057_s1 + $0xe0] sm:$0xff]  ;;  %v2931_v19 = vld [vmem:[%s4057_s1 + $0xd8] sm:$0xff]  ;;  %v2922_v22 = vld [vmem:[%s4057_s1 + $0x90] sm:$0xff] }
   0xd   :  { %1638 = vmatpush.bf16.msra.mxu3 %v2934_v7  ;;  %v3261_v23 = vld [vmem:[#allocation3] sm:$0xff]  ;;  %v3263_v24 = vld [vmem:[#allocation3 + $0x8] sm:$0xff]  ;;  %v2930_v26 = vld [vmem:[%s4057_s1 + $0xd0] sm:$0xff] }
   0xe   :  { %1132 = vmatpush.bf16.msra.mxu0 %v2909_v8  ;;  %v2001_v25 = vld [vmem:[%s4058_s2] sm:$0xff]  ;;  %v3271_v27 = vld [vmem:[#allocation3 + $0x10] sm:$0xff]  ;;  %v3273_v28 = vld [vmem:[#allocation3 + $0x18] sm:$0xff]  ;;  %v165_v30 = vunpack.c.0.s8 %v3261_v23  ;;  %v169_v31 = vunpack.c.1.s8 %v3261_v23  ;;  %v166_v32 = vunpack.c.0.s8 %v3263_v24  ;;  %v170_v33 = vunpack.c.1.s8 %v3263_v24 }
   0xf   :  { %1301 = vmatpush.bf16.msra.mxu1 %v2917_v9  ;;  %2067 = vperm.xlu0 %3131, %v2001_v25   ;;  %v2905_v34 = vld [vmem:[%s4057_s1 + $0x8] sm:$0xff]  ;;  %v167_v36 = vunpack.c.0.s8 %v3271_v27  ;;  %v171_v37 = vunpack.c.1.s8 %v3271_v27  ;;  %v168_v38 = vunpack.c.0.s8 %v3273_v28  ;;  %v172_v39 = vunpack.c.1.s8 %v3273_v28  ;;  %v2904_v46 = vld [vmem:[%s4057_s1] sm:$0xff]  ;;  %v2003_v59 = vld [vmem:[%s4058_s2 + $0x10] sm:$0xff] }
  0x10   :  { %1470 = vmatpush.bf16.msra.mxu2 %v2925_v10  ;;  %v2913_v35 = vld [vmem:[%s4057_s1 + $0x48] sm:$0xff]  ;;  %v421_v42 = vcvt.s32.f32 %v165_v30  ;;  %v425_v43 = vcvt.s32.f32 %v169_v31  ;;  %v422_v44 = vcvt.s32.f32 %v166_v32  ;;  %v426_v45 = vcvt.s32.f32 %v170_v33  ;;  %v2912_v47 = vld [vmem:[%s4057_s1 + $0x40] sm:$0xff]  ;;  %2077 = vperm.xlu1 %3132, %v2003_v59   ;;  %v2004_v4 = vld [vmem:[%s4058_s2 + $0x18] sm:$0xff] }
  0x11   :  { %1639 = vmatpush.bf16.msra.mxu3 %v2933_v11  ;;  %v2921_v40 = vld [vmem:[%s4057_s1 + $0x88] sm:$0xff]  ;;  %v423_v48 = vcvt.s32.f32 %v167_v36  ;;  %v427_v49 = vcvt.s32.f32 %v171_v37  ;;  %v424_v50 = vcvt.s32.f32 %v168_v38  ;;  %v428_v51 = vcvt.s32.f32 %v172_v39  ;;  %v2920_v53 = vld [vmem:[%s4057_s1 + $0x80] sm:$0xff] }
  0x12   :  { %1133 = vmatpush.bf16.msra.mxu0 %v2908_v12  ;;  %v2929_v41 = vld [vmem:[%s4057_s1 + $0xc8] sm:$0xff]  ;;  %v2928_v54 = vld [vmem:[%s4057_s1 + $0xc0] sm:$0xff]  ;;  %v677_v55 = vpack.c.bf16 %v425_v43, %v421_v42  ;;  %v678_v56 = vpack.c.bf16 %v426_v45, %v422_v44  ;;  %v173_v60 = vunpack.c.2.s8 %v3261_v23  ;;  %v177_v61 = vunpack.c.3.s8 %v3261_v23  ;;  %v2008_v43 = vld [vmem:[%s4058_s2 + $0x38] sm:$0xff] }
  0x13   :  { %1302 = vmatpush.bf16.msra.mxu1 %v2916_v13  ;;  %v2002_v52 = vld [vmem:[%s4058_s2 + $0x8] sm:$0xff]  ;;  %v679_v57 = vpack.c.bf16 %v427_v49, %v423_v48  ;;  %v680_v58 = vpack.c.bf16 %v428_v51, %v424_v50  ;;  %v174_v62 = vunpack.c.2.s8 %v3263_v24  ;;  %v178_v63 = vunpack.c.3.s8 %v3263_v24  ;;  %v2005_v42 = vld [vmem:[%s4058_s2 + $0x20] sm:$0xff] }
  0x14   :  { %1471 = vmatpush.bf16.msra.mxu2 %v2924_v14  ;;  %v175_v0 = vunpack.c.2.s8 %v3271_v27  ;;  %v179_v1 = vunpack.c.3.s8 %v3271_v27  ;;  %v176_v2 = vunpack.c.2.s8 %v3273_v28  ;;  %v180_v3 = vunpack.c.3.s8 %v3273_v28  ;;  %2087 = vperm.xlu2 %3133, %v2005_v42  }
  0x15   :  { %1640 = vmatpush.bf16.msra.mxu3 %v2932_v15  ;;  %v429_v5 = vcvt.s32.f32 %v173_v60  ;;  %v433_v6 = vcvt.s32.f32 %v177_v61  ;;  %v430_v7 = vcvt.s32.f32 %v174_v62  ;;  %v434_v8 = vcvt.s32.f32 %v178_v63 }
  0x16   :  { %1134 = vmatpush.bf16.msra.mxu0 %v2907_v16  ;;  %v431_v9 = vcvt.s32.f32 %v175_v0  ;;  %v435_v10 = vcvt.s32.f32 %v179_v1  ;;  %v432_v11 = vcvt.s32.f32 %v176_v2  ;;  %v436_v12 = vcvt.s32.f32 %v180_v3  ;;  %v109_v0 = vld [vmem:[#allocation3 + $0x40] sm:$0xff]  ;;  %v110_v1 = vld [vmem:[#allocation3 + $0x48] sm:$0xff] }
  0x17   :  { %1303 = vmatpush.bf16.msra.mxu1 %v2915_v17  ;;  %2072 = vperm.xlu0 %3131, %v2002_v52   ;;  %v681_v13 = vpack.c.bf16 %v433_v6, %v429_v5  ;;  %v682_v14 = vpack.c.bf16 %v434_v8, %v430_v7  ;;  %v105_v17 = vld [vmem:[#allocation3 + $0x20] sm:$0xff]  ;;  %v2006_v2 = vld [vmem:[%s4058_s2 + $0x28] sm:$0xff]  ;;  %v112_v5 = vld [vmem:[#allocation3 + $0x58] sm:$0xff]  ;;  %v197_v6 = vunpack.c.0.s8 %v109_v0  ;;  %v201_v7 = vunpack.c.1.s8 %v109_v0 }
  0x18   :  { %1472 = vmatpush.bf16.msra.mxu2 %v2923_v18  ;;  %2082 = vperm.xlu1 %3132, %v2004_v4   ;;  %v683_v15 = vpack.c.bf16 %v435_v10, %v431_v9  ;;  %v684_v16 = vpack.c.bf16 %v436_v12, %v432_v11  ;;  %v106_v18 = vld [vmem:[#allocation3 + $0x28] sm:$0xff]  ;;  %v189_v44 = vunpack.c.2.s8 %v105_v17  ;;  %v193_v45 = vunpack.c.3.s8 %v105_v17  ;;  %v111_v4 = vld [vmem:[#allocation3 + $0x50] sm:$0xff] }
  0x19   :  { %1641 = vmatpush.bf16.msra.mxu3 %v2931_v19  ;;  %v107_v19 = vld [vmem:[#allocation3 + $0x30] sm:$0xff]  ;;  %v182_v23 = vunpack.c.0.s8 %v106_v18  ;;  %v186_v24 = vunpack.c.1.s8 %v106_v18  ;;  %v2010_v3 = vld [vmem:[%s4058_s2 + $0x48] sm:$0xff]  ;;  %v198_v8 = vunpack.c.0.s8 %v110_v1  ;;  %v202_v9 = vunpack.c.1.s8 %v110_v1 }
  0x1a   :  { %1135 = vmatpush.bf16.msra.mxu0 %v2906_v20  ;;  %v108_v20 = vld [vmem:[#allocation3 + $0x38] sm:$0xff]  ;;  %v183_v25 = vunpack.c.0.s8 %v107_v19  ;;  %v191_v48 = vunpack.c.2.s8 %v107_v19  ;;  %v195_v49 = vunpack.c.3.s8 %v107_v19  ;;  %v445_v52 = vcvt.s32.f32 %v189_v44 }
  0x1b   :  { %1304 = vmatpush.bf16.msra.mxu1 %v2914_v21  ;;  %v181_v21 = vunpack.c.0.s8 %v105_v17  ;;  %v184_v27 = vunpack.c.0.s8 %v108_v20  ;;  %v188_v28 = vunpack.c.1.s8 %v108_v20  ;;  %v438_v31 = vcvt.s32.f32 %v182_v23 }
  0x1c   :  { %1473 = vmatpush.bf16.msra.mxu2 %v2922_v22  ;;  %v185_v22 = vunpack.c.1.s8 %v105_v17  ;;  %v442_v32 = vcvt.s32.f32 %v186_v24  ;;  %v439_v33 = vcvt.s32.f32 %v183_v25  ;;  %v192_v50 = vunpack.c.2.s8 %v108_v20  ;;  %2092 = vperm.xlu2 %3133, %v2006_v2  }
  0x1d   :  { %1642 = vmatpush.bf16.msra.mxu3 %v2930_v26  ;;  %v187_v26 = vunpack.c.1.s8 %v107_v19  ;;  %v437_v29 = vcvt.s32.f32 %v181_v21  ;;  %v444_v36 = vcvt.s32.f32 %v188_v28  ;;  %v196_v51 = vunpack.c.3.s8 %v108_v20 }
  0x1e   :  { %1136 = vmatpush.bf16.msra.mxu0 %v2905_v34  ;;  %v441_v30 = vcvt.s32.f32 %v185_v22  ;;  %v686_v38 = vpack.c.bf16 %v442_v32, %v438_v31  ;;  %v199_v10 = vunpack.c.0.s8 %v111_v4  ;;  %v203_v11 = vunpack.c.1.s8 %v111_v4 }
  0x1f   :  { %1305 = vmatpush.bf16.msra.mxu1 %v2913_v35  ;;  %v443_v34 = vcvt.s32.f32 %v187_v26  ;;  %v440_v35 = vcvt.s32.f32 %v184_v27  ;;  %v452_v59 = vcvt.s32.f32 %v196_v51  ;;  %v200_v12 = vunpack.c.0.s8 %v112_v5  ;;  %v2011_v26 = vld [vmem:[%s4058_s2 + $0x50] sm:$0xff]  ;;  %v2009_v27 = vld [vmem:[%s4058_s2 + $0x40] sm:$0xff]  ;;  %v2014_v51 = vld [vmem:[%s4058_s2 + $0x68] sm:$0xff] }
  0x20   :  { %1474 = vmatpush.bf16.msra.mxu2 %v2921_v40  ;;  %v685_v37 = vpack.c.bf16 %v441_v30, %v437_v29  ;;  %2102 = vperm.xlu1 %3132, %v2008_v43   ;;  %v458_v17 = vcvt.s32.f32 %v202_v9  ;;  %v459_v19 = vcvt.s32.f32 %v203_v11  ;;  %v205_v28 = vunpack.c.2.s8 %v109_v0 }
  0x21   :  { %1643 = vmatpush.bf16.msra.mxu3 %v2929_v41  ;;  %v687_v39 = vpack.c.bf16 %v443_v34, %v439_v33  ;;  %v688_v40 = vpack.c.bf16 %v444_v36, %v440_v35  ;;  %v2007_v41 = vld [vmem:[%s4058_s2 + $0x30] sm:$0xff]  ;;  %v456_v20 = vcvt.s32.f32 %v200_v12  ;;  %v209_v29 = vunpack.c.3.s8 %v109_v0 }
  0x22   :  { %1137 = vmatpush.bf16.msra.mxu0 %v2904_v46  ;;  %2097 = vperm.xlu0 %3131, %v2007_v41   ;;  %v190_v46 = vunpack.c.2.s8 %v106_v18  ;;  %v206_v30 = vunpack.c.2.s8 %v110_v1  ;;  %v210_v31 = vunpack.c.3.s8 %v110_v1  ;;  %v207_v32 = vunpack.c.2.s8 %v111_v4 }
  0x23   :  { %1306 = vmatpush.bf16.msra.mxu1 %v2912_v47  ;;  %v194_v47 = vunpack.c.3.s8 %v106_v18  ;;  %v455_v18 = vcvt.s32.f32 %v199_v10  ;;  %v211_v33 = vunpack.c.3.s8 %v111_v4  ;;  %v208_v34 = vunpack.c.2.s8 %v112_v5 }
  0x24   :  { %1475 = vmatpush.bf16.msra.mxu2 %v2920_v53  ;;  %v449_v53 = vcvt.s32.f32 %v193_v45  ;;  %2107 = vperm.xlu2 %3133, %v2009_v27   ;;  %v212_v35 = vunpack.c.3.s8 %v112_v5  ;;  %v461_v36 = vcvt.s32.f32 %v205_v28 }
  0x25   :  { %1644 = vmatpush.bf16.msra.mxu3 %v2928_v54  ;;  %1138 = vmatmul.bf16.vlgmr.msra.gmra.mxu0 %v677_v55  ;;  %v446_v54 = vcvt.s32.f32 %v190_v46  ;;  %v450_v55 = vcvt.s32.f32 %v194_v47  ;;  %v695_v24 = vpack.c.bf16 %v459_v19, %v455_v18  ;;  %v467_v41 = vcvt.s32.f32 %v211_v33  ;;  %v2012_v18 = vld [vmem:[%s4058_s2 + $0x58] sm:$0xff]  ;;  %v118_v33 = vld [vmem:[#allocation3 + $0x88] sm:$0xff] }
  0x26   :  { %1307 = vmatmul.bf16.vlgmr.msra.gmra.mxu1 %v678_v56  ;;  %v447_v56 = vcvt.s32.f32 %v191_v48  ;;  %v689_v60 = vpack.c.bf16 %v449_v53, %v445_v52  ;;  %v464_v42 = vcvt.s32.f32 %v208_v34  ;;  %v468_v43 = vcvt.s32.f32 %v212_v35  ;;  %v113_v48 = vld [vmem:[#allocation3 + $0x60] sm:$0xff]  ;;  %v115_v52 = vld [vmem:[#allocation3 + $0x70] sm:$0xff]  ;;  %v116_v53 = vld [vmem:[#allocation3 + $0x78] sm:$0xff] }
  0x27   :  { %1476 = vmatmul.bf16.vlgmr.msra.gmra.mxu2 %v679_v57  ;;  %v451_v57 = vcvt.s32.f32 %v195_v49  ;;  %v690_v61 = vpack.c.bf16 %v450_v55, %v446_v54  ;;  %v114_v49 = vld [vmem:[#allocation3 + $0x68] sm:$0xff]  ;;  %v213_v54 = vunpack.c.0.s8 %v113_v48  ;;  %v217_v55 = vunpack.c.1.s8 %v113_v48  ;;  %v119_v34 = vld [vmem:[#allocation3 + $0x90] sm:$0xff]  ;;  %v120_v35 = vld [vmem:[#allocation3 + $0x98] sm:$0xff] }
  0x28   :  { %1645 = vmatmul.bf16.vlgmr.msra.gmra.mxu3 %v680_v58  ;;  %v448_v58 = vcvt.s32.f32 %v192_v50  ;;  %2117 = vperm.xlu1 %3132, %v2011_v26   ;;  %v700_v47 = vpack.c.bf16 %v468_v43, %v464_v42  ;;  %v2013_v50 = vld [vmem:[%s4058_s2 + $0x60] sm:$0xff]  ;;  %v221_v10 = vunpack.c.2.s8 %v113_v48  ;;  %v225_v11 = vunpack.c.3.s8 %v113_v48 }
  0x29   :  { %v691_v62 = vpack.c.bf16 %v451_v57, %v447_v56  ;;  %v214_v56 = vunpack.c.0.s8 %v114_v49  ;;  %v218_v57 = vunpack.c.1.s8 %v114_v49  ;;  %v222_v12 = vunpack.c.2.s8 %v114_v49 }
  0x2a   :  { %v692_v63 = vpack.c.bf16 %v452_v59, %v448_v58  ;;  %2112 = vperm.xlu0 %3131, %v2010_v3   ;;  %v215_v58 = vunpack.c.0.s8 %v115_v52  ;;  %v219_v59 = vunpack.c.1.s8 %v115_v52  ;;  %v477_v19 = vcvt.s32.f32 %v221_v10 }
  0x2b   :  { %v470_v0 = vcvt.s32.f32 %v214_v56  ;;  %v474_v1 = vcvt.s32.f32 %v218_v57  ;;  %v232_v42 = vunpack.c.0.s8 %v120_v35  ;;  %v236_v43 = vunpack.c.1.s8 %v120_v35 }
  0x2c   :  { %v471_v2 = vcvt.s32.f32 %v215_v58  ;;  %v475_v3 = vcvt.s32.f32 %v219_v59  ;;  %2122 = vperm.xlu2 %3133, %v2012_v18   ;;  %v2015_v59 = vld [vmem:[%s4058_s2 + $0x70] sm:$0xff]  ;;  %v244_v10 = vunpack.c.3.s8 %v120_v35 }
  0x30   :  { %2132 = vperm.xlu1 %3132, %v2014_v51   ;;  %v488_v51 = vcvt.s32.f32 %v232_v42  ;;  %v3379_v42 = vld [vmem:[#allocation3 + $0xb0] sm:$0xff] }
  0x32   :  { %2127 = vperm.xlu0 %3131, %v2013_v50  }
  0x34   :  { %2137 = vperm.xlu2 %3133, %v2015_v59  }
  0x35   :  { %1143 = vmatmul.bf16.gmra.mxu0 %v681_v13  ;;  %v204_v13 = vunpack.c.1.s8 %v112_v5 }
  0x36   :  { %1312 = vmatmul.bf16.gmra.mxu1 %v682_v14  ;;  %v453_v14 = vcvt.s32.f32 %v197_v6 }
  0x37   :  { %1481 = vmatmul.bf16.gmra.mxu2 %v683_v15  ;;  %v457_v15 = vcvt.s32.f32 %v201_v7  ;;  %v460_v21 = vcvt.s32.f32 %v204_v13  ;;  %v702_v7 = vpack.c.bf16 %v474_v1, %v470_v0  ;;  %v226_v13 = vunpack.c.3.s8 %v114_v49 }
  0x38   :  { %1650 = vmatmul.bf16.gmra.mxu3 %v684_v16  ;;  %v454_v16 = vcvt.s32.f32 %v198_v8  ;;  %v703_v8 = vpack.c.bf16 %v475_v3, %v471_v2  ;;  %v238_v2 = vunpack.c.2.s8 %v118_v33  ;;  %v242_v3 = vunpack.c.3.s8 %v118_v33 }
  0x39   :  { %v693_v22 = vpack.c.bf16 %v457_v15, %v453_v14  ;;  %v696_v25 = vpack.c.bf16 %v460_v21, %v456_v20  ;;  %v223_v14 = vunpack.c.2.s8 %v115_v52  ;;  %v227_v15 = vunpack.c.3.s8 %v115_v52 }
  0x3a   :  { %v694_v23 = vpack.c.bf16 %v458_v17, %v454_v16  ;;  %v224_v16 = vunpack.c.2.s8 %v116_v53  ;;  %v228_v17 = vunpack.c.3.s8 %v116_v53  ;;  %v481_v20 = vcvt.s32.f32 %v225_v11  ;;  %v2019_v11 = vld [vmem:[%s4058_s2 + $0x90] sm:$0xff] }
  0x3b   :  { %v478_v21 = vcvt.s32.f32 %v222_v12  ;;  %v492_v52 = vcvt.s32.f32 %v236_v43  ;;  %v3381_v43 = vld [vmem:[#allocation3 + $0xb8] sm:$0xff] }
  0x3c   :  { %v484_v26 = vcvt.s32.f32 %v228_v17  ;;  %v705_v27 = vpack.c.bf16 %v481_v20, %v477_v19  ;;  %v500_v20 = vcvt.s32.f32 %v244_v10 }
  0x3d   :  { %v712_v58 = vpack.c.bf16 %v492_v52, %v488_v51  ;;  %v247_v52 = vunpack.c.0.s8 %v3379_v42 }
  0x45   :  { %1148 = vmatmul.bf16.gmra.mxu0 %v685_v37  ;;  %v465_v37 = vcvt.s32.f32 %v209_v29 }
  0x46   :  { %1317 = vmatmul.bf16.gmra.mxu1 %v686_v38  ;;  %v462_v38 = vcvt.s32.f32 %v206_v30 }
  0x47   :  { %1486 = vmatmul.bf16.gmra.mxu2 %v687_v39  ;;  %v466_v39 = vcvt.s32.f32 %v210_v31  ;;  %v697_v44 = vpack.c.bf16 %v465_v37, %v461_v36  ;;  %v2016_v31 = vld [vmem:[%s4058_s2 + $0x78] sm:$0xff] }
  0x48   :  { %1655 = vmatmul.bf16.gmra.mxu3 %v688_v40  ;;  %v463_v40 = vcvt.s32.f32 %v207_v32  ;;  %2142 = vperm.xlu0 %3131, %v2016_v31   ;;  %v117_v32 = vld [vmem:[#allocation3 + $0x80] sm:$0xff] }
  0x49   :  { %v698_v45 = vpack.c.bf16 %v466_v39, %v462_v38  ;;  %v229_v36 = vunpack.c.0.s8 %v117_v32  ;;  %v233_v37 = vunpack.c.1.s8 %v117_v32  ;;  %v230_v38 = vunpack.c.0.s8 %v118_v33 }
  0x4a   :  { %v699_v46 = vpack.c.bf16 %v467_v41, %v463_v40  ;;  %v234_v39 = vunpack.c.1.s8 %v118_v33  ;;  %v231_v40 = vunpack.c.0.s8 %v119_v34  ;;  %v235_v41 = vunpack.c.1.s8 %v119_v34  ;;  %v2449_v33 = vld [vmem:[%s4059_s3] sm:$0xff] }
  0x4b   :  { %v241_v1 = vunpack.c.3.s8 %v117_v32 }
  0x4c   :  { %v490_v48 = vcvt.s32.f32 %v234_v39  ;;  %v487_v49 = vcvt.s32.f32 %v231_v40  ;;  %v491_v50 = vcvt.s32.f32 %v235_v41 }
  0x4e   :  { %v711_v57 = vpack.c.bf16 %v491_v50, %v487_v49 }
  0x50   :  { %2157 = vperm.xlu0 %3131, %v2019_v11  }
  0x55   :  { %1153 = vmatmul.bf16.gmra.mxu0 %v689_v60  ;;  %v216_v60 = vunpack.c.0.s8 %v116_v53 }
  0x56   :  { %1322 = vmatmul.bf16.gmra.mxu1 %v690_v61  ;;  %v220_v61 = vunpack.c.1.s8 %v116_v53 }
  0x57   :  { %1491 = vmatmul.bf16.gmra.mxu2 %v691_v62  ;;  %v469_v62 = vcvt.s32.f32 %v213_v54  ;;  %v472_v4 = vcvt.s32.f32 %v216_v60 }
  0x58   :  { %1660 = vmatmul.bf16.gmra.mxu3 %v692_v63  ;;  %v473_v63 = vcvt.s32.f32 %v217_v55  ;;  %v476_v5 = vcvt.s32.f32 %v220_v61 }
  0x5a   :  { %v701_v6 = vpack.c.bf16 %v473_v63, %v469_v62  ;;  %v704_v9 = vpack.c.bf16 %v476_v5, %v472_v4  ;;  %v237_v62 = vunpack.c.2.s8 %v117_v32  ;;  %v239_v4 = vunpack.c.2.s8 %v119_v34  ;;  %v2020_v32 = vld [vmem:[%s4058_s2 + $0x98] sm:$0xff] }
  0x5c   :  { %v493_v12 = vcvt.s32.f32 %v237_v62 }
  0x65   :  { %1158 = vmatmul.bf16.gmra.mxu0 %v693_v22  ;;  %v482_v22 = vcvt.s32.f32 %v226_v13  ;;  %v497_v13 = vcvt.s32.f32 %v241_v1 }
  0x66   :  { %1327 = vmatmul.bf16.gmra.mxu1 %v694_v23  ;;  %v479_v23 = vcvt.s32.f32 %v223_v14  ;;  %v494_v14 = vcvt.s32.f32 %v238_v2 }
  0x67   :  { %1496 = vmatmul.bf16.gmra.mxu2 %v695_v24  ;;  %v483_v24 = vcvt.s32.f32 %v227_v15  ;;  %v706_v28 = vpack.c.bf16 %v482_v22, %v478_v21  ;;  %v498_v15 = vcvt.s32.f32 %v242_v3  ;;  %v503_v3 = vcvt.s32.f32 %v247_v52 }
  0x68   :  { %1665 = vmatmul.bf16.gmra.mxu3 %v696_v25  ;;  %v480_v25 = vcvt.s32.f32 %v224_v16  ;;  %v495_v16 = vcvt.s32.f32 %v239_v4 }
  0x69   :  { %v707_v29 = vpack.c.bf16 %v483_v24, %v479_v23  ;;  %v713_v24 = vpack.c.bf16 %v497_v13, %v493_v12 }
  0x6a   :  { %v708_v30 = vpack.c.bf16 %v484_v26, %v480_v25  ;;  %v714_v25 = vpack.c.bf16 %v498_v15, %v494_v14 }
  0x75   :  { %1163 = vmatmul.bf16.gmra.mxu0 %v697_v44  ;;  %v2017_v44 = vld [vmem:[%s4058_s2 + $0x80] sm:$0xff] }
  0x76   :  { %1332 = vmatmul.bf16.gmra.mxu1 %v698_v45  ;;  %2147 = vperm.xlu1 %3132, %v2017_v44   ;;  %v485_v45 = vcvt.s32.f32 %v229_v36  ;;  %v2450_v36 = vld [vmem:[%s4059_s3 + $0x8] sm:$0xff] }
  0x77   :  { %1501 = vmatmul.bf16.gmra.mxu2 %v699_v46  ;;  %v489_v46 = vcvt.s32.f32 %v233_v37  ;;  %v3375_v37 = vld [vmem:[#allocation3 + $0xa0] sm:$0xff] }
  0x78   :  { %1670 = vmatmul.bf16.gmra.mxu3 %v700_v47  ;;  %v486_v47 = vcvt.s32.f32 %v230_v38  ;;  %v3377_v38 = vld [vmem:[#allocation3 + $0xa8] sm:$0xff] }
  0x79   :  { %v709_v53 = vpack.c.bf16 %v489_v46, %v485_v45  ;;  %v245_v46 = vunpack.c.0.s8 %v3375_v37  ;;  %v250_v51 = vunpack.c.1.s8 %v3377_v38 }
  0x7a   :  { %v710_v54 = vpack.c.bf16 %v490_v48, %v486_v47  ;;  %v249_v47 = vunpack.c.1.s8 %v3375_v37  ;;  %v246_v48 = vunpack.c.0.s8 %v3377_v38 }
  0x7b   :  { %v506_v2 = vcvt.s32.f32 %v250_v51 }
  0x7c   :  { %v502_v1 = vcvt.s32.f32 %v246_v48 }
  0x7e   :  { %2162 = vperm.xlu1 %3132, %v2020_v32   ;;  %v718_v12 = vpack.c.bf16 %v506_v2, %v502_v1  ;;  %v2021_v2 = vld [vmem:[%s4058_s2 + $0xa0] sm:$0xff] }
  0x81   :  { %v2068_v61 = vpop.permute.xlu0 %2067 }
  0x82   :  { %v2078_v45 = vpop.permute.xlu1 %2077 }
  0x85   :  { %1168 = vmatmul.bf16.gmra.mxu0 %v701_v6 }
  0x86   :  { %1337 = vmatmul.bf16.gmra.mxu1 %v702_v7 }
  0x87   :  { %1506 = vmatmul.bf16.gmra.mxu2 %v703_v8  ;;  %v243_v8 = vunpack.c.3.s8 %v119_v34 }
  0x88   :  { %1675 = vmatmul.bf16.gmra.mxu3 %v704_v9  ;;  %v240_v9 = vunpack.c.2.s8 %v120_v35 }
  0x89   :  { %v499_v18 = vcvt.s32.f32 %v243_v8  ;;  %v2073_v34 = vpop.permute.xlu0 %2072 }
  0x8a   :  { %v496_v19 = vcvt.s32.f32 %v240_v9 }
  0x8c   :  { %v716_v31 = vpack.c.bf16 %v500_v20, %v496_v19  ;;  %v2022_v19 = vld [vmem:[%s4058_s2 + $0xa8] sm:$0xff]  ;;  %v2451_v20 = vld [vmem:[%s4059_s3 + $0x10] sm:$0xff] }
  0x8d   :  { %2172 = vperm.xlu0 %3131, %v2022_v19  }
  0x95   :  { %1173 = vmatmul.bf16.gmra.mxu0 %v705_v27 }
  0x96   :  { %1342 = vmatmul.bf16.gmra.mxu1 %v706_v28 }
  0x97   :  { %1511 = vmatmul.bf16.gmra.mxu2 %v707_v29 }
  0x98   :  { %1680 = vmatmul.bf16.gmra.mxu3 %v708_v30  ;;  %v715_v30 = vpack.c.bf16 %v499_v18, %v495_v16 }
  0xa2   :  { %v1139_v55 = vpop.f32.mrf.mxu0 }
  0xa3   :  { %v1308_v56 = vpop.f32.mrf.mxu1 }
  0xa4   :  { %v1309_v60 = vadd.f32 %v1308_v56, %v1139_v55 }
  0xa5   :  { %1178 = vmatmul.bf16.gmra.mxu0 %v709_v53  ;;  %v251_v53 = vunpack.c.1.s8 %v3379_v42 }
  0xa6   :  { %1347 = vmatmul.bf16.gmra.mxu1 %v710_v54  ;;  %v248_v54 = vunpack.c.0.s8 %v3381_v43 }
  0xa7   :  { %1516 = vmatmul.bf16.gmra.mxu2 %v711_v57 }
  0xa8   :  { %1685 = vmatmul.bf16.gmra.mxu3 %v712_v58 }
  0xaa   :  { %v1477_v63 = vpop.f32.mrf.mxu2  ;;  %v1141_v6 = vpop.f32.mrf.mxu0 }
  0xab   :  { %v1646_v0 = vpop.f32.mrf.mxu3  ;;  %v1478_v5 = vadd.f32 %v1477_v63, %v1309_v60  ;;  %v1310_v7 = vpop.f32.mrf.mxu1  ;;  %v252_v60 = vunpack.c.1.s8 %v3381_v43  ;;  %v501_v63 = vcvt.s32.f32 %v245_v46 }
  0xac   :  { %v1311_v21 = vadd.f32 %v1310_v7, %v1141_v6  ;;  %v504_v6 = vcvt.s32.f32 %v248_v54 }
  0xad   :  { %v1647_v17 = vadd.f32 %v1646_v0, %v1478_v5  ;;  %v505_v0 = vcvt.s32.f32 %v249_v47  ;;  %v507_v5 = vcvt.s32.f32 %v251_v53  ;;  %v508_v7 = vcvt.s32.f32 %v252_v60 }
  0xae   :  { %v260_v47 = vunpack.c.3.s8 %v3381_v43 }
  0xaf   :  { %v2385_v26 = vmul.f32 %v2068_v61, %v1647_v17  ;;  %v2018_v61 = vld [vmem:[%s4058_s2 + $0x88] sm:$0xff]  ;;  %v717_v11 = vpack.c.bf16 %v505_v0, %v501_v63  ;;  %v719_v17 = vpack.c.bf16 %v507_v5, %v503_v3  ;;  %v720_v18 = vpack.c.bf16 %v508_v7, %v504_v6  ;;  %v2453_v3 = vld [vmem:[%s4059_s3 + $0x20] sm:$0xff] }
  0xb0   :  { %2152 = vperm.xlu2 %3133, %v2018_v61   ;;  %v2454_v6 = vld [vmem:[%s4059_s3 + $0x28] sm:$0xff]  ;;  %v3429_v7 = vld [vmem:[#allocation3 + $0xc0] sm:$0xff] }
  0xb1   :  { %v2513_v39 = vadd.f32 %v2449_v33, %v2385_v26 }
  0xb2   :  { %v1479_v22 = vpop.f32.mrf.mxu2  ;;  %v1144_v28 = vpop.f32.mrf.mxu0 }
  0xb3   :  { %v1648_v23 = vpop.f32.mrf.mxu3  ;;  %v1480_v27 = vadd.f32 %v1479_v22, %v1311_v21  ;;  %v1313_v29 = vpop.f32.mrf.mxu1  ;;  %v2577_v55 = vmax.f32 %v2513_v39, 0.0  ;;  %v256_v39 = vunpack.c.2.s8 %v3381_v43 }
  0xb4   :  { %v1314_v40 = vadd.f32 %v1313_v29, %v1144_v28  ;;  %v2083_v21 = vpop.permute.xlu1 %2082  ;;  %v2088_v28 = vpop.permute.xlu2 %2087  ;;  %v253_v29 = vunpack.c.2.s8 %v3375_v37 }
  0xb5   :  { %v1649_v35 = vadd.f32 %v1648_v23, %v1480_v27  ;;  %1183 = vmatmul.bf16.gmra.mxu0 %v713_v24  ;;  %v2452_v23 = vld [vmem:[%s4059_s3 + $0x18] sm:$0xff]  ;;  %v512_v54 = vcvt.s32.f32 %v256_v39 }
  0xb6   :  { %1352 = vmatmul.bf16.gmra.mxu1 %v714_v25 }
  0xb7   :  { %v2386_v41 = vmul.f32 %v2073_v34, %v1649_v35  ;;  %1521 = vmatmul.bf16.gmra.mxu2 %v715_v30  ;;  %v257_v30 = vunpack.c.3.s8 %v3375_v37  ;;  %v258_v34 = vunpack.c.3.s8 %v3377_v38  ;;  %v255_v35 = vunpack.c.2.s8 %v3379_v42  ;;  %v2023_v37 = vld [vmem:[%s4058_s2 + $0xb0] sm:$0xff] }
  0xb8   :  { %1690 = vmatmul.bf16.gmra.mxu3 %v716_v31  ;;  %v254_v31 = vunpack.c.2.s8 %v3377_v38  ;;  %2177 = vperm.xlu1 %3132, %v2023_v37   ;;  %v509_v38 = vcvt.s32.f32 %v253_v29 }
  0xb9   :  { %v2514_v44 = vadd.f32 %v2450_v36, %v2386_v41  ;;  %v259_v36 = vunpack.c.3.s8 %v3379_v42  ;;  %v514_v51 = vcvt.s32.f32 %v258_v34  ;;  %v511_v42 = vcvt.s32.f32 %v255_v35  ;;  %2167 = vperm.xlu2 %3133, %v2021_v2  }
  0xba   :  { %v1482_v49 = vpop.f32.mrf.mxu2  ;;  %v1146_v58 = vpop.f32.mrf.mxu0 }
  0xbb   :  { %v1651_v50 = vpop.f32.mrf.mxu3  ;;  %v2578_v56 = vmax.f32 %v2514_v44, 0.0  ;;  %v1483_v57 = vadd.f32 %v1482_v49, %v1314_v40  ;;  %v1315_v59 = vpop.f32.mrf.mxu1  ;;  %v513_v49 = vcvt.s32.f32 %v257_v30  ;;  %v515_v53 = vcvt.s32.f32 %v259_v36  ;;  %v2025_v30 = vld [vmem:[%s4058_s2 + $0xc0] sm:$0xff] }
  0xbc   :  { %v1316_v8 = vadd.f32 %v1315_v59, %v1146_v58  ;;  %2187 = vperm.xlu0 %3131, %v2025_v30  }
  0xbd   :  { %v2939_v62 = vpack.c.bf16 %v2578_v56, %v2577_v55  ;;  %v1652_v4 = vadd.f32 %v1651_v50, %v1483_v57  ;;  %v510_v50 = vcvt.s32.f32 %v254_v31  ;;  %v516_v55 = vcvt.s32.f32 %v260_v47 }
  0xbe   :  { %v721_v58 = vpack.c.bf16 %v513_v49, %v509_v38  ;;  %v723_v0 = vpack.c.bf16 %v515_v53, %v511_v42 }
  0xbf   :  { %2940 = vst [vmem:[%s4060_s4] sm:$0xff] %v2939_v62   ;;  %v2387_v13 = vmul.f32 %v2078_v45, %v1652_v4  ;;  %v722_v59 = vpack.c.bf16 %v514_v51, %v510_v50  ;;  %v724_v1 = vpack.c.bf16 %v516_v55, %v512_v54  ;;  %v2093_v4 = vpop.permute.xlu2 %2092  ;;  %v2026_v54 = vld [vmem:[%s4058_s2 + $0xc8] sm:$0xff]  ;;  %v2455_v55 = vld [vmem:[%s4059_s3 + $0x30] sm:$0xff] }
  0xc0   :  { %2192 = vperm.xlu1 %3132, %v2026_v54  }
  0xc1   :  { %v2515_v24 = vadd.f32 %v2451_v20, %v2387_v13  ;;  %v3435_v13 = vld [vmem:[#allocation3 + $0xd8] sm:$0xff] }
  0xc2   :  { %v1484_v9 = vpop.f32.mrf.mxu2  ;;  %v1149_v15 = vpop.f32.mrf.mxu0  ;;  %v268_v29 = vunpack.c.1.s8 %v3435_v13 }
  0xc3   :  { %v1653_v10 = vpop.f32.mrf.mxu3  ;;  %v1485_v14 = vadd.f32 %v1484_v9, %v1316_v8  ;;  %v1318_v16 = vpop.f32.mrf.mxu1  ;;  %v2579_v40 = vmax.f32 %v2515_v24, 0.0  ;;  %v3431_v8 = vld [vmem:[#allocation3 + $0xc8] sm:$0xff] }
  0xc4   :  { %v1319_v25 = vadd.f32 %v1318_v16, %v1149_v15  ;;  %v261_v15 = vunpack.c.0.s8 %v3429_v7  ;;  %v265_v16 = vunpack.c.1.s8 %v3429_v7  ;;  %v266_v20 = vunpack.c.1.s8 %v3431_v8 }
  0xc5   :  { %v1654_v22 = vadd.f32 %v1653_v10, %v1485_v14  ;;  %1188 = vmatmul.bf16.gmra.mxu0 %v717_v11 }
  0xc6   :  { %1357 = vmatmul.bf16.gmra.mxu1 %v718_v12  ;;  %v3433_v12 = vld [vmem:[#allocation3 + $0xd0] sm:$0xff]  ;;  %v522_v35 = vcvt.s32.f32 %v266_v20 }
  0xc7   :  { %v2388_v26 = vmul.f32 %v2083_v21, %v1654_v22  ;;  %1526 = vmatmul.bf16.gmra.mxu2 %v719_v17  ;;  %v262_v17 = vunpack.c.0.s8 %v3431_v8  ;;  %v263_v21 = vunpack.c.0.s8 %v3433_v12  ;;  %v267_v22 = vunpack.c.1.s8 %v3433_v12 }
  0xc8   :  { %1695 = vmatmul.bf16.gmra.mxu3 %v720_v18 }
  0xc9   :  { %v2516_v27 = vadd.f32 %v2452_v23, %v2388_v26  ;;  %v264_v23 = vunpack.c.0.s8 %v3435_v13  ;;  %v518_v34 = vcvt.s32.f32 %v262_v17  ;;  %v519_v36 = vcvt.s32.f32 %v263_v21 }
  0xca   :  { %v1487_v32 = vpop.f32.mrf.mxu2  ;;  %v1151_v45 = vpop.f32.mrf.mxu0 }
  0xcb   :  { %v1656_v33 = vpop.f32.mrf.mxu3  ;;  %v2580_v41 = vmax.f32 %v2516_v27, 0.0  ;;  %v1488_v44 = vadd.f32 %v1487_v32, %v1319_v25  ;;  %v1320_v46 = vpop.f32.mrf.mxu1  ;;  %v517_v32 = vcvt.s32.f32 %v261_v15  ;;  %v726_v38 = vpack.c.bf16 %v522_v35, %v518_v34 }
  0xcc   :  { %v1321_v43 = vadd.f32 %v1320_v46, %v1151_v45  ;;  %v2098_v45 = vpop.permute.xlu0 %2097 }
  0xcd   :  { %v2944_v48 = vpack.c.bf16 %v2580_v41, %v2579_v40  ;;  %v1657_v52 = vadd.f32 %v1656_v33, %v1488_v44  ;;  %v521_v33 = vcvt.s32.f32 %v265_v16  ;;  %v523_v40 = vcvt.s32.f32 %v267_v22 }
  0xce   :  { %v520_v41 = vcvt.s32.f32 %v264_v23  ;;  %v524_v44 = vcvt.s32.f32 %v268_v29  ;;  %v276_v16 = vunpack.c.3.s8 %v3435_v13 }
  0xcf   :  { %3096 = vst [vmem:[%s4060_s4 + $0x8] sm:$0xff] %v2944_v48   ;;  %v2389_v60 = vmul.f32 %v2088_v28, %v1657_v52  ;;  %v725_v48 = vpack.c.bf16 %v521_v33, %v517_v32  ;;  %v727_v52 = vpack.c.bf16 %v523_v40, %v519_v36  ;;  %v2028_v36 = vld [vmem:[%s4058_s2 + $0xd8] sm:$0xff] }
  0xd0   :  { %v728_v53 = vpack.c.bf16 %v524_v44, %v520_v41  ;;  %2202 = vperm.xlu0 %3131, %v2028_v36   ;;  %v2458_v44 = vld [vmem:[%s4059_s3 + $0x48] sm:$0xff] }
  0xd1   :  { %v2517_v9 = vadd.f32 %v2453_v3, %v2389_v60  ;;  %v274_v3 = vunpack.c.3.s8 %v3431_v8 }
  0xd2   :  { %v1489_v56 = vpop.f32.mrf.mxu2  ;;  %v1154_v62 = vpop.f32.mrf.mxu0 }
  0xd3   :  { %v1658_v57 = vpop.f32.mrf.mxu3  ;;  %v1490_v61 = vadd.f32 %v1489_v56, %v1321_v43  ;;  %v1323_v63 = vpop.f32.mrf.mxu1  ;;  %v2581_v24 = vmax.f32 %v2517_v9, 0.0  ;;  %v530_v20 = vcvt.s32.f32 %v274_v3 }
  0xd4   :  { %v1324_v10 = vadd.f32 %v1323_v63, %v1154_v62  ;;  %v2103_v43 = vpop.permute.xlu1 %2102  ;;  %v269_v62 = vunpack.c.2.s8 %v3429_v7  ;;  %v273_v63 = vunpack.c.3.s8 %v3429_v7  ;;  %v2024_v7 = vld [vmem:[%s4058_s2 + $0xb8] sm:$0xff]  ;;  %v2113_v40 = vpop.permute.xlu0 %2112 }
  0xd5   :  { %v1659_v5 = vadd.f32 %v1658_v57, %v1490_v61  ;;  %1193 = vmatmul.bf16.gmra.mxu0 %v721_v58  ;;  %v2456_v57 = vld [vmem:[%s4059_s3 + $0x38] sm:$0xff]  ;;  %2182 = vperm.xlu2 %3133, %v2024_v7  }
  0xd6   :  { %1362 = vmatmul.bf16.gmra.mxu1 %v722_v59 }
  0xd7   :  { %v2390_v11 = vmul.f32 %v2093_v4, %v1659_v5  ;;  %1531 = vmatmul.bf16.gmra.mxu2 %v723_v0  ;;  %v270_v0 = vunpack.c.2.s8 %v3431_v8  ;;  %v271_v4 = vunpack.c.2.s8 %v3433_v12  ;;  %v275_v5 = vunpack.c.3.s8 %v3433_v12 }
  0xd8   :  { %1700 = vmatmul.bf16.gmra.mxu3 %v724_v1  ;;  %v525_v8 = vcvt.s32.f32 %v269_v62 }
  0xd9   :  { %v2518_v14 = vadd.f32 %v2454_v6, %v2390_v11  ;;  %v272_v6 = vunpack.c.2.s8 %v3435_v13  ;;  %v527_v12 = vcvt.s32.f32 %v271_v4  ;;  %v531_v22 = vcvt.s32.f32 %v275_v5  ;;  %v2108_v13 = vpop.permute.xlu2 %2107 }
  0xda   :  { %v1492_v18 = vpop.f32.mrf.mxu2  ;;  %v1156_v27 = vpop.f32.mrf.mxu0 }
  0xdb   :  { %v1661_v19 = vpop.f32.mrf.mxu3  ;;  %v2582_v25 = vmax.f32 %v2518_v14, 0.0  ;;  %v1493_v26 = vadd.f32 %v1492_v18, %v1324_v10  ;;  %v1325_v28 = vpop.f32.mrf.mxu1  ;;  %v529_v18 = vcvt.s32.f32 %v273_v63  ;;  %v528_v23 = vcvt.s32.f32 %v272_v6 }
  0xdc   :  { %v1326_v46 = vadd.f32 %v1325_v28, %v1156_v27  ;;  %v731_v34 = vpack.c.bf16 %v531_v22, %v527_v12 }
  0xdd   :  { %v2949_v31 = vpack.c.bf16 %v2582_v25, %v2581_v24  ;;  %v1662_v39 = vadd.f32 %v1661_v19, %v1493_v26  ;;  %v526_v19 = vcvt.s32.f32 %v270_v0  ;;  %v532_v24 = vcvt.s32.f32 %v276_v16  ;;  %v2029_v0 = vld [vmem:[%s4058_s2 + $0xe0] sm:$0xff] }
  0xde   :  { %v729_v28 = vpack.c.bf16 %v529_v18, %v525_v8  ;;  %2207 = vperm.xlu1 %3132, %v2029_v0  }
  0xdf   :  { %3097 = vst [vmem:[%s4060_s4 + $0x10] sm:$0xff] %v2949_v31   ;;  %v2391_v49 = vmul.f32 %v2098_v45, %v1662_v39  ;;  %v730_v29 = vpack.c.bf16 %v530_v20, %v526_v19  ;;  %v732_v35 = vpack.c.bf16 %v532_v24, %v528_v23  ;;  %v2457_v39 = vld [vmem:[%s4059_s3 + $0x40] sm:$0xff]  ;;  %v2027_v24 = vld [vmem:[%s4058_s2 + $0xd0] sm:$0xff] }
  0xe0   :  { %v3483_v45 = vld [vmem:[#allocation3 + $0xe0] sm:$0xff]  ;;  %2197 = vperm.xlu2 %3133, %v2027_v24  }
  0xe1   :  { %v2519_v58 = vadd.f32 %v2455_v55, %v2391_v49  ;;  %v3489_v49 = vld [vmem:[#allocation3 + $0xf8] sm:$0xff] }
  0xe2   :  { %v1494_v47 = vpop.f32.mrf.mxu2  ;;  %v1159_v51 = vpop.f32.mrf.mxu0  ;;  %v284_v63 = vunpack.c.1.s8 %v3489_v49 }
  0xe3   :  { %v1663_v37 = vpop.f32.mrf.mxu3  ;;  %v1495_v50 = vadd.f32 %v1494_v47, %v1326_v46  ;;  %v1328_v42 = vpop.f32.mrf.mxu1  ;;  %v2583_v9 = vmax.f32 %v2519_v58, 0.0  ;;  %v3485_v46 = vld [vmem:[#allocation3 + $0xe8] sm:$0xff] }
  0xe4   :  { %v1329_v59 = vadd.f32 %v1328_v42, %v1159_v51  ;;  %v277_v51 = vunpack.c.0.s8 %v3483_v45  ;;  %v281_v42 = vunpack.c.1.s8 %v3483_v45  ;;  %v282_v55 = vunpack.c.1.s8 %v3485_v46 }
  0xe5   :  { %v1664_v56 = vadd.f32 %v1663_v37, %v1495_v50  ;;  %1198 = vmatmul.bf16.gmra.mxu0 %v725_v48 }
  0xe6   :  { %1367 = vmatmul.bf16.gmra.mxu1 %v726_v38  ;;  %v3487_v38 = vld [vmem:[#allocation3 + $0xf0] sm:$0xff]  ;;  %v537_v3 = vcvt.s32.f32 %v281_v42  ;;  %v538_v5 = vcvt.s32.f32 %v282_v55  ;;  %v292_v42 = vunpack.c.3.s8 %v3489_v49 }
  0xe7   :  { %v2392_v60 = vmul.f32 %v2103_v43, %v1664_v56  ;;  %1536 = vmatmul.bf16.gmra.mxu2 %v727_v52  ;;  %v278_v52 = vunpack.c.0.s8 %v3485_v46  ;;  %v279_v43 = vunpack.c.0.s8 %v3487_v38  ;;  %v283_v56 = vunpack.c.1.s8 %v3487_v38 }
  0xe8   :  { %1705 = vmatmul.bf16.gmra.mxu3 %v728_v53 }
  0xe9   :  { %v2520_v61 = vadd.f32 %v2456_v57, %v2392_v60  ;;  %v280_v57 = vunpack.c.0.s8 %v3489_v49  ;;  %v534_v4 = vcvt.s32.f32 %v278_v52  ;;  %v535_v6 = vcvt.s32.f32 %v279_v43 }
  0xea   :  { %v1497_v1 = vpop.f32.mrf.mxu2  ;;  %v1161_v14 = vpop.f32.mrf.mxu0 }
  0xeb   :  { %v1666_v2 = vpop.f32.mrf.mxu3  ;;  %v2584_v10 = vmax.f32 %v2520_v61, 0.0  ;;  %v1498_v11 = vadd.f32 %v1497_v1, %v1329_v59  ;;  %v1330_v15 = vpop.f32.mrf.mxu1  ;;  %v734_v18 = vpack.c.bf16 %v538_v5, %v534_v4 }
  0xec   :  { %v1331_v25 = vadd.f32 %v1330_v15, %v1161_v14  ;;  %v540_v14 = vcvt.s32.f32 %v284_v63  ;;  %v2118_v15 = vpop.permute.xlu1 %2117 }
  0xed   :  { %v2954_v17 = vpack.c.bf16 %v2584_v10, %v2583_v9  ;;  %v1667_v21 = vadd.f32 %v1666_v2, %v1498_v11  ;;  %v533_v2 = vcvt.s32.f32 %v277_v51  ;;  %v539_v10 = vcvt.s32.f32 %v283_v56 }
  0xee   :  { %v536_v11 = vcvt.s32.f32 %v280_v57 }
  0xef   :  { %3098 = vst [vmem:[%s4060_s4 + $0x18] sm:$0xff] %v2954_v17   ;;  %v2393_v30 = vmul.f32 %v2108_v13, %v1667_v21  ;;  %v733_v8 = vpack.c.bf16 %v537_v3, %v533_v2  ;;  %v735_v22 = vpack.c.bf16 %v539_v10, %v535_v6  ;;  %v2459_v13 = vld [vmem:[%s4059_s3 + $0x50] sm:$0xff]  ;;  %v2032_v6 = vld [vmem:[%s4058_s2 + $0xf8] sm:$0xff] }
  0xf0   :  { %v736_v23 = vpack.c.bf16 %v540_v14, %v536_v11  ;;  %2222 = vperm.xlu1 %3132, %v2032_v6   ;;  %v2462_v14 = vld [vmem:[%s4059_s3 + $0x68] sm:$0xff] }
  0xf1   :  { %v2521_v47 = vadd.f32 %v2457_v39, %v2393_v30  ;;  %v290_v39 = vunpack.c.3.s8 %v3485_v46 }
  0xf2   :  { %v1499_v26 = vpop.f32.mrf.mxu2  ;;  %v1164_v32 = vpop.f32.mrf.mxu0 }
  0xf3   :  { %v1668_v27 = vpop.f32.mrf.mxu3  ;;  %v1500_v31 = vadd.f32 %v1499_v26, %v1331_v25  ;;  %v1333_v33 = vpop.f32.mrf.mxu1  ;;  %v2585_v58 = vmax.f32 %v2521_v47, 0.0  ;;  %v546_v55 = vcvt.s32.f32 %v290_v39 }
  0xf4   :  { %v1334_v37 = vadd.f32 %v1333_v33, %v1164_v32  ;;  %v2123_v25 = vpop.permute.xlu2 %2122  ;;  %v285_v32 = vunpack.c.2.s8 %v3483_v45  ;;  %v289_v33 = vunpack.c.3.s8 %v3483_v45  ;;  %v2031_v45 = vld [vmem:[%s4058_s2 + $0xf0] sm:$0xff]  ;;  %v2133_v10 = vpop.permute.xlu1 %2132 }
  0xf5   :  { %v1669_v41 = vadd.f32 %v1668_v27, %v1500_v31  ;;  %1203 = vmatmul.bf16.gmra.mxu0 %v729_v28  ;;  %v2460_v27 = vld [vmem:[%s4059_s3 + $0x58] sm:$0xff]  ;;  %2217 = vperm.xlu0 %3131, %v2031_v45  }
  0xf6   :  { %1372 = vmatmul.bf16.gmra.mxu1 %v730_v29 }
  0xf7   :  { %v2394_v48 = vmul.f32 %v2113_v40, %v1669_v41  ;;  %1541 = vmatmul.bf16.gmra.mxu2 %v731_v34  ;;  %v286_v34 = vunpack.c.2.s8 %v3485_v46  ;;  %v287_v40 = vunpack.c.2.s8 %v3487_v38  ;;  %v291_v41 = vunpack.c.3.s8 %v3487_v38 }
  0xf8   :  { %1710 = vmatmul.bf16.gmra.mxu3 %v732_v35  ;;  %v541_v46 = vcvt.s32.f32 %v285_v32 }
  0xf9   :  { %v2522_v50 = vadd.f32 %v2458_v44, %v2394_v48  ;;  %v288_v44 = vunpack.c.2.s8 %v3489_v49  ;;  %v543_v38 = vcvt.s32.f32 %v287_v40  ;;  %v547_v56 = vcvt.s32.f32 %v291_v41  ;;  %v2128_v49 = vpop.permute.xlu0 %2127 }
  0xfa   :  { %v1502_v53 = vpop.f32.mrf.mxu2  ;;  %v1166_v61 = vpop.f32.mrf.mxu0 }
  0xfb   :  { %v1671_v54 = vpop.f32.mrf.mxu3  ;;  %v2586_v59 = vmax.f32 %v2522_v50, 0.0  ;;  %v1503_v60 = vadd.f32 %v1502_v53, %v1334_v37  ;;  %v1335_v62 = vpop.f32.mrf.mxu1  ;;  %v545_v53 = vcvt.s32.f32 %v289_v33  ;;  %v544_v57 = vcvt.s32.f32 %v288_v44 }
  0xfc   :  { %v1336_v16 = vadd.f32 %v1335_v62, %v1166_v61  ;;  %v739_v4 = vpack.c.bf16 %v547_v56, %v543_v38 }
  0xfd   :  { %v2959_v1 = vpack.c.bf16 %v2586_v59, %v2585_v58  ;;  %v1672_v9 = vadd.f32 %v1671_v54, %v1503_v60  ;;  %v542_v54 = vcvt.s32.f32 %v286_v34  ;;  %v548_v58 = vcvt.s32.f32 %v292_v42  ;;  %v2030_v34 = vld [vmem:[%s4058_s2 + $0xe8] sm:$0xff]  ;;  %v2138_v42 = vpop.permute.xlu2 %2137 }
  0xfe   :  { %v737_v62 = vpack.c.bf16 %v545_v53, %v541_v46  ;;  %2212 = vperm.xlu2 %3133, %v2030_v34  }
  0xff   :  { %3099 = vst [vmem:[%s4060_s4 + $0x20] sm:$0xff] %v2959_v1   ;;  %v2395_v19 = vmul.f32 %v2118_v15, %v1672_v9  ;;  %v738_v63 = vpack.c.bf16 %v546_v55, %v542_v54  ;;  %v740_v5 = vpack.c.bf16 %v548_v58, %v544_v57  ;;  %v2461_v9 = vld [vmem:[%s4059_s3 + $0x60] sm:$0xff] }
 0x100   :  { %v3537_v15 = vld [vmem:[#allocation3 + $0x100] sm:$0xff] }
 0x101   :  { %v2523_v28 = vadd.f32 %v2459_v13, %v2395_v19  ;;  %v3543_v19 = vld [vmem:[#allocation3 + $0x118] sm:$0xff] }
 0x102   :  { %v1504_v7 = vpop.f32.mrf.mxu2  ;;  %v1169_v12 = vpop.f32.mrf.mxu0  ;;  %v300_v33 = vunpack.c.1.s8 %v3543_v19 }
 0x103   :  { %v1673_v17 = vpop.f32.mrf.mxu3  ;;  %v1505_v20 = vadd.f32 %v1504_v7, %v1336_v16  ;;  %v1338_v21 = vpop.f32.mrf.mxu1  ;;  %v2587_v47 = vmax.f32 %v2523_v28, 0.0  ;;  %v3539_v16 = vld [vmem:[#allocation3 + $0x108] sm:$0xff] }
 0x104   :  { %v1339_v29 = vadd.f32 %v1338_v21, %v1169_v12  ;;  %v293_v12 = vunpack.c.0.s8 %v3537_v15  ;;  %v297_v21 = vunpack.c.1.s8 %v3537_v15  ;;  %v298_v13 = vunpack.c.1.s8 %v3539_v16 }
 0x105   :  { %v1674_v26 = vadd.f32 %v1673_v17, %v1505_v20  ;;  %1208 = vmatmul.bf16.gmra.mxu0 %v733_v8 }
 0x106   :  { %1377 = vmatmul.bf16.gmra.mxu1 %v734_v18  ;;  %v3541_v18 = vld [vmem:[#allocation3 + $0x110] sm:$0xff]  ;;  %v549_v39 = vcvt.s32.f32 %v293_v12  ;;  %v553_v40 = vcvt.s32.f32 %v297_v21  ;;  %v554_v44 = vcvt.s32.f32 %v298_v13 }
 0x107   :  { %v2396_v30 = vmul.f32 %v2123_v25, %v1674_v26  ;;  %1546 = vmatmul.bf16.gmra.mxu2 %v735_v22  ;;  %v294_v22 = vunpack.c.0.s8 %v3539_v16  ;;  %v295_v25 = vunpack.c.0.s8 %v3541_v18  ;;  %v299_v26 = vunpack.c.1.s8 %v3541_v18 }
 0x108   :  { %1715 = vmatmul.bf16.gmra.mxu3 %v736_v23  ;;  %v741_v53 = vpack.c.bf16 %v553_v40, %v549_v39 }
 0x109   :  { %v2524_v31 = vadd.f32 %v2460_v27, %v2396_v30  ;;  %v296_v27 = vunpack.c.0.s8 %v3543_v19  ;;  %v550_v41 = vcvt.s32.f32 %v294_v22  ;;  %v308_v22 = vunpack.c.3.s8 %v3543_v19 }
 0x10a   :  { %v1507_v35 = vpop.f32.mrf.mxu2  ;;  %v1171_v50 = vpop.f32.mrf.mxu0 }
 0x10b   :  { %v1676_v36 = vpop.f32.mrf.mxu3  ;;  %v2588_v37 = vmax.f32 %v2524_v31, 0.0  ;;  %v1508_v48 = vadd.f32 %v1507_v35, %v1339_v29  ;;  %v1340_v51 = vpop.f32.mrf.mxu1  ;;  %v2034_v35 = vld [vmem:[%s4058_s2 + $0x108] sm:$0xff]  ;;  %v742_v54 = vpack.c.bf16 %v554_v44, %v550_v41 }
 0x10c   :  { %v1341_v59 = vadd.f32 %v1340_v51, %v1171_v50  ;;  %2232 = vperm.xlu0 %3131, %v2034_v35   ;;  %v552_v50 = vcvt.s32.f32 %v296_v27  ;;  %v556_v51 = vcvt.s32.f32 %v300_v33 }
 0x10d   :  { %v2964_v52 = vpack.c.bf16 %v2588_v37, %v2587_v47  ;;  %v1677_v43 = vadd.f32 %v1676_v36, %v1508_v48  ;;  %v551_v47 = vcvt.s32.f32 %v295_v25  ;;  %v555_v48 = vcvt.s32.f32 %v299_v26 }
 0x10e   :  { %v744_v58 = vpack.c.bf16 %v556_v51, %v552_v50  ;;  %v2043_v50 = vld [vmem:[%s4058_s2 + $0x150] sm:$0xff]  ;;  %v2465_v51 = vld [vmem:[%s4059_s3 + $0x80] sm:$0xff] }
 0x10f   :  { %3100 = vst [vmem:[%s4060_s4 + $0x28] sm:$0xff] %v2964_v52   ;;  %v2397_v0 = vmul.f32 %v2128_v49, %v1677_v43  ;;  %v743_v57 = vpack.c.bf16 %v555_v48, %v551_v47  ;;  %v2037_v49 = vld [vmem:[%s4058_s2 + $0x120] sm:$0xff]  ;;  %v2038_v48 = vld [vmem:[%s4058_s2 + $0x128] sm:$0xff] }
 0x111   :  { %v2525_v7 = vadd.f32 %v2461_v9, %v2397_v0 }
 0x112   :  { %v1509_v60 = vpop.f32.mrf.mxu2  ;;  %v1174_v2 = vpop.f32.mrf.mxu0 }
 0x113   :  { %v1678_v61 = vpop.f32.mrf.mxu3  ;;  %v1510_v1 = vadd.f32 %v1509_v60, %v1341_v59  ;;  %v1343_v3 = vpop.f32.mrf.mxu1  ;;  %v2589_v28 = vmax.f32 %v2525_v7, 0.0  ;;  %v2463_v59 = vld [vmem:[%s4059_s3 + $0x70] sm:$0xff]  ;;  %v304_v7 = vunpack.c.2.s8 %v3543_v19 }
 0x114   :  { %v1344_v17 = vadd.f32 %v1343_v3, %v1174_v2  ;;  %v2143_v60 = vpop.permute.xlu0 %2142  ;;  %2247 = vperm.xlu0 %3131, %v2037_v49   ;;  %v301_v3 = vunpack.c.2.s8 %v3537_v15 }
 0x115   :  { %v1679_v11 = vadd.f32 %v1678_v61, %v1510_v1  ;;  %1213 = vmatmul.bf16.gmra.mxu0 %v737_v62  ;;  %v2464_v62 = vld [vmem:[%s4059_s3 + $0x78] sm:$0xff] }
 0x116   :  { %1382 = vmatmul.bf16.gmra.mxu1 %v738_v63 }
 0x117   :  { %v2398_v8 = vmul.f32 %v2133_v10, %v1679_v11  ;;  %1551 = vmatmul.bf16.gmra.mxu2 %v739_v4  ;;  %v305_v4 = vunpack.c.3.s8 %v3537_v15  ;;  %v306_v10 = vunpack.c.3.s8 %v3539_v16  ;;  %v303_v11 = vunpack.c.2.s8 %v3541_v18  ;;  %v2035_v15 = vld [vmem:[%s4058_s2 + $0x110] sm:$0xff] }
 0x118   :  { %1720 = vmatmul.bf16.gmra.mxu3 %v740_v5  ;;  %v302_v5 = vunpack.c.2.s8 %v3539_v16  ;;  %v2040_v16 = vld [vmem:[%s4058_s2 + $0x138] sm:$0xff]  ;;  %2237 = vperm.xlu1 %3132, %v2035_v15  }
 0x119   :  { %v2526_v20 = vadd.f32 %v2462_v14, %v2398_v8  ;;  %v307_v14 = vunpack.c.3.s8 %v3541_v18  ;;  %v562_v25 = vcvt.s32.f32 %v306_v10  ;;  %v559_v26 = vcvt.s32.f32 %v303_v11  ;;  %v2041_v10 = vld [vmem:[%s4058_s2 + $0x140] sm:$0xff]  ;;  %v2046_v11 = vld [vmem:[%s4058_s2 + $0x168] sm:$0xff] }
 0x11a   :  { %v1512_v23 = vpop.f32.mrf.mxu2  ;;  %v1176_v31 = vpop.f32.mrf.mxu0  ;;  %v558_v13 = vcvt.s32.f32 %v302_v5 }
 0x11b   :  { %v1681_v24 = vpop.f32.mrf.mxu3  ;;  %v2590_v29 = vmax.f32 %v2526_v20, 0.0  ;;  %v1513_v30 = vadd.f32 %v1512_v23, %v1344_v17  ;;  %v1345_v32 = vpop.f32.mrf.mxu1  ;;  %v557_v23 = vcvt.s32.f32 %v301_v3  ;;  %v563_v27 = vcvt.s32.f32 %v307_v14 }
 0x11c   :  { %v1346_v45 = vadd.f32 %v1345_v32, %v1176_v31  ;;  %2262 = vperm.xlu0 %3131, %v2040_v16   ;;  %v746_v35 = vpack.c.bf16 %v562_v25, %v558_v13 }
 0x11d   :  { %v2969_v36 = vpack.c.bf16 %v2590_v29, %v2589_v28  ;;  %v1682_v37 = vadd.f32 %v1681_v24, %v1513_v30  ;;  %v561_v24 = vcvt.s32.f32 %v305_v4  ;;  %v560_v28 = vcvt.s32.f32 %v304_v7  ;;  %v2148_v30 = vpop.permute.xlu1 %2147 }
 0x11e   :  { %v564_v29 = vcvt.s32.f32 %v308_v22  ;;  %v747_v44 = vpack.c.bf16 %v563_v27, %v559_v26 }
 0x11f   :  { %3101 = vst [vmem:[%s4060_s4 + $0x30] sm:$0xff] %v2969_v36   ;;  %v2399_v55 = vmul.f32 %v2138_v42, %v1682_v37  ;;  %v745_v34 = vpack.c.bf16 %v561_v24, %v557_v23  ;;  %v2033_v37 = vld [vmem:[%s4058_s2 + $0x100] sm:$0xff]  ;;  %v2153_v42 = vpop.permute.xlu2 %2152 }
 0x120   :  { %v748_v47 = vpack.c.bf16 %v564_v29, %v560_v28  ;;  %2227 = vperm.xlu2 %3133, %v2033_v37   ;;  %2252 = vperm.xlu1 %3132, %v2038_v48  }
 0x121   :  { %v2527_v63 = vadd.f32 %v2463_v59, %v2399_v55 }
 0x122   :  { %v1514_v52 = vpop.f32.mrf.mxu2  ;;  %v1179_v43 = vpop.f32.mrf.mxu0 }
 0x123   :  { %v1683_v46 = vpop.f32.mrf.mxu3  ;;  %v1515_v38 = vadd.f32 %v1514_v52, %v1346_v45  ;;  %v1348_v56 = vpop.f32.mrf.mxu1  ;;  %v2591_v17 = vmax.f32 %v2527_v63, 0.0  ;;  %v2466_v52 = vld [vmem:[%s4059_s3 + $0x88] sm:$0xff] }
 0x124   :  { %v1349_v0 = vadd.f32 %v1348_v56, %v1179_v43  ;;  %2277 = vperm.xlu0 %3131, %v2043_v50   ;;  %v3607_v43 = vld [vmem:[#allocation3 + $0x130] sm:$0xff]  ;;  %v3609_v56 = vld [vmem:[#allocation3 + $0x138] sm:$0xff] }
 0x125   :  { %v1684_v61 = vadd.f32 %v1683_v46, %v1515_v38  ;;  %1218 = vmatmul.bf16.gmra.mxu0 %v741_v53  ;;  %v3603_v46 = vld [vmem:[#allocation3 + $0x120] sm:$0xff]  ;;  %v3605_v53 = vld [vmem:[#allocation3 + $0x128] sm:$0xff]  ;;  %v311_v63 = vunpack.c.0.s8 %v3607_v43 }
 0x126   :  { %1387 = vmatmul.bf16.gmra.mxu1 %v742_v54  ;;  %v313_v49 = vunpack.c.1.s8 %v3603_v46  ;;  %v310_v59 = vunpack.c.0.s8 %v3605_v53  ;;  %v317_v48 = vunpack.c.2.s8 %v3603_v46  ;;  %v321_v50 = vunpack.c.3.s8 %v3603_v46 }
 0x127   :  { %v2400_v1 = vmul.f32 %v2143_v60, %v1684_v61  ;;  %1556 = vmatmul.bf16.gmra.mxu2 %v743_v57 }
 0x128   :  { %1725 = vmatmul.bf16.gmra.mxu3 %v744_v58  ;;  %v309_v58 = vunpack.c.0.s8 %v3603_v46  ;;  %2267 = vperm.xlu1 %3132, %v2041_v10   ;;  %v2039_v46 = vld [vmem:[%s4058_s2 + $0x130] sm:$0xff] }
 0x129   :  { %v2528_v2 = vadd.f32 %v2464_v62, %v2400_v1  ;;  %v314_v62 = vunpack.c.1.s8 %v3605_v53  ;;  %v312_v1 = vunpack.c.0.s8 %v3609_v56 }
 0x12a   :  { %v1517_v6 = vpop.f32.mrf.mxu2  ;;  %v1181_v12 = vpop.f32.mrf.mxu0  ;;  %v565_v7 = vcvt.s32.f32 %v309_v58 }
 0x12b   :  { %v1686_v9 = vpop.f32.mrf.mxu3  ;;  %v2592_v8 = vmax.f32 %v2528_v2, 0.0  ;;  %v1518_v20 = vadd.f32 %v1517_v6, %v1349_v0  ;;  %v1350_v21 = vpop.f32.mrf.mxu1  ;;  %v315_v0 = vunpack.c.1.s8 %v3607_v43  ;;  %v568_v15 = vcvt.s32.f32 %v312_v1 }
 0x12c   :  { %v1351_v31 = vadd.f32 %v1350_v21, %v1181_v12  ;;  %2292 = vperm.xlu0 %3131, %v2046_v11   ;;  %v567_v12 = vcvt.s32.f32 %v311_v63  ;;  %v573_v63 = vcvt.s32.f32 %v317_v48 }
 0x12d   :  { %v2974_v18 = vpack.c.bf16 %v2592_v8, %v2591_v17  ;;  %v1687_v19 = vadd.f32 %v1686_v9, %v1518_v20  ;;  %v316_v9 = vunpack.c.1.s8 %v3609_v56  ;;  %v569_v17 = vcvt.s32.f32 %v313_v49 }
 0x12e   :  { %v566_v8 = vcvt.s32.f32 %v310_v59  ;;  %v570_v20 = vcvt.s32.f32 %v314_v62  ;;  %v571_v22 = vcvt.s32.f32 %v315_v0  ;;  %v577_v0 = vcvt.s32.f32 %v321_v50 }
 0x12f   :  { %3102 = vst [vmem:[%s4060_s4 + $0x38] sm:$0xff] %v2974_v18   ;;  %v2401_v36 = vmul.f32 %v2148_v30, %v1687_v19  ;;  %v572_v16 = vcvt.s32.f32 %v316_v9  ;;  %v2158_v18 = vpop.permute.xlu0 %2157  ;;  %v749_v25 = vpack.c.bf16 %v569_v17, %v565_v7  ;;  %v2168_v9 = vpop.permute.xlu2 %2167 }
 0x130   :  { %v750_v26 = vpack.c.bf16 %v570_v20, %v566_v8  ;;  %v751_v30 = vpack.c.bf16 %v571_v22, %v567_v12  ;;  %v753_v7 = vpack.c.bf16 %v577_v0, %v573_v63 }
 0x131   :  { %v2529_v54 = vadd.f32 %v2465_v51, %v2401_v36  ;;  %v2163_v36 = vpop.permute.xlu1 %2162  ;;  %v318_v51 = vunpack.c.2.s8 %v3605_v53 }
 0x132   :  { %v1519_v32 = vpop.f32.mrf.mxu2  ;;  %v1184_v40 = vpop.f32.mrf.mxu0 }
 0x133   :  { %v1688_v33 = vpop.f32.mrf.mxu3  ;;  %v1520_v39 = vadd.f32 %v1519_v32, %v1351_v31  ;;  %v1353_v41 = vpop.f32.mrf.mxu1  ;;  %v2593_v2 = vmax.f32 %v2529_v54, 0.0  ;;  %v752_v31 = vpack.c.bf16 %v572_v16, %v568_v15  ;;  %v2036_v32 = vld [vmem:[%s4058_s2 + $0x118] sm:$0xff]  ;;  %v319_v54 = vunpack.c.2.s8 %v3607_v43  ;;  %v2042_v16 = vld [vmem:[%s4058_s2 + $0x148] sm:$0xff] }
 0x134   :  { %v1354_v55 = vadd.f32 %v1353_v41, %v1184_v40  ;;  %2242 = vperm.xlu2 %3133, %v2036_v32   ;;  %v2468_v40 = vld [vmem:[%s4059_s3 + $0x98] sm:$0xff]  ;;  %v574_v1 = vcvt.s32.f32 %v318_v51 }
 0x135   :  { %v1689_v45 = vadd.f32 %v1688_v33, %v1520_v39  ;;  %1223 = vmatmul.bf16.gmra.mxu0 %v745_v34  ;;  %v2044_v33 = vld [vmem:[%s4058_s2 + $0x158] sm:$0xff]  ;;  %v2049_v34 = vld [vmem:[%s4058_s2 + $0x180] sm:$0xff] }
 0x136   :  { %1392 = vmatmul.bf16.gmra.mxu1 %v746_v35  ;;  %v2467_v35 = vld [vmem:[%s4059_s3 + $0x90] sm:$0xff]  ;;  %2282 = vperm.xlu1 %3132, %v2044_v33   ;;  %v3684_v32 = vld [vmem:[#allocation3 + $0x158] sm:$0xff] }
 0x137   :  { %v2402_v38 = vmul.f32 %v2153_v42, %v1689_v45  ;;  %1561 = vmatmul.bf16.gmra.mxu2 %v747_v44  ;;  %2307 = vperm.xlu0 %3131, %v2049_v34  }
 0x138   :  { %1730 = vmatmul.bf16.gmra.mxu3 %v748_v47 }
 0x139   :  { %v2530_v57 = vadd.f32 %v2466_v52, %v2402_v38  ;;  %v322_v52 = vunpack.c.3.s8 %v3605_v53  ;;  %v320_v38 = vunpack.c.2.s8 %v3609_v56  ;;  %v2047_v53 = vld [vmem:[%s4058_s2 + $0x170] sm:$0xff]  ;;  %v2178_v63 = vpop.permute.xlu1 %2177 }
 0x13a   :  { %v1522_v60 = vpop.f32.mrf.mxu2  ;;  %v1186_v5 = vpop.f32.mrf.mxu0 }
 0x13b   :  { %v1691_v61 = vpop.f32.mrf.mxu3  ;;  %v2594_v3 = vmax.f32 %v2530_v57, 0.0  ;;  %v1523_v4 = vadd.f32 %v1522_v60, %v1354_v55  ;;  %v1355_v6 = vpop.f32.mrf.mxu1  ;;  %v323_v55 = vunpack.c.3.s8 %v3607_v43  ;;  %v2052_v43 = vld [vmem:[%s4058_s2 + $0x198] sm:$0xff] }
 0x13c   :  { %v1356_v23 = vadd.f32 %v1355_v6, %v1186_v5  ;;  %2257 = vperm.xlu2 %3133, %v2039_v46   ;;  %v576_v5 = vcvt.s32.f32 %v320_v38  ;;  %v2058_v38 = vld [vmem:[%s4058_s2 + $0x1c8] sm:$0xff] }
 0x13d   :  { %v2979_v14 = vpack.c.bf16 %v2594_v3, %v2593_v2  ;;  %v1692_v21 = vadd.f32 %v1691_v61, %v1523_v4  ;;  %v324_v61 = vunpack.c.3.s8 %v3609_v56  ;;  %v578_v56 = vcvt.s32.f32 %v322_v52 }
 0x13e   :  { %2297 = vperm.xlu1 %3132, %v2047_v53   ;;  %v575_v2 = vcvt.s32.f32 %v319_v54  ;;  %v579_v4 = vcvt.s32.f32 %v323_v55  ;;  %v332_v52 = vunpack.c.1.s8 %v3684_v32  ;;  %v2045_v54 = vld [vmem:[%s4058_s2 + $0x160] sm:$0xff] }
 0x13f   :  { %3103 = vst [vmem:[%s4060_s4 + $0x40] sm:$0xff] %v2979_v14   ;;  %v2403_v19 = vmul.f32 %v2158_v18, %v1692_v21  ;;  %2322 = vperm.xlu0 %3131, %v2052_v43   ;;  %v580_v6 = vcvt.s32.f32 %v324_v61  ;;  %v754_v17 = vpack.c.bf16 %v578_v56, %v574_v1  ;;  %v2050_v18 = vld [vmem:[%s4058_s2 + $0x188] sm:$0xff]  ;;  %v2053_v55 = vld [vmem:[%s4058_s2 + $0x1a0] sm:$0xff] }
 0x140   :  { %v755_v22 = vpack.c.bf16 %v579_v4, %v575_v2 }
 0x141   :  { %v2531_v41 = vadd.f32 %v2467_v35, %v2403_v19  ;;  %v756_v15 = vpack.c.bf16 %v580_v6, %v576_v5  ;;  %v3678_v19 = vld [vmem:[#allocation3 + $0x140] sm:$0xff] }
 0x142   :  { %v1524_v24 = vpop.f32.mrf.mxu2  ;;  %v1189_v28 = vpop.f32.mrf.mxu0  ;;  %v325_v34 = vunpack.c.0.s8 %v3678_v19  ;;  %v329_v35 = vunpack.c.1.s8 %v3678_v19 }
 0x143   :  { %v1693_v13 = vpop.f32.mrf.mxu3  ;;  %v1525_v27 = vadd.f32 %v1524_v24, %v1356_v23  ;;  %v1358_v29 = vpop.f32.mrf.mxu1  ;;  %v2595_v57 = vmax.f32 %v2531_v41, 0.0  ;;  %v2055_v23 = vld [vmem:[%s4058_s2 + $0x1b0] sm:$0xff]  ;;  %v2469_v24 = vld [vmem:[%s4059_s3 + $0xa0] sm:$0xff] }
 0x144   :  { %v1359_v44 = vadd.f32 %v1358_v29, %v1189_v28  ;;  %2272 = vperm.xlu2 %3133, %v2042_v16  }
 0x145   :  { %v1694_v39 = vadd.f32 %v1693_v13, %v1525_v27  ;;  %1228 = vmatmul.bf16.gmra.mxu0 %v749_v25  ;;  %v2173_v13 = vpop.permute.xlu0 %2172  ;;  %v3680_v27 = vld [vmem:[#allocation3 + $0x148] sm:$0xff] }
 0x146   :  { %1397 = vmatmul.bf16.gmra.mxu1 %v750_v26  ;;  %2312 = vperm.xlu1 %3132, %v2050_v18   ;;  %v2470_v26 = vld [vmem:[%s4059_s3 + $0xa8] sm:$0xff]  ;;  %v330_v41 = vunpack.c.1.s8 %v3680_v27 }
 0x147   :  { %v2404_v47 = vmul.f32 %v2163_v36, %v1694_v39  ;;  %1566 = vmatmul.bf16.gmra.mxu2 %v751_v30  ;;  %2337 = vperm.xlu0 %3131, %v2055_v23   ;;  %v326_v36 = vunpack.c.0.s8 %v3680_v27  ;;  %v333_v23 = vunpack.c.2.s8 %v3678_v19 }
 0x148   :  { %1735 = vmatmul.bf16.gmra.mxu3 %v752_v31  ;;  %v3682_v31 = vld [vmem:[#allocation3 + $0x150] sm:$0xff] }
 0x149   :  { %v2532_v37 = vadd.f32 %v2468_v40, %v2404_v47  ;;  %v331_v47 = vunpack.c.1.s8 %v3682_v31 }
 0x14a   :  { %v1527_v42 = vpop.f32.mrf.mxu2  ;;  %v1191_v59 = vpop.f32.mrf.mxu0 }
 0x14b   :  { %v1696_v45 = vpop.f32.mrf.mxu3  ;;  %v2596_v58 = vmax.f32 %v2532_v37, 0.0  ;;  %v1528_v49 = vadd.f32 %v1527_v42, %v1359_v44  ;;  %v1360_v60 = vpop.f32.mrf.mxu1  ;;  %v327_v44 = vunpack.c.0.s8 %v3682_v31  ;;  %v328_v37 = vunpack.c.0.s8 %v3684_v32 }
 0x14c   :  { %v1361_v10 = vadd.f32 %v1360_v60, %v1191_v59  ;;  %2287 = vperm.xlu2 %3133, %v2045_v54   ;;  %v582_v59 = vcvt.s32.f32 %v326_v36  ;;  %v586_v60 = vcvt.s32.f32 %v330_v41  ;;  %v587_v53 = vcvt.s32.f32 %v331_v47 }
 0x14d   :  { %v2984_v62 = vpack.c.bf16 %v2596_v58, %v2595_v57  ;;  %v1697_v3 = vadd.f32 %v1696_v45, %v1528_v49  ;;  %v581_v58 = vcvt.s32.f32 %v325_v34  ;;  %v585_v49 = vcvt.s32.f32 %v329_v35  ;;  %v2188_v54 = vpop.permute.xlu0 %2187 }
 0x14e   :  { %2327 = vperm.xlu1 %3132, %v2053_v55   ;;  %v583_v61 = vcvt.s32.f32 %v327_v44  ;;  %v584_v43 = vcvt.s32.f32 %v328_v37  ;;  %v340_v41 = vunpack.c.3.s8 %v3684_v32  ;;  %v589_v47 = vcvt.s32.f32 %v333_v23 }
 0x14f   :  { %3104 = vst [vmem:[%s4060_s4 + $0x48] sm:$0xff] %v2984_v62   ;;  %v2405_v8 = vmul.f32 %v2168_v9, %v1697_v3  ;;  %2352 = vperm.xlu0 %3131, %v2058_v38   ;;  %v588_v62 = vcvt.s32.f32 %v332_v52  ;;  %v757_v2 = vpack.c.bf16 %v585_v49, %v581_v58  ;;  %v758_v3 = vpack.c.bf16 %v586_v60, %v582_v59 }
 0x150   :  { %v596_v52 = vcvt.s32.f32 %v340_v41 }
 0x151   :  { %v2533_v28 = vadd.f32 %v2469_v24, %v2405_v8  ;;  %v2471_v8 = vld [vmem:[%s4059_s3 + $0xb0] sm:$0xff]  ;;  %v337_v24 = vunpack.c.3.s8 %v3678_v19 }
 0x152   :  { %v1529_v11 = vpop.f32.mrf.mxu2  ;;  %v1194_v12 = vpop.f32.mrf.mxu0  ;;  %v2051_v19 = vld [vmem:[%s4058_s2 + $0x190] sm:$0xff] }
 0x153   :  { %v1698_v14 = vpop.f32.mrf.mxu3  ;;  %v1530_v20 = vadd.f32 %v1529_v11, %v1361_v10  ;;  %v1363_v21 = vpop.f32.mrf.mxu1  ;;  %v2597_v48 = vmax.f32 %v2533_v28, 0.0  ;;  %v759_v10 = vpack.c.bf16 %v587_v53, %v583_v61  ;;  %v760_v11 = vpack.c.bf16 %v588_v62, %v584_v43  ;;  %v2054_v62 = vld [vmem:[%s4058_s2 + $0x1a8] sm:$0xff] }
 0x154   :  { %v1364_v29 = vadd.f32 %v1363_v21, %v1194_v12  ;;  %v2472_v21 = vld [vmem:[%s4059_s3 + $0xb8] sm:$0xff]  ;;  %v338_v28 = vunpack.c.3.s8 %v3680_v27  ;;  %v593_v37 = vcvt.s32.f32 %v337_v24 }
 0x155   :  { %v1699_v25 = vadd.f32 %v1698_v14, %v1530_v20  ;;  %1233 = vmatmul.bf16.gmra.mxu0 %v753_v7  ;;  %v2048_v14 = vld [vmem:[%s4058_s2 + $0x178] sm:$0xff]  ;;  %v2183_v20 = vpop.permute.xlu2 %2182 }
 0x156   :  { %1402 = vmatmul.bf16.gmra.mxu1 %v754_v17  ;;  %v2056_v7 = vld [vmem:[%s4058_s2 + $0x1b8] sm:$0xff]  ;;  %v2061_v17 = vld [vmem:[%s4058_s2 + $0x1e0] sm:$0xff]  ;;  %2302 = vperm.xlu2 %3133, %v2048_v14   ;;  %v761_v58 = vpack.c.bf16 %v593_v37, %v589_v47 }
 0x157   :  { %v2406_v30 = vmul.f32 %v2173_v13, %v1699_v25  ;;  %1571 = vmatmul.bf16.gmra.mxu2 %v755_v22  ;;  %2342 = vperm.xlu1 %3132, %v2056_v7   ;;  %v334_v13 = vunpack.c.2.s8 %v3680_v27  ;;  %v2059_v27 = vld [vmem:[%s4058_s2 + $0x1d0] sm:$0xff] }
 0x158   :  { %1740 = vmatmul.bf16.gmra.mxu3 %v756_v15  ;;  %2367 = vperm.xlu0 %3131, %v2061_v17  }
 0x159   :  { %v2534_v33 = vadd.f32 %v2470_v26, %v2406_v30  ;;  %v339_v30 = vunpack.c.3.s8 %v3682_v31 }
 0x15a   :  { %v1532_v39 = vpop.f32.mrf.mxu2  ;;  %v1196_v42 = vpop.f32.mrf.mxu0 }
 0x15b   :  { %v1701_v40 = vpop.f32.mrf.mxu3  ;;  %v2598_v50 = vmax.f32 %v2534_v33, 0.0  ;;  %v1533_v51 = vadd.f32 %v1532_v39, %v1364_v29  ;;  %v1365_v45 = vpop.f32.mrf.mxu1  ;;  %v335_v29 = vunpack.c.2.s8 %v3682_v31  ;;  %v336_v33 = vunpack.c.2.s8 %v3684_v32  ;;  %v2064_v31 = vld [vmem:[%s4058_s2 + $0x1f8] sm:$0xff] }
 0x15c   :  { %v1366_v0 = vadd.f32 %v1365_v45, %v1196_v42  ;;  %v594_v32 = vcvt.s32.f32 %v338_v28  ;;  %v595_v42 = vcvt.s32.f32 %v339_v30  ;;  %v2057_v28 = vld [vmem:[%s4058_s2 + $0x1c0] sm:$0xff] }
 0x15d   :  { %v2989_v57 = vpack.c.bf16 %v2598_v50, %v2597_v48  ;;  %v1702_v46 = vadd.f32 %v1701_v40, %v1533_v51  ;;  %v590_v48 = vcvt.s32.f32 %v334_v13  ;;  %v591_v50 = vcvt.s32.f32 %v335_v29 }
 0x15e   :  { %2317 = vperm.xlu2 %3133, %v2051_v19   ;;  %v592_v45 = vcvt.s32.f32 %v336_v33 }
 0x15f   :  { %3105 = vst [vmem:[%s4060_s4 + $0x50] sm:$0xff] %v2989_v57   ;;  %v2407_v4 = vmul.f32 %v2178_v63, %v1702_v46  ;;  %2357 = vperm.xlu1 %3132, %v2059_v27   ;;  %v762_v49 = vpack.c.bf16 %v594_v32, %v590_v48  ;;  %v763_v53 = vpack.c.bf16 %v595_v42, %v591_v50  ;;  %v2062_v63 = vld [vmem:[%s4058_s2 + $0x1e8] sm:$0xff]  ;;  %v2198_v27 = vpop.permute.xlu2 %2197 }
 0x160   :  { %2382 = vperm.xlu0 %3131, %v2064_v31   ;;  %v764_v43 = vpack.c.bf16 %v596_v52, %v592_v45 }
 0x161   :  { %v2535_v22 = vadd.f32 %v2471_v8, %v2407_v4  ;;  %v3755_v4 = vld [vmem:[#allocation3 + $0x168] sm:$0xff] }
 0x162   :  { %v1534_v1 = vpop.f32.mrf.mxu2  ;;  %v1199_v6 = vpop.f32.mrf.mxu0  ;;  %v342_v8 = vunpack.c.0.s8 %v3755_v4 }
 0x163   :  { %v1703_v56 = vpop.f32.mrf.mxu3  ;;  %v1535_v5 = vadd.f32 %v1534_v1, %v1366_v0  ;;  %v1368_v9 = vpop.f32.mrf.mxu1  ;;  %v2599_v34 = vmax.f32 %v2535_v22, 0.0  ;;  %v2473_v0 = vld [vmem:[%s4059_s3 + $0xc0] sm:$0xff] }
 0x164   :  { %v1369_v15 = vadd.f32 %v1368_v9, %v1199_v6  ;;  %v2193_v1 = vpop.permute.xlu1 %2192 }
 0x165   :  { %v1704_v12 = vadd.f32 %v1703_v56, %v1535_v5  ;;  %1238 = vmatmul.bf16.gmra.mxu0 %v757_v2  ;;  %v2474_v2 = vld [vmem:[%s4059_s3 + $0xc8] sm:$0xff] }
 0x166   :  { %1407 = vmatmul.bf16.gmra.mxu1 %v758_v3  ;;  %2332 = vperm.xlu2 %3133, %v2054_v62   ;;  %v3753_v3 = vld [vmem:[#allocation3 + $0x160] sm:$0xff] }
 0x167   :  { %v2408_v16 = vmul.f32 %v2183_v20, %v1704_v12  ;;  %1576 = vmatmul.bf16.gmra.mxu2 %v759_v10  ;;  %2372 = vperm.xlu1 %3132, %v2062_v63   ;;  %v3757_v10 = vld [vmem:[#allocation3 + $0x170] sm:$0xff]  ;;  %v341_v7 = vunpack.c.0.s8 %v3753_v3  ;;  %v345_v17 = vunpack.c.1.s8 %v3753_v3 }
 0x168   :  { %1745 = vmatmul.bf16.gmra.mxu3 %v760_v11  ;;  %v3759_v11 = vld [vmem:[#allocation3 + $0x178] sm:$0xff]  ;;  %v343_v22 = vunpack.c.0.s8 %v3757_v10 }
 0x169   :  { %v2536_v18 = vadd.f32 %v2472_v21, %v2408_v16  ;;  %v346_v21 = vunpack.c.1.s8 %v3755_v4  ;;  %v344_v16 = vunpack.c.0.s8 %v3759_v11  ;;  %v597_v30 = vcvt.s32.f32 %v341_v7 }
 0x16a   :  { %v1537_v25 = vpop.f32.mrf.mxu2  ;;  %v1201_v39 = vpop.f32.mrf.mxu0  ;;  %v601_v33 = vcvt.s32.f32 %v345_v17  ;;  %v356_v17 = vunpack.c.3.s8 %v3759_v11 }
 0x16b   :  { %v1706_v26 = vpop.f32.mrf.mxu3  ;;  %v2600_v35 = vmax.f32 %v2536_v18, 0.0  ;;  %v1538_v36 = vadd.f32 %v1537_v25, %v1369_v15  ;;  %v1370_v40 = vpop.f32.mrf.mxu1  ;;  %v347_v15 = vunpack.c.1.s8 %v3757_v10  ;;  %v600_v41 = vcvt.s32.f32 %v344_v16 }
 0x16c   :  { %v1371_v55 = vadd.f32 %v1370_v40, %v1201_v39  ;;  %v765_v37 = vpack.c.bf16 %v601_v33, %v597_v30 }
 0x16d   :  { %v2994_v44 = vpack.c.bf16 %v2600_v35, %v2599_v34  ;;  %v1707_v51 = vadd.f32 %v1706_v26, %v1538_v36  ;;  %v348_v26 = vunpack.c.1.s8 %v3759_v11  ;;  %v598_v34 = vcvt.s32.f32 %v342_v8 }
 0x16e   :  { %2347 = vperm.xlu2 %3133, %v2057_v28   ;;  %v602_v35 = vcvt.s32.f32 %v346_v21  ;;  %v599_v36 = vcvt.s32.f32 %v343_v22  ;;  %v603_v40 = vcvt.s32.f32 %v347_v15 }
 0x16f   :  { %3106 = vst [vmem:[%s4060_s4 + $0x58] sm:$0xff] %v2994_v44   ;;  %v2409_v59 = vmul.f32 %v2188_v54, %v1707_v51  ;;  %v604_v19 = vcvt.s32.f32 %v348_v26  ;;  %v2060_v54 = vld [vmem:[%s4058_s2 + $0x1d8] sm:$0xff] }
 0x170   :  { %v766_v48 = vpack.c.bf16 %v602_v35, %v598_v34  ;;  %v767_v45 = vpack.c.bf16 %v603_v40, %v599_v36  ;;  %v2477_v36 = vld [vmem:[%s4059_s3 + $0xe0] sm:$0xff] }
 0x171   :  { %v2537_v5 = vadd.f32 %v2473_v0, %v2409_v59  ;;  %v768_v52 = vpack.c.bf16 %v604_v19, %v600_v41  ;;  %v354_v0 = vunpack.c.3.s8 %v3755_v4  ;;  %v2478_v41 = vld [vmem:[%s4059_s3 + $0xe8] sm:$0xff]  ;;  %v3804_v19 = vld [vmem:[#allocation3 + $0x180] sm:$0xff] }
 0x172   :  { %v1539_v38 = vpop.f32.mrf.mxu2  ;;  %v1204_v61 = vpop.f32.mrf.mxu0 }
 0x173   :  { %v1708_v57 = vpop.f32.mrf.mxu3  ;;  %v1540_v60 = vadd.f32 %v1539_v38, %v1371_v55  ;;  %v1373_v46 = vpop.f32.mrf.mxu1  ;;  %v2601_v18 = vmax.f32 %v2537_v5, 0.0  ;;  %v2475_v55 = vld [vmem:[%s4059_s3 + $0xd0] sm:$0xff]  ;;  %v610_v21 = vcvt.s32.f32 %v354_v0 }
 0x174   :  { %v1374_v6 = vadd.f32 %v1373_v46, %v1204_v61  ;;  %v2203_v38 = vpop.permute.xlu0 %2202  ;;  %v349_v46 = vunpack.c.2.s8 %v3753_v3 }
 0x175   :  { %v1709_v56 = vadd.f32 %v1708_v57, %v1540_v60  ;;  %1243 = vmatmul.bf16.gmra.mxu0 %v761_v58  ;;  %v2476_v58 = vld [vmem:[%s4059_s3 + $0xd8] sm:$0xff] }
 0x176   :  { %1412 = vmatmul.bf16.gmra.mxu1 %v762_v49  ;;  %2362 = vperm.xlu2 %3133, %v2060_v54  }
 0x177   :  { %v2410_v9 = vmul.f32 %v2193_v1, %v1709_v56  ;;  %1581 = vmatmul.bf16.gmra.mxu2 %v763_v53  ;;  %v353_v53 = vunpack.c.3.s8 %v3753_v3  ;;  %v351_v1 = vunpack.c.2.s8 %v3757_v10  ;;  %v355_v56 = vunpack.c.3.s8 %v3757_v10  ;;  %v2063_v3 = vld [vmem:[%s4058_s2 + $0x1f0] sm:$0xff] }
 0x178   :  { %1750 = vmatmul.bf16.gmra.mxu3 %v764_v43  ;;  %v350_v43 = vunpack.c.2.s8 %v3755_v4  ;;  %v605_v4 = vcvt.s32.f32 %v349_v46 }
 0x179   :  { %v2538_v14 = vadd.f32 %v2474_v2, %v2410_v9  ;;  %v352_v2 = vunpack.c.2.s8 %v3759_v11  ;;  %v607_v10 = vcvt.s32.f32 %v351_v1  ;;  %v611_v15 = vcvt.s32.f32 %v355_v56  ;;  %v2208_v11 = vpop.permute.xlu1 %2207 }
 0x17a   :  { %v1542_v20 = vpop.f32.mrf.mxu2  ;;  %v1206_v13 = vpop.f32.mrf.mxu0 }
 0x17b   :  { %v1711_v12 = vpop.f32.mrf.mxu3  ;;  %v2602_v23 = vmax.f32 %v2538_v14, 0.0  ;;  %v1543_v24 = vadd.f32 %v1542_v20, %v1374_v6  ;;  %v1375_v25 = vpop.f32.mrf.mxu1  ;;  %v609_v20 = vcvt.s32.f32 %v353_v53  ;;  %v608_v16 = vcvt.s32.f32 %v352_v2 }
 0x17c   :  { %v1376_v31 = vadd.f32 %v1375_v25, %v1206_v13  ;;  %v771_v34 = vpack.c.bf16 %v611_v15, %v607_v10  ;;  %v2479_v15 = vld [vmem:[%s4059_s3 + $0xf0] sm:$0xff] }
 0x17d   :  { %v2999_v29 = vpack.c.bf16 %v2602_v23, %v2601_v18  ;;  %v1712_v39 = vadd.f32 %v1711_v12, %v1543_v24  ;;  %v606_v12 = vcvt.s32.f32 %v350_v43  ;;  %v612_v18 = vcvt.s32.f32 %v356_v17 }
 0x17e   :  { %2377 = vperm.xlu2 %3133, %v2063_v3   ;;  %v769_v25 = vpack.c.bf16 %v609_v20, %v605_v4 }
 0x17f   :  { %3107 = vst [vmem:[%s4060_s4 + $0x60] sm:$0xff] %v2999_v29   ;;  %v2411_v32 = vmul.f32 %v2198_v27, %v1712_v39  ;;  %v770_v26 = vpack.c.bf16 %v610_v21, %v606_v12  ;;  %v772_v35 = vpack.c.bf16 %v612_v18, %v608_v16  ;;  %v2213_v39 = vpop.permute.xlu2 %2212  ;;  %v3806_v27 = vld [vmem:[#allocation3 + $0x188] sm:$0xff] }
 0x180   :  { %v362_v54 = vunpack.c.1.s8 %v3806_v27 }
 0x181   :  { %v2539_v49 = vadd.f32 %v2475_v55, %v2411_v32  ;;  %v2223_v16 = vpop.permute.xlu1 %2222 }
 0x182   :  { %v1544_v44 = vpop.f32.mrf.mxu2  ;;  %v1209_v51 = vpop.f32.mrf.mxu0  ;;  %v618_v0 = vcvt.s32.f32 %v362_v54 }
 0x183   :  { %v1713_v47 = vpop.f32.mrf.mxu3  ;;  %v1545_v50 = vadd.f32 %v1544_v44, %v1376_v31  ;;  %v1378_v42 = vpop.f32.mrf.mxu1  ;;  %v2603_v5 = vmax.f32 %v2539_v49, 0.0 }
 0x184   :  { %v1379_v59 = vadd.f32 %v1378_v42, %v1209_v51  ;;  %v361_v51 = vunpack.c.1.s8 %v3804_v19  ;;  %v358_v42 = vunpack.c.0.s8 %v3806_v27 }
 0x185   :  { %v1714_v57 = vadd.f32 %v1713_v47, %v1545_v50  ;;  %1248 = vmatmul.bf16.gmra.mxu0 %v765_v37  ;;  %v3808_v37 = vld [vmem:[#allocation3 + $0x190] sm:$0xff]  ;;  %v357_v50 = vunpack.c.0.s8 %v3804_v19 }
 0x186   :  { %1417 = vmatmul.bf16.gmra.mxu1 %v766_v48  ;;  %v3810_v48 = vld [vmem:[#allocation3 + $0x198] sm:$0xff]  ;;  %v359_v55 = vunpack.c.0.s8 %v3808_v37 }
 0x187   :  { %v2412_v60 = vmul.f32 %v2203_v38, %v1714_v57  ;;  %1586 = vmatmul.bf16.gmra.mxu2 %v767_v45  ;;  %v363_v38 = vunpack.c.1.s8 %v3808_v37  ;;  %v360_v57 = vunpack.c.0.s8 %v3810_v48  ;;  %v364_v46 = vunpack.c.1.s8 %v3810_v48 }
 0x188   :  { %1755 = vmatmul.bf16.gmra.mxu3 %v768_v52  ;;  %v613_v43 = vcvt.s32.f32 %v357_v50  ;;  %v615_v1 = vcvt.s32.f32 %v359_v55 }
 0x189   :  { %v2540_v61 = vadd.f32 %v2476_v58, %v2412_v60  ;;  %v619_v2 = vcvt.s32.f32 %v363_v38  ;;  %v2228_v38 = vpop.permute.xlu2 %2227 }
 0x18a   :  { %v1547_v62 = vpop.f32.mrf.mxu2  ;;  %v1211_v14 = vpop.f32.mrf.mxu0 }
 0x18b   :  { %v1716_v63 = vpop.f32.mrf.mxu3  ;;  %v2604_v6 = vmax.f32 %v2540_v61, 0.0  ;;  %v1548_v9 = vadd.f32 %v1547_v62, %v1379_v59  ;;  %v1380_v7 = vpop.f32.mrf.mxu1  ;;  %v617_v62 = vcvt.s32.f32 %v361_v51  ;;  %v775_v10 = vpack.c.bf16 %v619_v2, %v615_v1  ;;  %v3846_v2 = vld [vmem:[#allocation3 + $0x1a0] sm:$0xff] }
 0x18c   :  { %v1381_v23 = vadd.f32 %v1380_v7, %v1211_v14 }
 0x18d   :  { %v3004_v8 = vpack.c.bf16 %v2604_v6, %v2603_v5  ;;  %v1717_v22 = vadd.f32 %v1716_v63, %v1548_v9  ;;  %v614_v63 = vcvt.s32.f32 %v358_v42  ;;  %v616_v5 = vcvt.s32.f32 %v360_v57  ;;  %v2218_v9 = vpop.permute.xlu0 %2217 }
 0x18e   :  { %v620_v6 = vcvt.s32.f32 %v364_v46  ;;  %v773_v3 = vpack.c.bf16 %v617_v62, %v613_v43 }
 0x18f   :  { %3108 = vst [vmem:[%s4060_s4 + $0x68] sm:$0xff] %v3004_v8   ;;  %v2413_v28 = vmul.f32 %v2208_v11, %v1717_v22  ;;  %v774_v8 = vpack.c.bf16 %v618_v0, %v614_v63  ;;  %v2480_v11 = vld [vmem:[%s4059_s3 + $0xf8] sm:$0xff]  ;;  %v2481_v63 = vld [vmem:[%s4059_s3 + $0x100] sm:$0xff] }
 0x190   :  { %v776_v22 = vpack.c.bf16 %v620_v6, %v616_v5  ;;  %v3848_v5 = vld [vmem:[#allocation3 + $0x1a8] sm:$0xff] }
 0x191   :  { %v2541_v31 = vadd.f32 %v2477_v36, %v2413_v28  ;;  %v369_v28 = vunpack.c.3.s8 %v3804_v19  ;;  %v371_v36 = vunpack.c.3.s8 %v3808_v37 }
 0x192   :  { %v1549_v24 = vpop.f32.mrf.mxu2  ;;  %v1214_v30 = vpop.f32.mrf.mxu0 }
 0x193   :  { %v1718_v13 = vpop.f32.mrf.mxu3  ;;  %v1550_v29 = vadd.f32 %v1549_v24, %v1381_v23  ;;  %v1383_v33 = vpop.f32.mrf.mxu1  ;;  %v2605_v58 = vmax.f32 %v2541_v31, 0.0  ;;  %v625_v51 = vcvt.s32.f32 %v369_v28 }
 0x194   :  { %v1384_v44 = vadd.f32 %v1383_v33, %v1214_v30 }
 0x195   :  { %v1719_v40 = vadd.f32 %v1718_v13, %v1550_v29  ;;  %1253 = vmatmul.bf16.gmra.mxu0 %v769_v25  ;;  %v366_v29 = vunpack.c.2.s8 %v3806_v27  ;;  %v2233_v1 = vpop.permute.xlu0 %2232 }
 0x196   :  { %1422 = vmatmul.bf16.gmra.mxu1 %v770_v26  ;;  %v365_v26 = vunpack.c.2.s8 %v3804_v19 }
 0x197   :  { %v2414_v47 = vmul.f32 %v2213_v39, %v1719_v40  ;;  %1591 = vmatmul.bf16.gmra.mxu2 %v771_v34  ;;  %v370_v34 = vunpack.c.3.s8 %v3806_v27  ;;  %v368_v39 = vunpack.c.2.s8 %v3810_v48  ;;  %v622_v42 = vcvt.s32.f32 %v366_v29 }
 0x198   :  { %1760 = vmatmul.bf16.gmra.mxu3 %v772_v35  ;;  %v367_v35 = vunpack.c.2.s8 %v3808_v37  ;;  %v621_v50 = vcvt.s32.f32 %v365_v26  ;;  %v627_v37 = vcvt.s32.f32 %v371_v36 }
 0x199   :  { %v2542_v32 = vadd.f32 %v2478_v41, %v2414_v47  ;;  %v624_v54 = vcvt.s32.f32 %v368_v39 }
 0x19a   :  { %v1552_v45 = vpop.f32.mrf.mxu2  ;;  %v1216_v60 = vpop.f32.mrf.mxu0 }
 0x19b   :  { %v1721_v52 = vpop.f32.mrf.mxu3  ;;  %v2606_v49 = vmax.f32 %v2542_v32, 0.0  ;;  %v1553_v59 = vadd.f32 %v1552_v45, %v1384_v44  ;;  %v1385_v61 = vpop.f32.mrf.mxu1  ;;  %v372_v32 = vunpack.c.3.s8 %v3810_v48  ;;  %v626_v45 = vcvt.s32.f32 %v370_v34 }
 0x19c   :  { %v1386_v14 = vadd.f32 %v1385_v61, %v1216_v60 }
 0x19d   :  { %v3009_v53 = vpack.c.bf16 %v2606_v49, %v2605_v58  ;;  %v1722_v56 = vadd.f32 %v1721_v52, %v1553_v59  ;;  %v623_v52 = vcvt.s32.f32 %v367_v35  ;;  %v628_v55 = vcvt.s32.f32 %v372_v32 }
 0x19e   :  { %v777_v59 = vpack.c.bf16 %v625_v51, %v621_v50  ;;  %v778_v48 = vpack.c.bf16 %v626_v45, %v622_v42 }
 0x19f   :  { %3109 = vst [vmem:[%s4060_s4 + $0x70] sm:$0xff] %v3009_v53   ;;  %v2415_v4 = vmul.f32 %v2218_v9, %v1722_v56  ;;  %v779_v43 = vpack.c.bf16 %v627_v37, %v623_v52  ;;  %v780_v62 = vpack.c.bf16 %v628_v55, %v624_v54  ;;  %v2482_v56 = vld [vmem:[%s4059_s3 + $0x108] sm:$0xff]  ;;  %v2483_v37 = vld [vmem:[%s4059_s3 + $0x110] sm:$0xff]  ;;  %v2243_v55 = vpop.permute.xlu2 %2242 }
 0x1a1   :  { %v2543_v23 = vadd.f32 %v2479_v15, %v2415_v4  ;;  %v377_v4 = vunpack.c.1.s8 %v3846_v2 }
 0x1a2   :  { %v1554_v7 = vpop.f32.mrf.mxu2  ;;  %v1219_v12 = vpop.f32.mrf.mxu0 }
 0x1a3   :  { %v1723_v17 = vpop.f32.mrf.mxu3  ;;  %v1555_v20 = vadd.f32 %v1554_v7, %v1386_v14  ;;  %v1388_v21 = vpop.f32.mrf.mxu1  ;;  %v2607_v40 = vmax.f32 %v2543_v23, 0.0  ;;  %v3850_v7 = vld [vmem:[#allocation3 + $0x1b0] sm:$0xff]  ;;  %v633_v29 = vcvt.s32.f32 %v377_v4 }
 0x1a4   :  { %v1389_v24 = vadd.f32 %v1388_v21, %v1219_v12  ;;  %v379_v15 = vunpack.c.1.s8 %v3850_v7 }
 0x1a5   :  { %v1724_v18 = vadd.f32 %v1723_v17, %v1555_v20  ;;  %1258 = vmatmul.bf16.gmra.mxu0 %v773_v3  ;;  %v3852_v17 = vld [vmem:[#allocation3 + $0x1b8] sm:$0xff]  ;;  %v374_v20 = vunpack.c.0.s8 %v3848_v5 }
 0x1a6   :  { %1427 = vmatmul.bf16.gmra.mxu1 %v774_v8  ;;  %v373_v8 = vunpack.c.0.s8 %v3846_v2  ;;  %v635_v36 = vcvt.s32.f32 %v379_v15  ;;  %v2248_v15 = vpop.permute.xlu0 %2247 }
 0x1a7   :  { %v2416_v13 = vmul.f32 %v2223_v16, %v1724_v18  ;;  %1596 = vmatmul.bf16.gmra.mxu2 %v775_v10  ;;  %v378_v10 = vunpack.c.1.s8 %v3848_v5  ;;  %v376_v16 = vunpack.c.0.s8 %v3852_v17 }
 0x1a8   :  { %1765 = vmatmul.bf16.gmra.mxu3 %v776_v22  ;;  %v375_v22 = vunpack.c.0.s8 %v3850_v7  ;;  %v629_v28 = vcvt.s32.f32 %v373_v8 }
 0x1a9   :  { %v2544_v25 = vadd.f32 %v2480_v11, %v2416_v13  ;;  %v632_v39 = vcvt.s32.f32 %v376_v16 }
 0x1aa   :  { %v1557_v30 = vpop.f32.mrf.mxu2  ;;  %v1221_v44 = vpop.f32.mrf.mxu0  ;;  %v631_v34 = vcvt.s32.f32 %v375_v22  ;;  %v781_v32 = vpack.c.bf16 %v633_v29, %v629_v28 }
 0x1ab   :  { %v1726_v33 = vpop.f32.mrf.mxu3  ;;  %v2608_v41 = vmax.f32 %v2544_v25, 0.0  ;;  %v1558_v31 = vadd.f32 %v1557_v30, %v1389_v24  ;;  %v1390_v47 = vpop.f32.mrf.mxu1  ;;  %v380_v25 = vunpack.c.1.s8 %v3852_v17  ;;  %v630_v30 = vcvt.s32.f32 %v374_v20 }
 0x1ac   :  { %v1391_v57 = vadd.f32 %v1390_v47, %v1221_v44  ;;  %v783_v52 = vpack.c.bf16 %v635_v36, %v631_v34  ;;  %v3888_v36 = vld [vmem:[#allocation3 + $0x1c0] sm:$0xff] }
 0x1ad   :  { %v3014_v19 = vpack.c.bf16 %v2608_v41, %v2607_v40  ;;  %v1727_v27 = vadd.f32 %v1726_v33, %v1558_v31  ;;  %v634_v33 = vcvt.s32.f32 %v378_v10  ;;  %v636_v40 = vcvt.s32.f32 %v380_v25  ;;  %v2238_v41 = vpop.permute.xlu1 %2237 }
 0x1af   :  { %3110 = vst [vmem:[%s4060_s4 + $0x78] sm:$0xff] %v3014_v19   ;;  %v2417_v60 = vmul.f32 %v2228_v38, %v1727_v27  ;;  %v782_v19 = vpack.c.bf16 %v634_v33, %v630_v30  ;;  %v784_v27 = vpack.c.bf16 %v636_v40, %v632_v39  ;;  %v2484_v38 = vld [vmem:[%s4059_s3 + $0x118] sm:$0xff]  ;;  %v2485_v30 = vld [vmem:[%s4059_s3 + $0x120] sm:$0xff]  ;;  %v3890_v39 = vld [vmem:[#allocation3 + $0x1c8] sm:$0xff] }
 0x1b1   :  { %v2545_v6 = vadd.f32 %v2481_v63, %v2417_v60  ;;  %v385_v60 = vunpack.c.3.s8 %v3846_v2  ;;  %v387_v63 = vunpack.c.3.s8 %v3850_v7 }
 0x1b2   :  { %v1559_v58 = vpop.f32.mrf.mxu2  ;;  %v1224_v46 = vpop.f32.mrf.mxu0 }
 0x1b3   :  { %v1728_v49 = vpop.f32.mrf.mxu3  ;;  %v1560_v61 = vadd.f32 %v1559_v58, %v1391_v57  ;;  %v1393_v53 = vpop.f32.mrf.mxu1  ;;  %v2609_v18 = vmax.f32 %v2545_v6, 0.0  ;;  %v641_v4 = vcvt.s32.f32 %v385_v60 }
 0x1b4   :  { %v1394_v14 = vadd.f32 %v1393_v53, %v1224_v46 }
 0x1b5   :  { %v1729_v0 = vadd.f32 %v1728_v49, %v1560_v61  ;;  %1263 = vmatmul.bf16.gmra.mxu0 %v777_v59  ;;  %v382_v61 = vunpack.c.2.s8 %v3848_v5  ;;  %v2253_v34 = vpop.permute.xlu1 %2252 }
 0x1b6   :  { %1432 = vmatmul.bf16.gmra.mxu1 %v778_v48  ;;  %v381_v48 = vunpack.c.2.s8 %v3846_v2 }
 0x1b7   :  { %v2418_v9 = vmul.f32 %v2233_v1, %v1729_v0  ;;  %1601 = vmatmul.bf16.gmra.mxu2 %v779_v43  ;;  %v386_v43 = vunpack.c.3.s8 %v3848_v5  ;;  %v384_v0 = vunpack.c.2.s8 %v3852_v17  ;;  %v638_v20 = vcvt.s32.f32 %v382_v61 }
 0x1b8   :  { %1770 = vmatmul.bf16.gmra.mxu3 %v780_v62  ;;  %v383_v62 = vunpack.c.2.s8 %v3850_v7  ;;  %v637_v8 = vcvt.s32.f32 %v381_v48  ;;  %v643_v7 = vcvt.s32.f32 %v387_v63 }
 0x1b9   :  { %v2546_v3 = vadd.f32 %v2482_v56, %v2418_v9  ;;  %v640_v10 = vcvt.s32.f32 %v384_v0 }
 0x1ba   :  { %v1562_v12 = vpop.f32.mrf.mxu2  ;;  %v1226_v24 = vpop.f32.mrf.mxu0 }
 0x1bb   :  { %v1731_v21 = vpop.f32.mrf.mxu3  ;;  %v2610_v11 = vmax.f32 %v2546_v3, 0.0  ;;  %v1563_v23 = vadd.f32 %v1562_v12, %v1394_v14  ;;  %v1395_v13 = vpop.f32.mrf.mxu1  ;;  %v388_v3 = vunpack.c.3.s8 %v3852_v17  ;;  %v642_v12 = vcvt.s32.f32 %v386_v43 }
 0x1bc   :  { %v1396_v31 = vadd.f32 %v1395_v13, %v1226_v24 }
 0x1bd   :  { %v3019_v26 = vpack.c.bf16 %v2610_v11, %v2609_v18  ;;  %v1732_v35 = vadd.f32 %v1731_v21, %v1563_v23  ;;  %v639_v21 = vcvt.s32.f32 %v383_v62  ;;  %v644_v22 = vcvt.s32.f32 %v388_v3 }
 0x1be   :  { %v785_v23 = vpack.c.bf16 %v641_v4, %v637_v8  ;;  %v786_v17 = vpack.c.bf16 %v642_v12, %v638_v20 }
 0x1bf   :  { %3111 = vst [vmem:[%s4060_s4 + $0x80] sm:$0xff] %v3019_v26   ;;  %v2419_v50 = vmul.f32 %v2238_v41, %v1732_v35  ;;  %v787_v28 = vpack.c.bf16 %v643_v7, %v639_v21  ;;  %v788_v29 = vpack.c.bf16 %v644_v22, %v640_v10  ;;  %v2486_v35 = vld [vmem:[%s4059_s3 + $0x128] sm:$0xff]  ;;  %v2487_v7 = vld [vmem:[%s4059_s3 + $0x130] sm:$0xff]  ;;  %v2263_v22 = vpop.permute.xlu0 %2262 }
 0x1c1   :  { %v2547_v57 = vadd.f32 %v2483_v37, %v2419_v50  ;;  %v393_v50 = vunpack.c.1.s8 %v3888_v36 }
 0x1c2   :  { %v1564_v44 = vpop.f32.mrf.mxu2  ;;  %v1229_v42 = vpop.f32.mrf.mxu0 }
 0x1c3   :  { %v1733_v47 = vpop.f32.mrf.mxu3  ;;  %v1565_v51 = vadd.f32 %v1564_v44, %v1396_v31  ;;  %v1398_v45 = vpop.f32.mrf.mxu1  ;;  %v2611_v1 = vmax.f32 %v2547_v57, 0.0  ;;  %v3892_v44 = vld [vmem:[#allocation3 + $0x1d0] sm:$0xff]  ;;  %v649_v61 = vcvt.s32.f32 %v393_v50 }
 0x1c4   :  { %v1399_v49 = vadd.f32 %v1398_v45, %v1229_v42  ;;  %v395_v37 = vunpack.c.1.s8 %v3892_v44 }
 0x1c5   :  { %v1734_v54 = vadd.f32 %v1733_v47, %v1565_v51  ;;  %1268 = vmatmul.bf16.gmra.mxu0 %v781_v32  ;;  %v3894_v47 = vld [vmem:[#allocation3 + $0x1d8] sm:$0xff]  ;;  %v390_v51 = vunpack.c.0.s8 %v3890_v39 }
 0x1c6   :  { %1437 = vmatmul.bf16.gmra.mxu1 %v782_v19  ;;  %v389_v19 = vunpack.c.0.s8 %v3888_v36  ;;  %v651_v63 = vcvt.s32.f32 %v395_v37  ;;  %v2268_v37 = vpop.permute.xlu1 %2267 }
 0x1c7   :  { %v2420_v58 = vmul.f32 %v2243_v55, %v1734_v54  ;;  %1606 = vmatmul.bf16.gmra.mxu2 %v783_v52  ;;  %v394_v52 = vunpack.c.1.s8 %v3890_v39  ;;  %v392_v54 = vunpack.c.0.s8 %v3894_v47 }
 0x1c8   :  { %1775 = vmatmul.bf16.gmra.mxu3 %v784_v27  ;;  %v391_v27 = vunpack.c.0.s8 %v3892_v44  ;;  %v645_v60 = vcvt.s32.f32 %v389_v19 }
 0x1c9   :  { %v2548_v59 = vadd.f32 %v2484_v38, %v2420_v58  ;;  %v648_v0 = vcvt.s32.f32 %v392_v54 }
 0x1ca   :  { %v1567_v46 = vpop.f32.mrf.mxu2  ;;  %v1231_v9 = vpop.f32.mrf.mxu0  ;;  %v647_v43 = vcvt.s32.f32 %v391_v27  ;;  %v789_v3 = vpack.c.bf16 %v649_v61, %v645_v60 }
 0x1cb   :  { %v1736_v53 = vpop.f32.mrf.mxu3  ;;  %v2612_v56 = vmax.f32 %v2548_v59, 0.0  ;;  %v1568_v6 = vadd.f32 %v1567_v46, %v1399_v49  ;;  %v1400_v14 = vpop.f32.mrf.mxu1  ;;  %v396_v59 = vunpack.c.1.s8 %v3894_v47  ;;  %v646_v46 = vcvt.s32.f32 %v390_v51 }
 0x1cc   :  { %v1401_v16 = vadd.f32 %v1400_v14, %v1231_v9  ;;  %v791_v21 = vpack.c.bf16 %v651_v63, %v647_v43  ;;  %v3930_v63 = vld [vmem:[#allocation3 + $0x1e0] sm:$0xff] }
 0x1cd   :  { %v3024_v2 = vpack.c.bf16 %v2612_v56, %v2611_v1  ;;  %v1737_v5 = vadd.f32 %v1736_v53, %v1568_v6  ;;  %v650_v53 = vcvt.s32.f32 %v394_v52  ;;  %v652_v1 = vcvt.s32.f32 %v396_v59  ;;  %v2258_v56 = vpop.permute.xlu2 %2257 }
 0x1cf   :  { %3112 = vst [vmem:[%s4060_s4 + $0x88] sm:$0xff] %v3024_v2   ;;  %v2421_v24 = vmul.f32 %v2248_v15, %v1737_v5  ;;  %v790_v2 = vpack.c.bf16 %v650_v53, %v646_v46  ;;  %v792_v5 = vpack.c.bf16 %v652_v1, %v648_v0  ;;  %v2488_v15 = vld [vmem:[%s4059_s3 + $0x138] sm:$0xff]  ;;  %v2489_v46 = vld [vmem:[%s4059_s3 + $0x140] sm:$0xff]  ;;  %v3932_v0 = vld [vmem:[#allocation3 + $0x1e8] sm:$0xff] }
 0x1d1   :  { %v2549_v40 = vadd.f32 %v2485_v30, %v2421_v24  ;;  %v401_v24 = vunpack.c.3.s8 %v3888_v36  ;;  %v403_v30 = vunpack.c.3.s8 %v3892_v44 }
 0x1d2   :  { %v1569_v18 = vpop.f32.mrf.mxu2  ;;  %v1234_v25 = vpop.f32.mrf.mxu0 }
 0x1d3   :  { %v1738_v11 = vpop.f32.mrf.mxu3  ;;  %v1570_v13 = vadd.f32 %v1569_v18, %v1401_v16  ;;  %v1403_v26 = vpop.f32.mrf.mxu1  ;;  %v2613_v55 = vmax.f32 %v2549_v40, 0.0  ;;  %v657_v50 = vcvt.s32.f32 %v401_v24 }
 0x1d4   :  { %v1404_v31 = vadd.f32 %v1403_v26, %v1234_v25 }
 0x1d5   :  { %v1739_v33 = vadd.f32 %v1738_v11, %v1570_v13  ;;  %1273 = vmatmul.bf16.gmra.mxu0 %v785_v23  ;;  %v398_v13 = vunpack.c.2.s8 %v3890_v39  ;;  %v2273_v43 = vpop.permute.xlu2 %2272 }
 0x1d6   :  { %1442 = vmatmul.bf16.gmra.mxu1 %v786_v17  ;;  %v397_v17 = vunpack.c.2.s8 %v3888_v36 }
 0x1d7   :  { %v2422_v41 = vmul.f32 %v2253_v34, %v1739_v33  ;;  %1611 = vmatmul.bf16.gmra.mxu2 %v787_v28  ;;  %v402_v28 = vunpack.c.3.s8 %v3890_v39  ;;  %v400_v33 = vunpack.c.2.s8 %v3894_v47  ;;  %v654_v51 = vcvt.s32.f32 %v398_v13 }
 0x1d8   :  { %1780 = vmatmul.bf16.gmra.mxu3 %v788_v29  ;;  %v399_v29 = vunpack.c.2.s8 %v3892_v44  ;;  %v653_v19 = vcvt.s32.f32 %v397_v17  ;;  %v659_v44 = vcvt.s32.f32 %v403_v30 }
 0x1d9   :  { %v2550_v32 = vadd.f32 %v2486_v35, %v2422_v41  ;;  %v656_v52 = vcvt.s32.f32 %v400_v33 }
 0x1da   :  { %v1572_v42 = vpop.f32.mrf.mxu2  ;;  %v1236_v58 = vpop.f32.mrf.mxu0 }
 0x1db   :  { %v1741_v45 = vpop.f32.mrf.mxu3  ;;  %v2614_v38 = vmax.f32 %v2550_v32, 0.0  ;;  %v1573_v57 = vadd.f32 %v1572_v42, %v1404_v31  ;;  %v1405_v49 = vpop.f32.mrf.mxu1  ;;  %v404_v32 = vunpack.c.3.s8 %v3894_v47  ;;  %v658_v42 = vcvt.s32.f32 %v402_v28 }
 0x1dc   :  { %v1406_v6 = vadd.f32 %v1405_v49, %v1236_v58 }
 0x1dd   :  { %v3029_v48 = vpack.c.bf16 %v2614_v38, %v2613_v55  ;;  %v1742_v62 = vadd.f32 %v1741_v45, %v1573_v57  ;;  %v655_v45 = vcvt.s32.f32 %v399_v29  ;;  %v660_v27 = vcvt.s32.f32 %v404_v32 }
 0x1de   :  { %v793_v57 = vpack.c.bf16 %v657_v50, %v653_v19  ;;  %v794_v47 = vpack.c.bf16 %v658_v42, %v654_v51 }
 0x1df   :  { %3113 = vst [vmem:[%s4060_s4 + $0x90] sm:$0xff] %v3029_v48   ;;  %v2423_v8 = vmul.f32 %v2258_v56, %v1742_v62  ;;  %v795_v60 = vpack.c.bf16 %v659_v44, %v655_v45  ;;  %v796_v61 = vpack.c.bf16 %v660_v27, %v656_v52  ;;  %v2490_v62 = vld [vmem:[%s4059_s3 + $0x148] sm:$0xff]  ;;  %v2491_v44 = vld [vmem:[%s4059_s3 + $0x150] sm:$0xff]  ;;  %v2283_v27 = vpop.permute.xlu1 %2282 }
 0x1e1   :  { %v2551_v16 = vadd.f32 %v2487_v7, %v2423_v8  ;;  %v409_v8 = vunpack.c.1.s8 %v3930_v63 }
 0x1e2   :  { %v1574_v9 = vpop.f32.mrf.mxu2  ;;  %v1239_v20 = vpop.f32.mrf.mxu0 }
 0x1e3   :  { %v1743_v14 = vpop.f32.mrf.mxu3  ;;  %v1575_v4 = vadd.f32 %v1574_v9, %v1406_v6  ;;  %v1408_v12 = vpop.f32.mrf.mxu1  ;;  %v2615_v34 = vmax.f32 %v2551_v16, 0.0  ;;  %v3934_v9 = vld [vmem:[#allocation3 + $0x1f0] sm:$0xff]  ;;  %v665_v13 = vcvt.s32.f32 %v409_v8 }
 0x1e4   :  { %v1409_v11 = vadd.f32 %v1408_v12, %v1239_v20  ;;  %v411_v7 = vunpack.c.1.s8 %v3934_v9 }
 0x1e5   :  { %v1744_v10 = vadd.f32 %v1743_v14, %v1575_v4  ;;  %1278 = vmatmul.bf16.gmra.mxu0 %v789_v3  ;;  %v3936_v14 = vld [vmem:[#allocation3 + $0x1f8] sm:$0xff]  ;;  %v406_v4 = vunpack.c.0.s8 %v3932_v0 }
 0x1e6   :  { %1447 = vmatmul.bf16.gmra.mxu1 %v790_v2  ;;  %v405_v2 = vunpack.c.0.s8 %v3930_v63  ;;  %v667_v30 = vcvt.s32.f32 %v411_v7  ;;  %v2288_v7 = vpop.permute.xlu2 %2287 }
 0x1e7   :  { %v2424_v18 = vmul.f32 %v2263_v22, %v1744_v10  ;;  %1616 = vmatmul.bf16.gmra.mxu2 %v791_v21  ;;  %v410_v21 = vunpack.c.1.s8 %v3932_v0  ;;  %v408_v10 = vunpack.c.0.s8 %v3936_v14 }
 0x1e8   :  { %1785 = vmatmul.bf16.gmra.mxu3 %v792_v5  ;;  %v407_v5 = vunpack.c.0.s8 %v3934_v9  ;;  %v661_v24 = vcvt.s32.f32 %v405_v2 }
 0x1e9   :  { %v2552_v23 = vadd.f32 %v2488_v15, %v2424_v18  ;;  %v664_v33 = vcvt.s32.f32 %v408_v10 }
 0x1ea   :  { %v1577_v25 = vpop.f32.mrf.mxu2  ;;  %v1241_v41 = vpop.f32.mrf.mxu0  ;;  %v663_v28 = vcvt.s32.f32 %v407_v5  ;;  %v797_v32 = vpack.c.bf16 %v665_v13, %v661_v24 }
 0x1eb   :  { %v1746_v26 = vpop.f32.mrf.mxu3  ;;  %v2616_v35 = vmax.f32 %v2552_v23, 0.0  ;;  %v1578_v40 = vadd.f32 %v1577_v25, %v1409_v11  ;;  %v1410_v31 = vpop.f32.mrf.mxu1  ;;  %v412_v23 = vunpack.c.1.s8 %v3936_v14  ;;  %v662_v25 = vcvt.s32.f32 %v406_v4 }
 0x1ec   :  { %v1411_v54 = vadd.f32 %v1410_v31, %v1241_v41  ;;  %v799_v45 = vpack.c.bf16 %v667_v30, %v663_v28 }
 0x1ed   :  { %v3034_v36 = vpack.c.bf16 %v2616_v35, %v2615_v34  ;;  %v1747_v39 = vadd.f32 %v1746_v26, %v1578_v40  ;;  %v666_v26 = vcvt.s32.f32 %v410_v21  ;;  %v668_v34 = vcvt.s32.f32 %v412_v23  ;;  %v2278_v35 = vpop.permute.xlu0 %2277 }
 0x1ef   :  { %3114 = vst [vmem:[%s4060_s4 + $0x98] sm:$0xff] %v3034_v36   ;;  %v2425_v58 = vmul.f32 %v2268_v37, %v1747_v39  ;;  %v798_v36 = vpack.c.bf16 %v666_v26, %v662_v25  ;;  %v800_v39 = vpack.c.bf16 %v668_v34, %v664_v33  ;;  %v2492_v37 = vld [vmem:[%s4059_s3 + $0x158] sm:$0xff]  ;;  %v2493_v25 = vld [vmem:[%s4059_s3 + $0x160] sm:$0xff] }
 0x1f1   :  { %v2553_v1 = vadd.f32 %v2489_v46, %v2425_v58  ;;  %v417_v58 = vunpack.c.3.s8 %v3930_v63  ;;  %v419_v46 = vunpack.c.3.s8 %v3934_v9 }
 0x1f2   :  { %v1579_v55 = vpop.f32.mrf.mxu2  ;;  %v1244_v59 = vpop.f32.mrf.mxu0 }
 0x1f3   :  { %v1748_v38 = vpop.f32.mrf.mxu3  ;;  %v1580_v49 = vadd.f32 %v1579_v55, %v1411_v54  ;;  %v1413_v48 = vpop.f32.mrf.mxu1  ;;  %v2617_v22 = vmax.f32 %v2553_v1, 0.0  ;;  %v673_v8 = vcvt.s32.f32 %v417_v58  ;;  %v2496_v58 = vld [vmem:[%s4059_s3 + $0x178] sm:$0xff] }
 0x1f4   :  { %v1414_v6 = vadd.f32 %v1413_v48, %v1244_v59 }
 0x1f5   :  { %v1749_v53 = vadd.f32 %v1748_v38, %v1580_v49  ;;  %1283 = vmatmul.bf16.gmra.mxu0 %v793_v57  ;;  %v414_v49 = vunpack.c.2.s8 %v3932_v0  ;;  %v2293_v28 = vpop.permute.xlu0 %2292 }
 0x1f6   :  { %1452 = vmatmul.bf16.gmra.mxu1 %v794_v47  ;;  %v413_v47 = vunpack.c.2.s8 %v3930_v63 }
 0x1f7   :  { %v2426_v56 = vmul.f32 %v2273_v43, %v1749_v53  ;;  %1621 = vmatmul.bf16.gmra.mxu2 %v795_v60  ;;  %v418_v60 = vunpack.c.3.s8 %v3932_v0  ;;  %v416_v53 = vunpack.c.2.s8 %v3936_v14  ;;  %v670_v4 = vcvt.s32.f32 %v414_v49 }
 0x1f8   :  { %1790 = vmatmul.bf16.gmra.mxu3 %v796_v61  ;;  %v415_v61 = vunpack.c.2.s8 %v3934_v9  ;;  %v669_v2 = vcvt.s32.f32 %v413_v47  ;;  %v675_v9 = vcvt.s32.f32 %v419_v46  ;;  %v2303_v47 = vpop.permute.xlu2 %2302 }
 0x1f9   :  { %v2554_v3 = vadd.f32 %v2490_v62, %v2426_v56  ;;  %v672_v21 = vcvt.s32.f32 %v416_v53 }
 0x1fa   :  { %v1582_v20 = vpop.f32.mrf.mxu2  ;;  %v1246_v18 = vpop.f32.mrf.mxu0 }
 0x1fb   :  { %v1751_v12 = vpop.f32.mrf.mxu3  ;;  %v2618_v15 = vmax.f32 %v2554_v3, 0.0  ;;  %v1583_v16 = vadd.f32 %v1582_v20, %v1414_v6  ;;  %v1415_v11 = vpop.f32.mrf.mxu1  ;;  %v420_v3 = vunpack.c.3.s8 %v3936_v14  ;;  %v674_v20 = vcvt.s32.f32 %v418_v60 }
 0x1fc   :  { %v1416_v40 = vadd.f32 %v1415_v11, %v1246_v18 }
 0x1fd   :  { %v3039_v17 = vpack.c.bf16 %v2618_v15, %v2617_v22  ;;  %v1752_v29 = vadd.f32 %v1751_v12, %v1583_v16  ;;  %v671_v12 = vcvt.s32.f32 %v415_v61  ;;  %v676_v5 = vcvt.s32.f32 %v420_v3 }
 0x1fe   :  { %v801_v16 = vpack.c.bf16 %v673_v8, %v669_v2  ;;  %v802_v14 = vpack.c.bf16 %v674_v20, %v670_v4 }
 0x1ff   :  { %3115 = vst [vmem:[%s4060_s4 + $0xa0] sm:$0xff] %v3039_v17   ;;  %v2427_v19 = vmul.f32 %v2278_v35, %v1752_v29  ;;  %v803_v24 = vpack.c.bf16 %v675_v9, %v671_v12  ;;  %v804_v13 = vpack.c.bf16 %v676_v5, %v672_v21  ;;  %v2494_v29 = vld [vmem:[%s4059_s3 + $0x168] sm:$0xff]  ;;  %v2497_v21 = vld [vmem:[%s4059_s3 + $0x180] sm:$0xff] }
 0x201   :  { %v2555_v54 = vadd.f32 %v2491_v44, %v2427_v19 }
 0x202   :  { %v1584_v41 = vpop.f32.mrf.mxu2  ;;  %v1249_v51 = vpop.f32.mrf.mxu0 }
 0x203   :  { %v1753_v31 = vpop.f32.mrf.mxu3  ;;  %v1585_v50 = vadd.f32 %v1584_v41, %v1416_v40  ;;  %v1418_v42 = vpop.f32.mrf.mxu1  ;;  %v2619_v43 = vmax.f32 %v2555_v54, 0.0 }
 0x204   :  { %v1419_v38 = vadd.f32 %v1418_v42, %v1249_v51 }
 0x205   :  { %v1754_v52 = vadd.f32 %v1753_v31, %v1585_v50  ;;  %1288 = vmatmul.bf16.gmra.mxu0 %v797_v32 }
 0x206   :  { %1457 = vmatmul.bf16.gmra.mxu1 %v798_v36 }
 0x207   :  { %v2428_v55 = vmul.f32 %v2283_v27, %v1754_v52  ;;  %1626 = vmatmul.bf16.gmra.mxu2 %v799_v45  ;;  %v2298_v45 = vpop.permute.xlu1 %2297 }
 0x208   :  { %1795 = vmatmul.bf16.gmra.mxu3 %v800_v39 }
 0x209   :  { %v2556_v57 = vadd.f32 %v2492_v37, %v2428_v55 }
 0x20a   :  { %v1587_v59 = vpop.f32.mrf.mxu2  ;;  %v1251_v56 = vpop.f32.mrf.mxu0 }
 0x20b   :  { %v1756_v48 = vpop.f32.mrf.mxu3  ;;  %v2620_v62 = vmax.f32 %v2556_v57, 0.0  ;;  %v1588_v1 = vadd.f32 %v1587_v59, %v1419_v38  ;;  %v1420_v6 = vpop.f32.mrf.mxu1  ;;  %v2495_v38 = vld [vmem:[%s4059_s3 + $0x170] sm:$0xff] }
 0x20c   :  { %v1421_v10 = vadd.f32 %v1420_v6, %v1251_v56 }
 0x20d   :  { %v3044_v63 = vpack.c.bf16 %v2620_v62, %v2619_v43  ;;  %v1757_v0 = vadd.f32 %v1756_v48, %v1588_v1 }
 0x20f   :  { %3116 = vst [vmem:[%s4060_s4 + $0xa8] sm:$0xff] %v3044_v63   ;;  %v2429_v18 = vmul.f32 %v2288_v7, %v1757_v0  ;;  %v2308_v63 = vpop.permute.xlu0 %2307  ;;  %v2313_v7 = vpop.permute.xlu1 %2312 }
 0x211   :  { %v2557_v30 = vadd.f32 %v2493_v25, %v2429_v18 }
 0x212   :  { %v1589_v22 = vpop.f32.mrf.mxu2  ;;  %v1254_v23 = vpop.f32.mrf.mxu0 }
 0x213   :  { %v1758_v15 = vpop.f32.mrf.mxu3  ;;  %v1590_v11 = vadd.f32 %v1589_v22, %v1421_v10  ;;  %v1423_v17 = vpop.f32.mrf.mxu1  ;;  %v2621_v31 = vmax.f32 %v2557_v30, 0.0  ;;  %v2498_v10 = vld [vmem:[%s4059_s3 + $0x188] sm:$0xff] }
 0x214   :  { %v1424_v34 = vadd.f32 %v1423_v17, %v1254_v23 }
 0x215   :  { %v1759_v26 = vadd.f32 %v1758_v15, %v1590_v11  ;;  %1293 = vmatmul.bf16.gmra.mxu0 %v801_v16 }
 0x216   :  { %1462 = vmatmul.bf16.gmra.mxu1 %v802_v14 }
 0x217   :  { %v2430_v33 = vmul.f32 %v2293_v28, %v1759_v26  ;;  %1631 = vmatmul.bf16.gmra.mxu2 %v803_v24 }
 0x218   :  { %1800 = vmatmul.bf16.gmra.mxu3 %v804_v13 }
 0x219   :  { %v2558_v35 = vadd.f32 %v2494_v29, %v2430_v33  ;;  %v2318_v29 = vpop.permute.xlu2 %2317 }
 0x21a   :  { %v1592_v40 = vpop.f32.mrf.mxu2  ;;  %v1256_v19 = vpop.f32.mrf.mxu0 }
 0x21b   :  { %v1761_v41 = vpop.f32.mrf.mxu3  ;;  %v2622_v32 = vmax.f32 %v2558_v35, 0.0  ;;  %v1593_v36 = vadd.f32 %v1592_v40, %v1424_v34  ;;  %v1425_v50 = vpop.f32.mrf.mxu1 }
 0x21c   :  { %v1426_v39 = vadd.f32 %v1425_v50, %v1256_v19  ;;  %v2323_v19 = vpop.permute.xlu0 %2322  ;;  %v2500_v50 = vld [vmem:[%s4059_s3 + $0x198] sm:$0xff] }
 0x21d   :  { %v3049_v51 = vpack.c.bf16 %v2622_v32, %v2621_v31  ;;  %v1762_v42 = vadd.f32 %v1761_v41, %v1593_v36  ;;  %v2499_v32 = vld [vmem:[%s4059_s3 + $0x190] sm:$0xff] }
 0x21f   :  { %3117 = vst [vmem:[%s4060_s4 + $0xb0] sm:$0xff] %v3049_v51   ;;  %v2431_v27 = vmul.f32 %v2298_v45, %v1762_v42 }
 0x221   :  { %v2559_v49 = vadd.f32 %v2495_v38, %v2431_v27 }
 0x222   :  { %v1594_v44 = vpop.f32.mrf.mxu2  ;;  %v1259_v54 = vpop.f32.mrf.mxu0 }
 0x223   :  { %v1763_v52 = vpop.f32.mrf.mxu3  ;;  %v1595_v37 = vadd.f32 %v1594_v44, %v1426_v39  ;;  %v1428_v55 = vpop.f32.mrf.mxu1  ;;  %v2623_v53 = vmax.f32 %v2559_v49, 0.0 }
 0x224   :  { %v1429_v48 = vadd.f32 %v1428_v55, %v1259_v54 }
 0x225   :  { %v1764_v57 = vadd.f32 %v1763_v52, %v1595_v37 }
 0x227   :  { %v2432_v59 = vmul.f32 %v2303_v47, %v1764_v57 }
 0x229   :  { %v2560_v60 = vadd.f32 %v2496_v58, %v2432_v59  ;;  %v2328_v58 = vpop.permute.xlu1 %2327 }
 0x22a   :  { %v1597_v61 = vpop.f32.mrf.mxu2  ;;  %v1261_v1 = vpop.f32.mrf.mxu0 }
 0x22b   :  { %v1766_v46 = vpop.f32.mrf.mxu3  ;;  %v2624_v43 = vmax.f32 %v2560_v60, 0.0  ;;  %v1598_v62 = vadd.f32 %v1597_v61, %v1429_v48  ;;  %v1430_v56 = vpop.f32.mrf.mxu1 }
 0x22c   :  { %v1431_v2 = vadd.f32 %v1430_v56, %v1261_v1  ;;  %v2333_v1 = vpop.permute.xlu2 %2332  ;;  %v2502_v56 = vld [vmem:[%s4059_s3 + $0x1a8] sm:$0xff] }
 0x22d   :  { %v3054_v6 = vpack.c.bf16 %v2624_v43, %v2623_v53  ;;  %v1767_v3 = vadd.f32 %v1766_v46, %v1598_v62  ;;  %v2501_v43 = vld [vmem:[%s4059_s3 + $0x1a0] sm:$0xff] }
 0x22f   :  { %3118 = vst [vmem:[%s4060_s4 + $0xb8] sm:$0xff] %v3054_v6   ;;  %v2433_v20 = vmul.f32 %v2308_v63, %v1767_v3 }
 0x231   :  { %v2561_v22 = vadd.f32 %v2497_v21, %v2433_v20 }
 0x232   :  { %v1599_v8 = vpop.f32.mrf.mxu2  ;;  %v1264_v0 = vpop.f32.mrf.mxu0 }
 0x233   :  { %v1768_v4 = vpop.f32.mrf.mxu3  ;;  %v1600_v12 = vadd.f32 %v1599_v8, %v1431_v2  ;;  %v1433_v9 = vpop.f32.mrf.mxu1  ;;  %v2625_v23 = vmax.f32 %v2561_v22, 0.0 }
 0x234   :  { %v1434_v16 = vadd.f32 %v1433_v9, %v1264_v0 }
 0x235   :  { %v1769_v5 = vadd.f32 %v1768_v4, %v1600_v12 }
 0x237   :  { %v2434_v15 = vmul.f32 %v2313_v7, %v1769_v5 }
 0x239   :  { %v2562_v14 = vadd.f32 %v2498_v10, %v2434_v15  ;;  %v2338_v10 = vpop.permute.xlu0 %2337 }
 0x23a   :  { %v1602_v18 = vpop.f32.mrf.mxu2  ;;  %v1266_v13 = vpop.f32.mrf.mxu0 }
 0x23b   :  { %v1771_v11 = vpop.f32.mrf.mxu3  ;;  %v2626_v17 = vmax.f32 %v2562_v14, 0.0  ;;  %v1603_v24 = vadd.f32 %v1602_v18, %v1434_v16  ;;  %v1435_v25 = vpop.f32.mrf.mxu1 }
 0x23c   :  { %v1436_v30 = vadd.f32 %v1435_v25, %v1266_v13  ;;  %v2343_v13 = vpop.permute.xlu1 %2342  ;;  %v2504_v25 = vld [vmem:[%s4059_s3 + $0x1b8] sm:$0xff] }
 0x23d   :  { %v3059_v26 = vpack.c.bf16 %v2626_v17, %v2625_v23  ;;  %v1772_v28 = vadd.f32 %v1771_v11, %v1603_v24  ;;  %v2503_v17 = vld [vmem:[%s4059_s3 + $0x1b0] sm:$0xff] }
 0x23f   :  { %3119 = vst [vmem:[%s4060_s4 + $0xc0] sm:$0xff] %v3059_v26   ;;  %v2435_v35 = vmul.f32 %v2318_v29, %v1772_v28 }
 0x241   :  { %v2563_v51 = vadd.f32 %v2499_v32, %v2435_v35 }
 0x242   :  { %v1604_v33 = vpop.f32.mrf.mxu2  ;;  %v1269_v41 = vpop.f32.mrf.mxu0 }
 0x243   :  { %v1773_v34 = vpop.f32.mrf.mxu3  ;;  %v1605_v40 = vadd.f32 %v1604_v33, %v1436_v30  ;;  %v1438_v31 = vpop.f32.mrf.mxu1  ;;  %v2627_v27 = vmax.f32 %v2563_v51, 0.0 }
 0x244   :  { %v1439_v45 = vadd.f32 %v1438_v31, %v1269_v41 }
 0x245   :  { %v1774_v36 = vadd.f32 %v1773_v34, %v1605_v40 }
 0x247   :  { %v2436_v42 = vmul.f32 %v2323_v19, %v1774_v36 }
 0x249   :  { %v2564_v39 = vadd.f32 %v2500_v50, %v2436_v42  ;;  %v2348_v50 = vpop.permute.xlu2 %2347 }
 0x24a   :  { %v1607_v44 = vpop.f32.mrf.mxu2  ;;  %v1271_v55 = vpop.f32.mrf.mxu0 }
 0x24b   :  { %v1776_v52 = vpop.f32.mrf.mxu3  ;;  %v2628_v37 = vmax.f32 %v2564_v39, 0.0  ;;  %v1608_v54 = vadd.f32 %v1607_v44, %v1439_v45  ;;  %v1440_v38 = vpop.f32.mrf.mxu1 }
 0x24c   :  { %v1441_v49 = vadd.f32 %v1440_v38, %v1271_v55  ;;  %v2353_v55 = vpop.permute.xlu0 %2352  ;;  %v2506_v38 = vld [vmem:[%s4059_s3 + $0x1c8] sm:$0xff] }
 0x24d   :  { %v3064_v57 = vpack.c.bf16 %v2628_v37, %v2627_v27  ;;  %v1777_v47 = vadd.f32 %v1776_v52, %v1608_v54  ;;  %v2505_v37 = vld [vmem:[%s4059_s3 + $0x1c0] sm:$0xff] }
 0x24f   :  { %3120 = vst [vmem:[%s4060_s4 + $0xc8] sm:$0xff] %v3064_v57   ;;  %v2437_v60 = vmul.f32 %v2328_v58, %v1777_v47 }
 0x251   :  { %v2565_v6 = vadd.f32 %v2501_v43, %v2437_v60 }
 0x252   :  { %v1609_v59 = vpop.f32.mrf.mxu2  ;;  %v1274_v46 = vpop.f32.mrf.mxu0 }
 0x253   :  { %v1778_v48 = vpop.f32.mrf.mxu3  ;;  %v1610_v61 = vadd.f32 %v1609_v59, %v1441_v49  ;;  %v1443_v53 = vpop.f32.mrf.mxu1  ;;  %v2629_v20 = vmax.f32 %v2565_v6, 0.0 }
 0x254   :  { %v1444_v63 = vadd.f32 %v1443_v53, %v1274_v46 }
 0x255   :  { %v1779_v62 = vadd.f32 %v1778_v48, %v1610_v61 }
 0x257   :  { %v2438_v3 = vmul.f32 %v2333_v1, %v1779_v62 }
 0x259   :  { %v2566_v2 = vadd.f32 %v2502_v56, %v2438_v3  ;;  %v2358_v56 = vpop.permute.xlu1 %2357 }
 0x25a   :  { %v1612_v8 = vpop.f32.mrf.mxu2  ;;  %v1276_v9 = vpop.f32.mrf.mxu0 }
 0x25b   :  { %v1781_v4 = vpop.f32.mrf.mxu3  ;;  %v2630_v12 = vmax.f32 %v2566_v2, 0.0  ;;  %v1613_v0 = vadd.f32 %v1612_v8, %v1444_v63  ;;  %v1445_v21 = vpop.f32.mrf.mxu1 }
 0x25c   :  { %v1446_v22 = vadd.f32 %v1445_v21, %v1276_v9  ;;  %v2363_v9 = vpop.permute.xlu2 %2362  ;;  %v2508_v21 = vld [vmem:[%s4059_s3 + $0x1d8] sm:$0xff] }
 0x25d   :  { %v3069_v5 = vpack.c.bf16 %v2630_v12, %v2629_v20  ;;  %v1782_v7 = vadd.f32 %v1781_v4, %v1613_v0  ;;  %v2507_v12 = vld [vmem:[%s4059_s3 + $0x1d0] sm:$0xff] }
 0x25f   :  { %3121 = vst [vmem:[%s4060_s4 + $0xd0] sm:$0xff] %v3069_v5   ;;  %v2439_v14 = vmul.f32 %v2338_v10, %v1782_v7 }
 0x261   :  { %v2567_v26 = vadd.f32 %v2503_v17, %v2439_v14 }
 0x262   :  { %v1614_v15 = vpop.f32.mrf.mxu2  ;;  %v1279_v11 = vpop.f32.mrf.mxu0 }
 0x263   :  { %v1783_v16 = vpop.f32.mrf.mxu3  ;;  %v1615_v18 = vadd.f32 %v1614_v15, %v1446_v22  ;;  %v1448_v23 = vpop.f32.mrf.mxu1  ;;  %v2631_v35 = vmax.f32 %v2567_v26, 0.0 }
 0x264   :  { %v1449_v29 = vadd.f32 %v1448_v23, %v1279_v11 }
 0x265   :  { %v1784_v24 = vadd.f32 %v1783_v16, %v1615_v18 }
 0x267   :  { %v2440_v28 = vmul.f32 %v2343_v13, %v1784_v24 }
 0x269   :  { %v2568_v30 = vadd.f32 %v2504_v25, %v2440_v28  ;;  %v2368_v25 = vpop.permute.xlu0 %2367 }
 0x26a   :  { %v1617_v33 = vpop.f32.mrf.mxu2  ;;  %v1281_v31 = vpop.f32.mrf.mxu0 }
 0x26b   :  { %v1786_v34 = vpop.f32.mrf.mxu3  ;;  %v2632_v40 = vmax.f32 %v2568_v30, 0.0  ;;  %v1618_v41 = vadd.f32 %v1617_v33, %v1449_v29  ;;  %v1450_v32 = vpop.f32.mrf.mxu1 }
 0x26c   :  { %v1451_v51 = vadd.f32 %v1450_v32, %v1281_v31  ;;  %v2373_v31 = vpop.permute.xlu1 %2372  ;;  %v2510_v32 = vld [vmem:[%s4059_s3 + $0x1e8] sm:$0xff] }
 0x26d   :  { %v3074_v36 = vpack.c.bf16 %v2632_v40, %v2631_v35  ;;  %v1787_v19 = vadd.f32 %v1786_v34, %v1618_v41  ;;  %v2509_v34 = vld [vmem:[%s4059_s3 + $0x1e0] sm:$0xff] }
 0x26f   :  { %3122 = vst [vmem:[%s4060_s4 + $0xd8] sm:$0xff] %v3074_v36   ;;  %v2441_v39 = vmul.f32 %v2348_v50, %v1787_v19 }
 0x271   :  { %v2569_v57 = vadd.f32 %v2505_v37, %v2441_v39 }
 0x272   :  { %v1619_v42 = vpop.f32.mrf.mxu2  ;;  %v1284_v52 = vpop.f32.mrf.mxu0 }
 0x273   :  { %v1788_v45 = vpop.f32.mrf.mxu3  ;;  %v1620_v44 = vadd.f32 %v1619_v42, %v1451_v51  ;;  %v1453_v27 = vpop.f32.mrf.mxu1  ;;  %v2633_v60 = vmax.f32 %v2569_v57, 0.0 }
 0x274   :  { %v1454_v58 = vadd.f32 %v1453_v27, %v1284_v52  ;;  %v2378_v57 = vpop.permute.xlu2 %2377 }
 0x275   :  { %v1789_v54 = vadd.f32 %v1788_v45, %v1620_v44 }
 0x277   :  { %v2442_v47 = vmul.f32 %v2353_v55, %v1789_v54 }
 0x279   :  { %v2570_v49 = vadd.f32 %v2506_v38, %v2442_v47 }
 0x27a   :  { %v1622_v59 = vpop.f32.mrf.mxu2  ;;  %v1286_v53 = vpop.f32.mrf.mxu0 }
 0x27b   :  { %v1791_v48 = vpop.f32.mrf.mxu3  ;;  %v2634_v61 = vmax.f32 %v2570_v49, 0.0  ;;  %v1623_v46 = vadd.f32 %v1622_v59, %v1454_v58  ;;  %v1455_v43 = vpop.f32.mrf.mxu1  ;;  %v2511_v59 = vld [vmem:[%s4059_s3 + $0x1f0] sm:$0xff] }
 0x27c   :  { %v1456_v6 = vadd.f32 %v1455_v43, %v1286_v53 }
 0x27d   :  { %v3079_v62 = vpack.c.bf16 %v2634_v61, %v2633_v60  ;;  %v1792_v1 = vadd.f32 %v1791_v48, %v1623_v46  ;;  %v2383_v61 = vpop.permute.xlu0 %2382  ;;  %v2512_v46 = vld [vmem:[%s4059_s3 + $0x1f8] sm:$0xff] }
 0x27f   :  { %3123 = vst [vmem:[%s4060_s4 + $0xe0] sm:$0xff] %v3079_v62   ;;  %v2443_v2 = vmul.f32 %v2358_v56, %v1792_v1 }
 0x281   :  { %v2571_v5 = vadd.f32 %v2507_v12, %v2443_v2 }
 0x282   :  { %v1624_v3 = vpop.f32.mrf.mxu2  ;;  %v1289_v4 = vpop.f32.mrf.mxu0 }
 0x283   :  { %v1793_v63 = vpop.f32.mrf.mxu3  ;;  %v1625_v8 = vadd.f32 %v1624_v3, %v1456_v6  ;;  %v1458_v20 = vpop.f32.mrf.mxu1  ;;  %v2635_v14 = vmax.f32 %v2571_v5, 0.0 }
 0x284   :  { %v1459_v10 = vadd.f32 %v1458_v20, %v1289_v4 }
 0x285   :  { %v1794_v0 = vadd.f32 %v1793_v63, %v1625_v8 }
 0x287   :  { %v2444_v7 = vmul.f32 %v2363_v9, %v1794_v0 }
 0x289   :  { %v2572_v22 = vadd.f32 %v2508_v21, %v2444_v7 }
 0x28a   :  { %v1627_v15 = vpop.f32.mrf.mxu2  ;;  %v1291_v23 = vpop.f32.mrf.mxu0 }
 0x28b   :  { %v1796_v16 = vpop.f32.mrf.mxu3  ;;  %v2636_v18 = vmax.f32 %v2572_v22, 0.0  ;;  %v1628_v11 = vadd.f32 %v1627_v15, %v1459_v10  ;;  %v1460_v17 = vpop.f32.mrf.mxu1 }
 0x28c   :  { %v1461_v26 = vadd.f32 %v1460_v17, %v1291_v23 }
 0x28d   :  { %v3084_v24 = vpack.c.bf16 %v2636_v18, %v2635_v14  ;;  %v1797_v13 = vadd.f32 %v1796_v16, %v1628_v11 }
 0x28f   :  { %3124 = vst [vmem:[%s4060_s4 + $0xe8] sm:$0xff] %v3084_v24   ;;  %v2445_v30 = vmul.f32 %v2368_v25, %v1797_v13 }
 0x291   :  { %v2573_v36 = vadd.f32 %v2509_v34, %v2445_v30 }
 0x292   :  { %v1629_v28 = vpop.f32.mrf.mxu2  ;;  %v1294_v35 = vpop.f32.mrf.mxu0 }
 0x293   :  { %v1798_v29 = vpop.f32.mrf.mxu3  ;;  %v1630_v33 = vadd.f32 %v1629_v28, %v1461_v26  ;;  %v1463_v40 = vpop.f32.mrf.mxu1  ;;  %v2637_v39 = vmax.f32 %v2573_v36, 0.0 }
 0x294   :  { %v1464_v50 = vadd.f32 %v1463_v40, %v1294_v35 }
 0x295   :  { %v1799_v41 = vadd.f32 %v1798_v29, %v1630_v33 }
 0x297   :  { %v2446_v19 = vmul.f32 %v2373_v31, %v1799_v41 }
 0x299   :  { %v2574_v51 = vadd.f32 %v2510_v32, %v2446_v19 }
 0x29a   :  { %v1632_v42 = vpop.f32.mrf.mxu2  ;;  %v1296_v37 = vpop.f32.mrf.mxu0 }
 0x29b   :  { %v1801_v45 = vpop.f32.mrf.mxu3  ;;  %v2638_v44 = vmax.f32 %v2574_v51, 0.0  ;;  %v1633_v52 = vadd.f32 %v1632_v42, %v1464_v50  ;;  %v1465_v54 = vpop.f32.mrf.mxu1 }
 0x29c   :  { %v1466_v38 = vadd.f32 %v1465_v54, %v1296_v37 }
 0x29d   :  { %v3089_v27 = vpack.c.bf16 %v2638_v44, %v2637_v39  ;;  %v1802_v55 = vadd.f32 %v1801_v45, %v1633_v52 }
 0x29f   :  { %3125 = vst [vmem:[%s4060_s4 + $0xf0] sm:$0xff] %v3089_v27   ;;  %v2447_v58 = vmul.f32 %v2378_v57, %v1802_v55 }
 0x2a1   :  { %v2575_v53 = vadd.f32 %v2511_v59, %v2447_v58 }
 0x2a2   :  { %v1634_v47 = vpop.f32.mrf.mxu2 }
 0x2a3   :  { %v1635_v49 = vadd.f32 %v1634_v47, %v1466_v38  ;;  %v1803_v48 = vpop.f32.mrf.mxu3  ;;  %v2639_v1 = vmax.f32 %v2575_v53, 0.0 }
 0x2a5   :  { %v1804_v60 = vadd.f32 %v1803_v48, %v1635_v49 }
 0x2a7   :  { %v2448_v43 = vmul.f32 %v2383_v61, %v1804_v60 }
 0x2a9   :  { %v2576_v62 = vadd.f32 %v2512_v46, %v2448_v43 }
 0x2ab   :  { %v2640_v56 = vmax.f32 %v2576_v62, 0.0 }
 0x2ad   :  { %v3094_v6 = vpack.c.bf16 %v2640_v56, %v2639_v1 }
 0x2af   :  { %3126 = vst [vmem:[%s4060_s4 + $0xf8] sm:$0xff] %v3094_v6  }
 0x2b0   :  { %2773 = vsyncpa [#allocation4], 1 }

// kernel: model_forward.15
= control target key start
LH: loop header
LB: loop body
LE: loop exit
PB: predicated region body
PF: predicated region fallthrough
CT: control target
= control target key end

     0   :  { %9 = vsyncpa [#allocation4], 0  ;;  %s3096_s18 = smov [#allocation3]   ;;  %s3097_s20 = smov 512   ;;  %s3992_s0 = inlined_call_operand.hbm [shape: s8[512,512], index: 0, kind: input, shape index: {}]   ;;  %s3993_s1 = inlined_call_operand.vmem [shape: bf16[512,128], index: 1, kind: input, shape index: {}]   ;;  %s3994_s2 = inlined_call_operand.vmem [shape: f32[512,1], index: 2, kind: input, shape index: {}]   ;;  %s3995_s3 = inlined_call_operand.vmem [shape: f32[512,128], index: 3, kind: input, shape index: {}]   ;;  %s3996_s4 = inlined_call_operand.vmem [shape: bf16[512,128], index: 4, kind: output, shape index: {}]  }
   0x1   :  { %s14_s17 = sshll.u32 %s3992_s0, 4  ;;  %s16_s19 = sshll.u32 %s3096_s18, 4  ;;  %s15_s17 = int_to_ptr.hbm [resolvable:$true] %s14_s17  ;;  %s17_s19 = int_to_ptr.vmem [resolvable:$true] %s16_s19 }
   0x2   :  { %s3098_s21 = smov 32  }
   0x3   :  { %22 = dma.hbm_to_vmem [thread:$0]  %s15_s17, 8192, %s17_s19, [#allocation4], %s3097_s20, %s3097_s20, %s3098_s21  }
   0x4   :  { %3094 = dma.done.wait [#allocation4], 8192  }
   0x5   :  { %3095 = vsyncadd [#allocation4], 4294959104  ;;  %v2847_v0 = vld [vmem:[%s3993_s1 + $0x38] sm:$0xff]  ;;  %v2846_v4 = vld [vmem:[%s3993_s1 + $0x30] sm:$0xff]  ;;  %v3099_v29 = vmov 0  }
   0x6   :  { %v2855_v1 = vld [vmem:[%s3993_s1 + $0x78] sm:$0xff]  ;;  %1130 = vmatpush.bf16.msra.mxu0 %v2847_v0  ;;  %v2854_v5 = vld [vmem:[%s3993_s1 + $0x70] sm:$0xff]  ;;  %v2845_v8 = vld [vmem:[%s3993_s1 + $0x28] sm:$0xff]  ;;  %3067 = vset.pattern.permute.xlu0 %v3099_v29 }
   0x7   :  { %v2863_v2 = vld [vmem:[%s3993_s1 + $0xb8] sm:$0xff]  ;;  %1299 = vmatpush.bf16.msra.mxu1 %v2855_v1  ;;  %v2862_v6 = vld [vmem:[%s3993_s1 + $0xb0] sm:$0xff]  ;;  %v2853_v9 = vld [vmem:[%s3993_s1 + $0x68] sm:$0xff]  ;;  %3068 = vset.pattern.permute.xlu1 %v3099_v29 }
   0x8   :  { %v2871_v3 = vld [vmem:[%s3993_s1 + $0xf8] sm:$0xff]  ;;  %1468 = vmatpush.bf16.msra.mxu2 %v2863_v2  ;;  %v2870_v7 = vld [vmem:[%s3993_s1 + $0xf0] sm:$0xff]  ;;  %v2861_v10 = vld [vmem:[%s3993_s1 + $0xa8] sm:$0xff]  ;;  %3069 = vset.pattern.permute.xlu2 %v3099_v29 }
   0x9   :  { %1637 = vmatpush.bf16.msra.mxu3 %v2871_v3  ;;  %v2869_v11 = vld [vmem:[%s3993_s1 + $0xe8] sm:$0xff]  ;;  %v2844_v12 = vld [vmem:[%s3993_s1 + $0x20] sm:$0xff]  ;;  %v2843_v16 = vld [vmem:[%s3993_s1 + $0x18] sm:$0xff] }
   0xa   :  { %1131 = vmatpush.bf16.msra.mxu0 %v2846_v4  ;;  %v2852_v13 = vld [vmem:[%s3993_s1 + $0x60] sm:$0xff]  ;;  %v2851_v17 = vld [vmem:[%s3993_s1 + $0x58] sm:$0xff]  ;;  %v2842_v20 = vld [vmem:[%s3993_s1 + $0x10] sm:$0xff] }
   0xb   :  { %1300 = vmatpush.bf16.msra.mxu1 %v2854_v5  ;;  %v2860_v14 = vld [vmem:[%s3993_s1 + $0xa0] sm:$0xff]  ;;  %v2859_v18 = vld [vmem:[%s3993_s1 + $0x98] sm:$0xff]  ;;  %v2850_v21 = vld [vmem:[%s3993_s1 + $0x50] sm:$0xff] }
   0xc   :  { %1469 = vmatpush.bf16.msra.mxu2 %v2862_v6  ;;  %v2868_v15 = vld [vmem:[%s3993_s1 + $0xe0] sm:$0xff]  ;;  %v2867_v19 = vld [vmem:[%s3993_s1 + $0xd8] sm:$0xff]  ;;  %v2858_v22 = vld [vmem:[%s3993_s1 + $0x90] sm:$0xff] }
   0xd   :  { %1638 = vmatpush.bf16.msra.mxu3 %v2870_v7  ;;  %v3197_v23 = vld [vmem:[#allocation3] sm:$0xff]  ;;  %v3199_v24 = vld [vmem:[#allocation3 + $0x8] sm:$0xff]  ;;  %v2866_v26 = vld [vmem:[%s3993_s1 + $0xd0] sm:$0xff] }
   0xe   :  { %1132 = vmatpush.bf16.msra.mxu0 %v2845_v8  ;;  %v2001_v25 = vld [vmem:[%s3994_s2] sm:$0xff]  ;;  %v3207_v27 = vld [vmem:[#allocation3 + $0x10] sm:$0xff]  ;;  %v3209_v28 = vld [vmem:[#allocation3 + $0x18] sm:$0xff]  ;;  %v165_v30 = vunpack.c.0.s8 %v3197_v23  ;;  %v169_v31 = vunpack.c.1.s8 %v3197_v23  ;;  %v166_v32 = vunpack.c.0.s8 %v3199_v24  ;;  %v170_v33 = vunpack.c.1.s8 %v3199_v24 }
   0xf   :  { %1301 = vmatpush.bf16.msra.mxu1 %v2853_v9  ;;  %2067 = vperm.xlu0 %3067, %v2001_v25   ;;  %v2841_v34 = vld [vmem:[%s3993_s1 + $0x8] sm:$0xff]  ;;  %v167_v36 = vunpack.c.0.s8 %v3207_v27  ;;  %v171_v37 = vunpack.c.1.s8 %v3207_v27  ;;  %v168_v38 = vunpack.c.0.s8 %v3209_v28  ;;  %v172_v39 = vunpack.c.1.s8 %v3209_v28  ;;  %v2840_v46 = vld [vmem:[%s3993_s1] sm:$0xff]  ;;  %v2003_v59 = vld [vmem:[%s3994_s2 + $0x10] sm:$0xff] }
  0x10   :  { %1470 = vmatpush.bf16.msra.mxu2 %v2861_v10  ;;  %v2849_v35 = vld [vmem:[%s3993_s1 + $0x48] sm:$0xff]  ;;  %v421_v42 = vcvt.s32.f32 %v165_v30  ;;  %v425_v43 = vcvt.s32.f32 %v169_v31  ;;  %v422_v44 = vcvt.s32.f32 %v166_v32  ;;  %v426_v45 = vcvt.s32.f32 %v170_v33  ;;  %v2848_v47 = vld [vmem:[%s3993_s1 + $0x40] sm:$0xff]  ;;  %2077 = vperm.xlu1 %3068, %v2003_v59   ;;  %v2004_v4 = vld [vmem:[%s3994_s2 + $0x18] sm:$0xff] }
  0x11   :  { %1639 = vmatpush.bf16.msra.mxu3 %v2869_v11  ;;  %v2857_v40 = vld [vmem:[%s3993_s1 + $0x88] sm:$0xff]  ;;  %v423_v48 = vcvt.s32.f32 %v167_v36  ;;  %v427_v49 = vcvt.s32.f32 %v171_v37  ;;  %v424_v50 = vcvt.s32.f32 %v168_v38  ;;  %v428_v51 = vcvt.s32.f32 %v172_v39  ;;  %v2856_v53 = vld [vmem:[%s3993_s1 + $0x80] sm:$0xff] }
  0x12   :  { %1133 = vmatpush.bf16.msra.mxu0 %v2844_v12  ;;  %v2865_v41 = vld [vmem:[%s3993_s1 + $0xc8] sm:$0xff]  ;;  %v2864_v54 = vld [vmem:[%s3993_s1 + $0xc0] sm:$0xff]  ;;  %v677_v55 = vpack.c.bf16 %v425_v43, %v421_v42  ;;  %v678_v56 = vpack.c.bf16 %v426_v45, %v422_v44  ;;  %v173_v60 = vunpack.c.2.s8 %v3197_v23  ;;  %v177_v61 = vunpack.c.3.s8 %v3197_v23  ;;  %v2008_v43 = vld [vmem:[%s3994_s2 + $0x38] sm:$0xff] }
  0x13   :  { %1302 = vmatpush.bf16.msra.mxu1 %v2852_v13  ;;  %v2002_v52 = vld [vmem:[%s3994_s2 + $0x8] sm:$0xff]  ;;  %v679_v57 = vpack.c.bf16 %v427_v49, %v423_v48  ;;  %v680_v58 = vpack.c.bf16 %v428_v51, %v424_v50  ;;  %v174_v62 = vunpack.c.2.s8 %v3199_v24  ;;  %v178_v63 = vunpack.c.3.s8 %v3199_v24  ;;  %v2005_v42 = vld [vmem:[%s3994_s2 + $0x20] sm:$0xff] }
  0x14   :  { %1471 = vmatpush.bf16.msra.mxu2 %v2860_v14  ;;  %v175_v0 = vunpack.c.2.s8 %v3207_v27  ;;  %v179_v1 = vunpack.c.3.s8 %v3207_v27  ;;  %v176_v2 = vunpack.c.2.s8 %v3209_v28  ;;  %v180_v3 = vunpack.c.3.s8 %v3209_v28  ;;  %2087 = vperm.xlu2 %3069, %v2005_v42  }
  0x15   :  { %1640 = vmatpush.bf16.msra.mxu3 %v2868_v15  ;;  %v429_v5 = vcvt.s32.f32 %v173_v60  ;;  %v433_v6 = vcvt.s32.f32 %v177_v61  ;;  %v430_v7 = vcvt.s32.f32 %v174_v62  ;;  %v434_v8 = vcvt.s32.f32 %v178_v63 }
  0x16   :  { %1134 = vmatpush.bf16.msra.mxu0 %v2843_v16  ;;  %v431_v9 = vcvt.s32.f32 %v175_v0  ;;  %v435_v10 = vcvt.s32.f32 %v179_v1  ;;  %v432_v11 = vcvt.s32.f32 %v176_v2  ;;  %v436_v12 = vcvt.s32.f32 %v180_v3  ;;  %v109_v0 = vld [vmem:[#allocation3 + $0x40] sm:$0xff]  ;;  %v110_v1 = vld [vmem:[#allocation3 + $0x48] sm:$0xff] }
  0x17   :  { %1303 = vmatpush.bf16.msra.mxu1 %v2851_v17  ;;  %2072 = vperm.xlu0 %3067, %v2002_v52   ;;  %v681_v13 = vpack.c.bf16 %v433_v6, %v429_v5  ;;  %v682_v14 = vpack.c.bf16 %v434_v8, %v430_v7  ;;  %v105_v17 = vld [vmem:[#allocation3 + $0x20] sm:$0xff]  ;;  %v2006_v2 = vld [vmem:[%s3994_s2 + $0x28] sm:$0xff]  ;;  %v112_v5 = vld [vmem:[#allocation3 + $0x58] sm:$0xff]  ;;  %v197_v6 = vunpack.c.0.s8 %v109_v0  ;;  %v201_v7 = vunpack.c.1.s8 %v109_v0 }
  0x18   :  { %1472 = vmatpush.bf16.msra.mxu2 %v2859_v18  ;;  %2082 = vperm.xlu1 %3068, %v2004_v4   ;;  %v683_v15 = vpack.c.bf16 %v435_v10, %v431_v9  ;;  %v684_v16 = vpack.c.bf16 %v436_v12, %v432_v11  ;;  %v106_v18 = vld [vmem:[#allocation3 + $0x28] sm:$0xff]  ;;  %v189_v44 = vunpack.c.2.s8 %v105_v17  ;;  %v193_v45 = vunpack.c.3.s8 %v105_v17  ;;  %v111_v4 = vld [vmem:[#allocation3 + $0x50] sm:$0xff] }
  0x19   :  { %1641 = vmatpush.bf16.msra.mxu3 %v2867_v19  ;;  %v107_v19 = vld [vmem:[#allocation3 + $0x30] sm:$0xff]  ;;  %v182_v23 = vunpack.c.0.s8 %v106_v18  ;;  %v186_v24 = vunpack.c.1.s8 %v106_v18  ;;  %v2010_v3 = vld [vmem:[%s3994_s2 + $0x48] sm:$0xff]  ;;  %v198_v8 = vunpack.c.0.s8 %v110_v1  ;;  %v202_v9 = vunpack.c.1.s8 %v110_v1 }
  0x1a   :  { %1135 = vmatpush.bf16.msra.mxu0 %v2842_v20  ;;  %v108_v20 = vld [vmem:[#allocation3 + $0x38] sm:$0xff]  ;;  %v183_v25 = vunpack.c.0.s8 %v107_v19  ;;  %v191_v48 = vunpack.c.2.s8 %v107_v19  ;;  %v195_v49 = vunpack.c.3.s8 %v107_v19  ;;  %v445_v52 = vcvt.s32.f32 %v189_v44 }
  0x1b   :  { %1304 = vmatpush.bf16.msra.mxu1 %v2850_v21  ;;  %v181_v21 = vunpack.c.0.s8 %v105_v17  ;;  %v184_v27 = vunpack.c.0.s8 %v108_v20  ;;  %v188_v28 = vunpack.c.1.s8 %v108_v20  ;;  %v438_v31 = vcvt.s32.f32 %v182_v23 }
  0x1c   :  { %1473 = vmatpush.bf16.msra.mxu2 %v2858_v22  ;;  %v185_v22 = vunpack.c.1.s8 %v105_v17  ;;  %v442_v32 = vcvt.s32.f32 %v186_v24  ;;  %v439_v33 = vcvt.s32.f32 %v183_v25  ;;  %v192_v50 = vunpack.c.2.s8 %v108_v20  ;;  %2092 = vperm.xlu2 %3069, %v2006_v2  }
  0x1d   :  { %1642 = vmatpush.bf16.msra.mxu3 %v2866_v26  ;;  %v187_v26 = vunpack.c.1.s8 %v107_v19  ;;  %v437_v29 = vcvt.s32.f32 %v181_v21  ;;  %v444_v36 = vcvt.s32.f32 %v188_v28  ;;  %v196_v51 = vunpack.c.3.s8 %v108_v20 }
  0x1e   :  { %1136 = vmatpush.bf16.msra.mxu0 %v2841_v34  ;;  %v441_v30 = vcvt.s32.f32 %v185_v22  ;;  %v686_v38 = vpack.c.bf16 %v442_v32, %v438_v31  ;;  %v199_v10 = vunpack.c.0.s8 %v111_v4  ;;  %v203_v11 = vunpack.c.1.s8 %v111_v4 }
  0x1f   :  { %1305 = vmatpush.bf16.msra.mxu1 %v2849_v35  ;;  %v443_v34 = vcvt.s32.f32 %v187_v26  ;;  %v440_v35 = vcvt.s32.f32 %v184_v27  ;;  %v452_v59 = vcvt.s32.f32 %v196_v51  ;;  %v200_v12 = vunpack.c.0.s8 %v112_v5  ;;  %v2011_v26 = vld [vmem:[%s3994_s2 + $0x50] sm:$0xff]  ;;  %v2009_v27 = vld [vmem:[%s3994_s2 + $0x40] sm:$0xff]  ;;  %v2014_v51 = vld [vmem:[%s3994_s2 + $0x68] sm:$0xff] }
  0x20   :  { %1474 = vmatpush.bf16.msra.mxu2 %v2857_v40  ;;  %v685_v37 = vpack.c.bf16 %v441_v30, %v437_v29  ;;  %2102 = vperm.xlu1 %3068, %v2008_v43   ;;  %v458_v17 = vcvt.s32.f32 %v202_v9  ;;  %v459_v19 = vcvt.s32.f32 %v203_v11  ;;  %v205_v28 = vunpack.c.2.s8 %v109_v0 }
  0x21   :  { %1643 = vmatpush.bf16.msra.mxu3 %v2865_v41  ;;  %v687_v39 = vpack.c.bf16 %v443_v34, %v439_v33  ;;  %v688_v40 = vpack.c.bf16 %v444_v36, %v440_v35  ;;  %v2007_v41 = vld [vmem:[%s3994_s2 + $0x30] sm:$0xff]  ;;  %v456_v20 = vcvt.s32.f32 %v200_v12  ;;  %v209_v29 = vunpack.c.3.s8 %v109_v0 }
  0x22   :  { %1137 = vmatpush.bf16.msra.mxu0 %v2840_v46  ;;  %2097 = vperm.xlu0 %3067, %v2007_v41   ;;  %v190_v46 = vunpack.c.2.s8 %v106_v18  ;;  %v206_v30 = vunpack.c.2.s8 %v110_v1  ;;  %v210_v31 = vunpack.c.3.s8 %v110_v1  ;;  %v207_v32 = vunpack.c.2.s8 %v111_v4 }
  0x23   :  { %1306 = vmatpush.bf16.msra.mxu1 %v2848_v47  ;;  %v194_v47 = vunpack.c.3.s8 %v106_v18  ;;  %v455_v18 = vcvt.s32.f32 %v199_v10  ;;  %v211_v33 = vunpack.c.3.s8 %v111_v4  ;;  %v208_v34 = vunpack.c.2.s8 %v112_v5 }
  0x24   :  { %1475 = vmatpush.bf16.msra.mxu2 %v2856_v53  ;;  %v449_v53 = vcvt.s32.f32 %v193_v45  ;;  %2107 = vperm.xlu2 %3069, %v2009_v27   ;;  %v212_v35 = vunpack.c.3.s8 %v112_v5  ;;  %v461_v36 = vcvt.s32.f32 %v205_v28 }
  0x25   :  { %1644 = vmatpush.bf16.msra.mxu3 %v2864_v54  ;;  %1138 = vmatmul.bf16.vlgmr.msra.gmra.mxu0 %v677_v55  ;;  %v446_v54 = vcvt.s32.f32 %v190_v46  ;;  %v450_v55 = vcvt.s32.f32 %v194_v47  ;;  %v695_v24 = vpack.c.bf16 %v459_v19, %v455_v18  ;;  %v467_v41 = vcvt.s32.f32 %v211_v33  ;;  %v2012_v18 = vld [vmem:[%s3994_s2 + $0x58] sm:$0xff]  ;;  %v118_v33 = vld [vmem:[#allocation3 + $0x88] sm:$0xff] }
  0x26   :  { %1307 = vmatmul.bf16.vlgmr.msra.gmra.mxu1 %v678_v56  ;;  %v447_v56 = vcvt.s32.f32 %v191_v48  ;;  %v689_v60 = vpack.c.bf16 %v449_v53, %v445_v52  ;;  %v464_v42 = vcvt.s32.f32 %v208_v34  ;;  %v468_v43 = vcvt.s32.f32 %v212_v35  ;;  %v113_v48 = vld [vmem:[#allocation3 + $0x60] sm:$0xff]  ;;  %v115_v52 = vld [vmem:[#allocation3 + $0x70] sm:$0xff]  ;;  %v116_v53 = vld [vmem:[#allocation3 + $0x78] sm:$0xff] }
  0x27   :  { %1476 = vmatmul.bf16.vlgmr.msra.gmra.mxu2 %v679_v57  ;;  %v451_v57 = vcvt.s32.f32 %v195_v49  ;;  %v690_v61 = vpack.c.bf16 %v450_v55, %v446_v54  ;;  %v114_v49 = vld [vmem:[#allocation3 + $0x68] sm:$0xff]  ;;  %v213_v54 = vunpack.c.0.s8 %v113_v48  ;;  %v217_v55 = vunpack.c.1.s8 %v113_v48  ;;  %v119_v34 = vld [vmem:[#allocation3 + $0x90] sm:$0xff]  ;;  %v120_v35 = vld [vmem:[#allocation3 + $0x98] sm:$0xff] }
  0x28   :  { %1645 = vmatmul.bf16.vlgmr.msra.gmra.mxu3 %v680_v58  ;;  %v448_v58 = vcvt.s32.f32 %v192_v50  ;;  %2117 = vperm.xlu1 %3068, %v2011_v26   ;;  %v700_v47 = vpack.c.bf16 %v468_v43, %v464_v42  ;;  %v2013_v50 = vld [vmem:[%s3994_s2 + $0x60] sm:$0xff]  ;;  %v221_v10 = vunpack.c.2.s8 %v113_v48  ;;  %v225_v11 = vunpack.c.3.s8 %v113_v48 }
  0x29   :  { %v691_v62 = vpack.c.bf16 %v451_v57, %v447_v56  ;;  %v214_v56 = vunpack.c.0.s8 %v114_v49  ;;  %v218_v57 = vunpack.c.1.s8 %v114_v49  ;;  %v222_v12 = vunpack.c.2.s8 %v114_v49 }
  0x2a   :  { %v692_v63 = vpack.c.bf16 %v452_v59, %v448_v58  ;;  %2112 = vperm.xlu0 %3067, %v2010_v3   ;;  %v215_v58 = vunpack.c.0.s8 %v115_v52  ;;  %v219_v59 = vunpack.c.1.s8 %v115_v52  ;;  %v477_v19 = vcvt.s32.f32 %v221_v10  ;;  %v2019_v10 = vld [vmem:[%s3994_s2 + $0x90] sm:$0xff] }
  0x2b   :  { %v470_v0 = vcvt.s32.f32 %v214_v56  ;;  %v474_v1 = vcvt.s32.f32 %v218_v57  ;;  %v232_v42 = vunpack.c.0.s8 %v120_v35  ;;  %v236_v43 = vunpack.c.1.s8 %v120_v35 }
  0x2c   :  { %v471_v2 = vcvt.s32.f32 %v215_v58  ;;  %v475_v3 = vcvt.s32.f32 %v219_v59  ;;  %2122 = vperm.xlu2 %3069, %v2012_v18   ;;  %v2015_v59 = vld [vmem:[%s3994_s2 + $0x70] sm:$0xff] }
  0x30   :  { %2132 = vperm.xlu1 %3068, %v2014_v51   ;;  %v488_v51 = vcvt.s32.f32 %v232_v42 }
  0x32   :  { %2127 = vperm.xlu0 %3067, %v2013_v50  }
  0x34   :  { %2137 = vperm.xlu2 %3069, %v2015_v59   ;;  %v2018_v59 = vld [vmem:[%s3994_s2 + $0x88] sm:$0xff] }
  0x35   :  { %1143 = vmatmul.bf16.gmra.mxu0 %v681_v13  ;;  %v204_v13 = vunpack.c.1.s8 %v112_v5 }
  0x36   :  { %1312 = vmatmul.bf16.gmra.mxu1 %v682_v14  ;;  %v453_v14 = vcvt.s32.f32 %v197_v6 }
  0x37   :  { %1481 = vmatmul.bf16.gmra.mxu2 %v683_v15  ;;  %v457_v15 = vcvt.s32.f32 %v201_v7  ;;  %v460_v21 = vcvt.s32.f32 %v204_v13  ;;  %v702_v7 = vpack.c.bf16 %v474_v1, %v470_v0  ;;  %v226_v13 = vunpack.c.3.s8 %v114_v49 }
  0x38   :  { %1650 = vmatmul.bf16.gmra.mxu3 %v684_v16  ;;  %v454_v16 = vcvt.s32.f32 %v198_v8  ;;  %v703_v8 = vpack.c.bf16 %v475_v3, %v471_v2  ;;  %v238_v2 = vunpack.c.2.s8 %v118_v33  ;;  %v242_v3 = vunpack.c.3.s8 %v118_v33 }
  0x39   :  { %v693_v22 = vpack.c.bf16 %v457_v15, %v453_v14  ;;  %v696_v25 = vpack.c.bf16 %v460_v21, %v456_v20  ;;  %v223_v14 = vunpack.c.2.s8 %v115_v52  ;;  %v227_v15 = vunpack.c.3.s8 %v115_v52 }
  0x3a   :  { %v694_v23 = vpack.c.bf16 %v458_v17, %v454_v16  ;;  %v224_v16 = vunpack.c.2.s8 %v116_v53  ;;  %v228_v17 = vunpack.c.3.s8 %v116_v53  ;;  %v481_v20 = vcvt.s32.f32 %v225_v11 }
  0x3b   :  { %v478_v21 = vcvt.s32.f32 %v222_v12  ;;  %v492_v52 = vcvt.s32.f32 %v236_v43 }
  0x3c   :  { %v484_v26 = vcvt.s32.f32 %v228_v17  ;;  %v705_v27 = vpack.c.bf16 %v481_v20, %v477_v19  ;;  %2152 = vperm.xlu2 %3069, %v2018_v59  }
  0x3d   :  { %v712_v58 = vpack.c.bf16 %v492_v52, %v488_v51 }
  0x45   :  { %1148 = vmatmul.bf16.gmra.mxu0 %v685_v37  ;;  %v465_v37 = vcvt.s32.f32 %v209_v29 }
  0x46   :  { %1317 = vmatmul.bf16.gmra.mxu1 %v686_v38  ;;  %v462_v38 = vcvt.s32.f32 %v206_v30 }
  0x47   :  { %1486 = vmatmul.bf16.gmra.mxu2 %v687_v39  ;;  %v466_v39 = vcvt.s32.f32 %v210_v31  ;;  %v697_v44 = vpack.c.bf16 %v465_v37, %v461_v36  ;;  %v2016_v31 = vld [vmem:[%s3994_s2 + $0x78] sm:$0xff] }
  0x48   :  { %1655 = vmatmul.bf16.gmra.mxu3 %v688_v40  ;;  %v463_v40 = vcvt.s32.f32 %v207_v32  ;;  %2142 = vperm.xlu0 %3067, %v2016_v31   ;;  %v117_v32 = vld [vmem:[#allocation3 + $0x80] sm:$0xff]  ;;  %v2020_v31 = vld [vmem:[%s3994_s2 + $0x98] sm:$0xff] }
  0x49   :  { %v698_v45 = vpack.c.bf16 %v466_v39, %v462_v38  ;;  %v229_v36 = vunpack.c.0.s8 %v117_v32  ;;  %v233_v37 = vunpack.c.1.s8 %v117_v32  ;;  %v230_v38 = vunpack.c.0.s8 %v118_v33 }
  0x4a   :  { %v699_v46 = vpack.c.bf16 %v467_v41, %v463_v40  ;;  %v234_v39 = vunpack.c.1.s8 %v118_v33  ;;  %v231_v40 = vunpack.c.0.s8 %v119_v34  ;;  %v235_v41 = vunpack.c.1.s8 %v119_v34 }
  0x4b   :  { %v237_v0 = vunpack.c.2.s8 %v117_v32  ;;  %v241_v1 = vunpack.c.3.s8 %v117_v32 }
  0x4c   :  { %v490_v48 = vcvt.s32.f32 %v234_v39  ;;  %v487_v49 = vcvt.s32.f32 %v231_v40  ;;  %v491_v50 = vcvt.s32.f32 %v235_v41  ;;  %v3313_v39 = vld [vmem:[#allocation3 + $0xa8] sm:$0xff]  ;;  %v3315_v40 = vld [vmem:[#allocation3 + $0xb0] sm:$0xff]  ;;  %v3317_v41 = vld [vmem:[#allocation3 + $0xb8] sm:$0xff] }
  0x4d   :  { %v493_v12 = vcvt.s32.f32 %v237_v0  ;;  %v250_v51 = vunpack.c.1.s8 %v3313_v39  ;;  %v247_v52 = vunpack.c.0.s8 %v3315_v40 }
  0x4e   :  { %v711_v57 = vpack.c.bf16 %v491_v50, %v487_v49  ;;  %v246_v50 = vunpack.c.0.s8 %v3313_v39 }
  0x4f   :  { %v506_v0 = vcvt.s32.f32 %v250_v51 }
  0x50   :  { %2157 = vperm.xlu0 %3067, %v2019_v10  }
  0x55   :  { %1153 = vmatmul.bf16.gmra.mxu0 %v689_v60  ;;  %v216_v60 = vunpack.c.0.s8 %v116_v53 }
  0x56   :  { %1322 = vmatmul.bf16.gmra.mxu1 %v690_v61  ;;  %v220_v61 = vunpack.c.1.s8 %v116_v53 }
  0x57   :  { %1491 = vmatmul.bf16.gmra.mxu2 %v691_v62  ;;  %v469_v62 = vcvt.s32.f32 %v213_v54  ;;  %v472_v4 = vcvt.s32.f32 %v216_v60 }
  0x58   :  { %1660 = vmatmul.bf16.gmra.mxu3 %v692_v63  ;;  %v473_v63 = vcvt.s32.f32 %v217_v55  ;;  %v476_v5 = vcvt.s32.f32 %v220_v61 }
  0x5a   :  { %v701_v6 = vpack.c.bf16 %v473_v63, %v469_v62  ;;  %v704_v9 = vpack.c.bf16 %v476_v5, %v472_v4 }
  0x65   :  { %1158 = vmatmul.bf16.gmra.mxu0 %v693_v22  ;;  %v482_v22 = vcvt.s32.f32 %v226_v13  ;;  %v497_v13 = vcvt.s32.f32 %v241_v1  ;;  %v503_v1 = vcvt.s32.f32 %v247_v52 }
  0x66   :  { %1327 = vmatmul.bf16.gmra.mxu1 %v694_v23  ;;  %v479_v23 = vcvt.s32.f32 %v223_v14  ;;  %v494_v14 = vcvt.s32.f32 %v238_v2 }
  0x67   :  { %1496 = vmatmul.bf16.gmra.mxu2 %v695_v24  ;;  %v483_v24 = vcvt.s32.f32 %v227_v15  ;;  %v706_v28 = vpack.c.bf16 %v482_v22, %v478_v21  ;;  %v498_v15 = vcvt.s32.f32 %v242_v3 }
  0x68   :  { %1665 = vmatmul.bf16.gmra.mxu3 %v696_v25  ;;  %v480_v25 = vcvt.s32.f32 %v224_v16 }
  0x69   :  { %v707_v29 = vpack.c.bf16 %v483_v24, %v479_v23  ;;  %v713_v24 = vpack.c.bf16 %v497_v13, %v493_v12 }
  0x6a   :  { %v708_v30 = vpack.c.bf16 %v484_v26, %v480_v25  ;;  %v714_v25 = vpack.c.bf16 %v498_v15, %v494_v14 }
  0x75   :  { %1163 = vmatmul.bf16.gmra.mxu0 %v697_v44  ;;  %v2017_v44 = vld [vmem:[%s3994_s2 + $0x80] sm:$0xff] }
  0x76   :  { %1332 = vmatmul.bf16.gmra.mxu1 %v698_v45  ;;  %2147 = vperm.xlu1 %3068, %v2017_v44   ;;  %v485_v45 = vcvt.s32.f32 %v229_v36  ;;  %v2450_v36 = vld [vmem:[%s3995_s3 + $0x8] sm:$0xff] }
  0x77   :  { %1501 = vmatmul.bf16.gmra.mxu2 %v699_v46  ;;  %v489_v46 = vcvt.s32.f32 %v233_v37  ;;  %v3311_v37 = vld [vmem:[#allocation3 + $0xa0] sm:$0xff] }
  0x78   :  { %1670 = vmatmul.bf16.gmra.mxu3 %v700_v47  ;;  %v486_v47 = vcvt.s32.f32 %v230_v38  ;;  %v249_v49 = vunpack.c.1.s8 %v3311_v37 }
  0x79   :  { %v709_v53 = vpack.c.bf16 %v489_v46, %v485_v45  ;;  %v245_v46 = vunpack.c.0.s8 %v3311_v37 }
  0x7a   :  { %v710_v54 = vpack.c.bf16 %v490_v48, %v486_v47 }
  0x7e   :  { %2162 = vperm.xlu1 %3068, %v2020_v31   ;;  %v254_v31 = vunpack.c.2.s8 %v3313_v39 }
  0x81   :  { %v2068_v61 = vpop.permute.xlu0 %2067 }
  0x82   :  { %v2078_v45 = vpop.permute.xlu1 %2077 }
  0x85   :  { %1168 = vmatmul.bf16.gmra.mxu0 %v701_v6  ;;  %v239_v6 = vunpack.c.2.s8 %v119_v34 }
  0x86   :  { %1337 = vmatmul.bf16.gmra.mxu1 %v702_v7  ;;  %v243_v7 = vunpack.c.3.s8 %v119_v34 }
  0x87   :  { %1506 = vmatmul.bf16.gmra.mxu2 %v703_v8  ;;  %v240_v8 = vunpack.c.2.s8 %v120_v35  ;;  %v495_v16 = vcvt.s32.f32 %v239_v6 }
  0x88   :  { %1675 = vmatmul.bf16.gmra.mxu3 %v704_v9  ;;  %v244_v9 = vunpack.c.3.s8 %v120_v35  ;;  %v499_v17 = vcvt.s32.f32 %v243_v7  ;;  %v2449_v35 = vld [vmem:[%s3995_s3] sm:$0xff] }
  0x89   :  { %v496_v18 = vcvt.s32.f32 %v240_v8  ;;  %v2073_v32 = vpop.permute.xlu0 %2072 }
  0x8a   :  { %v500_v19 = vcvt.s32.f32 %v244_v9 }
  0x95   :  { %1173 = vmatmul.bf16.gmra.mxu0 %v705_v27 }
  0x96   :  { %1342 = vmatmul.bf16.gmra.mxu1 %v706_v28 }
  0x97   :  { %1511 = vmatmul.bf16.gmra.mxu2 %v707_v29  ;;  %v715_v29 = vpack.c.bf16 %v499_v17, %v495_v16  ;;  %v2022_v16 = vld [vmem:[%s3994_s2 + $0xa8] sm:$0xff]  ;;  %v2083_v17 = vpop.permute.xlu1 %2082 }
  0x98   :  { %1680 = vmatmul.bf16.gmra.mxu3 %v708_v30  ;;  %v716_v30 = vpack.c.bf16 %v500_v19, %v496_v18  ;;  %2172 = vperm.xlu0 %3067, %v2022_v16  }
  0xa2   :  { %v1139_v55 = vpop.f32.mrf.mxu0 }
  0xa3   :  { %v1308_v56 = vpop.f32.mrf.mxu1 }
  0xa4   :  { %v1309_v60 = vadd.f32 %v1308_v56, %v1139_v55  ;;  %v251_v56 = vunpack.c.1.s8 %v3315_v40 }
  0xa5   :  { %1178 = vmatmul.bf16.gmra.mxu0 %v709_v53 }
  0xa6   :  { %1347 = vmatmul.bf16.gmra.mxu1 %v710_v54  ;;  %v507_v2 = vcvt.s32.f32 %v251_v56 }
  0xa7   :  { %1516 = vmatmul.bf16.gmra.mxu2 %v711_v57  ;;  %v248_v57 = vunpack.c.0.s8 %v3317_v41 }
  0xa8   :  { %1685 = vmatmul.bf16.gmra.mxu3 %v712_v58  ;;  %v252_v58 = vunpack.c.1.s8 %v3317_v41  ;;  %v719_v14 = vpack.c.bf16 %v507_v2, %v503_v1  ;;  %v2453_v1 = vld [vmem:[%s3995_s3 + $0x20] sm:$0xff]  ;;  %v2454_v2 = vld [vmem:[%s3995_s3 + $0x28] sm:$0xff] }
  0xa9   :  { %v504_v3 = vcvt.s32.f32 %v248_v57 }
  0xaa   :  { %v1477_v62 = vpop.f32.mrf.mxu2  ;;  %v1141_v4 = vpop.f32.mrf.mxu0 }
  0xab   :  { %v1646_v63 = vpop.f32.mrf.mxu3  ;;  %v1310_v5 = vpop.f32.mrf.mxu1  ;;  %v1478_v11 = vadd.f32 %v1477_v62, %v1309_v60  ;;  %v505_v62 = vcvt.s32.f32 %v249_v49 }
  0xac   :  { %v1311_v21 = vadd.f32 %v1310_v5, %v1141_v4  ;;  %v508_v4 = vcvt.s32.f32 %v252_v58 }
  0xad   :  { %v1647_v20 = vadd.f32 %v1646_v63, %v1478_v11  ;;  %v502_v63 = vcvt.s32.f32 %v246_v50 }
  0xae   :  { %v720_v15 = vpack.c.bf16 %v508_v4, %v504_v3  ;;  %v3365_v3 = vld [vmem:[#allocation3 + $0xc0] sm:$0xff] }
  0xaf   :  { %v2385_v33 = vmul.f32 %v2068_v61, %v1647_v20  ;;  %v501_v61 = vcvt.s32.f32 %v245_v46  ;;  %v718_v10 = vpack.c.bf16 %v506_v0, %v502_v63  ;;  %v2451_v20 = vld [vmem:[%s3995_s3 + $0x10] sm:$0xff]  ;;  %v510_v46 = vcvt.s32.f32 %v254_v31 }
  0xb1   :  { %v2513_v42 = vadd.f32 %v2449_v35, %v2385_v33  ;;  %v717_v9 = vpack.c.bf16 %v505_v62, %v501_v61  ;;  %v255_v33 = vunpack.c.2.s8 %v3315_v40  ;;  %v2021_v61 = vld [vmem:[%s3994_s2 + $0xa0] sm:$0xff] }
  0xb2   :  { %v1479_v22 = vpop.f32.mrf.mxu2  ;;  %v1144_v27 = vpop.f32.mrf.mxu0  ;;  %2167 = vperm.xlu2 %3069, %v2021_v61  }
  0xb3   :  { %v1648_v23 = vpop.f32.mrf.mxu3  ;;  %v1480_v26 = vadd.f32 %v1479_v22, %v1311_v21  ;;  %v1313_v28 = vpop.f32.mrf.mxu1  ;;  %v2452_v21 = vld [vmem:[%s3995_s3 + $0x18] sm:$0xff] }
  0xb4   :  { %v1314_v43 = vadd.f32 %v1313_v28, %v1144_v27  ;;  %v253_v27 = vunpack.c.2.s8 %v3311_v37 }
  0xb5   :  { %v1649_v34 = vadd.f32 %v1648_v23, %v1480_v26  ;;  %1183 = vmatmul.bf16.gmra.mxu0 %v713_v24  ;;  %v2088_v26 = vpop.permute.xlu2 %2087 }
  0xb6   :  { %1352 = vmatmul.bf16.gmra.mxu1 %v714_v25 }
  0xb7   :  { %v2386_v38 = vmul.f32 %v2073_v32, %v1649_v34  ;;  %1521 = vmatmul.bf16.gmra.mxu2 %v715_v29  ;;  %v258_v32 = vunpack.c.3.s8 %v3313_v39  ;;  %v509_v39 = vcvt.s32.f32 %v253_v27 }
  0xb8   :  { %1690 = vmatmul.bf16.gmra.mxu3 %v716_v30  ;;  %v257_v30 = vunpack.c.3.s8 %v3311_v37 }
  0xb9   :  { %v2514_v44 = vadd.f32 %v2450_v36, %v2386_v38  ;;  %v259_v38 = vunpack.c.3.s8 %v3315_v40 }
  0xba   :  { %v1482_v47 = vpop.f32.mrf.mxu2  ;;  %v1146_v54 = vpop.f32.mrf.mxu0 }
  0xbb   :  { %v1651_v48 = vpop.f32.mrf.mxu3  ;;  %v2875_v53 = vpack.c.bf16 %v2514_v44, %v2513_v42  ;;  %v1315_v55 = vpop.f32.mrf.mxu1  ;;  %v1483_v60 = vadd.f32 %v1482_v47, %v1314_v43  ;;  %v256_v42 = vunpack.c.2.s8 %v3317_v41  ;;  %v260_v43 = vunpack.c.3.s8 %v3317_v41  ;;  %v2023_v44 = vld [vmem:[%s3994_s2 + $0xb0] sm:$0xff] }
  0xbc   :  { %v1316_v6 = vadd.f32 %v1315_v55, %v1146_v54  ;;  %2177 = vperm.xlu1 %3068, %v2023_v44   ;;  %v514_v47 = vcvt.s32.f32 %v258_v32  ;;  %v515_v40 = vcvt.s32.f32 %v259_v38 }
  0xbd   :  { %2876 = vst [vmem:[%s3996_s4] sm:$0xff] %v2875_v53   ;;  %v1652_v5 = vadd.f32 %v1651_v48, %v1483_v60  ;;  %v511_v48 = vcvt.s32.f32 %v255_v33  ;;  %v512_v49 = vcvt.s32.f32 %v256_v42  ;;  %v516_v50 = vcvt.s32.f32 %v260_v43  ;;  %v2093_v62 = vpop.permute.xlu2 %2092 }
  0xbe   :  { %v722_v55 = vpack.c.bf16 %v514_v47, %v510_v46 }
  0xbf   :  { %v2387_v18 = vmul.f32 %v2078_v45, %v1652_v5  ;;  %v513_v45 = vcvt.s32.f32 %v257_v30  ;;  %v723_v59 = vpack.c.bf16 %v515_v40, %v511_v48  ;;  %v724_v60 = vpack.c.bf16 %v516_v50, %v512_v49  ;;  %v3367_v5 = vld [vmem:[#allocation3 + $0xc8] sm:$0xff]  ;;  %v2103_v40 = vpop.permute.xlu1 %2102 }
  0xc0   :  { %v266_v16 = vunpack.c.1.s8 %v3367_v5  ;;  %v2026_v48 = vld [vmem:[%s3994_s2 + $0xc8] sm:$0xff]  ;;  %v274_v61 = vunpack.c.3.s8 %v3367_v5 }
  0xc1   :  { %v2515_v23 = vadd.f32 %v2451_v20, %v2387_v18  ;;  %v721_v54 = vpack.c.bf16 %v513_v45, %v509_v39 }
  0xc2   :  { %v1484_v7 = vpop.f32.mrf.mxu2  ;;  %v1149_v12 = vpop.f32.mrf.mxu0 }
  0xc3   :  { %v1653_v8 = vpop.f32.mrf.mxu3  ;;  %v1485_v11 = vadd.f32 %v1484_v7, %v1316_v6  ;;  %v1318_v13 = vpop.f32.mrf.mxu1  ;;  %v3369_v6 = vld [vmem:[#allocation3 + $0xd0] sm:$0xff]  ;;  %v3371_v7 = vld [vmem:[#allocation3 + $0xd8] sm:$0xff] }
  0xc4   :  { %v1319_v24 = vadd.f32 %v1318_v13, %v1149_v12  ;;  %2192 = vperm.xlu1 %3068, %v2026_v48  }
  0xc5   :  { %v1654_v19 = vadd.f32 %v1653_v8, %v1485_v11  ;;  %1188 = vmatmul.bf16.gmra.mxu0 %v717_v9  ;;  %v261_v11 = vunpack.c.0.s8 %v3365_v3 }
  0xc6   :  { %1357 = vmatmul.bf16.gmra.mxu1 %v718_v10 }
  0xc7   :  { %v2388_v22 = vmul.f32 %v2083_v17, %v1654_v19  ;;  %1526 = vmatmul.bf16.gmra.mxu2 %v719_v14  ;;  %v265_v14 = vunpack.c.1.s8 %v3365_v3  ;;  %v263_v17 = vunpack.c.0.s8 %v3369_v6 }
  0xc8   :  { %1695 = vmatmul.bf16.gmra.mxu3 %v720_v15  ;;  %v262_v15 = vunpack.c.0.s8 %v3367_v5 }
  0xc9   :  { %v2516_v25 = vadd.f32 %v2452_v21, %v2388_v22  ;;  %v267_v21 = vunpack.c.1.s8 %v3369_v6  ;;  %v264_v22 = vunpack.c.0.s8 %v3371_v7  ;;  %v521_v27 = vcvt.s32.f32 %v265_v14 }
  0xca   :  { %v1487_v28 = vpop.f32.mrf.mxu2  ;;  %v1151_v35 = vpop.f32.mrf.mxu0  ;;  %v519_v30 = vcvt.s32.f32 %v263_v17 }
  0xcb   :  { %v1656_v29 = vpop.f32.mrf.mxu3  ;;  %v2880_v34 = vpack.c.bf16 %v2516_v25, %v2515_v23  ;;  %v1320_v36 = vpop.f32.mrf.mxu1  ;;  %v1488_v37 = vadd.f32 %v1487_v28, %v1319_v24  ;;  %v268_v23 = vunpack.c.1.s8 %v3371_v7  ;;  %v2025_v24 = vld [vmem:[%s3994_s2 + $0xc0] sm:$0xff]  ;;  %v518_v28 = vcvt.s32.f32 %v262_v15 }
  0xcc   :  { %v1321_v41 = vadd.f32 %v1320_v36, %v1151_v35  ;;  %2187 = vperm.xlu0 %3067, %v2025_v24   ;;  %v523_v31 = vcvt.s32.f32 %v267_v21  ;;  %v520_v32 = vcvt.s32.f32 %v264_v22  ;;  %v2098_v36 = vpop.permute.xlu0 %2097  ;;  %v2108_v17 = vpop.permute.xlu2 %2107 }
  0xcd   :  { %3032 = vst [vmem:[%s3996_s4 + $0x8] sm:$0xff] %v2880_v34   ;;  %v1657_v51 = vadd.f32 %v1656_v29, %v1488_v37  ;;  %v522_v29 = vcvt.s32.f32 %v266_v16  ;;  %v524_v33 = vcvt.s32.f32 %v268_v23 }
  0xce   :  { %v727_v46 = vpack.c.bf16 %v523_v31, %v519_v30  ;;  %v2457_v31 = vld [vmem:[%s3995_s3 + $0x40] sm:$0xff] }
  0xcf   :  { %v2389_v63 = vmul.f32 %v2088_v26, %v1657_v51  ;;  %v517_v26 = vcvt.s32.f32 %v261_v11  ;;  %v726_v44 = vpack.c.bf16 %v522_v29, %v518_v28  ;;  %v728_v47 = vpack.c.bf16 %v524_v33, %v520_v32  ;;  %v2455_v51 = vld [vmem:[%s3995_s3 + $0x30] sm:$0xff]  ;;  %v2458_v32 = vld [vmem:[%s3995_s3 + $0x48] sm:$0xff]  ;;  %v3419_v33 = vld [vmem:[#allocation3 + $0xe0] sm:$0xff] }
  0xd1   :  { %v2517_v8 = vadd.f32 %v2453_v1, %v2389_v63  ;;  %v725_v43 = vpack.c.bf16 %v521_v27, %v517_v26  ;;  %v2028_v27 = vld [vmem:[%s3994_s2 + $0xd8] sm:$0xff] }
  0xd2   :  { %v1489_v52 = vpop.f32.mrf.mxu2  ;;  %v1154_v57 = vpop.f32.mrf.mxu0 }
  0xd3   :  { %v1658_v53 = vpop.f32.mrf.mxu3  ;;  %v1490_v56 = vadd.f32 %v1489_v52, %v1321_v41  ;;  %v1323_v58 = vpop.f32.mrf.mxu1  ;;  %v2456_v41 = vld [vmem:[%s3995_s3 + $0x38] sm:$0xff] }
  0xd4   :  { %v1324_v9 = vadd.f32 %v1323_v58, %v1154_v57  ;;  %v2113_v28 = vpop.permute.xlu0 %2112  ;;  %2202 = vperm.xlu0 %3067, %v2028_v27  }
  0xd5   :  { %v1659_v0 = vadd.f32 %v1658_v53, %v1490_v56  ;;  %1193 = vmatmul.bf16.gmra.mxu0 %v721_v54  ;;  %v269_v56 = vunpack.c.2.s8 %v3365_v3 }
  0xd6   :  { %1362 = vmatmul.bf16.gmra.mxu1 %v722_v55 }
  0xd7   :  { %v2390_v4 = vmul.f32 %v2093_v62, %v1659_v0  ;;  %1531 = vmatmul.bf16.gmra.mxu2 %v723_v59  ;;  %v273_v59 = vunpack.c.3.s8 %v3365_v3  ;;  %v271_v62 = vunpack.c.2.s8 %v3369_v6 }
  0xd8   :  { %1700 = vmatmul.bf16.gmra.mxu3 %v724_v60  ;;  %v270_v60 = vunpack.c.2.s8 %v3367_v5  ;;  %v525_v5 = vcvt.s32.f32 %v269_v56 }
  0xd9   :  { %v2518_v10 = vadd.f32 %v2454_v2, %v2390_v4  ;;  %v275_v2 = vunpack.c.3.s8 %v3369_v6  ;;  %v272_v4 = vunpack.c.2.s8 %v3371_v7 }
  0xda   :  { %v1492_v12 = vpop.f32.mrf.mxu2  ;;  %v1156_v19 = vpop.f32.mrf.mxu0  ;;  %v526_v11 = vcvt.s32.f32 %v270_v60 }
  0xdb   :  { %v1661_v13 = vpop.f32.mrf.mxu3  ;;  %v2885_v18 = vpack.c.bf16 %v2518_v10, %v2517_v8  ;;  %v1325_v20 = vpop.f32.mrf.mxu1  ;;  %v1493_v25 = vadd.f32 %v1492_v12, %v1324_v9  ;;  %v276_v8 = vunpack.c.3.s8 %v3371_v7  ;;  %v2024_v9 = vld [vmem:[%s3994_s2 + $0xb8] sm:$0xff]  ;;  %v529_v10 = vcvt.s32.f32 %v273_v59 }
  0xdc   :  { %v1326_v35 = vadd.f32 %v1325_v20, %v1156_v19  ;;  %2182 = vperm.xlu2 %3069, %v2024_v9   ;;  %v530_v12 = vcvt.s32.f32 %v274_v61  ;;  %v531_v6 = vcvt.s32.f32 %v275_v2  ;;  %v528_v14 = vcvt.s32.f32 %v272_v4  ;;  %v2118_v2 = vpop.permute.xlu1 %2117 }
  0xdd   :  { %3033 = vst [vmem:[%s3996_s4 + $0x10] sm:$0xff] %v2885_v18   ;;  %v1662_v34 = vadd.f32 %v1661_v13, %v1493_v25  ;;  %v527_v13 = vcvt.s32.f32 %v271_v62  ;;  %v532_v15 = vcvt.s32.f32 %v276_v8  ;;  %v729_v20 = vpack.c.bf16 %v529_v10, %v525_v5 }
  0xde   :  { %v730_v21 = vpack.c.bf16 %v530_v12, %v526_v11 }
  0xdf   :  { %v2391_v49 = vmul.f32 %v2098_v36, %v1662_v34  ;;  %v731_v25 = vpack.c.bf16 %v531_v6, %v527_v13  ;;  %v732_v26 = vpack.c.bf16 %v532_v15, %v528_v14  ;;  %v3423_v36 = vld [vmem:[#allocation3 + $0xf0] sm:$0xff]  ;;  %v2123_v14 = vpop.permute.xlu2 %2122 }
  0xe0   :  { %v2027_v6 = vld [vmem:[%s3994_s2 + $0xd0] sm:$0xff] }
  0xe1   :  { %v2519_v53 = vadd.f32 %v2455_v51, %v2391_v49 }
  0xe2   :  { %v1494_v38 = vpop.f32.mrf.mxu2  ;;  %v1159_v39 = vpop.f32.mrf.mxu0 }
  0xe3   :  { %v1663_v42 = vpop.f32.mrf.mxu3  ;;  %v1495_v37 = vadd.f32 %v1494_v38, %v1326_v35  ;;  %v1328_v45 = vpop.f32.mrf.mxu1  ;;  %v3421_v35 = vld [vmem:[#allocation3 + $0xe8] sm:$0xff]  ;;  %v3425_v38 = vld [vmem:[#allocation3 + $0xf8] sm:$0xff] }
  0xe4   :  { %v1329_v54 = vadd.f32 %v1328_v45, %v1159_v39  ;;  %v282_v48 = vunpack.c.1.s8 %v3421_v35  ;;  %2197 = vperm.xlu2 %3069, %v2027_v6   ;;  %v290_v27 = vunpack.c.3.s8 %v3421_v35 }
  0xe5   :  { %v1664_v50 = vadd.f32 %v1663_v42, %v1495_v37  ;;  %1198 = vmatmul.bf16.gmra.mxu0 %v725_v43  ;;  %v277_v37 = vunpack.c.0.s8 %v3419_v33 }
  0xe6   :  { %1367 = vmatmul.bf16.gmra.mxu1 %v726_v44  ;;  %v538_v59 = vcvt.s32.f32 %v282_v48 }
  0xe7   :  { %v2392_v52 = vmul.f32 %v2103_v40, %v1664_v50  ;;  %1536 = vmatmul.bf16.gmra.mxu2 %v727_v46  ;;  %v281_v46 = vunpack.c.1.s8 %v3419_v33  ;;  %v279_v40 = vunpack.c.0.s8 %v3423_v36  ;;  %v533_v56 = vcvt.s32.f32 %v277_v37 }
  0xe8   :  { %1705 = vmatmul.bf16.gmra.mxu3 %v728_v47  ;;  %v278_v47 = vunpack.c.0.s8 %v3421_v35 }
  0xe9   :  { %v2520_v55 = vadd.f32 %v2456_v41, %v2392_v52  ;;  %v283_v41 = vunpack.c.1.s8 %v3423_v36  ;;  %v280_v52 = vunpack.c.0.s8 %v3425_v38  ;;  %v535_v60 = vcvt.s32.f32 %v279_v40  ;;  %v2128_v40 = vpop.permute.xlu0 %2127 }
  0xea   :  { %v1497_v57 = vpop.f32.mrf.mxu2  ;;  %v1161_v0 = vpop.f32.mrf.mxu0 }
  0xeb   :  { %v1666_v58 = vpop.f32.mrf.mxu3  ;;  %v2890_v63 = vpack.c.bf16 %v2520_v55, %v2519_v53  ;;  %v1330_v1 = vpop.f32.mrf.mxu1  ;;  %v1498_v3 = vadd.f32 %v1497_v57, %v1329_v54  ;;  %v284_v53 = vunpack.c.1.s8 %v3425_v38  ;;  %v2029_v54 = vld [vmem:[%s3994_s2 + $0xe0] sm:$0xff]  ;;  %v537_v57 = vcvt.s32.f32 %v281_v46 }
  0xec   :  { %v1331_v7 = vadd.f32 %v1330_v1, %v1161_v0  ;;  %2207 = vperm.xlu1 %3068, %v2029_v54   ;;  %v539_v61 = vcvt.s32.f32 %v283_v41  ;;  %v536_v62 = vcvt.s32.f32 %v280_v52 }
  0xed   :  { %3034 = vst [vmem:[%s3996_s4 + $0x18] sm:$0xff] %v2890_v63   ;;  %v1667_v16 = vadd.f32 %v1666_v58, %v1498_v3  ;;  %v534_v58 = vcvt.s32.f32 %v278_v47  ;;  %v540_v63 = vcvt.s32.f32 %v284_v53  ;;  %v733_v9 = vpack.c.bf16 %v537_v57, %v533_v56  ;;  %v2032_v57 = vld [vmem:[%s3994_s2 + $0xf8] sm:$0xff] }
  0xee   :  { %v735_v12 = vpack.c.bf16 %v539_v61, %v535_v60  ;;  %v2461_v61 = vld [vmem:[%s3995_s3 + $0x60] sm:$0xff] }
  0xef   :  { %v2393_v29 = vmul.f32 %v2108_v17, %v1667_v16  ;;  %v734_v3 = vpack.c.bf16 %v538_v59, %v534_v58  ;;  %v736_v13 = vpack.c.bf16 %v540_v63, %v536_v62  ;;  %v2460_v17 = vld [vmem:[%s3995_s3 + $0x58] sm:$0xff]  ;;  %v2133_v58 = vpop.permute.xlu1 %2132  ;;  %v2462_v62 = vld [vmem:[%s3995_s3 + $0x68] sm:$0xff]  ;;  %v3473_v63 = vld [vmem:[#allocation3 + $0x100] sm:$0xff] }
  0xf1   :  { %v2521_v42 = vadd.f32 %v2457_v31, %v2393_v29 }
  0xf2   :  { %v1499_v18 = vpop.f32.mrf.mxu2  ;;  %v1164_v23 = vpop.f32.mrf.mxu0 }
  0xf3   :  { %v1668_v19 = vpop.f32.mrf.mxu3  ;;  %v1500_v22 = vadd.f32 %v1499_v18, %v1331_v7  ;;  %v1333_v24 = vpop.f32.mrf.mxu1  ;;  %v2459_v7 = vld [vmem:[%s3995_s3 + $0x50] sm:$0xff] }
  0xf4   :  { %v1334_v43 = vadd.f32 %v1333_v24, %v1164_v23  ;;  %2222 = vperm.xlu1 %3068, %v2032_v57  }
  0xf5   :  { %v1669_v30 = vadd.f32 %v1668_v19, %v1500_v22  ;;  %1203 = vmatmul.bf16.gmra.mxu0 %v729_v20  ;;  %v285_v22 = vunpack.c.2.s8 %v3419_v33 }
  0xf6   :  { %1372 = vmatmul.bf16.gmra.mxu1 %v730_v21 }
  0xf7   :  { %v2394_v34 = vmul.f32 %v2113_v28, %v1669_v30  ;;  %1541 = vmatmul.bf16.gmra.mxu2 %v731_v25  ;;  %v289_v25 = vunpack.c.3.s8 %v3419_v33  ;;  %v287_v28 = vunpack.c.2.s8 %v3423_v36 }
  0xf8   :  { %1710 = vmatmul.bf16.gmra.mxu3 %v732_v26  ;;  %v286_v26 = vunpack.c.2.s8 %v3421_v35  ;;  %v541_v35 = vcvt.s32.f32 %v285_v22 }
  0xf9   :  { %v2522_v44 = vadd.f32 %v2458_v32, %v2394_v34  ;;  %v291_v32 = vunpack.c.3.s8 %v3423_v36  ;;  %v288_v34 = vunpack.c.2.s8 %v3425_v38 }
  0xfa   :  { %v1502_v39 = vpop.f32.mrf.mxu2  ;;  %v1166_v50 = vpop.f32.mrf.mxu0  ;;  %v542_v37 = vcvt.s32.f32 %v286_v26 }
  0xfb   :  { %v1671_v45 = vpop.f32.mrf.mxu3  ;;  %v2895_v49 = vpack.c.bf16 %v2522_v44, %v2521_v42  ;;  %v1335_v51 = vpop.f32.mrf.mxu1  ;;  %v1503_v55 = vadd.f32 %v1502_v39, %v1334_v43  ;;  %v292_v42 = vunpack.c.3.s8 %v3425_v38  ;;  %v2031_v43 = vld [vmem:[%s3994_s2 + $0xf0] sm:$0xff]  ;;  %v545_v44 = vcvt.s32.f32 %v289_v25 }
  0xfc   :  { %v1336_v1 = vadd.f32 %v1335_v51, %v1166_v50  ;;  %2217 = vperm.xlu0 %3067, %v2031_v43   ;;  %v546_v39 = vcvt.s32.f32 %v290_v27  ;;  %v547_v36 = vcvt.s32.f32 %v291_v32  ;;  %v544_v46 = vcvt.s32.f32 %v288_v34  ;;  %v2138_v34 = vpop.permute.xlu2 %2137 }
  0xfd   :  { %3035 = vst [vmem:[%s3996_s4 + $0x20] sm:$0xff] %v2895_v49   ;;  %v1672_v0 = vadd.f32 %v1671_v45, %v1503_v55  ;;  %v543_v45 = vcvt.s32.f32 %v287_v28  ;;  %v548_v47 = vcvt.s32.f32 %v292_v42  ;;  %v737_v51 = vpack.c.bf16 %v545_v44, %v541_v35 }
  0xfe   :  { %v738_v41 = vpack.c.bf16 %v546_v39, %v542_v37 }
  0xff   :  { %v2395_v15 = vmul.f32 %v2118_v2, %v1672_v0  ;;  %v739_v55 = vpack.c.bf16 %v547_v36, %v543_v45  ;;  %v740_v56 = vpack.c.bf16 %v548_v47, %v544_v46  ;;  %v3477_v2 = vld [vmem:[#allocation3 + $0x110] sm:$0xff]  ;;  %v2037_v46 = vld [vmem:[%s3994_s2 + $0x120] sm:$0xff]  ;;  %v2143_v47 = vpop.permute.xlu0 %2142 }
 0x101   :  { %v2523_v19 = vadd.f32 %v2459_v7, %v2395_v15 }
 0x102   :  { %v1504_v4 = vpop.f32.mrf.mxu2  ;;  %v1169_v10 = vpop.f32.mrf.mxu0 }
 0x103   :  { %v1673_v8 = vpop.f32.mrf.mxu3  ;;  %v1505_v5 = vadd.f32 %v1504_v4, %v1336_v1  ;;  %v1338_v11 = vpop.f32.mrf.mxu1  ;;  %v3475_v1 = vld [vmem:[#allocation3 + $0x108] sm:$0xff]  ;;  %v3479_v4 = vld [vmem:[#allocation3 + $0x118] sm:$0xff] }
 0x104   :  { %v1339_v20 = vadd.f32 %v1338_v11, %v1169_v10  ;;  %v298_v6 = vunpack.c.1.s8 %v3475_v1  ;;  %v302_v57 = vunpack.c.2.s8 %v3475_v1 }
 0x105   :  { %v1674_v16 = vadd.f32 %v1673_v8, %v1505_v5  ;;  %1208 = vmatmul.bf16.gmra.mxu0 %v733_v9  ;;  %v293_v5 = vunpack.c.0.s8 %v3473_v63 }
 0x106   :  { %1377 = vmatmul.bf16.gmra.mxu1 %v734_v3  ;;  %v554_v26 = vcvt.s32.f32 %v298_v6 }
 0x107   :  { %v2396_v18 = vmul.f32 %v2123_v14, %v1674_v16  ;;  %1546 = vmatmul.bf16.gmra.mxu2 %v735_v12  ;;  %v297_v12 = vunpack.c.1.s8 %v3473_v63  ;;  %v295_v14 = vunpack.c.0.s8 %v3477_v2 }
 0x108   :  { %1715 = vmatmul.bf16.gmra.mxu3 %v736_v13  ;;  %v294_v13 = vunpack.c.0.s8 %v3475_v1 }
 0x109   :  { %v2524_v21 = vadd.f32 %v2460_v17, %v2396_v18  ;;  %v299_v17 = vunpack.c.1.s8 %v3477_v2  ;;  %v296_v18 = vunpack.c.0.s8 %v3479_v4  ;;  %v551_v27 = vcvt.s32.f32 %v295_v14 }
 0x10a   :  { %v1507_v23 = vpop.f32.mrf.mxu2  ;;  %v1171_v30 = vpop.f32.mrf.mxu0  ;;  %v550_v25 = vcvt.s32.f32 %v294_v13 }
 0x10b   :  { %v1676_v24 = vpop.f32.mrf.mxu3  ;;  %v2900_v29 = vpack.c.bf16 %v2524_v21, %v2523_v19  ;;  %v1340_v31 = vpop.f32.mrf.mxu1  ;;  %v1508_v33 = vadd.f32 %v1507_v23, %v1339_v20  ;;  %v300_v19 = vunpack.c.1.s8 %v3479_v4  ;;  %v2030_v20 = vld [vmem:[%s3994_s2 + $0xe8] sm:$0xff]  ;;  %v549_v23 = vcvt.s32.f32 %v293_v5 }
 0x10c   :  { %v1341_v38 = vadd.f32 %v1340_v31, %v1171_v30  ;;  %v2034_v21 = vld [vmem:[%s3994_s2 + $0x108] sm:$0xff]  ;;  %2212 = vperm.xlu2 %3069, %v2030_v20   ;;  %v555_v28 = vcvt.s32.f32 %v299_v17  ;;  %v742_v35 = vpack.c.bf16 %v554_v26, %v550_v25  ;;  %v2033_v25 = vld [vmem:[%s3994_s2 + $0x100] sm:$0xff] }
 0x10d   :  { %3036 = vst [vmem:[%s3996_s4 + $0x28] sm:$0xff] %v2900_v29   ;;  %v1677_v48 = vadd.f32 %v1676_v24, %v1508_v33  ;;  %2232 = vperm.xlu0 %3067, %v2034_v21   ;;  %v553_v24 = vcvt.s32.f32 %v297_v12  ;;  %v552_v29 = vcvt.s32.f32 %v296_v18  ;;  %v556_v30 = vcvt.s32.f32 %v300_v19  ;;  %v2038_v26 = vld [vmem:[%s3994_s2 + $0x128] sm:$0xff] }
 0x10e   :  { %v743_v45 = vpack.c.bf16 %v555_v28, %v551_v27  ;;  %v2043_v27 = vld [vmem:[%s3994_s2 + $0x150] sm:$0xff]  ;;  %v2153_v28 = vpop.permute.xlu2 %2152 }
 0x10f   :  { %v2397_v59 = vmul.f32 %v2128_v40, %v1677_v48  ;;  %v741_v33 = vpack.c.bf16 %v553_v24, %v549_v23  ;;  %v744_v36 = vpack.c.bf16 %v556_v30, %v552_v29  ;;  %v2463_v40 = vld [vmem:[%s3995_s3 + $0x70] sm:$0xff] }
 0x111   :  { %v2525_v8 = vadd.f32 %v2461_v61, %v2397_v59  ;;  %v303_v59 = vunpack.c.2.s8 %v3477_v2 }
 0x112   :  { %v1509_v49 = vpop.f32.mrf.mxu2  ;;  %v1174_v53 = vpop.f32.mrf.mxu0 }
 0x113   :  { %v1678_v50 = vpop.f32.mrf.mxu3  ;;  %v1510_v52 = vadd.f32 %v1509_v49, %v1341_v38  ;;  %v1343_v54 = vpop.f32.mrf.mxu1  ;;  %v2464_v49 = vld [vmem:[%s3995_s3 + $0x78] sm:$0xff] }
 0x114   :  { %v1344_v9 = vadd.f32 %v1343_v54, %v1174_v53  ;;  %v301_v53 = vunpack.c.2.s8 %v3473_v63  ;;  %2227 = vperm.xlu2 %3069, %v2033_v25  }
 0x115   :  { %v1679_v60 = vadd.f32 %v1678_v50, %v1510_v52  ;;  %1213 = vmatmul.bf16.gmra.mxu0 %v737_v51  ;;  %2247 = vperm.xlu0 %3067, %v2037_v46  }
 0x116   :  { %1382 = vmatmul.bf16.gmra.mxu1 %v738_v41 }
 0x117   :  { %v2398_v0 = vmul.f32 %v2133_v58, %v1679_v60  ;;  %1551 = vmatmul.bf16.gmra.mxu2 %v739_v55  ;;  %v306_v58 = vunpack.c.3.s8 %v3475_v1 }
 0x118   :  { %1720 = vmatmul.bf16.gmra.mxu3 %v740_v56  ;;  %v305_v56 = vunpack.c.3.s8 %v3473_v63  ;;  %v2040_v63 = vld [vmem:[%s3994_s2 + $0x138] sm:$0xff] }
 0x119   :  { %v2526_v3 = vadd.f32 %v2462_v62, %v2398_v0  ;;  %v307_v0 = vunpack.c.3.s8 %v3477_v2  ;;  %v557_v2 = vcvt.s32.f32 %v301_v53 }
 0x11a   :  { %v1512_v10 = vpop.f32.mrf.mxu2  ;;  %v1176_v16 = vpop.f32.mrf.mxu0  ;;  %v561_v5 = vcvt.s32.f32 %v305_v56 }
 0x11b   :  { %v1681_v11 = vpop.f32.mrf.mxu3  ;;  %v2905_v15 = vpack.c.bf16 %v2526_v3, %v2525_v8  ;;  %v1345_v7 = vpop.f32.mrf.mxu1  ;;  %v1513_v22 = vadd.f32 %v1512_v10, %v1344_v9  ;;  %v304_v8 = vunpack.c.2.s8 %v3479_v4  ;;  %v308_v9 = vunpack.c.3.s8 %v3479_v4  ;;  %v2035_v3 = vld [vmem:[%s3994_s2 + $0x110] sm:$0xff] }
 0x11c   :  { %v1346_v32 = vadd.f32 %v1345_v7, %v1176_v16  ;;  %2237 = vperm.xlu1 %3068, %v2035_v3   ;;  %v558_v10 = vcvt.s32.f32 %v302_v57  ;;  %v559_v4 = vcvt.s32.f32 %v303_v59  ;;  %v563_v12 = vcvt.s32.f32 %v307_v0  ;;  %v2148_v16 = vpop.permute.xlu1 %2147 }
 0x11d   :  { %3037 = vst [vmem:[%s3996_s4 + $0x30] sm:$0xff] %v2905_v15   ;;  %v1682_v31 = vadd.f32 %v1681_v11, %v1513_v22  ;;  %2262 = vperm.xlu0 %3067, %v2040_v63   ;;  %v562_v11 = vcvt.s32.f32 %v306_v58  ;;  %v560_v13 = vcvt.s32.f32 %v304_v8  ;;  %v564_v6 = vcvt.s32.f32 %v308_v9  ;;  %v2158_v63 = vpop.permute.xlu0 %2157 }
 0x11e   :  { %v745_v18 = vpack.c.bf16 %v561_v5, %v557_v2  ;;  %v747_v23 = vpack.c.bf16 %v563_v12, %v559_v4 }
 0x11f   :  { %v2399_v48 = vmul.f32 %v2138_v34, %v1682_v31  ;;  %v746_v19 = vpack.c.bf16 %v562_v11, %v558_v10  ;;  %v748_v24 = vpack.c.bf16 %v564_v6, %v560_v13  ;;  %v2465_v31 = vld [vmem:[%s3995_s3 + $0x80] sm:$0xff] }
 0x120   :  { %v3539_v34 = vld [vmem:[#allocation3 + $0x120] sm:$0xff] }
 0x121   :  { %v2527_v51 = vadd.f32 %v2463_v40, %v2399_v48  ;;  %v317_v25 = vunpack.c.2.s8 %v3539_v34 }
 0x122   :  { %v1514_v42 = vpop.f32.mrf.mxu2  ;;  %v1179_v37 = vpop.f32.mrf.mxu0 }
 0x123   :  { %v1683_v43 = vpop.f32.mrf.mxu3  ;;  %v1515_v44 = vadd.f32 %v1514_v42, %v1346_v32  ;;  %v1348_v39 = vpop.f32.mrf.mxu1  ;;  %v2466_v32 = vld [vmem:[%s3995_s3 + $0x88] sm:$0xff] }
 0x124   :  { %v1349_v41 = vadd.f32 %v1348_v39, %v1179_v37  ;;  %2252 = vperm.xlu1 %3068, %v2038_v26  }
 0x125   :  { %v1684_v38 = vadd.f32 %v1683_v43, %v1515_v44  ;;  %1218 = vmatmul.bf16.gmra.mxu0 %v741_v33  ;;  %2277 = vperm.xlu0 %3067, %v2043_v27   ;;  %v3541_v43 = vld [vmem:[#allocation3 + $0x128] sm:$0xff]  ;;  %v3543_v33 = vld [vmem:[#allocation3 + $0x130] sm:$0xff] }
 0x126   :  { %1387 = vmatmul.bf16.gmra.mxu1 %v742_v35  ;;  %v3545_v35 = vld [vmem:[#allocation3 + $0x138] sm:$0xff]  ;;  %v310_v48 = vunpack.c.0.s8 %v3541_v43  ;;  %v311_v40 = vunpack.c.0.s8 %v3543_v33 }
 0x127   :  { %v2400_v50 = vmul.f32 %v2143_v47, %v1684_v38  ;;  %1556 = vmatmul.bf16.gmra.mxu2 %v743_v45  ;;  %v309_v45 = vunpack.c.0.s8 %v3539_v34  ;;  %v313_v47 = vunpack.c.1.s8 %v3539_v34  ;;  %v314_v38 = vunpack.c.1.s8 %v3541_v43 }
 0x128   :  { %1725 = vmatmul.bf16.gmra.mxu3 %v744_v36  ;;  %v316_v53 = vunpack.c.1.s8 %v3545_v35  ;;  %v566_v59 = vcvt.s32.f32 %v310_v48 }
 0x129   :  { %v2528_v52 = vadd.f32 %v2464_v49, %v2400_v50  ;;  %v565_v57 = vcvt.s32.f32 %v309_v45  ;;  %v569_v58 = vcvt.s32.f32 %v313_v47  ;;  %v324_v45 = vunpack.c.3.s8 %v3545_v35 }
 0x12a   :  { %v1517_v54 = vpop.f32.mrf.mxu2  ;;  %v1181_v61 = vpop.f32.mrf.mxu0  ;;  %v572_v8 = vcvt.s32.f32 %v316_v53 }
 0x12b   :  { %v1686_v55 = vpop.f32.mrf.mxu3  ;;  %v2910_v60 = vpack.c.bf16 %v2528_v52, %v2527_v51  ;;  %v1350_v62 = vpop.f32.mrf.mxu1  ;;  %v1518_v1 = vadd.f32 %v1517_v54, %v1349_v41  ;;  %v315_v41 = vunpack.c.1.s8 %v3543_v33  ;;  %v312_v52 = vunpack.c.0.s8 %v3545_v35  ;;  %v2041_v54 = vld [vmem:[%s3994_s2 + $0x140] sm:$0xff] }
 0x12c   :  { %v1351_v15 = vadd.f32 %v1350_v62, %v1181_v61  ;;  %2267 = vperm.xlu1 %3068, %v2041_v54   ;;  %v567_v61 = vcvt.s32.f32 %v311_v40  ;;  %v749_v5 = vpack.c.bf16 %v569_v58, %v565_v57 }
 0x12d   :  { %3038 = vst [vmem:[%s3996_s4 + $0x38] sm:$0xff] %v2910_v60   ;;  %v1687_v14 = vadd.f32 %v1686_v55, %v1518_v1  ;;  %v2046_v55 = vld [vmem:[%s3994_s2 + $0x168] sm:$0xff]  ;;  %v570_v60 = vcvt.s32.f32 %v314_v38  ;;  %v571_v62 = vcvt.s32.f32 %v315_v41  ;;  %v568_v0 = vcvt.s32.f32 %v312_v52  ;;  %v2168_v52 = vpop.permute.xlu2 %2167 }
 0x12e   :  { %2292 = vperm.xlu0 %3067, %v2046_v55  }
 0x12f   :  { %v2401_v29 = vmul.f32 %v2148_v16, %v1687_v14  ;;  %v750_v10 = vpack.c.bf16 %v570_v60, %v566_v59  ;;  %v751_v13 = vpack.c.bf16 %v571_v62, %v567_v61  ;;  %v752_v6 = vpack.c.bf16 %v572_v8, %v568_v0  ;;  %v2036_v14 = vld [vmem:[%s3994_s2 + $0x118] sm:$0xff]  ;;  %v2049_v16 = vld [vmem:[%s3994_s2 + $0x180] sm:$0xff]  ;;  %v2042_v62 = vld [vmem:[%s3994_s2 + $0x148] sm:$0xff] }
 0x130   :  { %2242 = vperm.xlu2 %3069, %v2036_v14   ;;  %v2050_v0 = vld [vmem:[%s3994_s2 + $0x188] sm:$0xff]  ;;  %v2055_v8 = vld [vmem:[%s3994_s2 + $0x1b0] sm:$0xff] }
 0x131   :  { %v2529_v44 = vadd.f32 %v2465_v31, %v2401_v29  ;;  %v318_v29 = vunpack.c.2.s8 %v3541_v43  ;;  %v319_v31 = vunpack.c.2.s8 %v3543_v33 }
 0x132   :  { %v1519_v7 = vpop.f32.mrf.mxu2  ;;  %v1184_v21 = vpop.f32.mrf.mxu0 }
 0x133   :  { %v1688_v17 = vpop.f32.mrf.mxu3  ;;  %v1520_v20 = vadd.f32 %v1519_v7, %v1351_v15  ;;  %v1353_v22 = vpop.f32.mrf.mxu1  ;;  %v2044_v15 = vld [vmem:[%s3994_s2 + $0x158] sm:$0xff]  ;;  %v574_v47 = vcvt.s32.f32 %v318_v29  ;;  %v575_v38 = vcvt.s32.f32 %v319_v31  ;;  %v2058_v29 = vld [vmem:[%s3994_s2 + $0x1c8] sm:$0xff] }
 0x134   :  { %v1354_v37 = vadd.f32 %v1353_v22, %v1184_v21  ;;  %v2163_v7 = vpop.permute.xlu1 %2162  ;;  %2282 = vperm.xlu1 %3068, %v2044_v15  }
 0x135   :  { %v1689_v30 = vadd.f32 %v1688_v17, %v1520_v20  ;;  %1223 = vmatmul.bf16.gmra.mxu0 %v745_v18  ;;  %v2468_v20 = vld [vmem:[%s3995_s3 + $0x98] sm:$0xff] }
 0x136   :  { %1392 = vmatmul.bf16.gmra.mxu1 %v746_v19  ;;  %2307 = vperm.xlu0 %3067, %v2049_v16   ;;  %v2467_v19 = vld [vmem:[%s3995_s3 + $0x90] sm:$0xff] }
 0x137   :  { %v2402_v42 = vmul.f32 %v2153_v28, %v1689_v30  ;;  %1561 = vmatmul.bf16.gmra.mxu2 %v747_v23  ;;  %v321_v28 = vunpack.c.3.s8 %v3539_v34  ;;  %v322_v30 = vunpack.c.3.s8 %v3541_v43  ;;  %v2047_v34 = vld [vmem:[%s3994_s2 + $0x170] sm:$0xff]  ;;  %v2052_v43 = vld [vmem:[%s3994_s2 + $0x198] sm:$0xff] }
 0x138   :  { %1730 = vmatmul.bf16.gmra.mxu3 %v748_v24 }
 0x139   :  { %v2530_v39 = vadd.f32 %v2466_v32, %v2402_v42  ;;  %v578_v48 = vcvt.s32.f32 %v322_v30 }
 0x13a   :  { %v1522_v36 = vpop.f32.mrf.mxu2  ;;  %v1186_v50 = vpop.f32.mrf.mxu0 }
 0x13b   :  { %v1691_v46 = vpop.f32.mrf.mxu3  ;;  %v2915_v49 = vpack.c.bf16 %v2530_v39, %v2529_v44  ;;  %v1355_v51 = vpop.f32.mrf.mxu1  ;;  %v1523_v56 = vadd.f32 %v1522_v36, %v1354_v37  ;;  %v323_v37 = vunpack.c.3.s8 %v3543_v33  ;;  %v320_v39 = vunpack.c.2.s8 %v3545_v35  ;;  %v2039_v36 = vld [vmem:[%s3994_s2 + $0x130] sm:$0xff] }
 0x13c   :  { %v1356_v3 = vadd.f32 %v1355_v51, %v1186_v50  ;;  %2257 = vperm.xlu2 %3069, %v2039_v36   ;;  %2297 = vperm.xlu1 %3068, %v2047_v34   ;;  %v573_v35 = vcvt.s32.f32 %v317_v25  ;;  %v580_v50 = vcvt.s32.f32 %v324_v45 }
 0x13d   :  { %3039 = vst [vmem:[%s3996_s4 + $0x40] sm:$0xff] %v2915_v49   ;;  %v1692_v9 = vadd.f32 %v1691_v46, %v1523_v56  ;;  %v577_v46 = vcvt.s32.f32 %v321_v28  ;;  %v579_v40 = vcvt.s32.f32 %v323_v37  ;;  %v576_v49 = vcvt.s32.f32 %v320_v39  ;;  %v2053_v28 = vld [vmem:[%s3994_s2 + $0x1a0] sm:$0xff] }
 0x13e   :  { %2322 = vperm.xlu0 %3067, %v2052_v43   ;;  %v754_v56 = vpack.c.bf16 %v578_v48, %v574_v47 }
 0x13f   :  { %v2403_v17 = vmul.f32 %v2158_v63, %v1692_v9  ;;  %v753_v55 = vpack.c.bf16 %v577_v46, %v573_v35  ;;  %v755_v60 = vpack.c.bf16 %v579_v40, %v575_v38  ;;  %v756_v61 = vpack.c.bf16 %v580_v50, %v576_v49  ;;  %v2173_v9 = vpop.permute.xlu0 %2172 }
 0x141   :  { %v2531_v22 = vadd.f32 %v2467_v19, %v2403_v17 }
 0x142   :  { %v1524_v1 = vpop.f32.mrf.mxu2  ;;  %v1189_v4 = vpop.f32.mrf.mxu0 }
 0x143   :  { %v1693_v2 = vpop.f32.mrf.mxu3  ;;  %v1525_v11 = vadd.f32 %v1524_v1, %v1356_v3  ;;  %v1358_v12 = vpop.f32.mrf.mxu1  ;;  %v2469_v1 = vld [vmem:[%s3995_s3 + $0xa0] sm:$0xff] }
 0x144   :  { %v1359_v23 = vadd.f32 %v1358_v12, %v1189_v4  ;;  %2272 = vperm.xlu2 %3069, %v2042_v62   ;;  %2312 = vperm.xlu1 %3068, %v2050_v0   ;;  %v3618_v4 = vld [vmem:[#allocation3 + $0x150] sm:$0xff]  ;;  %v3620_v12 = vld [vmem:[#allocation3 + $0x158] sm:$0xff] }
 0x145   :  { %v1694_v18 = vadd.f32 %v1693_v2, %v1525_v11  ;;  %1228 = vmatmul.bf16.gmra.mxu0 %v749_v5  ;;  %v2470_v2 = vld [vmem:[%s3995_s3 + $0xa8] sm:$0xff]  ;;  %v3614_v5 = vld [vmem:[#allocation3 + $0x140] sm:$0xff]  ;;  %v328_v25 = vunpack.c.0.s8 %v3620_v12 }
 0x146   :  { %1397 = vmatmul.bf16.gmra.mxu1 %v750_v10  ;;  %2337 = vperm.xlu0 %3067, %v2055_v8   ;;  %v3616_v11 = vld [vmem:[#allocation3 + $0x148] sm:$0xff]  ;;  %v325_v15 = vunpack.c.0.s8 %v3614_v5  ;;  %v329_v17 = vunpack.c.1.s8 %v3614_v5  ;;  %v333_v0 = vunpack.c.2.s8 %v3614_v5 }
 0x147   :  { %v2404_v21 = vmul.f32 %v2163_v7, %v1694_v18  ;;  %1566 = vmatmul.bf16.gmra.mxu2 %v751_v13  ;;  %v326_v18 = vunpack.c.0.s8 %v3616_v11  ;;  %v330_v19 = vunpack.c.1.s8 %v3616_v11  ;;  %v584_v45 = vcvt.s32.f32 %v328_v25 }
 0x148   :  { %1735 = vmatmul.bf16.gmra.mxu3 %v752_v6  ;;  %v581_v31 = vcvt.s32.f32 %v325_v15  ;;  %v336_v15 = vunpack.c.2.s8 %v3620_v12 }
 0x149   :  { %v2532_v24 = vadd.f32 %v2468_v20, %v2404_v21  ;;  %v327_v20 = vunpack.c.0.s8 %v3618_v4 }
 0x14a   :  { %v1527_v26 = vpop.f32.mrf.mxu2  ;;  %v1191_v42 = vpop.f32.mrf.mxu0 }
 0x14b   :  { %v1696_v27 = vpop.f32.mrf.mxu3  ;;  %v2920_v32 = vpack.c.bf16 %v2532_v24, %v2531_v22  ;;  %v1360_v44 = vpop.f32.mrf.mxu1  ;;  %v1528_v33 = vadd.f32 %v1527_v26, %v1359_v23  ;;  %v331_v24 = vunpack.c.1.s8 %v3618_v4  ;;  %v332_v26 = vunpack.c.1.s8 %v3620_v12 }
 0x14c   :  { %v1361_v41 = vadd.f32 %v1360_v44, %v1191_v42  ;;  %2327 = vperm.xlu1 %3068, %v2053_v28   ;;  %v582_v42 = vcvt.s32.f32 %v326_v18  ;;  %v586_v44 = vcvt.s32.f32 %v330_v19  ;;  %v583_v37 = vcvt.s32.f32 %v327_v20 }
 0x14d   :  { %3040 = vst [vmem:[%s3996_s4 + $0x48] sm:$0xff] %v2920_v32   ;;  %v1697_v51 = vadd.f32 %v1696_v27, %v1528_v33  ;;  %v2045_v27 = vld [vmem:[%s3994_s2 + $0x160] sm:$0xff]  ;;  %v585_v32 = vcvt.s32.f32 %v329_v17  ;;  %v587_v39 = vcvt.s32.f32 %v331_v24  ;;  %v588_v36 = vcvt.s32.f32 %v332_v26  ;;  %v2178_v33 = vpop.permute.xlu1 %2177  ;;  %v2188_v26 = vpop.permute.xlu0 %2187 }
 0x14e   :  { %2287 = vperm.xlu2 %3069, %v2045_v27   ;;  %2352 = vperm.xlu0 %3067, %v2058_v29   ;;  %v758_v48 = vpack.c.bf16 %v586_v44, %v582_v42 }
 0x14f   :  { %v2405_v3 = vmul.f32 %v2168_v52, %v1697_v51  ;;  %v757_v47 = vpack.c.bf16 %v585_v32, %v581_v31  ;;  %v759_v50 = vpack.c.bf16 %v587_v39, %v583_v37  ;;  %v760_v51 = vpack.c.bf16 %v588_v36, %v584_v45  ;;  %v2056_v52 = vld [vmem:[%s3994_s2 + $0x1b8] sm:$0xff]  ;;  %v2054_v39 = vld [vmem:[%s3994_s2 + $0x1a8] sm:$0xff] }
 0x150   :  { %v2062_v45 = vld [vmem:[%s3994_s2 + $0x1e8] sm:$0xff] }
 0x151   :  { %v2533_v13 = vadd.f32 %v2469_v1, %v2405_v3  ;;  %v337_v3 = vunpack.c.3.s8 %v3614_v5  ;;  %v338_v1 = vunpack.c.3.s8 %v3616_v11  ;;  %v2059_v5 = vld [vmem:[%s3994_s2 + $0x1d0] sm:$0xff] }
 0x152   :  { %v1529_v53 = vpop.f32.mrf.mxu2  ;;  %v1194_v58 = vpop.f32.mrf.mxu0 }
 0x153   :  { %v1698_v54 = vpop.f32.mrf.mxu3  ;;  %v1530_v57 = vadd.f32 %v1529_v53, %v1361_v41  ;;  %v1363_v59 = vpop.f32.mrf.mxu1  ;;  %v2048_v41 = vld [vmem:[%s3994_s2 + $0x178] sm:$0xff]  ;;  %v2061_v53 = vld [vmem:[%s3994_s2 + $0x1e0] sm:$0xff]  ;;  %v593_v17 = vcvt.s32.f32 %v337_v3  ;;  %v594_v19 = vcvt.s32.f32 %v338_v1 }
 0x154   :  { %v1364_v6 = vadd.f32 %v1363_v59, %v1194_v58  ;;  %2342 = vperm.xlu1 %3068, %v2056_v52   ;;  %v2472_v58 = vld [vmem:[%s3995_s3 + $0xb8] sm:$0xff] }
 0x155   :  { %v1699_v63 = vadd.f32 %v1698_v54, %v1530_v57  ;;  %1233 = vmatmul.bf16.gmra.mxu0 %v753_v55  ;;  %v2183_v54 = vpop.permute.xlu2 %2182  ;;  %v2471_v57 = vld [vmem:[%s3995_s3 + $0xb0] sm:$0xff]  ;;  %v2193_v36 = vpop.permute.xlu1 %2192 }
 0x156   :  { %1402 = vmatmul.bf16.gmra.mxu1 %v754_v56  ;;  %2302 = vperm.xlu2 %3069, %v2048_v41  }
 0x157   :  { %v2406_v10 = vmul.f32 %v2173_v9, %v1699_v63  ;;  %1571 = vmatmul.bf16.gmra.mxu2 %v755_v60  ;;  %2367 = vperm.xlu0 %3067, %v2061_v53   ;;  %v334_v63 = vunpack.c.2.s8 %v3616_v11  ;;  %v2064_v11 = vld [vmem:[%s3994_s2 + $0x1f8] sm:$0xff] }
 0x158   :  { %1740 = vmatmul.bf16.gmra.mxu3 %v756_v61 }
 0x159   :  { %v2534_v14 = vadd.f32 %v2470_v2, %v2406_v10  ;;  %v335_v2 = vunpack.c.2.s8 %v3618_v4  ;;  %v590_v18 = vcvt.s32.f32 %v334_v63 }
 0x15a   :  { %v1532_v16 = vpop.f32.mrf.mxu2  ;;  %v1196_v22 = vpop.f32.mrf.mxu0 }
 0x15b   :  { %v1701_v7 = vpop.f32.mrf.mxu3  ;;  %v2925_v21 = vpack.c.bf16 %v2534_v14, %v2533_v13  ;;  %v1365_v23 = vpop.f32.mrf.mxu1  ;;  %v1533_v30 = vadd.f32 %v1532_v16, %v1364_v6  ;;  %v339_v14 = vunpack.c.3.s8 %v3618_v4  ;;  %v340_v16 = vunpack.c.3.s8 %v3620_v12 }
 0x15c   :  { %v1366_v43 = vadd.f32 %v1365_v23, %v1196_v22  ;;  %2357 = vperm.xlu1 %3068, %v2059_v5   ;;  %v589_v12 = vcvt.s32.f32 %v333_v0  ;;  %v591_v20 = vcvt.s32.f32 %v335_v2  ;;  %v592_v22 = vcvt.s32.f32 %v336_v15 }
 0x15d   :  { %3041 = vst [vmem:[%s3996_s4 + $0x50] sm:$0xff] %v2925_v21   ;;  %v1702_v34 = vadd.f32 %v1701_v7, %v1533_v30  ;;  %v2051_v7 = vld [vmem:[%s3994_s2 + $0x190] sm:$0xff]  ;;  %v595_v21 = vcvt.s32.f32 %v339_v14  ;;  %v596_v23 = vcvt.s32.f32 %v340_v16  ;;  %v762_v30 = vpack.c.bf16 %v594_v19, %v590_v18 }
 0x15e   :  { %2317 = vperm.xlu2 %3069, %v2051_v7   ;;  %v761_v29 = vpack.c.bf16 %v593_v17, %v589_v12  ;;  %v2198_v7 = vpop.permute.xlu2 %2197 }
 0x15f   :  { %v2407_v55 = vmul.f32 %v2178_v33, %v1702_v34  ;;  %2382 = vperm.xlu0 %3067, %v2064_v11   ;;  %v763_v44 = vpack.c.bf16 %v595_v21, %v591_v20  ;;  %v764_v37 = vpack.c.bf16 %v596_v23, %v592_v22  ;;  %v2473_v33 = vld [vmem:[%s3995_s3 + $0xc0] sm:$0xff]  ;;  %v2060_v22 = vld [vmem:[%s3994_s2 + $0x1d8] sm:$0xff]  ;;  %v2203_v23 = vpop.permute.xlu0 %2202 }
 0x161   :  { %v2535_v60 = vadd.f32 %v2471_v57, %v2407_v55 }
 0x162   :  { %v1534_v35 = vpop.f32.mrf.mxu2  ;;  %v1199_v40 = vpop.f32.mrf.mxu0 }
 0x163   :  { %v1703_v46 = vpop.f32.mrf.mxu3  ;;  %v1535_v38 = vadd.f32 %v1534_v35, %v1366_v43  ;;  %v1368_v49 = vpop.f32.mrf.mxu1  ;;  %v2474_v35 = vld [vmem:[%s3995_s3 + $0xc8] sm:$0xff] }
 0x164   :  { %v1369_v61 = vadd.f32 %v1368_v49, %v1199_v40  ;;  %2372 = vperm.xlu1 %3068, %v2062_v45   ;;  %v3695_v40 = vld [vmem:[#allocation3 + $0x178] sm:$0xff] }
 0x165   :  { %v1704_v56 = vadd.f32 %v1703_v46, %v1535_v38  ;;  %1238 = vmatmul.bf16.gmra.mxu0 %v757_v47  ;;  %v3689_v46 = vld [vmem:[#allocation3 + $0x160] sm:$0xff]  ;;  %v3693_v38 = vld [vmem:[#allocation3 + $0x170] sm:$0xff]  ;;  %v348_v0 = vunpack.c.1.s8 %v3695_v40 }
 0x166   :  { %1407 = vmatmul.bf16.gmra.mxu1 %v758_v48  ;;  %2332 = vperm.xlu2 %3069, %v2054_v39   ;;  %v3691_v48 = vld [vmem:[#allocation3 + $0x168] sm:$0xff]  ;;  %v341_v41 = vunpack.c.0.s8 %v3689_v46  ;;  %v343_v57 = vunpack.c.0.s8 %v3693_v38 }
 0x167   :  { %v2408_v59 = vmul.f32 %v2183_v54, %v1704_v56  ;;  %1576 = vmatmul.bf16.gmra.mxu2 %v759_v50  ;;  %v345_v54 = vunpack.c.1.s8 %v3689_v46  ;;  %v342_v55 = vunpack.c.0.s8 %v3691_v48  ;;  %v346_v56 = vunpack.c.1.s8 %v3691_v48 }
 0x168   :  { %1745 = vmatmul.bf16.gmra.mxu3 %v760_v51  ;;  %v597_v3 = vcvt.s32.f32 %v341_v41  ;;  %v604_v14 = vcvt.s32.f32 %v348_v0  ;;  %v350_v39 = vunpack.c.2.s8 %v3691_v48  ;;  %v354_v45 = vunpack.c.3.s8 %v3691_v48 }
 0x169   :  { %v2536_v62 = vadd.f32 %v2472_v58, %v2408_v59  ;;  %v601_v63 = vcvt.s32.f32 %v345_v54  ;;  %v598_v1 = vcvt.s32.f32 %v342_v55  ;;  %v602_v2 = vcvt.s32.f32 %v346_v56 }
 0x16a   :  { %v1537_v8 = vpop.f32.mrf.mxu2  ;;  %v1201_v13 = vpop.f32.mrf.mxu0  ;;  %v606_v41 = vcvt.s32.f32 %v350_v39 }
 0x16b   :  { %v1706_v9 = vpop.f32.mrf.mxu3  ;;  %v2930_v10 = vpack.c.bf16 %v2536_v62, %v2535_v60  ;;  %v1370_v6 = vpop.f32.mrf.mxu1  ;;  %v1538_v4 = vadd.f32 %v1537_v8, %v1369_v61  ;;  %v347_v61 = vunpack.c.1.s8 %v3693_v38  ;;  %v344_v62 = vunpack.c.0.s8 %v3695_v40  ;;  %v2057_v8 = vld [vmem:[%s3994_s2 + $0x1c0] sm:$0xff] }
 0x16c   :  { %v1371_v25 = vadd.f32 %v1370_v6, %v1201_v13  ;;  %v766_v12 = vpack.c.bf16 %v602_v2, %v598_v1 }
 0x16d   :  { %3042 = vst [vmem:[%s3996_s4 + $0x58] sm:$0xff] %v2930_v10   ;;  %v1707_v24 = vadd.f32 %v1706_v9, %v1538_v4  ;;  %v599_v10 = vcvt.s32.f32 %v343_v57  ;;  %v603_v13 = vcvt.s32.f32 %v347_v61  ;;  %v600_v6 = vcvt.s32.f32 %v344_v62  ;;  %v2208_v57 = vpop.permute.xlu1 %2207 }
 0x16e   :  { %2347 = vperm.xlu2 %3069, %v2057_v8   ;;  %v765_v4 = vpack.c.bf16 %v601_v63, %v597_v3  ;;  %v2213_v63 = vpop.permute.xlu2 %2212 }
 0x16f   :  { %v2409_v34 = vmul.f32 %v2188_v26, %v1707_v24  ;;  %v767_v20 = vpack.c.bf16 %v603_v13, %v599_v10  ;;  %v768_v21 = vpack.c.bf16 %v604_v14, %v600_v6  ;;  %v2475_v26 = vld [vmem:[%s3995_s3 + $0xd0] sm:$0xff]  ;;  %v2477_v10 = vld [vmem:[%s3995_s3 + $0xe0] sm:$0xff]  ;;  %v2478_v13 = vld [vmem:[%s3995_s3 + $0xe8] sm:$0xff] }
 0x170   :  { %v3740_v6 = vld [vmem:[#allocation3 + $0x180] sm:$0xff] }
 0x171   :  { %v2537_v49 = vadd.f32 %v2473_v33, %v2409_v34 }
 0x172   :  { %v1539_v27 = vpop.f32.mrf.mxu2  ;;  %v1204_v32 = vpop.f32.mrf.mxu0 }
 0x173   :  { %v1708_v28 = vpop.f32.mrf.mxu3  ;;  %v1540_v31 = vadd.f32 %v1539_v27, %v1371_v25  ;;  %v1373_v42 = vpop.f32.mrf.mxu1  ;;  %v2476_v27 = vld [vmem:[%s3995_s3 + $0xd8] sm:$0xff] }
 0x174   :  { %v1374_v50 = vadd.f32 %v1373_v42, %v1204_v32  ;;  %v349_v32 = vunpack.c.2.s8 %v3689_v46 }
 0x175   :  { %v1709_v43 = vadd.f32 %v1708_v28, %v1540_v31  ;;  %1243 = vmatmul.bf16.gmra.mxu0 %v761_v29 }
 0x176   :  { %1412 = vmatmul.bf16.gmra.mxu1 %v762_v30  ;;  %2362 = vperm.xlu2 %3069, %v2060_v22   ;;  %v605_v48 = vcvt.s32.f32 %v349_v32 }
 0x177   :  { %v2410_v47 = vmul.f32 %v2193_v36, %v1709_v43  ;;  %1581 = vmatmul.bf16.gmra.mxu2 %v763_v44  ;;  %v351_v36 = vunpack.c.2.s8 %v3693_v38 }
 0x178   :  { %1750 = vmatmul.bf16.gmra.mxu3 %v764_v37  ;;  %v353_v37 = vunpack.c.3.s8 %v3689_v46 }
 0x179   :  { %v2538_v51 = vadd.f32 %v2474_v35, %v2410_v47  ;;  %v355_v35 = vunpack.c.3.s8 %v3693_v38  ;;  %v352_v47 = vunpack.c.2.s8 %v3695_v40 }
 0x17a   :  { %v1542_v52 = vpop.f32.mrf.mxu2  ;;  %v1206_v59 = vpop.f32.mrf.mxu0 }
 0x17b   :  { %v1711_v53 = vpop.f32.mrf.mxu3  ;;  %v2935_v58 = vpack.c.bf16 %v2538_v51, %v2537_v49  ;;  %v1375_v60 = vpop.f32.mrf.mxu1  ;;  %v1543_v9 = vadd.f32 %v1542_v52, %v1374_v50  ;;  %v356_v49 = vunpack.c.3.s8 %v3695_v40  ;;  %v2063_v50 = vld [vmem:[%s3994_s2 + $0x1f0] sm:$0xff]  ;;  %v609_v51 = vcvt.s32.f32 %v353_v37 }
 0x17c   :  { %v1376_v16 = vadd.f32 %v1375_v60, %v1206_v59  ;;  %v610_v52 = vcvt.s32.f32 %v354_v45  ;;  %v611_v38 = vcvt.s32.f32 %v355_v35  ;;  %v608_v54 = vcvt.s32.f32 %v352_v47 }
 0x17d   :  { %3043 = vst [vmem:[%s3996_s4 + $0x60] sm:$0xff] %v2935_v58   ;;  %v1712_v15 = vadd.f32 %v1711_v53, %v1543_v9  ;;  %v607_v53 = vcvt.s32.f32 %v351_v36  ;;  %v612_v55 = vcvt.s32.f32 %v356_v49  ;;  %v769_v60 = vpack.c.bf16 %v609_v51, %v605_v48 }
 0x17e   :  { %2377 = vperm.xlu2 %3069, %v2063_v50   ;;  %v770_v61 = vpack.c.bf16 %v610_v52, %v606_v41  ;;  %v2223_v52 = vpop.permute.xlu1 %2222 }
 0x17f   :  { %v2411_v24 = vmul.f32 %v2198_v7, %v1712_v15  ;;  %v771_v9 = vpack.c.bf16 %v611_v38, %v607_v53  ;;  %v772_v3 = vpack.c.bf16 %v612_v55, %v608_v54  ;;  %v3742_v15 = vld [vmem:[#allocation3 + $0x188] sm:$0xff]  ;;  %v3746_v7 = vld [vmem:[#allocation3 + $0x198] sm:$0xff]  ;;  %v2479_v54 = vld [vmem:[%s3995_s3 + $0xf0] sm:$0xff] }
 0x180   :  { %v2480_v55 = vld [vmem:[%s3995_s3 + $0xf8] sm:$0xff] }
 0x181   :  { %v2539_v29 = vadd.f32 %v2475_v26, %v2411_v24 }
 0x182   :  { %v1544_v5 = vpop.f32.mrf.mxu2  ;;  %v1209_v18 = vpop.f32.mrf.mxu0 }
 0x183   :  { %v1713_v11 = vpop.f32.mrf.mxu3  ;;  %v1545_v17 = vadd.f32 %v1544_v5, %v1376_v16  ;;  %v1378_v19 = vpop.f32.mrf.mxu1  ;;  %v3744_v16 = vld [vmem:[#allocation3 + $0x190] sm:$0xff] }
 0x184   :  { %v1379_v30 = vadd.f32 %v1378_v19, %v1209_v18  ;;  %v361_v19 = vunpack.c.1.s8 %v3740_v6  ;;  %v359_v22 = vunpack.c.0.s8 %v3744_v16  ;;  %v363_v26 = vunpack.c.1.s8 %v3744_v16 }
 0x185   :  { %v1714_v25 = vadd.f32 %v1713_v11, %v1545_v17  ;;  %1248 = vmatmul.bf16.gmra.mxu0 %v765_v4 }
 0x186   :  { %1417 = vmatmul.bf16.gmra.mxu1 %v766_v12  ;;  %v357_v12 = vunpack.c.0.s8 %v3740_v6  ;;  %v619_v37 = vcvt.s32.f32 %v363_v26 }
 0x187   :  { %v2412_v28 = vmul.f32 %v2203_v23, %v1714_v25  ;;  %1586 = vmatmul.bf16.gmra.mxu2 %v767_v20  ;;  %v358_v20 = vunpack.c.0.s8 %v3742_v15 }
 0x188   :  { %1755 = vmatmul.bf16.gmra.mxu3 %v768_v21  ;;  %v362_v21 = vunpack.c.1.s8 %v3742_v15 }
 0x189   :  { %v2540_v31 = vadd.f32 %v2476_v27, %v2412_v28  ;;  %v360_v27 = vunpack.c.0.s8 %v3746_v7  ;;  %v364_v28 = vunpack.c.1.s8 %v3746_v7  ;;  %v614_v32 = vcvt.s32.f32 %v358_v20 }
 0x18a   :  { %v1547_v42 = vpop.f32.mrf.mxu2  ;;  %v1211_v43 = vpop.f32.mrf.mxu0 }
 0x18b   :  { %v1716_v44 = vpop.f32.mrf.mxu3  ;;  %v2940_v34 = vpack.c.bf16 %v2540_v31, %v2539_v29  ;;  %v1380_v33 = vpop.f32.mrf.mxu1  ;;  %v1548_v46 = vadd.f32 %v1547_v42, %v1379_v30  ;;  %v613_v30 = vcvt.s32.f32 %v357_v12  ;;  %v617_v31 = vcvt.s32.f32 %v361_v19 }
 0x18c   :  { %v1381_v40 = vadd.f32 %v1380_v33, %v1211_v43  ;;  %v618_v42 = vcvt.s32.f32 %v362_v21  ;;  %v616_v39 = vcvt.s32.f32 %v360_v27  ;;  %v620_v45 = vcvt.s32.f32 %v364_v28  ;;  %v2218_v43 = vpop.permute.xlu0 %2217 }
 0x18d   :  { %3044 = vst [vmem:[%s3996_s4 + $0x68] sm:$0xff] %v2940_v34   ;;  %v1717_v56 = vadd.f32 %v1716_v44, %v1548_v46  ;;  %v615_v44 = vcvt.s32.f32 %v359_v22  ;;  %v773_v47 = vpack.c.bf16 %v617_v31, %v613_v30  ;;  %v2481_v31 = vld [vmem:[%s3995_s3 + $0x100] sm:$0xff] }
 0x18e   :  { %v774_v49 = vpack.c.bf16 %v618_v42, %v614_v32  ;;  %v776_v41 = vpack.c.bf16 %v620_v45, %v616_v39  ;;  %v2482_v42 = vld [vmem:[%s3995_s3 + $0x108] sm:$0xff]  ;;  %v3786_v45 = vld [vmem:[#allocation3 + $0x1b0] sm:$0xff] }
 0x18f   :  { %v2413_v1 = vmul.f32 %v2208_v57, %v1717_v56  ;;  %v775_v51 = vpack.c.bf16 %v619_v37, %v615_v44  ;;  %v3782_v44 = vld [vmem:[#allocation3 + $0x1a0] sm:$0xff]  ;;  %v3784_v39 = vld [vmem:[#allocation3 + $0x1a8] sm:$0xff] }
 0x191   :  { %v2541_v5 = vadd.f32 %v2477_v10, %v2413_v1  ;;  %v368_v10 = vunpack.c.2.s8 %v3746_v7 }
 0x192   :  { %v1549_v58 = vpop.f32.mrf.mxu2  ;;  %v1214_v0 = vpop.f32.mrf.mxu0 }
 0x193   :  { %v1718_v59 = vpop.f32.mrf.mxu3  ;;  %v1550_v62 = vadd.f32 %v1549_v58, %v1381_v40  ;;  %v1383_v8 = vpop.f32.mrf.mxu1 }
 0x194   :  { %v1384_v11 = vadd.f32 %v1383_v8, %v1214_v0  ;;  %v366_v0 = vunpack.c.2.s8 %v3742_v15  ;;  %v370_v8 = vunpack.c.3.s8 %v3742_v15  ;;  %v2233_v32 = vpop.permute.xlu0 %2232 }
 0x195   :  { %v1719_v2 = vadd.f32 %v1718_v59, %v1550_v62  ;;  %1253 = vmatmul.bf16.gmra.mxu0 %v769_v60  ;;  %v365_v59 = vunpack.c.2.s8 %v3740_v6  ;;  %v369_v62 = vunpack.c.3.s8 %v3740_v6 }
 0x196   :  { %1422 = vmatmul.bf16.gmra.mxu1 %v770_v61  ;;  %v626_v15 = vcvt.s32.f32 %v370_v8 }
 0x197   :  { %v2414_v14 = vmul.f32 %v2213_v63, %v1719_v2  ;;  %1591 = vmatmul.bf16.gmra.mxu2 %v771_v9  ;;  %v367_v9 = vunpack.c.2.s8 %v3744_v16  ;;  %v371_v2 = vunpack.c.3.s8 %v3744_v16  ;;  %v2228_v16 = vpop.permute.xlu2 %2227 }
 0x198   :  { %1760 = vmatmul.bf16.gmra.mxu3 %v772_v3 }
 0x199   :  { %v2542_v4 = vadd.f32 %v2478_v13, %v2414_v14  ;;  %v372_v13 = vunpack.c.3.s8 %v3746_v7  ;;  %v621_v14 = vcvt.s32.f32 %v365_v59  ;;  %v627_v12 = vcvt.s32.f32 %v371_v2 }
 0x19a   :  { %v1552_v17 = vpop.f32.mrf.mxu2  ;;  %v1216_v24 = vpop.f32.mrf.mxu0 }
 0x19b   :  { %v1721_v18 = vpop.f32.mrf.mxu3  ;;  %v2945_v23 = vpack.c.bf16 %v2542_v4, %v2541_v5  ;;  %v1385_v25 = vpop.f32.mrf.mxu1  ;;  %v1553_v29 = vadd.f32 %v1552_v17, %v1384_v11  ;;  %v625_v5 = vcvt.s32.f32 %v369_v62  ;;  %v622_v11 = vcvt.s32.f32 %v366_v0 }
 0x19c   :  { %v1386_v34 = vadd.f32 %v1385_v25, %v1216_v24  ;;  %v623_v4 = vcvt.s32.f32 %v367_v9  ;;  %v624_v17 = vcvt.s32.f32 %v368_v10 }
 0x19d   :  { %3045 = vst [vmem:[%s3996_s4 + $0x70] sm:$0xff] %v2945_v23   ;;  %v1722_v36 = vadd.f32 %v1721_v18, %v1553_v29  ;;  %v628_v18 = vcvt.s32.f32 %v372_v13  ;;  %v777_v23 = vpack.c.bf16 %v625_v5, %v621_v14  ;;  %v778_v7 = vpack.c.bf16 %v626_v15, %v622_v11 }
 0x19e   :  { %v779_v27 = vpack.c.bf16 %v627_v12, %v623_v4 }
 0x19f   :  { %v2415_v53 = vmul.f32 %v2218_v43, %v1722_v36  ;;  %v780_v28 = vpack.c.bf16 %v628_v18, %v624_v17  ;;  %v3788_v36 = vld [vmem:[#allocation3 + $0x1b8] sm:$0xff]  ;;  %v2243_v12 = vpop.permute.xlu2 %2242  ;;  %v2483_v17 = vld [vmem:[%s3995_s3 + $0x110] sm:$0xff] }
 0x1a0   :  { %v2484_v18 = vld [vmem:[%s3995_s3 + $0x118] sm:$0xff] }
 0x1a1   :  { %v2543_v40 = vadd.f32 %v2479_v54, %v2415_v53  ;;  %v376_v54 = vunpack.c.0.s8 %v3788_v36 }
 0x1a2   :  { %v1554_v33 = vpop.f32.mrf.mxu2  ;;  %v1219_v46 = vpop.f32.mrf.mxu0 }
 0x1a3   :  { %v1723_v35 = vpop.f32.mrf.mxu3  ;;  %v1555_v50 = vadd.f32 %v1554_v33, %v1386_v34  ;;  %v1388_v48 = vpop.f32.mrf.mxu1  ;;  %v632_v62 = vcvt.s32.f32 %v376_v54 }
 0x1a4   :  { %v1389_v57 = vadd.f32 %v1388_v48, %v1219_v46  ;;  %v374_v46 = vunpack.c.0.s8 %v3784_v39  ;;  %v378_v48 = vunpack.c.1.s8 %v3784_v39 }
 0x1a5   :  { %v1724_v38 = vadd.f32 %v1723_v35, %v1555_v50  ;;  %1258 = vmatmul.bf16.gmra.mxu0 %v773_v47  ;;  %v373_v35 = vunpack.c.0.s8 %v3782_v44  ;;  %v377_v50 = vunpack.c.1.s8 %v3782_v44 }
 0x1a6   :  { %1427 = vmatmul.bf16.gmra.mxu1 %v774_v49  ;;  %v634_v59 = vcvt.s32.f32 %v378_v48 }
 0x1a7   :  { %v2416_v56 = vmul.f32 %v2223_v52, %v1724_v38  ;;  %1596 = vmatmul.bf16.gmra.mxu2 %v775_v51  ;;  %v375_v51 = vunpack.c.0.s8 %v3786_v45  ;;  %v379_v38 = vunpack.c.1.s8 %v3786_v45 }
 0x1a8   :  { %1765 = vmatmul.bf16.gmra.mxu3 %v776_v41 }
 0x1a9   :  { %v2544_v58 = vadd.f32 %v2480_v55, %v2416_v56  ;;  %v380_v55 = vunpack.c.1.s8 %v3788_v36 }
 0x1aa   :  { %v1557_v60 = vpop.f32.mrf.mxu2  ;;  %v1221_v63 = vpop.f32.mrf.mxu0 }
 0x1ab   :  { %v1726_v61 = vpop.f32.mrf.mxu3  ;;  %v2950_v3 = vpack.c.bf16 %v2544_v58, %v2543_v40  ;;  %v1390_v1 = vpop.f32.mrf.mxu1  ;;  %v1558_v6 = vadd.f32 %v1557_v60, %v1389_v57  ;;  %v629_v40 = vcvt.s32.f32 %v373_v35  ;;  %v633_v57 = vcvt.s32.f32 %v377_v50 }
 0x1ac   :  { %v1391_v20 = vadd.f32 %v1390_v1, %v1221_v63  ;;  %v630_v58 = vcvt.s32.f32 %v374_v46  ;;  %v631_v60 = vcvt.s32.f32 %v375_v51  ;;  %v636_v0 = vcvt.s32.f32 %v380_v55  ;;  %v2248_v55 = vpop.permute.xlu0 %2247 }
 0x1ad   :  { %3046 = vst [vmem:[%s3996_s4 + $0x78] sm:$0xff] %v2950_v3   ;;  %v1727_v19 = vadd.f32 %v1726_v61, %v1558_v6  ;;  %v635_v61 = vcvt.s32.f32 %v379_v38  ;;  %v2238_v3 = vpop.permute.xlu1 %2237  ;;  %v781_v2 = vpack.c.bf16 %v633_v57, %v629_v40 }
 0x1ae   :  { %v782_v10 = vpack.c.bf16 %v634_v59, %v630_v58  ;;  %v784_v11 = vpack.c.bf16 %v636_v0, %v632_v62  ;;  %v2485_v58 = vld [vmem:[%s3995_s3 + $0x120] sm:$0xff]  ;;  %v2486_v59 = vld [vmem:[%s3995_s3 + $0x128] sm:$0xff]  ;;  %v3828_v0 = vld [vmem:[#allocation3 + $0x1d0] sm:$0xff] }
 0x1af   :  { %v2417_v29 = vmul.f32 %v2228_v16, %v1727_v19  ;;  %v783_v5 = vpack.c.bf16 %v635_v61, %v631_v60  ;;  %v3824_v60 = vld [vmem:[#allocation3 + $0x1c0] sm:$0xff]  ;;  %v3826_v62 = vld [vmem:[#allocation3 + $0x1c8] sm:$0xff] }
 0x1b1   :  { %v2545_v34 = vadd.f32 %v2481_v31, %v2417_v29  ;;  %v387_v31 = vunpack.c.3.s8 %v3786_v45 }
 0x1b2   :  { %v1559_v21 = vpop.f32.mrf.mxu2  ;;  %v1224_v25 = vpop.f32.mrf.mxu0 }
 0x1b3   :  { %v1728_v22 = vpop.f32.mrf.mxu3  ;;  %v1560_v24 = vadd.f32 %v1559_v21, %v1391_v20  ;;  %v1393_v26 = vpop.f32.mrf.mxu1  ;;  %v643_v35 = vcvt.s32.f32 %v387_v31 }
 0x1b4   :  { %v1394_v33 = vadd.f32 %v1393_v26, %v1224_v25  ;;  %v382_v25 = vunpack.c.2.s8 %v3784_v39  ;;  %v386_v26 = vunpack.c.3.s8 %v3784_v39 }
 0x1b5   :  { %v1729_v30 = vadd.f32 %v1728_v22, %v1560_v24  ;;  %1263 = vmatmul.bf16.gmra.mxu0 %v777_v23  ;;  %v381_v22 = vunpack.c.2.s8 %v3782_v44  ;;  %v385_v24 = vunpack.c.3.s8 %v3782_v44  ;;  %v2253_v57 = vpop.permute.xlu1 %2252 }
 0x1b6   :  { %1432 = vmatmul.bf16.gmra.mxu1 %v778_v7  ;;  %v642_v39 = vcvt.s32.f32 %v386_v26 }
 0x1b7   :  { %v2418_v37 = vmul.f32 %v2233_v32, %v1729_v30  ;;  %1601 = vmatmul.bf16.gmra.mxu2 %v779_v27  ;;  %v383_v27 = vunpack.c.2.s8 %v3786_v45  ;;  %v384_v32 = vunpack.c.2.s8 %v3788_v36 }
 0x1b8   :  { %1770 = vmatmul.bf16.gmra.mxu3 %v780_v28 }
 0x1b9   :  { %v2546_v43 = vadd.f32 %v2482_v42, %v2418_v37  ;;  %v388_v42 = vunpack.c.3.s8 %v3788_v36  ;;  %v637_v37 = vcvt.s32.f32 %v381_v22 }
 0x1ba   :  { %v1562_v47 = vpop.f32.mrf.mxu2  ;;  %v1226_v52 = vpop.f32.mrf.mxu0 }
 0x1bb   :  { %v1731_v49 = vpop.f32.mrf.mxu3  ;;  %v2955_v41 = vpack.c.bf16 %v2546_v43, %v2545_v34  ;;  %v1395_v53 = vpop.f32.mrf.mxu1  ;;  %v1563_v56 = vadd.f32 %v1562_v47, %v1394_v33  ;;  %v641_v34 = vcvt.s32.f32 %v385_v24  ;;  %v638_v43 = vcvt.s32.f32 %v382_v25 }
 0x1bc   :  { %v1396_v9 = vadd.f32 %v1395_v53, %v1226_v52  ;;  %v639_v33 = vcvt.s32.f32 %v383_v27  ;;  %v640_v47 = vcvt.s32.f32 %v384_v32 }
 0x1bd   :  { %3047 = vst [vmem:[%s3996_s4 + $0x80] sm:$0xff] %v2955_v41   ;;  %v1732_v8 = vadd.f32 %v1731_v49, %v1563_v56  ;;  %v644_v49 = vcvt.s32.f32 %v388_v42  ;;  %v785_v51 = vpack.c.bf16 %v641_v34, %v637_v37  ;;  %v786_v41 = vpack.c.bf16 %v642_v39, %v638_v43  ;;  %v2258_v43 = vpop.permute.xlu2 %2257 }
 0x1be   :  { %v787_v38 = vpack.c.bf16 %v643_v35, %v639_v33  ;;  %v2263_v35 = vpop.permute.xlu0 %2262 }
 0x1bf   :  { %v2419_v15 = vmul.f32 %v2238_v3, %v1732_v8  ;;  %v788_v54 = vpack.c.bf16 %v644_v49, %v640_v47  ;;  %v3830_v8 = vld [vmem:[#allocation3 + $0x1d8] sm:$0xff]  ;;  %v2487_v47 = vld [vmem:[%s3995_s3 + $0x130] sm:$0xff] }
 0x1c0   :  { %v2488_v49 = vld [vmem:[%s3995_s3 + $0x138] sm:$0xff] }
 0x1c1   :  { %v2547_v20 = vadd.f32 %v2483_v17, %v2419_v15  ;;  %v392_v17 = vunpack.c.0.s8 %v3830_v8 }
 0x1c2   :  { %v1564_v63 = vpop.f32.mrf.mxu2  ;;  %v1229_v6 = vpop.f32.mrf.mxu0 }
 0x1c3   :  { %v1733_v1 = vpop.f32.mrf.mxu3  ;;  %v1565_v13 = vadd.f32 %v1564_v63, %v1396_v9  ;;  %v1398_v14 = vpop.f32.mrf.mxu1  ;;  %v648_v24 = vcvt.s32.f32 %v392_v17 }
 0x1c4   :  { %v1399_v21 = vadd.f32 %v1398_v14, %v1229_v6  ;;  %v390_v6 = vunpack.c.0.s8 %v3826_v62  ;;  %v394_v14 = vunpack.c.1.s8 %v3826_v62 }
 0x1c5   :  { %v1734_v4 = vadd.f32 %v1733_v1, %v1565_v13  ;;  %1268 = vmatmul.bf16.gmra.mxu0 %v781_v2  ;;  %v389_v1 = vunpack.c.0.s8 %v3824_v60  ;;  %v393_v13 = vunpack.c.1.s8 %v3824_v60 }
 0x1c6   :  { %1437 = vmatmul.bf16.gmra.mxu1 %v782_v10  ;;  %v650_v22 = vcvt.s32.f32 %v394_v14 }
 0x1c7   :  { %v2420_v19 = vmul.f32 %v2243_v12, %v1734_v4  ;;  %1606 = vmatmul.bf16.gmra.mxu2 %v783_v5  ;;  %v391_v5 = vunpack.c.0.s8 %v3828_v0  ;;  %v395_v12 = vunpack.c.1.s8 %v3828_v0 }
 0x1c8   :  { %1775 = vmatmul.bf16.gmra.mxu3 %v784_v11 }
 0x1c9   :  { %v2548_v16 = vadd.f32 %v2484_v18, %v2420_v19  ;;  %v396_v18 = vunpack.c.1.s8 %v3830_v8 }
 0x1ca   :  { %v1567_v23 = vpop.f32.mrf.mxu2  ;;  %v1231_v29 = vpop.f32.mrf.mxu0 }
 0x1cb   :  { %v1736_v7 = vpop.f32.mrf.mxu3  ;;  %v2960_v28 = vpack.c.bf16 %v2548_v16, %v2547_v20  ;;  %v1400_v30 = vpop.f32.mrf.mxu1  ;;  %v1568_v44 = vadd.f32 %v1567_v23, %v1399_v21  ;;  %v645_v20 = vcvt.s32.f32 %v389_v1  ;;  %v649_v16 = vcvt.s32.f32 %v393_v13 }
 0x1cc   :  { %v1401_v46 = vadd.f32 %v1400_v30, %v1231_v29  ;;  %v646_v21 = vcvt.s32.f32 %v390_v6  ;;  %v647_v23 = vcvt.s32.f32 %v391_v5  ;;  %v652_v25 = vcvt.s32.f32 %v396_v18  ;;  %v2268_v18 = vpop.permute.xlu1 %2267 }
 0x1cd   :  { %3048 = vst [vmem:[%s3996_s4 + $0x88] sm:$0xff] %v2960_v28   ;;  %v1737_v50 = vadd.f32 %v1736_v7, %v1568_v44  ;;  %v651_v7 = vcvt.s32.f32 %v395_v12  ;;  %v789_v30 = vpack.c.bf16 %v649_v16, %v645_v20  ;;  %v2273_v16 = vpop.permute.xlu2 %2272 }
 0x1ce   :  { %v790_v31 = vpack.c.bf16 %v650_v22, %v646_v21  ;;  %v792_v34 = vpack.c.bf16 %v652_v25, %v648_v24  ;;  %v2489_v21 = vld [vmem:[%s3995_s3 + $0x140] sm:$0xff]  ;;  %v2490_v22 = vld [vmem:[%s3995_s3 + $0x148] sm:$0xff]  ;;  %v3870_v25 = vld [vmem:[#allocation3 + $0x1f0] sm:$0xff] }
 0x1cf   :  { %v2421_v56 = vmul.f32 %v2248_v55, %v1737_v50  ;;  %v791_v37 = vpack.c.bf16 %v651_v7, %v647_v23  ;;  %v3866_v23 = vld [vmem:[#allocation3 + $0x1e0] sm:$0xff]  ;;  %v3868_v24 = vld [vmem:[#allocation3 + $0x1e8] sm:$0xff] }
 0x1d1   :  { %v2549_v9 = vadd.f32 %v2485_v58, %v2421_v56  ;;  %v400_v58 = vunpack.c.2.s8 %v3830_v8 }
 0x1d2   :  { %v1569_v45 = vpop.f32.mrf.mxu2  ;;  %v1234_v52 = vpop.f32.mrf.mxu0 }
 0x1d3   :  { %v1738_v48 = vpop.f32.mrf.mxu3  ;;  %v1570_v36 = vadd.f32 %v1569_v45, %v1401_v46  ;;  %v1403_v53 = vpop.f32.mrf.mxu1 }
 0x1d4   :  { %v1404_v63 = vadd.f32 %v1403_v53, %v1234_v52  ;;  %v401_v52 = vunpack.c.3.s8 %v3824_v60  ;;  %v398_v53 = vunpack.c.2.s8 %v3826_v62 }
 0x1d5   :  { %v1739_v40 = vadd.f32 %v1738_v48, %v1570_v36  ;;  %1273 = vmatmul.bf16.gmra.mxu0 %v785_v51  ;;  %v397_v51 = vunpack.c.2.s8 %v3824_v60 }
 0x1d6   :  { %1442 = vmatmul.bf16.gmra.mxu1 %v786_v41 }
 0x1d7   :  { %v2422_v61 = vmul.f32 %v2253_v57, %v1739_v40  ;;  %1611 = vmatmul.bf16.gmra.mxu2 %v787_v38  ;;  %v402_v38 = vunpack.c.3.s8 %v3826_v62  ;;  %v403_v57 = vunpack.c.3.s8 %v3828_v0 }
 0x1d8   :  { %1780 = vmatmul.bf16.gmra.mxu3 %v788_v54  ;;  %v399_v54 = vunpack.c.2.s8 %v3828_v0 }
 0x1d9   :  { %v2550_v3 = vadd.f32 %v2486_v59, %v2422_v61  ;;  %v404_v59 = vunpack.c.3.s8 %v3830_v8  ;;  %v653_v61 = vcvt.s32.f32 %v397_v51  ;;  %v658_v62 = vcvt.s32.f32 %v402_v38 }
 0x1da   :  { %v1572_v2 = vpop.f32.mrf.mxu2  ;;  %v1236_v15 = vpop.f32.mrf.mxu0  ;;  %v659_v1 = vcvt.s32.f32 %v403_v57 }
 0x1db   :  { %v1741_v10 = vpop.f32.mrf.mxu3  ;;  %v2965_v11 = vpack.c.bf16 %v2550_v3, %v2549_v9  ;;  %v1405_v4 = vpop.f32.mrf.mxu1  ;;  %v1573_v19 = vadd.f32 %v1572_v2, %v1404_v63  ;;  %v657_v9 = vcvt.s32.f32 %v401_v52  ;;  %v654_v3 = vcvt.s32.f32 %v398_v53 }
 0x1dc   :  { %v1406_v27 = vadd.f32 %v1405_v4, %v1236_v15  ;;  %v655_v63 = vcvt.s32.f32 %v399_v54  ;;  %v656_v2 = vcvt.s32.f32 %v400_v58 }
 0x1dd   :  { %3049 = vst [vmem:[%s3996_s4 + $0x90] sm:$0xff] %v2965_v11   ;;  %v1742_v26 = vadd.f32 %v1741_v10, %v1573_v19  ;;  %v660_v10 = vcvt.s32.f32 %v404_v59  ;;  %v793_v5 = vpack.c.bf16 %v657_v9, %v653_v61  ;;  %v794_v11 = vpack.c.bf16 %v658_v62, %v654_v3  ;;  %v2278_v3 = vpop.permute.xlu0 %2277 }
 0x1de   :  { %v795_v12 = vpack.c.bf16 %v659_v1, %v655_v63  ;;  %v2283_v1 = vpop.permute.xlu1 %2282 }
 0x1df   :  { %v2423_v39 = vmul.f32 %v2258_v43, %v1742_v26  ;;  %v796_v17 = vpack.c.bf16 %v660_v10, %v656_v2  ;;  %v3872_v26 = vld [vmem:[#allocation3 + $0x1f8] sm:$0xff]  ;;  %v2491_v2 = vld [vmem:[%s3995_s3 + $0x150] sm:$0xff] }
 0x1e0   :  { %v2492_v10 = vld [vmem:[%s3995_s3 + $0x158] sm:$0xff] }
 0x1e1   :  { %v2551_v46 = vadd.f32 %v2487_v47, %v2423_v39  ;;  %v408_v47 = vunpack.c.0.s8 %v3872_v26 }
 0x1e2   :  { %v1574_v28 = vpop.f32.mrf.mxu2  ;;  %v1239_v42 = vpop.f32.mrf.mxu0 }
 0x1e3   :  { %v1743_v29 = vpop.f32.mrf.mxu3  ;;  %v1575_v32 = vadd.f32 %v1574_v28, %v1406_v27  ;;  %v1408_v44 = vpop.f32.mrf.mxu1  ;;  %v664_v52 = vcvt.s32.f32 %v408_v47 }
 0x1e4   :  { %v1409_v48 = vadd.f32 %v1408_v44, %v1239_v42  ;;  %v409_v42 = vunpack.c.1.s8 %v3866_v23  ;;  %v406_v44 = vunpack.c.0.s8 %v3868_v24 }
 0x1e5   :  { %v1744_v33 = vadd.f32 %v1743_v29, %v1575_v32  ;;  %1278 = vmatmul.bf16.gmra.mxu0 %v789_v30  ;;  %v405_v30 = vunpack.c.0.s8 %v3866_v23 }
 0x1e6   :  { %1447 = vmatmul.bf16.gmra.mxu1 %v790_v31 }
 0x1e7   :  { %v2424_v50 = vmul.f32 %v2263_v35, %v1744_v33  ;;  %1616 = vmatmul.bf16.gmra.mxu2 %v791_v37  ;;  %v410_v37 = vunpack.c.1.s8 %v3868_v24  ;;  %v411_v35 = vunpack.c.1.s8 %v3870_v25 }
 0x1e8   :  { %1785 = vmatmul.bf16.gmra.mxu3 %v792_v34  ;;  %v407_v34 = vunpack.c.0.s8 %v3870_v25 }
 0x1e9   :  { %v2552_v45 = vadd.f32 %v2488_v49, %v2424_v50  ;;  %v412_v49 = vunpack.c.1.s8 %v3872_v26  ;;  %v666_v51 = vcvt.s32.f32 %v410_v37 }
 0x1ea   :  { %v1577_v41 = vpop.f32.mrf.mxu2  ;;  %v1241_v56 = vpop.f32.mrf.mxu0 }
 0x1eb   :  { %v1746_v36 = vpop.f32.mrf.mxu3  ;;  %v2970_v55 = vpack.c.bf16 %v2552_v45, %v2551_v46  ;;  %v1410_v40 = vpop.f32.mrf.mxu1  ;;  %v1578_v60 = vadd.f32 %v1577_v41, %v1409_v48  ;;  %v661_v46 = vcvt.s32.f32 %v405_v30  ;;  %v665_v45 = vcvt.s32.f32 %v409_v42 }
 0x1ec   :  { %v1411_v6 = vadd.f32 %v1410_v40, %v1241_v56  ;;  %v662_v48 = vcvt.s32.f32 %v406_v44  ;;  %v663_v41 = vcvt.s32.f32 %v407_v34  ;;  %v668_v53 = vcvt.s32.f32 %v412_v49  ;;  %v2288_v49 = vpop.permute.xlu2 %2287 }
 0x1ed   :  { %3050 = vst [vmem:[%s3996_s4 + $0x98] sm:$0xff] %v2970_v55   ;;  %v1747_v13 = vadd.f32 %v1746_v36, %v1578_v60  ;;  %v667_v36 = vcvt.s32.f32 %v411_v35  ;;  %v797_v40 = vpack.c.bf16 %v665_v45, %v661_v46  ;;  %v2293_v45 = vpop.permute.xlu0 %2292 }
 0x1ee   :  { %v798_v57 = vpack.c.bf16 %v666_v51, %v662_v48  ;;  %v800_v9 = vpack.c.bf16 %v668_v53, %v664_v52  ;;  %v2493_v48 = vld [vmem:[%s3995_s3 + $0x160] sm:$0xff]  ;;  %v2494_v51 = vld [vmem:[%s3995_s3 + $0x168] sm:$0xff] }
 0x1ef   :  { %v2425_v19 = vmul.f32 %v2268_v18, %v1747_v13  ;;  %v799_v61 = vpack.c.bf16 %v667_v36, %v663_v41 }
 0x1f1   :  { %v2553_v27 = vadd.f32 %v2489_v21, %v2425_v19  ;;  %v416_v21 = vunpack.c.2.s8 %v3872_v26 }
 0x1f2   :  { %v1579_v0 = vpop.f32.mrf.mxu2  ;;  %v1244_v15 = vpop.f32.mrf.mxu0 }
 0x1f3   :  { %v1748_v14 = vpop.f32.mrf.mxu3  ;;  %v1580_v8 = vadd.f32 %v1579_v0, %v1411_v6  ;;  %v1413_v4 = vpop.f32.mrf.mxu1 }
 0x1f4   :  { %v1414_v29 = vadd.f32 %v1413_v4, %v1244_v15  ;;  %v417_v15 = vunpack.c.3.s8 %v3866_v23  ;;  %v414_v4 = vunpack.c.2.s8 %v3868_v24 }
 0x1f5   :  { %v1749_v20 = vadd.f32 %v1748_v14, %v1580_v8  ;;  %1283 = vmatmul.bf16.gmra.mxu0 %v793_v5  ;;  %v413_v5 = vunpack.c.2.s8 %v3866_v23 }
 0x1f6   :  { %1452 = vmatmul.bf16.gmra.mxu1 %v794_v11 }
 0x1f7   :  { %v2426_v7 = vmul.f32 %v2273_v16, %v1749_v20  ;;  %1621 = vmatmul.bf16.gmra.mxu2 %v795_v12  ;;  %v418_v12 = vunpack.c.3.s8 %v3868_v24  ;;  %v419_v16 = vunpack.c.3.s8 %v3870_v25 }
 0x1f8   :  { %1790 = vmatmul.bf16.gmra.mxu3 %v796_v17  ;;  %v415_v17 = vunpack.c.2.s8 %v3870_v25 }
 0x1f9   :  { %v2554_v28 = vadd.f32 %v2490_v22, %v2426_v7  ;;  %v420_v22 = vunpack.c.3.s8 %v3872_v26  ;;  %v669_v7 = vcvt.s32.f32 %v413_v5  ;;  %v674_v24 = vcvt.s32.f32 %v418_v12 }
 0x1fa   :  { %v1582_v31 = vpop.f32.mrf.mxu2  ;;  %v1246_v39 = vpop.f32.mrf.mxu0  ;;  %v675_v30 = vcvt.s32.f32 %v419_v16 }
 0x1fb   :  { %v1751_v32 = vpop.f32.mrf.mxu3  ;;  %v2975_v43 = vpack.c.bf16 %v2554_v28, %v2553_v27  ;;  %v1415_v33 = vpop.f32.mrf.mxu1  ;;  %v1583_v50 = vadd.f32 %v1582_v31, %v1414_v29  ;;  %v673_v27 = vcvt.s32.f32 %v417_v15  ;;  %v670_v28 = vcvt.s32.f32 %v414_v4 }
 0x1fc   :  { %v1416_v54 = vadd.f32 %v1415_v33, %v1246_v39  ;;  %v671_v29 = vcvt.s32.f32 %v415_v17  ;;  %v672_v31 = vcvt.s32.f32 %v416_v21 }
 0x1fd   :  { %3051 = vst [vmem:[%s3996_s4 + $0xa0] sm:$0xff] %v2975_v43   ;;  %v1752_v38 = vadd.f32 %v1751_v32, %v1583_v50  ;;  %v676_v32 = vcvt.s32.f32 %v420_v22  ;;  %v801_v34 = vpack.c.bf16 %v673_v27, %v669_v7  ;;  %v802_v43 = vpack.c.bf16 %v674_v24, %v670_v28  ;;  %v2308_v27 = vpop.permute.xlu0 %2307 }
 0x1fe   :  { %v803_v35 = vpack.c.bf16 %v675_v30, %v671_v29  ;;  %v2497_v30 = vld [vmem:[%s3995_s3 + $0x180] sm:$0xff] }
 0x1ff   :  { %v2427_v62 = vmul.f32 %v2278_v3, %v1752_v38  ;;  %v804_v47 = vpack.c.bf16 %v676_v32, %v672_v31  ;;  %v2498_v31 = vld [vmem:[%s3995_s3 + $0x188] sm:$0xff] }
 0x201   :  { %v2555_v6 = vadd.f32 %v2491_v2, %v2427_v62 }
 0x202   :  { %v1584_v55 = vpop.f32.mrf.mxu2  ;;  %v1249_v59 = vpop.f32.mrf.mxu0 }
 0x203   :  { %v1753_v56 = vpop.f32.mrf.mxu3  ;;  %v1585_v58 = vadd.f32 %v1584_v55, %v1416_v54  ;;  %v1418_v60 = vpop.f32.mrf.mxu1 }
 0x204   :  { %v1419_v14 = vadd.f32 %v1418_v60, %v1249_v59 }
 0x205   :  { %v1754_v63 = vadd.f32 %v1753_v56, %v1585_v58  ;;  %1288 = vmatmul.bf16.gmra.mxu0 %v797_v40 }
 0x206   :  { %1457 = vmatmul.bf16.gmra.mxu1 %v798_v57 }
 0x207   :  { %v2428_v13 = vmul.f32 %v2283_v1, %v1754_v63  ;;  %1626 = vmatmul.bf16.gmra.mxu2 %v799_v61  ;;  %v2298_v63 = vpop.permute.xlu1 %2297 }
 0x208   :  { %1795 = vmatmul.bf16.gmra.mxu3 %v800_v9 }
 0x209   :  { %v2556_v0 = vadd.f32 %v2492_v10, %v2428_v13  ;;  %v2303_v10 = vpop.permute.xlu2 %2302  ;;  %v2495_v13 = vld [vmem:[%s3995_s3 + $0x170] sm:$0xff] }
 0x20a   :  { %v1587_v11 = vpop.f32.mrf.mxu2  ;;  %v1251_v19 = vpop.f32.mrf.mxu0 }
 0x20b   :  { %v1756_v8 = vpop.f32.mrf.mxu3  ;;  %v2980_v18 = vpack.c.bf16 %v2556_v0, %v2555_v6  ;;  %v1420_v20 = vpop.f32.mrf.mxu1  ;;  %v1588_v23 = vadd.f32 %v1587_v11, %v1419_v14  ;;  %v2496_v6 = vld [vmem:[%s3995_s3 + $0x178] sm:$0xff] }
 0x20c   :  { %v1421_v44 = vadd.f32 %v1420_v20, %v1251_v19 }
 0x20d   :  { %3052 = vst [vmem:[%s3996_s4 + $0xa8] sm:$0xff] %v2980_v18   ;;  %v1757_v42 = vadd.f32 %v1756_v8, %v1588_v23 }
 0x20f   :  { %v2429_v50 = vmul.f32 %v2288_v49, %v1757_v42  ;;  %v2313_v29 = vpop.permute.xlu1 %2312 }
 0x211   :  { %v2557_v36 = vadd.f32 %v2493_v48, %v2429_v50 }
 0x212   :  { %v1589_v25 = vpop.f32.mrf.mxu2  ;;  %v1254_v39 = vpop.f32.mrf.mxu0 }
 0x213   :  { %v1758_v37 = vpop.f32.mrf.mxu3  ;;  %v1590_v26 = vadd.f32 %v1589_v25, %v1421_v44  ;;  %v1423_v33 = vpop.f32.mrf.mxu1 }
 0x214   :  { %v1424_v53 = vadd.f32 %v1423_v33, %v1254_v39 }
 0x215   :  { %v1759_v46 = vadd.f32 %v1758_v37, %v1590_v26  ;;  %1293 = vmatmul.bf16.gmra.mxu0 %v801_v34 }
 0x216   :  { %1462 = vmatmul.bf16.gmra.mxu1 %v802_v43 }
 0x217   :  { %v2430_v41 = vmul.f32 %v2293_v45, %v1759_v46  ;;  %1631 = vmatmul.bf16.gmra.mxu2 %v803_v35 }
 0x218   :  { %1800 = vmatmul.bf16.gmra.mxu3 %v804_v47 }
 0x219   :  { %v2558_v52 = vadd.f32 %v2494_v51, %v2430_v41  ;;  %v2318_v51 = vpop.permute.xlu2 %2317 }
 0x21a   :  { %v1592_v38 = vpop.f32.mrf.mxu2  ;;  %v1256_v56 = vpop.f32.mrf.mxu0 }
 0x21b   :  { %v1761_v54 = vpop.f32.mrf.mxu3  ;;  %v2985_v55 = vpack.c.bf16 %v2558_v52, %v2557_v36  ;;  %v1425_v40 = vpop.f32.mrf.mxu1  ;;  %v1593_v57 = vadd.f32 %v1592_v38, %v1424_v53  ;;  %v2499_v53 = vld [vmem:[%s3995_s3 + $0x190] sm:$0xff]  ;;  %v2500_v38 = vld [vmem:[%s3995_s3 + $0x198] sm:$0xff] }
 0x21c   :  { %v1426_v59 = vadd.f32 %v1425_v40, %v1256_v56  ;;  %v2323_v52 = vpop.permute.xlu0 %2322 }
 0x21d   :  { %3053 = vst [vmem:[%s3996_s4 + $0xb0] sm:$0xff] %v2985_v55   ;;  %v1762_v58 = vadd.f32 %v1761_v54, %v1593_v57 }
 0x21f   :  { %v2431_v1 = vmul.f32 %v2298_v63, %v1762_v58 }
 0x221   :  { %v2559_v14 = vadd.f32 %v2495_v13, %v2431_v1 }
 0x222   :  { %v1594_v60 = vpop.f32.mrf.mxu2  ;;  %v1259_v3 = vpop.f32.mrf.mxu0 }
 0x223   :  { %v1763_v61 = vpop.f32.mrf.mxu3  ;;  %v1595_v9 = vadd.f32 %v1594_v60, %v1426_v59  ;;  %v1428_v62 = vpop.f32.mrf.mxu1 }
 0x224   :  { %v1429_v11 = vadd.f32 %v1428_v62, %v1259_v3 }
 0x225   :  { %v1764_v2 = vadd.f32 %v1763_v61, %v1595_v9 }
 0x227   :  { %v2432_v0 = vmul.f32 %v2303_v10, %v1764_v2 }
 0x229   :  { %v2560_v5 = vadd.f32 %v2496_v6, %v2432_v0  ;;  %v2328_v6 = vpop.permute.xlu1 %2327 }
 0x22a   :  { %v1597_v8 = vpop.f32.mrf.mxu2  ;;  %v1261_v12 = vpop.f32.mrf.mxu0 }
 0x22b   :  { %v1766_v15 = vpop.f32.mrf.mxu3  ;;  %v2990_v4 = vpack.c.bf16 %v2560_v5, %v2559_v14  ;;  %v1430_v17 = vpop.f32.mrf.mxu1  ;;  %v1598_v18 = vadd.f32 %v1597_v8, %v1429_v11  ;;  %v2501_v11 = vld [vmem:[%s3995_s3 + $0x1a0] sm:$0xff]  ;;  %v2502_v8 = vld [vmem:[%s3995_s3 + $0x1a8] sm:$0xff] }
 0x22c   :  { %v1431_v20 = vadd.f32 %v1430_v17, %v1261_v12  ;;  %v2333_v5 = vpop.permute.xlu2 %2332 }
 0x22d   :  { %3054 = vst [vmem:[%s3996_s4 + $0xb8] sm:$0xff] %v2990_v4   ;;  %v1767_v19 = vadd.f32 %v1766_v15, %v1598_v18 }
 0x22f   :  { %v2433_v28 = vmul.f32 %v2308_v27, %v1767_v19 }
 0x231   :  { %v2561_v42 = vadd.f32 %v2497_v30, %v2433_v28 }
 0x232   :  { %v1599_v16 = vpop.f32.mrf.mxu2  ;;  %v1264_v23 = vpop.f32.mrf.mxu0 }
 0x233   :  { %v1768_v21 = vpop.f32.mrf.mxu3  ;;  %v1600_v22 = vadd.f32 %v1599_v16, %v1431_v20  ;;  %v1433_v7 = vpop.f32.mrf.mxu1 }
 0x234   :  { %v1434_v25 = vadd.f32 %v1433_v7, %v1264_v23 }
 0x235   :  { %v1769_v24 = vadd.f32 %v1768_v21, %v1600_v22 }
 0x237   :  { %v2434_v32 = vmul.f32 %v2313_v29, %v1769_v24 }
 0x239   :  { %v2562_v44 = vadd.f32 %v2498_v31, %v2434_v32  ;;  %v2338_v31 = vpop.permute.xlu0 %2337 }
 0x23a   :  { %v1602_v37 = vpop.f32.mrf.mxu2  ;;  %v1266_v26 = vpop.f32.mrf.mxu0 }
 0x23b   :  { %v1771_v34 = vpop.f32.mrf.mxu3  ;;  %v2995_v43 = vpack.c.bf16 %v2562_v44, %v2561_v42  ;;  %v1435_v39 = vpop.f32.mrf.mxu1  ;;  %v1603_v33 = vadd.f32 %v1602_v37, %v1434_v25  ;;  %v2503_v25 = vld [vmem:[%s3995_s3 + $0x1b0] sm:$0xff]  ;;  %v2504_v37 = vld [vmem:[%s3995_s3 + $0x1b8] sm:$0xff] }
 0x23c   :  { %v1436_v47 = vadd.f32 %v1435_v39, %v1266_v26  ;;  %v2343_v44 = vpop.permute.xlu1 %2342 }
 0x23d   :  { %3055 = vst [vmem:[%s3996_s4 + $0xc0] sm:$0xff] %v2995_v43   ;;  %v1772_v35 = vadd.f32 %v1771_v34, %v1603_v33 }
 0x23f   :  { %v2435_v41 = vmul.f32 %v2318_v51, %v1772_v35 }
 0x241   :  { %v2563_v55 = vadd.f32 %v2499_v53, %v2435_v41 }
 0x242   :  { %v1604_v49 = vpop.f32.mrf.mxu2  ;;  %v1269_v45 = vpop.f32.mrf.mxu0 }
 0x243   :  { %v1773_v50 = vpop.f32.mrf.mxu3  ;;  %v1605_v46 = vadd.f32 %v1604_v49, %v1436_v47  ;;  %v1438_v48 = vpop.f32.mrf.mxu1 }
 0x244   :  { %v1439_v40 = vadd.f32 %v1438_v48, %v1269_v45 }
 0x245   :  { %v1774_v36 = vadd.f32 %v1773_v50, %v1605_v46 }
 0x247   :  { %v2436_v54 = vmul.f32 %v2323_v52, %v1774_v36 }
 0x249   :  { %v2564_v56 = vadd.f32 %v2500_v38, %v2436_v54  ;;  %v2348_v38 = vpop.permute.xlu2 %2347 }
 0x24a   :  { %v1607_v57 = vpop.f32.mrf.mxu2  ;;  %v1271_v60 = vpop.f32.mrf.mxu0 }
 0x24b   :  { %v1776_v58 = vpop.f32.mrf.mxu3  ;;  %v3000_v59 = vpack.c.bf16 %v2564_v56, %v2563_v55  ;;  %v1440_v61 = vpop.f32.mrf.mxu1  ;;  %v1608_v9 = vadd.f32 %v1607_v57, %v1439_v40  ;;  %v2505_v40 = vld [vmem:[%s3995_s3 + $0x1c0] sm:$0xff]  ;;  %v2506_v57 = vld [vmem:[%s3995_s3 + $0x1c8] sm:$0xff] }
 0x24c   :  { %v1441_v62 = vadd.f32 %v1440_v61, %v1271_v60  ;;  %v2353_v56 = vpop.permute.xlu0 %2352 }
 0x24d   :  { %3056 = vst [vmem:[%s3996_s4 + $0xc8] sm:$0xff] %v3000_v59   ;;  %v1777_v3 = vadd.f32 %v1776_v58, %v1608_v9 }
 0x24f   :  { %v2437_v0 = vmul.f32 %v2328_v6, %v1777_v3 }
 0x251   :  { %v2565_v4 = vadd.f32 %v2501_v11, %v2437_v0 }
 0x252   :  { %v1609_v63 = vpop.f32.mrf.mxu2  ;;  %v1274_v10 = vpop.f32.mrf.mxu0 }
 0x253   :  { %v1778_v1 = vpop.f32.mrf.mxu3  ;;  %v1610_v2 = vadd.f32 %v1609_v63, %v1441_v62  ;;  %v1443_v13 = vpop.f32.mrf.mxu1 }
 0x254   :  { %v1444_v17 = vadd.f32 %v1443_v13, %v1274_v10 }
 0x255   :  { %v1779_v14 = vadd.f32 %v1778_v1, %v1610_v2 }
 0x257   :  { %v2438_v15 = vmul.f32 %v2333_v5, %v1779_v14 }
 0x259   :  { %v2566_v12 = vadd.f32 %v2502_v8, %v2438_v15  ;;  %v2358_v8 = vpop.permute.xlu1 %2357 }
 0x25a   :  { %v1612_v18 = vpop.f32.mrf.mxu2  ;;  %v1276_v16 = vpop.f32.mrf.mxu0 }
 0x25b   :  { %v1781_v19 = vpop.f32.mrf.mxu3  ;;  %v3005_v20 = vpack.c.bf16 %v2566_v12, %v2565_v4  ;;  %v1445_v21 = vpop.f32.mrf.mxu1  ;;  %v1613_v22 = vadd.f32 %v1612_v18, %v1444_v17  ;;  %v2507_v17 = vld [vmem:[%s3995_s3 + $0x1d0] sm:$0xff]  ;;  %v2508_v18 = vld [vmem:[%s3995_s3 + $0x1d8] sm:$0xff] }
 0x25c   :  { %v1446_v7 = vadd.f32 %v1445_v21, %v1276_v16  ;;  %v2363_v12 = vpop.permute.xlu2 %2362 }
 0x25d   :  { %3057 = vst [vmem:[%s3996_s4 + $0xd0] sm:$0xff] %v3005_v20   ;;  %v1782_v23 = vadd.f32 %v1781_v19, %v1613_v22 }
 0x25f   :  { %v2439_v32 = vmul.f32 %v2338_v31, %v1782_v23 }
 0x261   :  { %v2567_v43 = vadd.f32 %v2503_v25, %v2439_v32 }
 0x262   :  { %v1614_v27 = vpop.f32.mrf.mxu2  ;;  %v1279_v29 = vpop.f32.mrf.mxu0 }
 0x263   :  { %v1783_v28 = vpop.f32.mrf.mxu3  ;;  %v1615_v24 = vadd.f32 %v1614_v27, %v1446_v7  ;;  %v1448_v30 = vpop.f32.mrf.mxu1 }
 0x264   :  { %v1449_v39 = vadd.f32 %v1448_v30, %v1279_v29 }
 0x265   :  { %v1784_v42 = vadd.f32 %v1783_v28, %v1615_v24 }
 0x267   :  { %v2440_v34 = vmul.f32 %v2343_v44, %v1784_v42  ;;  %v2368_v42 = vpop.permute.xlu0 %2367 }
 0x269   :  { %v2568_v26 = vadd.f32 %v2504_v37, %v2440_v34 }
 0x26a   :  { %v1617_v33 = vpop.f32.mrf.mxu2  ;;  %v1281_v49 = vpop.f32.mrf.mxu0 }
 0x26b   :  { %v1786_v35 = vpop.f32.mrf.mxu3  ;;  %v3010_v47 = vpack.c.bf16 %v2568_v26, %v2567_v43  ;;  %v1450_v50 = vpop.f32.mrf.mxu1  ;;  %v1618_v46 = vadd.f32 %v1617_v33, %v1449_v39  ;;  %v2509_v39 = vld [vmem:[%s3995_s3 + $0x1e0] sm:$0xff]  ;;  %v2510_v33 = vld [vmem:[%s3995_s3 + $0x1e8] sm:$0xff] }
 0x26c   :  { %v1451_v48 = vadd.f32 %v1450_v50, %v1281_v49  ;;  %v2373_v26 = vpop.permute.xlu1 %2372 }
 0x26d   :  { %3058 = vst [vmem:[%s3996_s4 + $0xd8] sm:$0xff] %v3010_v47   ;;  %v1787_v45 = vadd.f32 %v1786_v35, %v1618_v46 }
 0x26f   :  { %v2441_v54 = vmul.f32 %v2348_v38, %v1787_v45 }
 0x271   :  { %v2569_v59 = vadd.f32 %v2505_v40, %v2441_v54 }
 0x272   :  { %v1619_v51 = vpop.f32.mrf.mxu2  ;;  %v1284_v52 = vpop.f32.mrf.mxu0 }
 0x273   :  { %v1788_v41 = vpop.f32.mrf.mxu3  ;;  %v1620_v36 = vadd.f32 %v1619_v51, %v1451_v48  ;;  %v1453_v53 = vpop.f32.mrf.mxu1 }
 0x274   :  { %v1454_v61 = vadd.f32 %v1453_v53, %v1284_v52 }
 0x275   :  { %v1789_v55 = vadd.f32 %v1788_v41, %v1620_v36 }
 0x277   :  { %v2442_v58 = vmul.f32 %v2353_v56, %v1789_v55  ;;  %v2378_v55 = vpop.permute.xlu2 %2377 }
 0x279   :  { %v2570_v60 = vadd.f32 %v2506_v57, %v2442_v58  ;;  %v2383_v58 = vpop.permute.xlu0 %2382 }
 0x27a   :  { %v1622_v9 = vpop.f32.mrf.mxu2  ;;  %v1286_v63 = vpop.f32.mrf.mxu0 }
 0x27b   :  { %v1791_v3 = vpop.f32.mrf.mxu3  ;;  %v3015_v62 = vpack.c.bf16 %v2570_v60, %v2569_v59  ;;  %v1455_v1 = vpop.f32.mrf.mxu1  ;;  %v1623_v2 = vadd.f32 %v1622_v9, %v1454_v61  ;;  %v2511_v59 = vld [vmem:[%s3995_s3 + $0x1f0] sm:$0xff]  ;;  %v2512_v60 = vld [vmem:[%s3995_s3 + $0x1f8] sm:$0xff] }
 0x27c   :  { %v1456_v13 = vadd.f32 %v1455_v1, %v1286_v63 }
 0x27d   :  { %3059 = vst [vmem:[%s3996_s4 + $0xe0] sm:$0xff] %v3015_v62   ;;  %v1792_v10 = vadd.f32 %v1791_v3, %v1623_v2 }
 0x27f   :  { %v2443_v15 = vmul.f32 %v2358_v8, %v1792_v10 }
 0x281   :  { %v2571_v20 = vadd.f32 %v2507_v17, %v2443_v15 }
 0x282   :  { %v1624_v6 = vpop.f32.mrf.mxu2  ;;  %v1289_v5 = vpop.f32.mrf.mxu0 }
 0x283   :  { %v1793_v0 = vpop.f32.mrf.mxu3  ;;  %v1625_v14 = vadd.f32 %v1624_v6, %v1456_v13  ;;  %v1458_v11 = vpop.f32.mrf.mxu1 }
 0x284   :  { %v1459_v21 = vadd.f32 %v1458_v11, %v1289_v5 }
 0x285   :  { %v1794_v4 = vadd.f32 %v1793_v0, %v1625_v14 }
 0x287   :  { %v2444_v19 = vmul.f32 %v2363_v12, %v1794_v4 }
 0x289   :  { %v2572_v16 = vadd.f32 %v2508_v18, %v2444_v19 }
 0x28a   :  { %v1627_v22 = vpop.f32.mrf.mxu2  ;;  %v1291_v27 = vpop.f32.mrf.mxu0 }
 0x28b   :  { %v1796_v23 = vpop.f32.mrf.mxu3  ;;  %v3020_v7 = vpack.c.bf16 %v2572_v16, %v2571_v20  ;;  %v1460_v28 = vpop.f32.mrf.mxu1  ;;  %v1628_v24 = vadd.f32 %v1627_v22, %v1459_v21 }
 0x28c   :  { %v1461_v30 = vadd.f32 %v1460_v28, %v1291_v27 }
 0x28d   :  { %3060 = vst [vmem:[%s3996_s4 + $0xe8] sm:$0xff] %v3020_v7   ;;  %v1797_v29 = vadd.f32 %v1796_v23, %v1628_v24 }
 0x28f   :  { %v2445_v34 = vmul.f32 %v2368_v42, %v1797_v29 }
 0x291   :  { %v2573_v47 = vadd.f32 %v2509_v39, %v2445_v34 }
 0x292   :  { %v1629_v31 = vpop.f32.mrf.mxu2  ;;  %v1294_v25 = vpop.f32.mrf.mxu0 }
 0x293   :  { %v1798_v32 = vpop.f32.mrf.mxu3  ;;  %v1630_v44 = vadd.f32 %v1629_v31, %v1461_v30  ;;  %v1463_v37 = vpop.f32.mrf.mxu1 }
 0x294   :  { %v1464_v50 = vadd.f32 %v1463_v37, %v1294_v25 }
 0x295   :  { %v1799_v43 = vadd.f32 %v1798_v32, %v1630_v44 }
 0x297   :  { %v2446_v35 = vmul.f32 %v2373_v26, %v1799_v43 }
 0x299   :  { %v2574_v49 = vadd.f32 %v2510_v33, %v2446_v35 }
 0x29a   :  { %v1632_v46 = vpop.f32.mrf.mxu2  ;;  %v1296_v41 = vpop.f32.mrf.mxu0 }
 0x29b   :  { %v1801_v45 = vpop.f32.mrf.mxu3  ;;  %v3025_v48 = vpack.c.bf16 %v2574_v49, %v2573_v47  ;;  %v1633_v51 = vadd.f32 %v1632_v46, %v1464_v50  ;;  %v1465_v36 = vpop.f32.mrf.mxu1 }
 0x29c   :  { %v1466_v53 = vadd.f32 %v1465_v36, %v1296_v41 }
 0x29d   :  { %3061 = vst [vmem:[%s3996_s4 + $0xf0] sm:$0xff] %v3025_v48   ;;  %v1802_v52 = vadd.f32 %v1801_v45, %v1633_v51 }
 0x29f   :  { %v2447_v40 = vmul.f32 %v2378_v55, %v1802_v52 }
 0x2a1   :  { %v2575_v9 = vadd.f32 %v2511_v59, %v2447_v40 }
 0x2a2   :  { %v1634_v38 = vpop.f32.mrf.mxu2 }
 0x2a3   :  { %v1635_v54 = vadd.f32 %v1634_v38, %v1466_v53  ;;  %v1803_v56 = vpop.f32.mrf.mxu3 }
 0x2a5   :  { %v1804_v57 = vadd.f32 %v1803_v56, %v1635_v54 }
 0x2a7   :  { %v2448_v61 = vmul.f32 %v2383_v58, %v1804_v57 }
 0x2a9   :  { %v2576_v3 = vadd.f32 %v2512_v60, %v2448_v61 }
 0x2ab   :  { %v3030_v62 = vpack.c.bf16 %v2576_v3, %v2575_v9 }
 0x2ad   :  { %3062 = vst [vmem:[%s3996_s4 + $0xf8] sm:$0xff] %v3030_v62  }
 0x2ae   :  { %2709 = vsyncpa [#allocation4], 1 }

// kernel: model_forward.17
= control target key start
LH: loop header
LB: loop body
LE: loop exit
PB: predicated region body
PF: predicated region fallthrough
CT: control target
= control target key end

     0   :  { %vm1231_vm0 = vcmask 1040384   ;;  %vm1233_vm1 = vcmask 1042434   ;;  %vm1235_vm2 = vcmask 1041408   ;;  %s2127_s3 = inlined_call_operand.vmem [shape: bf16[128,128], index: 3, kind: input, shape index: {}]   ;;  %s2128_s2 = inlined_call_operand.vmem [shape: bf16[128,128], index: 2, kind: input, shape index: {}]   ;;  %s2129_s1 = inlined_call_operand.vmem [shape: bf16[512,128], index: 1, kind: input, shape index: {}]   ;;  %s2130_s0 = inlined_call_operand.vmem [shape: bf16[512,128], index: 0, kind: input, shape index: {}]   ;;  %s2131_s4 = inlined_call_operand.vmem [shape: f32[1,128], index: 4, kind: input, shape index: {}]   ;;  %s2132_s5 = inlined_call_operand.vmem [shape: bf16[1,128], index: 5, kind: input, shape index: {}]   ;;  %s2133_s6 = inlined_call_operand.<no memory space> [shape: f32[1,1], index: 6, kind: input, shape index: {}]   ;;  %s2134_s7 = inlined_call_operand.vmem [shape: f32[1,512], index: 7, kind: output, shape index: {}]  }
   0x1   :  { %v1646_v0 = vld [vmem:[%s2127_s3 + $0x38] sm:$0xff]  ;;  %v1645_v2 = vld [vmem:[%s2127_s3 + $0x30] sm:$0xff]  ;;  %v1644_v4 = vld [vmem:[%s2127_s3 + $0x28] sm:$0xff] }
   0x2   :  { %v1606_v1 = vld [vmem:[%s2128_s2 + $0x38] sm:$0xff]  ;;  %427 = vmatpush.bf16.msra.mxu0 %v1646_v0  ;;  %v1605_v3 = vld [vmem:[%s2128_s2 + $0x30] sm:$0xff]  ;;  %1647 = vmatpush.bf16.msra.mxu2 %v1646_v0  ;;  %v1604_v5 = vld [vmem:[%s2128_s2 + $0x28] sm:$0xff] }
   0x3   :  { %836 = vmatpush.bf16.msra.mxu1 %v1606_v1  ;;  %1655 = vmatpush.bf16.msra.mxu3 %v1606_v1  ;;  %v1643_v6 = vld [vmem:[%s2127_s3 + $0x20] sm:$0xff]  ;;  %v1642_v8 = vld [vmem:[%s2127_s3 + $0x18] sm:$0xff]  ;;  %v1641_v10 = vld [vmem:[%s2127_s3 + $0x10] sm:$0xff] }
   0x4   :  { %v1603_v7 = vld [vmem:[%s2128_s2 + $0x20] sm:$0xff]  ;;  %v1602_v9 = vld [vmem:[%s2128_s2 + $0x18] sm:$0xff]  ;;  %v1601_v11 = vld [vmem:[%s2128_s2 + $0x10] sm:$0xff] }
   0x5   :  { %v1640_v12 = vld [vmem:[%s2127_s3 + $0x8] sm:$0xff]  ;;  %v1639_v14 = vld [vmem:[%s2127_s3] sm:$0xff]  ;;  %v1609_v20 = vld [vmem:[%s2129_s1 + $0x10] sm:$0xff] }
   0x6   :  { %428 = vmatpush.bf16.msra.mxu0 %v1645_v2  ;;  %1648 = vmatpush.bf16.msra.mxu2 %v1645_v2  ;;  %v1600_v13 = vld [vmem:[%s2128_s2 + $0x8] sm:$0xff]  ;;  %v1599_v15 = vld [vmem:[%s2128_s2] sm:$0xff]  ;;  %v1569_v21 = vld [vmem:[%s2130_s0 + $0x10] sm:$0xff] }
   0x7   :  { %837 = vmatpush.bf16.msra.mxu1 %v1605_v3  ;;  %1656 = vmatpush.bf16.msra.mxu3 %v1605_v3  ;;  %v1607_v16 = vld [vmem:[%s2129_s1] sm:$0xff]  ;;  %v1608_v18 = vld [vmem:[%s2129_s1 + $0x8] sm:$0xff]  ;;  %v1610_v22 = vld [vmem:[%s2129_s1 + $0x18] sm:$0xff] }
   0x8   :  { %v1567_v17 = vld [vmem:[%s2130_s0] sm:$0xff]  ;;  %v1568_v19 = vld [vmem:[%s2130_s0 + $0x8] sm:$0xff]  ;;  %v1570_v23 = vld [vmem:[%s2130_s0 + $0x18] sm:$0xff] }
   0x9   :  { %v1626_v24 = vld [vmem:[%s2129_s1 + $0x98] sm:$0xff]  ;;  %v1611_v26 = vld [vmem:[%s2129_s1 + $0x20] sm:$0xff]  ;;  %v1612_v30 = vld [vmem:[%s2129_s1 + $0x28] sm:$0xff] }
   0xa   :  { %429 = vmatpush.bf16.msra.mxu0 %v1644_v4  ;;  %1649 = vmatpush.bf16.msra.mxu2 %v1644_v4  ;;  %v1586_v25 = vld [vmem:[%s2130_s0 + $0x98] sm:$0xff]  ;;  %v1571_v27 = vld [vmem:[%s2130_s0 + $0x20] sm:$0xff]  ;;  %v1572_v31 = vld [vmem:[%s2130_s0 + $0x28] sm:$0xff] }
   0xb   :  { %838 = vmatpush.bf16.msra.mxu1 %v1604_v5  ;;  %1657 = vmatpush.bf16.msra.mxu3 %v1604_v5  ;;  %v1627_v28 = vld [vmem:[%s2129_s1 + $0xa0] sm:$0xff]  ;;  %v1628_v32 = vld [vmem:[%s2129_s1 + $0xa8] sm:$0xff]  ;;  %v1613_v34 = vld [vmem:[%s2129_s1 + $0x30] sm:$0xff] }
   0xc   :  { %v1587_v29 = vld [vmem:[%s2130_s0 + $0xa0] sm:$0xff]  ;;  %v1588_v33 = vld [vmem:[%s2130_s0 + $0xa8] sm:$0xff]  ;;  %v1573_v35 = vld [vmem:[%s2130_s0 + $0x30] sm:$0xff] }
   0xd   :  { %v1629_v36 = vld [vmem:[%s2129_s1 + $0xb0] sm:$0xff]  ;;  %v1614_v38 = vld [vmem:[%s2129_s1 + $0x38] sm:$0xff]  ;;  %v1615_v42 = vld [vmem:[%s2129_s1 + $0x40] sm:$0xff] }
   0xe   :  { %430 = vmatpush.bf16.msra.mxu0 %v1643_v6  ;;  %1650 = vmatpush.bf16.msra.mxu2 %v1643_v6  ;;  %v1589_v37 = vld [vmem:[%s2130_s0 + $0xb0] sm:$0xff]  ;;  %v1574_v39 = vld [vmem:[%s2130_s0 + $0x38] sm:$0xff]  ;;  %v1575_v43 = vld [vmem:[%s2130_s0 + $0x40] sm:$0xff] }
   0xf   :  { %839 = vmatpush.bf16.msra.mxu1 %v1603_v7  ;;  %1658 = vmatpush.bf16.msra.mxu3 %v1603_v7  ;;  %v1630_v40 = vld [vmem:[%s2129_s1 + $0xb8] sm:$0xff]  ;;  %v1839_v47 = vld [vmem:[%s2131_s4] ss:$0 sm:$0xff]  ;;  %v1616_v57 = vld [vmem:[%s2129_s1 + $0x48] sm:$0xff] }
  0x10   :  { %v1590_v41 = vld [vmem:[%s2130_s0 + $0xb8] sm:$0xff]  ;;  %v1631_v53 = vld [vmem:[%s2129_s1 + $0xc0] sm:$0xff]  ;;  %v1576_v58 = vld [vmem:[%s2130_s0 + $0x48] sm:$0xff] }
  0x11   :  { %v1591_v54 = vld [vmem:[%s2130_s0 + $0xc0] sm:$0xff]  ;;  %v1632_v4 = vld [vmem:[%s2129_s1 + $0xc8] sm:$0xff] }
  0x12   :  { %431 = vmatpush.bf16.msra.mxu0 %v1642_v8  ;;  %1651 = vmatpush.bf16.msra.mxu2 %v1642_v8  ;;  %v1592_v5 = vld [vmem:[%s2130_s0 + $0xc8] sm:$0xff]  ;;  %v1617_v8 = vld [vmem:[%s2129_s1 + $0x50] sm:$0xff] }
  0x13   :  { %840 = vmatpush.bf16.msra.mxu1 %v1602_v9  ;;  %1659 = vmatpush.bf16.msra.mxu3 %v1602_v9  ;;  %v1577_v9 = vld [vmem:[%s2130_s0 + $0x50] sm:$0xff] }
  0x16   :  { %432 = vmatpush.bf16.msra.mxu0 %v1641_v10  ;;  %1652 = vmatpush.bf16.msra.mxu2 %v1641_v10 }
  0x17   :  { %841 = vmatpush.bf16.msra.mxu1 %v1601_v11  ;;  %1660 = vmatpush.bf16.msra.mxu3 %v1601_v11 }
  0x1a   :  { %433 = vmatpush.bf16.msra.mxu0 %v1640_v12  ;;  %1653 = vmatpush.bf16.msra.mxu2 %v1640_v12 }
  0x1b   :  { %842 = vmatpush.bf16.msra.mxu1 %v1600_v13  ;;  %1661 = vmatpush.bf16.msra.mxu3 %v1600_v13 }
  0x1e   :  { %434 = vmatpush.bf16.msra.mxu0 %v1639_v14  ;;  %1654 = vmatpush.bf16.msra.mxu2 %v1639_v14 }
  0x1f   :  { %843 = vmatpush.bf16.msra.mxu1 %v1599_v15  ;;  %1662 = vmatpush.bf16.msra.mxu3 %v1599_v15 }
  0x21   :  { %435 = vmatmul.bf16.vlgmr.msra.gmra.mxu0 %v1607_v16  ;;  %530 = vmatmul.bf16.vlgmr.msra.gmra.mxu2 %v1626_v24  ;;  %v1578_v24 = vld [vmem:[%s2130_s0 + $0x58] sm:$0xff] }
  0x22   :  { %844 = vmatmul.bf16.vlgmr.msra.gmra.mxu1 %v1567_v17  ;;  %939 = vmatmul.bf16.vlgmr.msra.gmra.mxu3 %v1586_v25 }
  0x31   :  { %440 = vmatmul.bf16.gmra.mxu0 %v1608_v18  ;;  %535 = vmatmul.bf16.gmra.mxu2 %v1627_v28 }
  0x32   :  { %849 = vmatmul.bf16.gmra.mxu1 %v1568_v19  ;;  %944 = vmatmul.bf16.gmra.mxu3 %v1587_v29  ;;  %v1633_v19 = vld [vmem:[%s2129_s1 + $0xd0] sm:$0xff] }
  0x41   :  { %445 = vmatmul.bf16.gmra.mxu0 %v1609_v20  ;;  %540 = vmatmul.bf16.gmra.mxu2 %v1628_v32  ;;  %v1593_v20 = vld [vmem:[%s2130_s0 + $0xd0] sm:$0xff] }
  0x42   :  { %854 = vmatmul.bf16.gmra.mxu1 %v1569_v21  ;;  %949 = vmatmul.bf16.gmra.mxu3 %v1588_v33 }
  0x51   :  { %450 = vmatmul.bf16.gmra.mxu0 %v1610_v22  ;;  %545 = vmatmul.bf16.gmra.mxu2 %v1629_v36 }
  0x52   :  { %859 = vmatmul.bf16.gmra.mxu1 %v1570_v23  ;;  %954 = vmatmul.bf16.gmra.mxu3 %v1589_v37  ;;  %v1618_v23 = vld [vmem:[%s2129_s1 + $0x58] sm:$0xff] }
  0x61   :  { %455 = vmatmul.bf16.gmra.mxu0 %v1611_v26  ;;  %550 = vmatmul.bf16.gmra.mxu2 %v1630_v40 }
  0x62   :  { %864 = vmatmul.bf16.gmra.mxu1 %v1571_v27  ;;  %959 = vmatmul.bf16.gmra.mxu3 %v1590_v41 }
  0x71   :  { %460 = vmatmul.bf16.gmra.mxu0 %v1612_v30  ;;  %555 = vmatmul.bf16.gmra.mxu2 %v1631_v53 }
  0x72   :  { %869 = vmatmul.bf16.gmra.mxu1 %v1572_v31  ;;  %964 = vmatmul.bf16.gmra.mxu3 %v1591_v54 }
  0x81   :  { %465 = vmatmul.bf16.gmra.mxu0 %v1613_v34  ;;  %560 = vmatmul.bf16.gmra.mxu2 %v1632_v4  ;;  %v1634_v34 = vld [vmem:[%s2129_s1 + $0xd8] sm:$0xff] }
  0x82   :  { %874 = vmatmul.bf16.gmra.mxu1 %v1573_v35  ;;  %969 = vmatmul.bf16.gmra.mxu3 %v1592_v5  ;;  %v1594_v35 = vld [vmem:[%s2130_s0 + $0xd8] sm:$0xff] }
  0x91   :  { %470 = vmatmul.bf16.gmra.mxu0 %v1614_v38  ;;  %565 = vmatmul.bf16.gmra.mxu2 %v1633_v19  ;;  %v1619_v38 = vld [vmem:[%s2129_s1 + $0x60] sm:$0xff] }
  0x92   :  { %879 = vmatmul.bf16.gmra.mxu1 %v1574_v39  ;;  %974 = vmatmul.bf16.gmra.mxu3 %v1593_v20  ;;  %v1579_v39 = vld [vmem:[%s2130_s0 + $0x60] sm:$0xff] }
  0x9e   :  { %v436_v44 = vpop.f32.mrf.mxu0 }
  0x9f   :  { %v845_v45 = vpop.f32.mrf.mxu1 }
  0xa0   :  { %v846_v46 = vadd.f32 %v845_v45, %v436_v44 }
  0xa1   :  { %475 = vmatmul.bf16.gmra.mxu0 %v1615_v42  ;;  %570 = vmatmul.bf16.gmra.mxu2 %v1634_v34 }
  0xa2   :  { %884 = vmatmul.bf16.gmra.mxu1 %v1575_v43  ;;  %v1009_v50 = vadd.f32 %v1839_v47, %v846_v46  ;;  %979 = vmatmul.bf16.gmra.mxu3 %v1594_v35 }
  0xa4   :  { %v1073_v55 = vmax.f32 %v1009_v50, 0.0  ;;  %v531_v44 = vpop.f32.mrf.mxu2 }
  0xa5   :  { %v940_v45 = vpop.f32.mrf.mxu3 }
  0xa6   :  { %v438_v48 = vpop.f32.mrf.mxu0  ;;  %v941_v53 = vadd.f32 %v940_v45, %v531_v44 }
  0xa7   :  { %v847_v49 = vpop.f32.mrf.mxu1 }
  0xa8   :  { %v848_v51 = vadd.f32 %v847_v49, %v438_v48 }
  0xaa   :  { %v1010_v52 = vadd.f32 %v1839_v47, %v848_v51 }
  0xac   :  { %v1074_v56 = vmax.f32 %v1010_v52, 0.0  ;;  %v533_v51 = vpop.f32.mrf.mxu2 }
  0xad   :  { %v942_v52 = vpop.f32.mrf.mxu3 }
  0xae   :  { %v1855_v59 = vpack.c.bf16 %v1074_v56, %v1073_v55  ;;  %v441_v60 = vpop.f32.mrf.mxu0  ;;  %v943_v54 = vadd.f32 %v942_v52, %v533_v51  ;;  %v1047_v56 = vadd.f32 %v1839_v47, %v941_v53 }
  0xaf   :  { %v850_v61 = vpop.f32.mrf.mxu1 }
  0xb0   :  { %v851_v62 = vadd.f32 %v850_v61, %v441_v60  ;;  %v1595_v60 = vld [vmem:[%s2130_s0 + $0xe0] sm:$0xff] }
  0xb1   :  { %480 = vmatmul.bf16.gmra.mxu0 %v1616_v57  ;;  %v1048_v57 = vadd.f32 %v1839_v47, %v943_v54  ;;  %v1623_v54 = vld [vmem:[%s2129_s1 + $0x80] sm:$0xff] }
  0xb2   :  { %889 = vmatmul.bf16.gmra.mxu1 %v1576_v58  ;;  %v1011_v1 = vadd.f32 %v1839_v47, %v851_v62  ;;  %v1635_v58 = vld [vmem:[%s2129_s1 + $0xe0] sm:$0xff]  ;;  %984 = vmatmul.bf16.gmra.mxu3 %v1595_v60 }
  0xb3   :  { %575 = vmatmul.bf16.gmra.mxu2 %v1635_v58 }
  0xb4   :  { %v1075_v6 = vmax.f32 %v1011_v1, 0.0  ;;  %v1620_v1 = vld [vmem:[%s2129_s1 + $0x68] sm:$0xff] }
  0xb6   :  { %v443_v63 = vpop.f32.mrf.mxu0 }
  0xb7   :  { %v852_v0 = vpop.f32.mrf.mxu1 }
  0xb8   :  { %v853_v2 = vadd.f32 %v852_v0, %v443_v63  ;;  %v1111_v63 = vmax.f32 %v1047_v56, 0.0  ;;  %v1112_v0 = vmax.f32 %v1048_v57, 0.0 }
  0xba   :  { %v1012_v3 = vadd.f32 %v1839_v47, %v853_v2  ;;  %v1580_v2 = vld [vmem:[%s2130_s0 + $0x68] sm:$0xff] }
  0xbc   :  { %v1076_v7 = vmax.f32 %v1012_v3, 0.0 }
  0xbe   :  { %v1871_v10 = vpack.c.bf16 %v1076_v7, %v1075_v6  ;;  %v446_v11 = vpop.f32.mrf.mxu0  ;;  %v1927_v6 = vpack.c.bf16 %v1112_v0, %v1111_v63  ;;  %v536_v7 = vpop.f32.mrf.mxu2 }
  0xbf   :  { %v855_v12 = vpop.f32.mrf.mxu1 }
  0xc0   :  { %v856_v13 = vadd.f32 %v855_v12, %v446_v11 }
  0xc1   :  { %485 = vmatmul.bf16.gmra.mxu0 %v1617_v8  ;;  %v945_v8 = vpop.f32.mrf.mxu3 }
  0xc2   :  { %894 = vmatmul.bf16.gmra.mxu1 %v1577_v9  ;;  %v1013_v16 = vadd.f32 %v1839_v47, %v856_v13 }
  0xc4   :  { %v1077_v21 = vmax.f32 %v1013_v16, 0.0  ;;  %v1596_v16 = vld [vmem:[%s2130_s0 + $0xe8] sm:$0xff] }
  0xc5   :  { %989 = vmatmul.bf16.gmra.mxu3 %v1596_v16 }
  0xc6   :  { %v448_v14 = vpop.f32.mrf.mxu0  ;;  %v1929_v12 = vpop.f32.mrf.mxu2 }
  0xc7   :  { %v857_v15 = vpop.f32.mrf.mxu1 }
  0xc8   :  { %v858_v17 = vadd.f32 %v857_v15, %v448_v14  ;;  %v1933_v14 = vadd.f32 %v945_v8, %v536_v7  ;;  %v1636_v15 = vld [vmem:[%s2129_s1 + $0xe8] sm:$0xff] }
  0xc9   :  { %v1931_v13 = vpop.f32.mrf.mxu3  ;;  %580 = vmatmul.bf16.gmra.mxu2 %v1636_v15 }
  0xca   :  { %v1014_v18 = vadd.f32 %v1839_v47, %v858_v17  ;;  %v1621_v17 = vld [vmem:[%s2129_s1 + $0x70] sm:$0xff] }
  0xcc   :  { %v1078_v22 = vmax.f32 %v1014_v18, 0.0  ;;  %v1581_v18 = vld [vmem:[%s2130_s0 + $0x70] sm:$0xff] }
  0xce   :  { %v1887_v25 = vpack.c.bf16 %v1078_v22, %v1077_v21  ;;  %v451_v26 = vpop.f32.mrf.mxu0  ;;  %v1947_v21 = vpop.f32.mrf.mxu2 }
  0xcf   :  { %v860_v27 = vpop.f32.mrf.mxu1 }
  0xd0   :  { %v861_v28 = vadd.f32 %v860_v27, %v451_v26 }
  0xd1   :  { %490 = vmatmul.bf16.gmra.mxu0 %v1618_v23  ;;  %v1949_v22 = vpop.f32.mrf.mxu3 }
  0xd2   :  { %899 = vmatmul.bf16.gmra.mxu1 %v1578_v24  ;;  %v1015_v31 = vadd.f32 %v1839_v47, %v861_v28  ;;  %v1637_v28 = vld [vmem:[%s2129_s1 + $0xf0] sm:$0xff] }
  0xd4   :  { %v1079_v36 = vmax.f32 %v1015_v31, 0.0  ;;  %v1582_v31 = vld [vmem:[%s2130_s0 + $0x78] sm:$0xff] }
  0xd6   :  { %v453_v29 = vpop.f32.mrf.mxu0  ;;  %v1951_v26 = vpop.f32.mrf.mxu2 }
  0xd7   :  { %v862_v30 = vpop.f32.mrf.mxu1 }
  0xd8   :  { %v863_v32 = vadd.f32 %v862_v30, %v453_v29  ;;  %v1597_v29 = vld [vmem:[%s2130_s0 + $0xf0] sm:$0xff]  ;;  %v1622_v30 = vld [vmem:[%s2129_s1 + $0x78] sm:$0xff] }
  0xd9   :  { %v1953_v27 = vpop.f32.mrf.mxu3  ;;  %585 = vmatmul.bf16.gmra.mxu2 %v1637_v28  ;;  %994 = vmatmul.bf16.gmra.mxu3 %v1597_v29  ;;  %v1624_v29 = vld [vmem:[%s2129_s1 + $0x88] sm:$0xff] }
  0xda   :  { %v1016_v33 = vadd.f32 %v1839_v47, %v863_v32 }
  0xdc   :  { %v1080_v37 = vmax.f32 %v1016_v33, 0.0 }
  0xde   :  { %v1903_v40 = vpack.c.bf16 %v1080_v37, %v1079_v36  ;;  %v456_v41 = vpop.f32.mrf.mxu0  ;;  %v1967_v34 = vpop.f32.mrf.mxu2 }
  0xdf   :  { %v865_v42 = vpop.f32.mrf.mxu1 }
  0xe0   :  { %v866_v43 = vadd.f32 %v865_v42, %v456_v41 }
  0xe1   :  { %495 = vmatmul.bf16.gmra.mxu0 %v1619_v38  ;;  %v1969_v35 = vpop.f32.mrf.mxu3 }
  0xe2   :  { %904 = vmatmul.bf16.gmra.mxu1 %v1579_v39  ;;  %v1017_v49 = vadd.f32 %v1839_v47, %v866_v43 }
  0xe4   :  { %v1081_v61 = vmax.f32 %v1017_v49, 0.0 }
  0xe6   :  { %v458_v46 = vpop.f32.mrf.mxu0  ;;  %v1972_v42 = vpop.f32.mrf.mxu2 }
  0xe7   :  { %v867_v48 = vpop.f32.mrf.mxu1 }
  0xe8   :  { %v868_v50 = vadd.f32 %v867_v48, %v458_v46  ;;  %v1638_v46 = vld [vmem:[%s2129_s1 + $0xf8] sm:$0xff] }
  0xe9   :  { %v1974_v43 = vpop.f32.mrf.mxu3  ;;  %v1598_v48 = vld [vmem:[%s2130_s0 + $0xf8] sm:$0xff]  ;;  %590 = vmatmul.bf16.gmra.mxu2 %v1638_v46 }
  0xea   :  { %v1018_v55 = vadd.f32 %v1839_v47, %v868_v50  ;;  %999 = vmatmul.bf16.gmra.mxu3 %v1598_v48 }
  0xec   :  { %v1082_v62 = vmax.f32 %v1018_v55, 0.0  ;;  %v1583_v55 = vld [vmem:[%s2130_s0 + $0x80] sm:$0xff] }
  0xee   :  { %v1921_v3 = vpack.c.bf16 %v1082_v62, %v1081_v61  ;;  %v1923_v4 = vpop.f32.mrf.mxu0  ;;  %v1991_v61 = vpop.f32.mrf.mxu2 }
  0xef   :  { %v1925_v5 = vpop.f32.mrf.mxu1 }
  0xf1   :  { %500 = vmatmul.bf16.gmra.mxu0 %v1620_v1  ;;  %v1993_v62 = vpop.f32.mrf.mxu3  ;;  %v871_v1 = vadd.f32 %v1925_v5, %v1923_v4 }
  0xf2   :  { %909 = vmatmul.bf16.gmra.mxu1 %v1580_v2 }
  0xf6   :  { %v463_v9 = vpop.f32.mrf.mxu0 }
  0xf7   :  { %v872_v11 = vpop.f32.mrf.mxu1 }
  0xf8   :  { %v873_v63 = vadd.f32 %v872_v11, %v463_v9 }
  0xf9   :  { %v962_v9 = vpop.f32.mrf.mxu3 }
  0xfa   :  { %v1020_v7 = vadd.f32 %v1839_v47, %v873_v63 }
  0xfe   :  { %v466_v19 = vpop.f32.mrf.mxu0 }
  0xff   :  { %v875_v20 = vpop.f32.mrf.mxu1 }
 0x100   :  { %v876_v49 = vadd.f32 %v875_v20, %v466_v19  ;;  %v553_v20 = vpop.f32.mrf.mxu2 }
 0x101   :  { %505 = vmatmul.bf16.gmra.mxu0 %v1621_v17  ;;  %v1019_v17 = vadd.f32 %v1839_v47, %v871_v1 }
 0x102   :  { %914 = vmatmul.bf16.gmra.mxu1 %v1581_v18  ;;  %v1021_v58 = vadd.f32 %v1839_v47, %v876_v49 }
 0x104   :  { %v1085_v2 = vmax.f32 %v1021_v58, 0.0  ;;  %v1625_v58 = vld [vmem:[%s2129_s1 + $0x90] sm:$0xff] }
 0x106   :  { %v468_v23 = vpop.f32.mrf.mxu0 }
 0x107   :  { %v877_v24 = vpop.f32.mrf.mxu1 }
 0x108   :  { %v878_v44 = vadd.f32 %v877_v24, %v468_v23  ;;  %v1084_v23 = vmax.f32 %v1020_v7, 0.0  ;;  %v1083_v24 = vmax.f32 %v1019_v17, 0.0 }
 0x10a   :  { %v1022_v52 = vadd.f32 %v1839_v47, %v878_v44  ;;  %v1143_v5 = vpack.c.bf16 %v1084_v23, %v1083_v24 }
 0x10c   :  { %v1086_v0 = vmax.f32 %v1022_v52, 0.0 }
 0x10e   :  { %v471_v32 = vpop.f32.mrf.mxu0  ;;  %v1144_v8 = vpack.c.bf16 %v1086_v0, %v1085_v2 }
 0x10f   :  { %v880_v33 = vpop.f32.mrf.mxu1 }
 0x110   :  { %v881_v36 = vadd.f32 %v880_v33, %v471_v32 }
 0x111   :  { %510 = vmatmul.bf16.gmra.mxu0 %v1622_v30  ;;  %v1584_v30 = vld [vmem:[%s2130_s0 + $0x88] sm:$0xff] }
 0x112   :  { %919 = vmatmul.bf16.gmra.mxu1 %v1582_v31  ;;  %v1023_v39 = vadd.f32 %v1839_v47, %v881_v36 }
 0x114   :  { %v1087_v50 = vmax.f32 %v1023_v39, 0.0 }
 0x116   :  { %v473_v37 = vpop.f32.mrf.mxu0 }
 0x117   :  { %v882_v38 = vpop.f32.mrf.mxu1 }
 0x118   :  { %v883_v41 = vadd.f32 %v882_v38, %v473_v37  ;;  %v556_v37 = vpop.f32.mrf.mxu2  ;;  %v965_v38 = vpop.f32.mrf.mxu3 }
 0x119   :  { %v966_v49 = vadd.f32 %v965_v38, %v556_v37 }
 0x11a   :  { %v1024_v45 = vadd.f32 %v1839_v47, %v883_v41 }
 0x11b   :  { %v1057_v52 = vadd.f32 %v1839_v47, %v966_v49 }
 0x11c   :  { %v1088_v51 = vmax.f32 %v1024_v45, 0.0 }
 0x11e   :  { %v1145_v53 = vpack.c.bf16 %v1088_v51, %v1087_v50  ;;  %v476_v56 = vpop.f32.mrf.mxu0 }
 0x11f   :  { %v885_v57 = vpop.f32.mrf.mxu1 }
 0x120   :  { %v886_v60 = vadd.f32 %v885_v57, %v476_v56  ;;  %1172 = vmatpush.bf16.xpose.msrb.mxu2 %v1145_v53  ;;  %v558_v46 = vpop.f32.mrf.mxu2  ;;  %v967_v48 = vpop.f32.mrf.mxu3  ;;  %v1121_v56 = vmax.f32 %v1057_v52, 0.0 }
 0x121   :  { %515 = vmatmul.bf16.gmra.mxu0 %v1623_v54  ;;  %v968_v50 = vadd.f32 %v967_v48, %v558_v46 }
 0x122   :  { %924 = vmatmul.bf16.gmra.mxu1 %v1583_v55  ;;  %v1025_v18 = vadd.f32 %v1839_v47, %v886_v60 }
 0x123   :  { %v1058_v53 = vadd.f32 %v1839_v47, %v968_v50 }
 0x124   :  { %v1089_v28 = vmax.f32 %v1025_v18, 0.0 }
 0x125   :  { %v1122_v57 = vmax.f32 %v1058_v53, 0.0 }
 0x126   :  { %v478_v15 = vpop.f32.mrf.mxu0 }
 0x127   :  { %v887_v16 = vpop.f32.mrf.mxu1  ;;  %v2022_v1 = vpack.c.bf16 %v1122_v57, %v1121_v56 }
 0x128   :  { %v888_v19 = vadd.f32 %v887_v16, %v478_v15  ;;  %1173 = vmatpush.bf16.xpose.msrb.mxu2 %v1144_v8  ;;  %v561_v7 = vpop.f32.mrf.mxu2  ;;  %v970_v8 = vpop.f32.mrf.mxu3 }
 0x129   :  { %v971_v23 = vadd.f32 %v970_v8, %v561_v7 }
 0x12a   :  { %v1026_v11 = vadd.f32 %v1839_v47, %v888_v19 }
 0x12c   :  { %v1090_v4 = vmax.f32 %v1026_v11, 0.0 }
 0x12e   :  { %v2007_v31 = vpack.c.bf16 %v1090_v4, %v1089_v28  ;;  %v481_v32 = vpop.f32.mrf.mxu0  ;;  %v963_v4 = vadd.f32 %v962_v9, %v553_v20  ;;  %v956_v9 = vadd.f32 %v1969_v35, %v1967_v34 }
 0x12f   :  { %v890_v33 = vpop.f32.mrf.mxu1 }
 0x130   :  { %v891_v36 = vadd.f32 %v890_v33, %v481_v32  ;;  %1174 = vmatpush.bf16.xpose.msrb.mxu2 %v1143_v5  ;;  %v563_v19 = vpop.f32.mrf.mxu2  ;;  %v972_v11 = vpop.f32.mrf.mxu3  ;;  %v1059_v5 = vadd.f32 %v1839_v47, %v971_v23  ;;  %v1053_v49 = vadd.f32 %v1839_v47, %v956_v9  ;;  %v948_v23 = vadd.f32 %v1931_v13, %v1929_v12 }
 0x131   :  { %520 = vmatmul.bf16.gmra.mxu0 %v1624_v29  ;;  %v973_v24 = vadd.f32 %v972_v11, %v563_v19 }
 0x132   :  { %929 = vmatmul.bf16.gmra.mxu1 %v1584_v30  ;;  %v1027_v44 = vadd.f32 %v1839_v47, %v891_v36  ;;  %v1123_v33 = vmax.f32 %v1059_v5, 0.0 }
 0x133   :  { %v1060_v29 = vadd.f32 %v1839_v47, %v973_v24 }
 0x134   :  { %v1091_v54 = vmax.f32 %v1027_v44, 0.0 }
 0x135   :  { %v1124_v36 = vmax.f32 %v1060_v29, 0.0 }
 0x136   :  { %v483_v39 = vpop.f32.mrf.mxu0 }
 0x137   :  { %v892_v41 = vpop.f32.mrf.mxu1  ;;  %v2036_v44 = vpack.c.bf16 %v1124_v36, %v1123_v33 }
 0x138   :  { %v893_v45 = vadd.f32 %v892_v41, %v483_v39  ;;  %1175 = vmatpush.bf16.xpose.msrb.mxu2 %v1921_v3  ;;  %v1585_v3 = vld [vmem:[%s2130_s0 + $0x90] sm:$0xff]  ;;  %v1056_v41 = vadd.f32 %v1839_v47, %v963_v4  ;;  %v975_v20 = vpop.f32.mrf.mxu3  ;;  %v1050_v4 = vadd.f32 %v1839_v47, %v948_v23 }
 0x13a   :  { %v1028_v51 = vadd.f32 %v1839_v47, %v893_v45  ;;  %v958_v45 = vadd.f32 %v1974_v43, %v1972_v42  ;;  %v1120_v48 = vmax.f32 %v1056_v41, 0.0  ;;  %v951_v42 = vadd.f32 %v1949_v22, %v1947_v21 }
 0x13b   :  { %v953_v43 = vadd.f32 %v1953_v27, %v1951_v26  ;;  %v1114_v41 = vmax.f32 %v1050_v4, 0.0 }
 0x13c   :  { %v1092_v55 = vmax.f32 %v1028_v51, 0.0  ;;  %v1054_v50 = vadd.f32 %v1839_v47, %v958_v45 }
 0x13d   :  { %v1052_v21 = vadd.f32 %v1839_v47, %v953_v43 }
 0x13e   :  { %v2020_v60 = vpack.c.bf16 %v1092_v55, %v1091_v54  ;;  %v486_v63 = vpop.f32.mrf.mxu0 }
 0x13f   :  { %v895_v0 = vpop.f32.mrf.mxu1 }
 0x140   :  { %v896_v2 = vadd.f32 %v895_v0, %v486_v63  ;;  %1176 = vmatpush.bf16.xpose.msrb.mxu2 %v1903_v40  ;;  %v961_v40 = vadd.f32 %v1993_v62, %v1991_v61  ;;  %v566_v62 = vpop.f32.mrf.mxu2  ;;  %v977_v56 = vpop.f32.mrf.mxu3 }
 0x141   :  { %525 = vmatmul.bf16.gmra.mxu0 %v1625_v58  ;;  %v976_v34 = vadd.f32 %v975_v20, %v566_v62  ;;  %v1117_v58 = vmax.f32 %v1053_v49, 0.0 }
 0x142   :  { %934 = vmatmul.bf16.gmra.mxu1 %v1585_v3  ;;  %v1029_v17 = vadd.f32 %v1839_v47, %v896_v2  ;;  %v1118_v3 = vmax.f32 %v1054_v50, 0.0 }
 0x143   :  { %v1061_v63 = vadd.f32 %v1839_v47, %v976_v34 }
 0x144   :  { %v1093_v30 = vmax.f32 %v1029_v17, 0.0  ;;  %v1160_v27 = vpack.c.bf16 %v1118_v3, %v1117_v58 }
 0x145   :  { %v1125_v7 = vmax.f32 %v1061_v63, 0.0 }
 0x146   :  { %v488_v15 = vpop.f32.mrf.mxu0 }
 0x147   :  { %v897_v16 = vpop.f32.mrf.mxu1 }
 0x148   :  { %v898_v18 = vadd.f32 %v897_v16, %v488_v15  ;;  %1177 = vmatpush.bf16.xpose.msrb.mxu2 %v1887_v25  ;;  %v1055_v25 = vadd.f32 %v1839_v47, %v961_v40  ;;  %v568_v55 = vpop.f32.mrf.mxu2  ;;  %v1051_v16 = vadd.f32 %v1839_v47, %v951_v42  ;;  %v980_v11 = vpop.f32.mrf.mxu3  ;;  %v1049_v40 = vadd.f32 %v1839_v47, %v1933_v14 }
 0x149   :  { %v978_v35 = vadd.f32 %v977_v56, %v568_v55 }
 0x14a   :  { %v1030_v28 = vadd.f32 %v1839_v47, %v898_v18  ;;  %v1119_v46 = vmax.f32 %v1055_v25, 0.0  ;;  %v1115_v24 = vmax.f32 %v1051_v16, 0.0  ;;  %v1113_v13 = vmax.f32 %v1049_v40, 0.0 }
 0x14b   :  { %v1062_v0 = vadd.f32 %v1839_v47, %v978_v35 }
 0x14c   :  { %v1094_v32 = vmax.f32 %v1030_v28, 0.0  ;;  %v1161_v51 = vpack.c.bf16 %v1120_v48, %v1119_v46  ;;  %v1116_v28 = vmax.f32 %v1052_v21, 0.0  ;;  %v1158_v50 = vpack.c.bf16 %v1114_v41, %v1113_v13 }
 0x14d   :  { %v1126_v8 = vmax.f32 %v1062_v0, 0.0 }
 0x14e   :  { %v2032_v37 = vpack.c.bf16 %v1094_v32, %v1093_v30  ;;  %v491_v38 = vpop.f32.mrf.mxu0  ;;  %v1159_v30 = vpack.c.bf16 %v1116_v28, %v1115_v24 }
 0x14f   :  { %v900_v39 = vpop.f32.mrf.mxu1  ;;  %v2058_v17 = vpack.c.bf16 %v1126_v8, %v1125_v7 }
 0x150   :  { %v901_v61 = vadd.f32 %v900_v39, %v491_v38  ;;  %1178 = vmatpush.bf16.xpose.msrb.mxu2 %v1871_v10  ;;  %v571_v19 = vpop.f32.mrf.mxu2  ;;  %v982_v25 = vpop.f32.mrf.mxu3 }
 0x151   :  { %v981_v38 = vadd.f32 %v980_v11, %v571_v19 }
 0x152   :  { %v1031_v54 = vadd.f32 %v1839_v47, %v901_v61 }
 0x153   :  { %v1063_v61 = vadd.f32 %v1839_v47, %v981_v38 }
 0x155   :  { %v1127_v9 = vmax.f32 %v1063_v61, 0.0 }
 0x156   :  { %v493_v52 = vpop.f32.mrf.mxu0 }
 0x157   :  { %v902_v53 = vpop.f32.mrf.mxu1 }
 0x158   :  { %v903_v10 = vadd.f32 %v902_v53, %v493_v52  ;;  %1179 = vmatpush.bf16.xpose.msrb.mxu2 %v1855_v59  ;;  %v1095_v59 = vmax.f32 %v1031_v54, 0.0  ;;  %v573_v36 = vpop.f32.mrf.mxu2  ;;  %v985_v53 = vpop.f32.mrf.mxu3 }
 0x159   :  { %v983_v39 = vadd.f32 %v982_v25, %v573_v36 }
 0x15a   :  { %v1032_v57 = vadd.f32 %v1839_v47, %v903_v10 }
 0x15b   :  { %v1064_v14 = vadd.f32 %v1839_v47, %v983_v39 }
 0x15c   :  { %v1096_v2 = vmax.f32 %v1032_v57, 0.0 }
 0x15d   :  { %v1128_v45 = vmax.f32 %v1064_v14, 0.0 }
 0x15e   :  { %v2054_v15 = vpack.c.bf16 %v1096_v2, %v1095_v59  ;;  %v496_v22 = vpop.f32.mrf.mxu0 }
 0x15f   :  { %v905_v26 = vpop.f32.mrf.mxu1 }
 0x160   :  { %1198 = vmatpush.bf16.xpose.msra.mxu2 %v1161_v51  ;;  %v906_v18 = vadd.f32 %v905_v26, %v496_v22  ;;  %v2071_v51 = vpack.c.bf16 %v1128_v45, %v1127_v9  ;;  %v576_v52 = vpop.f32.mrf.mxu2  ;;  %v987_v56 = vpop.f32.mrf.mxu3 }
 0x161   :  { %v986_v34 = vadd.f32 %v985_v53, %v576_v52 }
 0x162   :  { %v1033_v32 = vadd.f32 %v1839_v47, %v906_v18 }
 0x163   :  { %v1065_v42 = vadd.f32 %v1839_v47, %v986_v34 }
 0x164   :  { %v1097_v62 = vmax.f32 %v1033_v32, 0.0 }
 0x165   :  { %v1129_v57 = vmax.f32 %v1065_v42, 0.0 }
 0x166   :  { %v498_v5 = vpop.f32.mrf.mxu0 }
 0x167   :  { %v907_v29 = vpop.f32.mrf.mxu1 }
 0x168   :  { %1199 = vmatpush.bf16.xpose.msra.mxu2 %v1160_v27  ;;  %v908_v33 = vadd.f32 %v907_v29, %v498_v5  ;;  %v578_v55 = vpop.f32.mrf.mxu2 }
 0x169   :  { %v988_v35 = vadd.f32 %v987_v56, %v578_v55 }
 0x16a   :  { %v1034_v12 = vadd.f32 %v1839_v47, %v908_v33 }
 0x16b   :  { %v1066_v43 = vadd.f32 %v1839_v47, %v988_v35 }
 0x16c   :  { %v1098_v20 = vmax.f32 %v1034_v12, 0.0 }
 0x16d   :  { %v1130_v58 = vmax.f32 %v1066_v43, 0.0 }
 0x16e   :  { %v2069_v46 = vpack.c.bf16 %v1098_v20, %v1097_v62  ;;  %v501_v48 = vpop.f32.mrf.mxu0 }
 0x16f   :  { %v910_v49 = vpop.f32.mrf.mxu1  ;;  %v2076_v0 = vpack.c.bf16 %v1130_v58, %v1129_v57 }
 0x170   :  { %1200 = vmatpush.bf16.xpose.msra.mxu2 %v1159_v30  ;;  %v2078_v21 = vpop.f32.mrf.mxu2  ;;  %v911_v38 = vadd.f32 %v910_v49, %v501_v48 }
 0x172   :  { %v1035_v14 = vadd.f32 %v1839_v47, %v911_v38 }
 0x174   :  { %v1099_v45 = vmax.f32 %v1035_v14, 0.0 }
 0x176   :  { %v503_v54 = vpop.f32.mrf.mxu0 }
 0x177   :  { %v912_v10 = vpop.f32.mrf.mxu1 }
 0x178   :  { %1201 = vmatpush.bf16.xpose.msra.mxu2 %v1158_v50  ;;  %v2086_v32 = vpop.f32.mrf.mxu2  ;;  %v913_v36 = vadd.f32 %v912_v10, %v503_v54 }
 0x17a   :  { %v1036_v12 = vadd.f32 %v1839_v47, %v913_v36 }
 0x17c   :  { %v1100_v62 = vmax.f32 %v1036_v12, 0.0 }
 0x17e   :  { %v506_v3 = vpop.f32.mrf.mxu0  ;;  %v1151_v50 = vpack.c.bf16 %v1100_v62, %v1099_v45 }
 0x17f   :  { %v915_v63 = vpop.f32.mrf.mxu1 }
 0x180   :  { %1202 = vmatpush.bf16.xpose.msra.mxu2 %v1927_v6  ;;  %v2080_v6 = vpop.f32.mrf.mxu3  ;;  %v916_v23 = vadd.f32 %v915_v63, %v506_v3  ;;  %v586_v20 = vpop.f32.mrf.mxu2 }
 0x182   :  { %v1037_v30 = vadd.f32 %v1839_v47, %v916_v23 }
 0x184   :  { %v1101_v39 = vmax.f32 %v1037_v30, 0.0 }
 0x186   :  { %v508_v59 = vpop.f32.mrf.mxu0 }
 0x187   :  { %v917_v2 = vpop.f32.mrf.mxu1 }
 0x188   :  { %v918_v19 = vadd.f32 %v917_v2, %v508_v59  ;;  %v2088_v33 = vpop.f32.mrf.mxu3  ;;  %v588_v54 = vpop.f32.mrf.mxu2 }
 0x18a   :  { %v1038_v40 = vadd.f32 %v1839_v47, %v918_v19 }
 0x18c   :  { %v1102_v25 = vmax.f32 %v1038_v40, 0.0 }
 0x18e   :  { %v511_v7 = vpop.f32.mrf.mxu0  ;;  %v1152_v13 = vpack.c.bf16 %v1102_v25, %v1101_v39 }
 0x18f   :  { %v920_v8 = vpop.f32.mrf.mxu1 }
 0x190   :  { %v921_v16 = vadd.f32 %v920_v8, %v511_v7  ;;  %v995_v9 = vpop.f32.mrf.mxu3  ;;  %v591_v55 = vpop.f32.mrf.mxu2 }
 0x191   :  { %v996_v40 = vadd.f32 %v995_v9, %v586_v20 }
 0x192   :  { %v1039_v27 = vadd.f32 %v1839_v47, %v921_v16 }
 0x193   :  { %v1069_v12 = vadd.f32 %v1839_v47, %v996_v40 }
 0x194   :  { %v1103_v24 = vmax.f32 %v1039_v27, 0.0 }
 0x196   :  { %v513_v22 = vpop.f32.mrf.mxu0 }
 0x197   :  { %v922_v26 = vpop.f32.mrf.mxu1 }
 0x198   :  { %v923_v18 = vadd.f32 %v922_v26, %v513_v22  ;;  %v997_v10 = vpop.f32.mrf.mxu3  ;;  %v593_v3 = vpop.f32.mrf.mxu2 }
 0x19a   :  { %v1040_v11 = vadd.f32 %v1839_v47, %v923_v18 }
 0x19c   :  { %v1104_v28 = vmax.f32 %v1040_v11, 0.0 }
 0x19e   :  { %v1153_v4 = vpack.c.bf16 %v1104_v28, %v1103_v24  ;;  %v516_v5 = vpop.f32.mrf.mxu0 }
 0x19f   :  { %v925_v29 = vpop.f32.mrf.mxu1 }
 0x1a0   :  { %1185 = vmatpush.bf16.xpose.msrb.mxu3 %v1153_v4  ;;  %v1000_v56 = vpop.f32.mrf.mxu3  ;;  %v926_v24 = vadd.f32 %v925_v29, %v516_v5  ;;  %v998_v4 = vadd.f32 %v997_v10, %v588_v54  ;;  %v991_v29 = vadd.f32 %v2080_v6, %v2078_v21 }
 0x1a1   :  { %v1001_v16 = vadd.f32 %v1000_v56, %v591_v55  ;;  %v1238_v55 = vlaneseq }
 0x1a2   :  { %v1041_v38 = vadd.f32 %v1839_v47, %v926_v24  ;;  %v1067_v9 = vadd.f32 %v1839_v47, %v991_v29 }
 0x1a3   :  { %v1071_v19 = vadd.f32 %v1839_v47, %v1001_v16  ;;  %vm1240_vm3 = vcmp.lt.s32.totalorder %v1238_v55, 512 }
 0x1a4   :  { %v1131_v21 = vmax.f32 %v1067_v9, 0.0 }
 0x1a5   :  { %v1135_v30 = vmax.f32 %v1071_v19, 0.0 }
 0x1a6   :  { %v518_v41 = vpop.f32.mrf.mxu0 }
 0x1a7   :  { %v927_v61 = vpop.f32.mrf.mxu1 }
 0x1a8   :  { %1186 = vmatpush.bf16.xpose.msrb.mxu3 %v1152_v13  ;;  %v1002_v63 = vpop.f32.mrf.mxu3  ;;  %v928_v28 = vadd.f32 %v927_v61, %v518_v41  ;;  %v1070_v13 = vadd.f32 %v1839_v47, %v998_v4  ;;  %v993_v41 = vadd.f32 %v2088_v33, %v2086_v32  ;;  %v1133_v61 = vmax.f32 %v1069_v12, 0.0 }
 0x1a9   :  { %v1003_v22 = vadd.f32 %v1002_v63, %v593_v3 }
 0x1aa   :  { %v1042_v39 = vadd.f32 %v1839_v47, %v928_v28  ;;  %v1134_v62 = vmax.f32 %v1070_v13, 0.0  ;;  %v1068_v45 = vadd.f32 %v1839_v47, %v993_v41 }
 0x1ac   :  { %v1106_v5 = vmax.f32 %v1042_v39, 0.0  ;;  %v1132_v6 = vmax.f32 %v1068_v45, 0.0 }
 0x1ae   :  { %v521_v52 = vpop.f32.mrf.mxu0 }
 0x1af   :  { %v930_v53 = vpop.f32.mrf.mxu1 }
 0x1b0   :  { %1187 = vmatpush.bf16.xpose.msrb.mxu3 %v1151_v50  ;;  %v931_v59 = vadd.f32 %v930_v53, %v521_v52  ;;  %v1168_v50 = vpack.c.bf16 %v1134_v62, %v1133_v61  ;;  %v1167_v52 = vpack.c.bf16 %v1132_v6, %v1131_v21 }
 0x1b2   :  { %v1043_v26 = vadd.f32 %v1839_v47, %v931_v59 }
 0x1b4   :  { %v1107_v11 = vmax.f32 %v1043_v26, 0.0 }
 0x1b6   :  { %v523_v48 = vpop.f32.mrf.mxu0 }
 0x1b7   :  { %v932_v49 = vpop.f32.mrf.mxu1 }
 0x1b8   :  { %1188 = vmatpush.bf16.xpose.msrb.mxu3 %v2069_v46  ;;  %v933_v2 = vadd.f32 %v932_v49, %v523_v48 }
 0x1be   :  { %v526_v34 = vpop.f32.mrf.mxu0 }
 0x1bf   :  { %v935_v35 = vpop.f32.mrf.mxu1 }
 0x1c0   :  { %1189 = vmatpush.bf16.xpose.msrb.mxu3 %v2054_v15  ;;  %v936_v42 = vadd.f32 %v935_v35, %v526_v34  ;;  %v1044_v15 = vadd.f32 %v1839_v47, %v933_v2 }
 0x1c2   :  { %v1045_v43 = vadd.f32 %v1839_v47, %v936_v42  ;;  %v1108_v23 = vmax.f32 %v1044_v15, 0.0 }
 0x1c4   :  { %v1109_v8 = vmax.f32 %v1045_v43, 0.0  ;;  %v1155_v25 = vpack.c.bf16 %v1108_v23, %v1107_v11 }
 0x1c6   :  { %v528_v57 = vpop.f32.mrf.mxu0 }
 0x1c7   :  { %v937_v58 = vpop.f32.mrf.mxu1 }
 0x1c8   :  { %1190 = vmatpush.bf16.xpose.msrb.mxu3 %v2032_v37  ;;  %v938_v7 = vadd.f32 %v937_v58, %v528_v57  ;;  %v1072_v37 = vadd.f32 %v1839_v47, %v1003_v22 }
 0x1ca   :  { %v1046_v46 = vadd.f32 %v1839_v47, %v938_v7  ;;  %v1136_v36 = vmax.f32 %v1072_v37, 0.0 }
 0x1cc   :  { %v1110_v27 = vmax.f32 %v1046_v46, 0.0  ;;  %v1169_v14 = vpack.c.bf16 %v1136_v36, %v1135_v30 }
 0x1ce   :  { %v1156_v18 = vpack.c.bf16 %v1110_v27, %v1109_v8 }
 0x1d0   :  { %1191 = vmatpush.bf16.xpose.msrb.mxu3 %v2020_v60  ;;  %1203 = vmatpush.bf16.xpose.msra.mxu2 %v1156_v18  ;;  %v1105_v60 = vmax.f32 %v1041_v38, 0.0 }
 0x1d2   :  { %v1154_v20 = vpack.c.bf16 %v1106_v5, %v1105_v60 }
 0x1d8   :  { %1192 = vmatpush.bf16.xpose.msrb.mxu3 %v2007_v31  ;;  %1204 = vmatpush.bf16.xpose.msra.mxu2 %v1155_v25  ;;  %v1137_v31 = vld [vmem:[%s2132_s5] sm:$0x1] }
 0x1d9   :  { %1180 = vmatmul.bf16.vlgmr.msrb.gmra.mxu2 %v1137_v31 }
 0x1df   :  { %1193 = vmatmul.bf16.vlgmr.msrb.gmra.mxu3 %v1137_v31 }
 0x1e0   :  { %1211 = vmatpush.bf16.xpose.msra.mxu3 %v1169_v14  ;;  %1205 = vmatpush.bf16.xpose.msra.mxu2 %v1154_v20 }
 0x1e8   :  { %1212 = vmatpush.bf16.xpose.msra.mxu3 %v1168_v50 }
 0x1e9   :  { %1206 = vmatmul.bf16.vlgmr.msra.gmra.mxu2 %v1137_v31 }
 0x1f0   :  { %1213 = vmatpush.bf16.xpose.msra.mxu3 %v1167_v52 }
 0x1f8   :  { %1214 = vmatpush.bf16.xpose.msra.mxu3 %v2076_v0  ;;  %v1171_v0 = vstv %s2133_s6 }
 0x200   :  { %1215 = vmatpush.bf16.xpose.msra.mxu3 %v2071_v51 }
 0x208   :  { %1216 = vmatpush.bf16.xpose.msra.mxu3 %v2058_v17 }
 0x210   :  { %1217 = vmatpush.bf16.xpose.msra.mxu3 %v2036_v44 }
 0x218   :  { %1218 = vmatpush.bf16.xpose.msra.mxu3 %v2022_v1 }
 0x21f   :  { %1219 = vmatmul.bf16.vlgmr.msra.gmra.mxu3 %v1137_v31 }
 0x25c   :  { %v1181_v32 = vpop.f32.mrf.mxu2 }
 0x25d   :  { %v1182_v17 = vadd.f32 %v1181_v32, %v1171_v0 }
 0x262   :  { %v1194_v47 = vpop.f32.mrf.mxu3 }
 0x263   :  { %v1195_v48 = vadd.f32 %v1194_v47, %v1171_v0 }
 0x264   :  { %v1183_v53 = vpop.f32.mrf.mxu2 }
 0x265   :  { %v1228_v56 = vrot.slane %v1195_v48, 7 }
 0x267   :  { %v1232_v35 = vsel %vm1231_vm0, %v1182_v17, %v1228_v56 }
 0x26a   :  { %v1196_v33 = vpop.f32.mrf.mxu3 }
 0x26c   :  { %v1207_v54 = vpop.f32.mrf.mxu2 }
 0x26d   :  { %v1208_v49 = vadd.f32 %v1207_v54, %v1171_v0 }
 0x26f   :  { %v1229_v44 = vrot.slane %v1208_v49, 6 }
 0x274   :  { %v1209_v10 = vpop.f32.mrf.mxu2 }
 0x2a2   :  { %v1220_v51 = vpop.f32.mrf.mxu3 }
 0x2a3   :  { %v1221_v34 = vadd.f32 %v1220_v51, %v1171_v0 }
 0x2a5   :  { %v1230_v1 = vrot.slane %v1221_v34, 5 }
 0x2a7   :  { %v1234_v42 = vsel %vm1233_vm1, %v1229_v44, %v1230_v1 }
 0x2a8   :  { %v1236_v43 = vsel %vm1235_vm2, %v1232_v35, %v1234_v42 }
 0x2a9   :  { %1242 = vst.msk [vmem:[%s2134_s7] sm:$0xf] %vm1240_vm3, %v1236_v43 }
 0x2aa   :  { %v1222_v57 = vpop.f32.mrf.mxu3 }

// kernel: model_forward.16
= control target key start
LH: loop header
LB: loop body
LE: loop exit
PB: predicated region body
PF: predicated region fallthrough
CT: control target
= control target key end

     0   :  { %v3050_v29 = vmov 0   ;;  %s4132_s1 = inlined_call_operand.vmem [shape: bf16[512,128], index: 1, kind: input, shape index: {}]   ;;  %s4133_s0 = inlined_call_operand.vmem [shape: s8[512,512], index: 0, kind: input, shape index: {}]   ;;  %s4134_s2 = inlined_call_operand.vmem [shape: f32[512,1], index: 2, kind: input, shape index: {}]   ;;  %s4135_s3 = inlined_call_operand.vmem [shape: f32[512,128], index: 3, kind: input, shape index: {}]   ;;  %s4136_s4 = inlined_call_operand.vmem [shape: bf16[512,128], index: 4, kind: output, shape index: {}]  }
   0x1   :  { %v2830_v0 = vld [vmem:[%s4132_s1 + $0x38] sm:$0xff]  ;;  %v2829_v4 = vld [vmem:[%s4132_s1 + $0x30] sm:$0xff]  ;;  %v2828_v8 = vld [vmem:[%s4132_s1 + $0x28] sm:$0xff]  ;;  %3047 = vset.pattern.permute.xlu0 %v3050_v29  ;;  %3048 = vset.pattern.permute.xlu1 %v3050_v29 }
   0x2   :  { %v2838_v1 = vld [vmem:[%s4132_s1 + $0x78] sm:$0xff]  ;;  %1114 = vmatpush.bf16.msra.mxu0 %v2830_v0  ;;  %v2837_v5 = vld [vmem:[%s4132_s1 + $0x70] sm:$0xff]  ;;  %v2836_v9 = vld [vmem:[%s4132_s1 + $0x68] sm:$0xff]  ;;  %3049 = vset.pattern.permute.xlu2 %v3050_v29 }
   0x3   :  { %v2846_v2 = vld [vmem:[%s4132_s1 + $0xb8] sm:$0xff]  ;;  %1283 = vmatpush.bf16.msra.mxu1 %v2838_v1  ;;  %v2845_v6 = vld [vmem:[%s4132_s1 + $0xb0] sm:$0xff]  ;;  %v2844_v10 = vld [vmem:[%s4132_s1 + $0xa8] sm:$0xff] }
   0x4   :  { %v2854_v3 = vld [vmem:[%s4132_s1 + $0xf8] sm:$0xff]  ;;  %1452 = vmatpush.bf16.msra.mxu2 %v2846_v2  ;;  %v2853_v7 = vld [vmem:[%s4132_s1 + $0xf0] sm:$0xff]  ;;  %v2852_v11 = vld [vmem:[%s4132_s1 + $0xe8] sm:$0xff] }
   0x5   :  { %1621 = vmatpush.bf16.msra.mxu3 %v2854_v3  ;;  %v2827_v12 = vld [vmem:[%s4132_s1 + $0x20] sm:$0xff]  ;;  %v2826_v16 = vld [vmem:[%s4132_s1 + $0x18] sm:$0xff]  ;;  %v2825_v20 = vld [vmem:[%s4132_s1 + $0x10] sm:$0xff] }
   0x6   :  { %1115 = vmatpush.bf16.msra.mxu0 %v2829_v4  ;;  %v2835_v13 = vld [vmem:[%s4132_s1 + $0x60] sm:$0xff]  ;;  %v2834_v17 = vld [vmem:[%s4132_s1 + $0x58] sm:$0xff]  ;;  %v2833_v21 = vld [vmem:[%s4132_s1 + $0x50] sm:$0xff] }
   0x7   :  { %1284 = vmatpush.bf16.msra.mxu1 %v2837_v5  ;;  %v2843_v14 = vld [vmem:[%s4132_s1 + $0xa0] sm:$0xff]  ;;  %v2842_v18 = vld [vmem:[%s4132_s1 + $0x98] sm:$0xff]  ;;  %v2841_v22 = vld [vmem:[%s4132_s1 + $0x90] sm:$0xff] }
   0x8   :  { %1453 = vmatpush.bf16.msra.mxu2 %v2845_v6  ;;  %v2851_v15 = vld [vmem:[%s4132_s1 + $0xe0] sm:$0xff]  ;;  %v2850_v19 = vld [vmem:[%s4132_s1 + $0xd8] sm:$0xff]  ;;  %v3153_v24 = vld [vmem:[%s4133_s0 + $0x8] sm:$0xff] }
   0x9   :  { %1622 = vmatpush.bf16.msra.mxu3 %v2853_v7  ;;  %v3148_v23 = vld [vmem:[%s4133_s0] sm:$0xff]  ;;  %v2849_v26 = vld [vmem:[%s4132_s1 + $0xd0] sm:$0xff]  ;;  %v3169_v28 = vld [vmem:[%s4133_s0 + $0x18] sm:$0xff]  ;;  %v150_v32 = vunpack.c.0.s8 %v3153_v24  ;;  %v154_v33 = vunpack.c.1.s8 %v3153_v24  ;;  %v158_v62 = vunpack.c.2.s8 %v3153_v24  ;;  %v162_v63 = vunpack.c.3.s8 %v3153_v24 }
   0xa   :  { %1116 = vmatpush.bf16.msra.mxu0 %v2828_v8  ;;  %v1985_v25 = vld [vmem:[%s4134_s2] sm:$0xff]  ;;  %v3164_v27 = vld [vmem:[%s4133_s0 + $0x10] sm:$0xff]  ;;  %v149_v30 = vunpack.c.0.s8 %v3148_v23  ;;  %v153_v31 = vunpack.c.1.s8 %v3148_v23  ;;  %v2824_v34 = vld [vmem:[%s4132_s1 + $0x8] sm:$0xff]  ;;  %v152_v38 = vunpack.c.0.s8 %v3169_v28  ;;  %v156_v39 = vunpack.c.1.s8 %v3169_v28 }
   0xb   :  { %1285 = vmatpush.bf16.msra.mxu1 %v2836_v9  ;;  %2051 = vperm.xlu0 %3047, %v1985_v25   ;;  %v2832_v35 = vld [vmem:[%s4132_s1 + $0x48] sm:$0xff]  ;;  %v151_v36 = vunpack.c.0.s8 %v3164_v27  ;;  %v155_v37 = vunpack.c.1.s8 %v3164_v27  ;;  %v406_v44 = vcvt.s32.f32 %v150_v32  ;;  %v410_v45 = vcvt.s32.f32 %v154_v33  ;;  %v2823_v46 = vld [vmem:[%s4132_s1] sm:$0xff]  ;;  %v1987_v59 = vld [vmem:[%s4134_s2 + $0x10] sm:$0xff] }
   0xc   :  { %1454 = vmatpush.bf16.msra.mxu2 %v2844_v10  ;;  %v2840_v40 = vld [vmem:[%s4132_s1 + $0x88] sm:$0xff]  ;;  %v405_v42 = vcvt.s32.f32 %v149_v30  ;;  %v409_v43 = vcvt.s32.f32 %v153_v31  ;;  %v2831_v47 = vld [vmem:[%s4132_s1 + $0x40] sm:$0xff]  ;;  %v408_v50 = vcvt.s32.f32 %v152_v38  ;;  %v412_v51 = vcvt.s32.f32 %v156_v39  ;;  %2061 = vperm.xlu1 %3048, %v1987_v59   ;;  %v1988_v4 = vld [vmem:[%s4134_s2 + $0x18] sm:$0xff] }
   0xd   :  { %1623 = vmatpush.bf16.msra.mxu3 %v2852_v11  ;;  %v2848_v41 = vld [vmem:[%s4132_s1 + $0xc8] sm:$0xff]  ;;  %v407_v48 = vcvt.s32.f32 %v151_v36  ;;  %v411_v49 = vcvt.s32.f32 %v155_v37  ;;  %v2839_v53 = vld [vmem:[%s4132_s1 + $0x80] sm:$0xff]  ;;  %v662_v56 = vpack.c.bf16 %v410_v45, %v406_v44  ;;  %v157_v60 = vunpack.c.2.s8 %v3148_v23 }
   0xe   :  { %1117 = vmatpush.bf16.msra.mxu0 %v2827_v12  ;;  %v1986_v52 = vld [vmem:[%s4134_s2 + $0x8] sm:$0xff]  ;;  %v2847_v54 = vld [vmem:[%s4132_s1 + $0xc0] sm:$0xff]  ;;  %v661_v55 = vpack.c.bf16 %v409_v43, %v405_v42  ;;  %v664_v58 = vpack.c.bf16 %v412_v51, %v408_v50  ;;  %v161_v61 = vunpack.c.3.s8 %v3148_v23  ;;  %v159_v0 = vunpack.c.2.s8 %v3164_v27  ;;  %v1992_v43 = vld [vmem:[%s4134_s2 + $0x38] sm:$0xff] }
   0xf   :  { %1286 = vmatpush.bf16.msra.mxu1 %v2835_v13  ;;  %v663_v57 = vpack.c.bf16 %v411_v49, %v407_v48  ;;  %v163_v1 = vunpack.c.3.s8 %v3164_v27  ;;  %v160_v2 = vunpack.c.2.s8 %v3169_v28  ;;  %v164_v3 = vunpack.c.3.s8 %v3169_v28  ;;  %v1989_v42 = vld [vmem:[%s4134_s2 + $0x20] sm:$0xff] }
  0x10   :  { %1455 = vmatpush.bf16.msra.mxu2 %v2843_v14  ;;  %v413_v5 = vcvt.s32.f32 %v157_v60  ;;  %v417_v6 = vcvt.s32.f32 %v161_v61  ;;  %v414_v7 = vcvt.s32.f32 %v158_v62  ;;  %v418_v8 = vcvt.s32.f32 %v162_v63  ;;  %2071 = vperm.xlu2 %3049, %v1989_v42  }
  0x11   :  { %1624 = vmatpush.bf16.msra.mxu3 %v2851_v15  ;;  %v415_v9 = vcvt.s32.f32 %v159_v0  ;;  %v419_v10 = vcvt.s32.f32 %v163_v1  ;;  %v416_v11 = vcvt.s32.f32 %v160_v2  ;;  %v420_v12 = vcvt.s32.f32 %v164_v3  ;;  %v93_v0 = vld [vmem:[%s4133_s0 + $0x40] sm:$0xff]  ;;  %v94_v1 = vld [vmem:[%s4133_s0 + $0x48] sm:$0xff] }
  0x12   :  { %1118 = vmatpush.bf16.msra.mxu0 %v2826_v16  ;;  %v665_v13 = vpack.c.bf16 %v417_v6, %v413_v5  ;;  %v666_v14 = vpack.c.bf16 %v418_v8, %v414_v7  ;;  %v1990_v2 = vld [vmem:[%s4134_s2 + $0x28] sm:$0xff]  ;;  %v96_v5 = vld [vmem:[%s4133_s0 + $0x58] sm:$0xff]  ;;  %v181_v6 = vunpack.c.0.s8 %v93_v0  ;;  %v185_v7 = vunpack.c.1.s8 %v93_v0 }
  0x13   :  { %1287 = vmatpush.bf16.msra.mxu1 %v2834_v17  ;;  %2056 = vperm.xlu0 %3047, %v1986_v52   ;;  %v667_v15 = vpack.c.bf16 %v419_v10, %v415_v9  ;;  %v668_v16 = vpack.c.bf16 %v420_v12, %v416_v11  ;;  %v89_v17 = vld [vmem:[%s4133_s0 + $0x20] sm:$0xff]  ;;  %v1994_v3 = vld [vmem:[%s4134_s2 + $0x48] sm:$0xff]  ;;  %v182_v8 = vunpack.c.0.s8 %v94_v1  ;;  %v186_v9 = vunpack.c.1.s8 %v94_v1 }
  0x14   :  { %1456 = vmatpush.bf16.msra.mxu2 %v2842_v18  ;;  %2066 = vperm.xlu1 %3048, %v1988_v4   ;;  %v90_v18 = vld [vmem:[%s4133_s0 + $0x28] sm:$0xff]  ;;  %v173_v44 = vunpack.c.2.s8 %v89_v17  ;;  %v177_v45 = vunpack.c.3.s8 %v89_v17  ;;  %v95_v4 = vld [vmem:[%s4133_s0 + $0x50] sm:$0xff]  ;;  %v184_v12 = vunpack.c.0.s8 %v96_v5 }
  0x15   :  { %1625 = vmatpush.bf16.msra.mxu3 %v2850_v19  ;;  %v91_v19 = vld [vmem:[%s4133_s0 + $0x30] sm:$0xff]  ;;  %v166_v23 = vunpack.c.0.s8 %v90_v18  ;;  %v170_v24 = vunpack.c.1.s8 %v90_v18  ;;  %v183_v10 = vunpack.c.0.s8 %v95_v4  ;;  %v187_v11 = vunpack.c.1.s8 %v95_v4 }
  0x16   :  { %1119 = vmatpush.bf16.msra.mxu0 %v2825_v20  ;;  %v92_v20 = vld [vmem:[%s4133_s0 + $0x38] sm:$0xff]  ;;  %v167_v25 = vunpack.c.0.s8 %v91_v19  ;;  %v175_v48 = vunpack.c.2.s8 %v91_v19  ;;  %v179_v49 = vunpack.c.3.s8 %v91_v19  ;;  %v429_v52 = vcvt.s32.f32 %v173_v44 }
  0x17   :  { %1288 = vmatpush.bf16.msra.mxu1 %v2833_v21  ;;  %v165_v21 = vunpack.c.0.s8 %v89_v17  ;;  %v168_v27 = vunpack.c.0.s8 %v92_v20  ;;  %v172_v28 = vunpack.c.1.s8 %v92_v20  ;;  %v422_v31 = vcvt.s32.f32 %v166_v23 }
  0x18   :  { %1457 = vmatpush.bf16.msra.mxu2 %v2841_v22  ;;  %v169_v22 = vunpack.c.1.s8 %v89_v17  ;;  %v426_v32 = vcvt.s32.f32 %v170_v24  ;;  %v423_v33 = vcvt.s32.f32 %v167_v25  ;;  %v176_v50 = vunpack.c.2.s8 %v92_v20  ;;  %2076 = vperm.xlu2 %3049, %v1990_v2  }
  0x19   :  { %1626 = vmatpush.bf16.msra.mxu3 %v2849_v26  ;;  %v171_v26 = vunpack.c.1.s8 %v91_v19  ;;  %v421_v29 = vcvt.s32.f32 %v165_v21  ;;  %v428_v36 = vcvt.s32.f32 %v172_v28  ;;  %v180_v51 = vunpack.c.3.s8 %v92_v20 }
  0x1a   :  { %1120 = vmatpush.bf16.msra.mxu0 %v2824_v34  ;;  %v425_v30 = vcvt.s32.f32 %v169_v22  ;;  %v670_v38 = vpack.c.bf16 %v426_v32, %v422_v31  ;;  %v442_v17 = vcvt.s32.f32 %v186_v9  ;;  %v443_v19 = vcvt.s32.f32 %v187_v11 }
  0x1b   :  { %1289 = vmatpush.bf16.msra.mxu1 %v2832_v35  ;;  %v427_v34 = vcvt.s32.f32 %v171_v26  ;;  %v424_v35 = vcvt.s32.f32 %v168_v27  ;;  %v436_v59 = vcvt.s32.f32 %v180_v51  ;;  %v440_v20 = vcvt.s32.f32 %v184_v12  ;;  %v1995_v26 = vld [vmem:[%s4134_s2 + $0x50] sm:$0xff]  ;;  %v1993_v27 = vld [vmem:[%s4134_s2 + $0x40] sm:$0xff]  ;;  %v1998_v51 = vld [vmem:[%s4134_s2 + $0x68] sm:$0xff] }
  0x1c   :  { %1458 = vmatpush.bf16.msra.mxu2 %v2840_v40  ;;  %v669_v37 = vpack.c.bf16 %v425_v30, %v421_v29  ;;  %2086 = vperm.xlu1 %3048, %v1992_v43   ;;  %v189_v28 = vunpack.c.2.s8 %v93_v0  ;;  %v193_v29 = vunpack.c.3.s8 %v93_v0  ;;  %v190_v30 = vunpack.c.2.s8 %v94_v1 }
  0x1d   :  { %1627 = vmatpush.bf16.msra.mxu3 %v2848_v41  ;;  %v671_v39 = vpack.c.bf16 %v427_v34, %v423_v33  ;;  %v672_v40 = vpack.c.bf16 %v428_v36, %v424_v35  ;;  %v1991_v41 = vld [vmem:[%s4134_s2 + $0x30] sm:$0xff]  ;;  %v194_v31 = vunpack.c.3.s8 %v94_v1  ;;  %v191_v32 = vunpack.c.2.s8 %v95_v4 }
  0x1e   :  { %1121 = vmatpush.bf16.msra.mxu0 %v2823_v46  ;;  %2081 = vperm.xlu0 %3047, %v1991_v41   ;;  %v174_v46 = vunpack.c.2.s8 %v90_v18  ;;  %v195_v33 = vunpack.c.3.s8 %v95_v4  ;;  %v192_v34 = vunpack.c.2.s8 %v96_v5  ;;  %v196_v35 = vunpack.c.3.s8 %v96_v5 }
  0x1f   :  { %1290 = vmatpush.bf16.msra.mxu1 %v2831_v47  ;;  %v178_v47 = vunpack.c.3.s8 %v90_v18  ;;  %v439_v18 = vcvt.s32.f32 %v183_v10  ;;  %v445_v36 = vcvt.s32.f32 %v189_v28 }
  0x20   :  { %1459 = vmatpush.bf16.msra.mxu2 %v2839_v53  ;;  %v433_v53 = vcvt.s32.f32 %v177_v45  ;;  %2091 = vperm.xlu2 %3049, %v1993_v27   ;;  %v451_v41 = vcvt.s32.f32 %v195_v33  ;;  %v448_v42 = vcvt.s32.f32 %v192_v34  ;;  %v452_v43 = vcvt.s32.f32 %v196_v35  ;;  %v102_v33 = vld [vmem:[%s4133_s0 + $0x88] sm:$0xff]  ;;  %v103_v34 = vld [vmem:[%s4133_s0 + $0x90] sm:$0xff]  ;;  %v104_v35 = vld [vmem:[%s4133_s0 + $0x98] sm:$0xff] }
  0x21   :  { %1628 = vmatpush.bf16.msra.mxu3 %v2847_v54  ;;  %1122 = vmatmul.bf16.vlgmr.msra.gmra.mxu0 %v661_v55  ;;  %v430_v54 = vcvt.s32.f32 %v174_v46  ;;  %v434_v55 = vcvt.s32.f32 %v178_v47  ;;  %v679_v24 = vpack.c.bf16 %v443_v19, %v439_v18  ;;  %v1996_v18 = vld [vmem:[%s4134_s2 + $0x58] sm:$0xff] }
  0x22   :  { %1291 = vmatmul.bf16.vlgmr.msra.gmra.mxu1 %v662_v56  ;;  %v431_v56 = vcvt.s32.f32 %v175_v48  ;;  %v673_v60 = vpack.c.bf16 %v433_v53, %v429_v52  ;;  %v684_v47 = vpack.c.bf16 %v452_v43, %v448_v42  ;;  %v97_v48 = vld [vmem:[%s4133_s0 + $0x60] sm:$0xff]  ;;  %v99_v52 = vld [vmem:[%s4133_s0 + $0x70] sm:$0xff]  ;;  %v100_v53 = vld [vmem:[%s4133_s0 + $0x78] sm:$0xff]  ;;  %v216_v42 = vunpack.c.0.s8 %v104_v35 }
  0x23   :  { %1460 = vmatmul.bf16.vlgmr.msra.gmra.mxu2 %v663_v57  ;;  %v435_v57 = vcvt.s32.f32 %v179_v49  ;;  %v674_v61 = vpack.c.bf16 %v434_v55, %v430_v54  ;;  %v98_v49 = vld [vmem:[%s4133_s0 + $0x68] sm:$0xff]  ;;  %v197_v54 = vunpack.c.0.s8 %v97_v48  ;;  %v201_v55 = vunpack.c.1.s8 %v97_v48 }
  0x24   :  { %1629 = vmatmul.bf16.vlgmr.msra.gmra.mxu3 %v664_v58  ;;  %v432_v58 = vcvt.s32.f32 %v176_v50  ;;  %2101 = vperm.xlu1 %3048, %v1995_v26   ;;  %v1997_v50 = vld [vmem:[%s4134_s2 + $0x60] sm:$0xff]  ;;  %v205_v10 = vunpack.c.2.s8 %v97_v48  ;;  %v209_v11 = vunpack.c.3.s8 %v97_v48  ;;  %v206_v12 = vunpack.c.2.s8 %v98_v49 }
  0x25   :  { %v675_v62 = vpack.c.bf16 %v435_v57, %v431_v56  ;;  %v198_v56 = vunpack.c.0.s8 %v98_v49  ;;  %v202_v57 = vunpack.c.1.s8 %v98_v49  ;;  %v220_v43 = vunpack.c.1.s8 %v104_v35 }
  0x26   :  { %v676_v63 = vpack.c.bf16 %v436_v59, %v432_v58  ;;  %2096 = vperm.xlu0 %3047, %v1994_v3   ;;  %v199_v58 = vunpack.c.0.s8 %v99_v52  ;;  %v203_v59 = vunpack.c.1.s8 %v99_v52  ;;  %v461_v19 = vcvt.s32.f32 %v205_v10  ;;  %v2003_v10 = vld [vmem:[%s4134_s2 + $0x90] sm:$0xff] }
  0x27   :  { %v454_v0 = vcvt.s32.f32 %v198_v56  ;;  %v458_v1 = vcvt.s32.f32 %v202_v57 }
  0x28   :  { %v455_v2 = vcvt.s32.f32 %v199_v58  ;;  %v459_v3 = vcvt.s32.f32 %v203_v59  ;;  %2106 = vperm.xlu2 %3049, %v1996_v18   ;;  %v1999_v59 = vld [vmem:[%s4134_s2 + $0x70] sm:$0xff] }
  0x2c   :  { %2116 = vperm.xlu1 %3048, %v1998_v51   ;;  %v472_v51 = vcvt.s32.f32 %v216_v42 }
  0x2e   :  { %2111 = vperm.xlu0 %3047, %v1997_v50  }
  0x30   :  { %2121 = vperm.xlu2 %3049, %v1999_v59   ;;  %v2002_v59 = vld [vmem:[%s4134_s2 + $0x88] sm:$0xff] }
  0x31   :  { %1127 = vmatmul.bf16.gmra.mxu0 %v665_v13  ;;  %v188_v13 = vunpack.c.1.s8 %v96_v5 }
  0x32   :  { %1296 = vmatmul.bf16.gmra.mxu1 %v666_v14  ;;  %v437_v14 = vcvt.s32.f32 %v181_v6 }
  0x33   :  { %1465 = vmatmul.bf16.gmra.mxu2 %v667_v15  ;;  %v441_v15 = vcvt.s32.f32 %v185_v7  ;;  %v444_v21 = vcvt.s32.f32 %v188_v13  ;;  %v686_v7 = vpack.c.bf16 %v458_v1, %v454_v0  ;;  %v210_v13 = vunpack.c.3.s8 %v98_v49 }
  0x34   :  { %1634 = vmatmul.bf16.gmra.mxu3 %v668_v16  ;;  %v438_v16 = vcvt.s32.f32 %v182_v8  ;;  %v687_v8 = vpack.c.bf16 %v459_v3, %v455_v2  ;;  %v222_v2 = vunpack.c.2.s8 %v102_v33  ;;  %v226_v3 = vunpack.c.3.s8 %v102_v33 }
  0x35   :  { %v677_v22 = vpack.c.bf16 %v441_v15, %v437_v14  ;;  %v680_v25 = vpack.c.bf16 %v444_v21, %v440_v20  ;;  %v207_v14 = vunpack.c.2.s8 %v99_v52  ;;  %v211_v15 = vunpack.c.3.s8 %v99_v52 }
  0x36   :  { %v678_v23 = vpack.c.bf16 %v442_v17, %v438_v16  ;;  %v208_v16 = vunpack.c.2.s8 %v100_v53  ;;  %v212_v17 = vunpack.c.3.s8 %v100_v53  ;;  %v465_v20 = vcvt.s32.f32 %v209_v11 }
  0x37   :  { %v462_v21 = vcvt.s32.f32 %v206_v12  ;;  %v476_v52 = vcvt.s32.f32 %v220_v43 }
  0x38   :  { %v468_v26 = vcvt.s32.f32 %v212_v17  ;;  %v689_v27 = vpack.c.bf16 %v465_v20, %v461_v19  ;;  %2136 = vperm.xlu2 %3049, %v2002_v59  }
  0x39   :  { %v696_v58 = vpack.c.bf16 %v476_v52, %v472_v51 }
  0x41   :  { %1132 = vmatmul.bf16.gmra.mxu0 %v669_v37  ;;  %v449_v37 = vcvt.s32.f32 %v193_v29 }
  0x42   :  { %1301 = vmatmul.bf16.gmra.mxu1 %v670_v38  ;;  %v446_v38 = vcvt.s32.f32 %v190_v30 }
  0x43   :  { %1470 = vmatmul.bf16.gmra.mxu2 %v671_v39  ;;  %v450_v39 = vcvt.s32.f32 %v194_v31  ;;  %v681_v44 = vpack.c.bf16 %v449_v37, %v445_v36  ;;  %v2000_v31 = vld [vmem:[%s4134_s2 + $0x78] sm:$0xff] }
  0x44   :  { %1639 = vmatmul.bf16.gmra.mxu3 %v672_v40  ;;  %v447_v40 = vcvt.s32.f32 %v191_v32  ;;  %2126 = vperm.xlu0 %3047, %v2000_v31   ;;  %v101_v32 = vld [vmem:[%s4133_s0 + $0x80] sm:$0xff]  ;;  %v2004_v31 = vld [vmem:[%s4134_s2 + $0x98] sm:$0xff] }
  0x45   :  { %v682_v45 = vpack.c.bf16 %v450_v39, %v446_v38  ;;  %v213_v36 = vunpack.c.0.s8 %v101_v32  ;;  %v217_v37 = vunpack.c.1.s8 %v101_v32  ;;  %v214_v38 = vunpack.c.0.s8 %v102_v33 }
  0x46   :  { %v683_v46 = vpack.c.bf16 %v451_v41, %v447_v40  ;;  %v218_v39 = vunpack.c.1.s8 %v102_v33  ;;  %v215_v40 = vunpack.c.0.s8 %v103_v34  ;;  %v219_v41 = vunpack.c.1.s8 %v103_v34 }
  0x47   :  { %v221_v0 = vunpack.c.2.s8 %v101_v32  ;;  %v225_v1 = vunpack.c.3.s8 %v101_v32 }
  0x48   :  { %v474_v48 = vcvt.s32.f32 %v218_v39  ;;  %v471_v49 = vcvt.s32.f32 %v215_v40  ;;  %v475_v50 = vcvt.s32.f32 %v219_v41  ;;  %v3327_v39 = vld [vmem:[%s4133_s0 + $0xa8] sm:$0xff]  ;;  %v3332_v40 = vld [vmem:[%s4133_s0 + $0xb0] sm:$0xff]  ;;  %v3337_v41 = vld [vmem:[%s4133_s0 + $0xb8] sm:$0xff] }
  0x49   :  { %v477_v12 = vcvt.s32.f32 %v221_v0  ;;  %v234_v51 = vunpack.c.1.s8 %v3327_v39  ;;  %v231_v52 = vunpack.c.0.s8 %v3332_v40 }
  0x4a   :  { %v695_v57 = vpack.c.bf16 %v475_v50, %v471_v49  ;;  %v230_v50 = vunpack.c.0.s8 %v3327_v39 }
  0x4b   :  { %v490_v0 = vcvt.s32.f32 %v234_v51 }
  0x4c   :  { %2141 = vperm.xlu0 %3047, %v2003_v10  }
  0x51   :  { %1137 = vmatmul.bf16.gmra.mxu0 %v673_v60  ;;  %v200_v60 = vunpack.c.0.s8 %v100_v53 }
  0x52   :  { %1306 = vmatmul.bf16.gmra.mxu1 %v674_v61  ;;  %v204_v61 = vunpack.c.1.s8 %v100_v53 }
  0x53   :  { %1475 = vmatmul.bf16.gmra.mxu2 %v675_v62  ;;  %v453_v62 = vcvt.s32.f32 %v197_v54  ;;  %v456_v4 = vcvt.s32.f32 %v200_v60 }
  0x54   :  { %1644 = vmatmul.bf16.gmra.mxu3 %v676_v63  ;;  %v457_v63 = vcvt.s32.f32 %v201_v55  ;;  %v460_v5 = vcvt.s32.f32 %v204_v61 }
  0x56   :  { %v685_v6 = vpack.c.bf16 %v457_v63, %v453_v62  ;;  %v688_v9 = vpack.c.bf16 %v460_v5, %v456_v4 }
  0x61   :  { %1142 = vmatmul.bf16.gmra.mxu0 %v677_v22  ;;  %v466_v22 = vcvt.s32.f32 %v210_v13  ;;  %v481_v13 = vcvt.s32.f32 %v225_v1  ;;  %v487_v1 = vcvt.s32.f32 %v231_v52 }
  0x62   :  { %1311 = vmatmul.bf16.gmra.mxu1 %v678_v23  ;;  %v463_v23 = vcvt.s32.f32 %v207_v14  ;;  %v478_v14 = vcvt.s32.f32 %v222_v2 }
  0x63   :  { %1480 = vmatmul.bf16.gmra.mxu2 %v679_v24  ;;  %v467_v24 = vcvt.s32.f32 %v211_v15  ;;  %v690_v28 = vpack.c.bf16 %v466_v22, %v462_v21  ;;  %v482_v15 = vcvt.s32.f32 %v226_v3 }
  0x64   :  { %1649 = vmatmul.bf16.gmra.mxu3 %v680_v25  ;;  %v464_v25 = vcvt.s32.f32 %v208_v16 }
  0x65   :  { %v691_v29 = vpack.c.bf16 %v467_v24, %v463_v23  ;;  %v697_v24 = vpack.c.bf16 %v481_v13, %v477_v12 }
  0x66   :  { %v692_v30 = vpack.c.bf16 %v468_v26, %v464_v25  ;;  %v698_v25 = vpack.c.bf16 %v482_v15, %v478_v14 }
  0x71   :  { %1147 = vmatmul.bf16.gmra.mxu0 %v681_v44  ;;  %v2001_v44 = vld [vmem:[%s4134_s2 + $0x80] sm:$0xff] }
  0x72   :  { %1316 = vmatmul.bf16.gmra.mxu1 %v682_v45  ;;  %2131 = vperm.xlu1 %3048, %v2001_v44   ;;  %v469_v45 = vcvt.s32.f32 %v213_v36  ;;  %v2434_v36 = vld [vmem:[%s4135_s3 + $0x8] sm:$0xff] }
  0x73   :  { %1485 = vmatmul.bf16.gmra.mxu2 %v683_v46  ;;  %v473_v46 = vcvt.s32.f32 %v217_v37  ;;  %v3322_v37 = vld [vmem:[%s4133_s0 + $0xa0] sm:$0xff] }
  0x74   :  { %1654 = vmatmul.bf16.gmra.mxu3 %v684_v47  ;;  %v470_v47 = vcvt.s32.f32 %v214_v38  ;;  %v233_v49 = vunpack.c.1.s8 %v3322_v37 }
  0x75   :  { %v693_v53 = vpack.c.bf16 %v473_v46, %v469_v45  ;;  %v229_v46 = vunpack.c.0.s8 %v3322_v37 }
  0x76   :  { %v694_v54 = vpack.c.bf16 %v474_v48, %v470_v47 }
  0x7a   :  { %2146 = vperm.xlu1 %3048, %v2004_v31   ;;  %v238_v31 = vunpack.c.2.s8 %v3327_v39 }
  0x7d   :  { %v2052_v61 = vpop.permute.xlu0 %2051 }
  0x7e   :  { %v2062_v45 = vpop.permute.xlu1 %2061 }
  0x81   :  { %1152 = vmatmul.bf16.gmra.mxu0 %v685_v6  ;;  %v223_v6 = vunpack.c.2.s8 %v103_v34 }
  0x82   :  { %1321 = vmatmul.bf16.gmra.mxu1 %v686_v7  ;;  %v227_v7 = vunpack.c.3.s8 %v103_v34 }
  0x83   :  { %1490 = vmatmul.bf16.gmra.mxu2 %v687_v8  ;;  %v224_v8 = vunpack.c.2.s8 %v104_v35  ;;  %v479_v16 = vcvt.s32.f32 %v223_v6 }
  0x84   :  { %1659 = vmatmul.bf16.gmra.mxu3 %v688_v9  ;;  %v228_v9 = vunpack.c.3.s8 %v104_v35  ;;  %v483_v17 = vcvt.s32.f32 %v227_v7  ;;  %v2433_v35 = vld [vmem:[%s4135_s3] sm:$0xff] }
  0x85   :  { %v480_v18 = vcvt.s32.f32 %v224_v8  ;;  %v2057_v32 = vpop.permute.xlu0 %2056 }
  0x86   :  { %v484_v19 = vcvt.s32.f32 %v228_v9 }
  0x91   :  { %1157 = vmatmul.bf16.gmra.mxu0 %v689_v27 }
  0x92   :  { %1326 = vmatmul.bf16.gmra.mxu1 %v690_v28 }
  0x93   :  { %1495 = vmatmul.bf16.gmra.mxu2 %v691_v29  ;;  %v699_v29 = vpack.c.bf16 %v483_v17, %v479_v16  ;;  %v2006_v16 = vld [vmem:[%s4134_s2 + $0xa8] sm:$0xff]  ;;  %v2067_v17 = vpop.permute.xlu1 %2066 }
  0x94   :  { %1664 = vmatmul.bf16.gmra.mxu3 %v692_v30  ;;  %v700_v30 = vpack.c.bf16 %v484_v19, %v480_v18  ;;  %2156 = vperm.xlu0 %3047, %v2006_v16  }
  0x9e   :  { %v1123_v55 = vpop.f32.mrf.mxu0 }
  0x9f   :  { %v1292_v56 = vpop.f32.mrf.mxu1 }
  0xa0   :  { %v1293_v60 = vadd.f32 %v1292_v56, %v1123_v55  ;;  %v235_v56 = vunpack.c.1.s8 %v3332_v40 }
  0xa1   :  { %1162 = vmatmul.bf16.gmra.mxu0 %v693_v53 }
  0xa2   :  { %1331 = vmatmul.bf16.gmra.mxu1 %v694_v54  ;;  %v491_v2 = vcvt.s32.f32 %v235_v56 }
  0xa3   :  { %1500 = vmatmul.bf16.gmra.mxu2 %v695_v57  ;;  %v232_v57 = vunpack.c.0.s8 %v3337_v41 }
  0xa4   :  { %1669 = vmatmul.bf16.gmra.mxu3 %v696_v58  ;;  %v236_v58 = vunpack.c.1.s8 %v3337_v41  ;;  %v703_v14 = vpack.c.bf16 %v491_v2, %v487_v1  ;;  %v2437_v1 = vld [vmem:[%s4135_s3 + $0x20] sm:$0xff]  ;;  %v2438_v2 = vld [vmem:[%s4135_s3 + $0x28] sm:$0xff] }
  0xa5   :  { %v488_v3 = vcvt.s32.f32 %v232_v57 }
  0xa6   :  { %v1461_v62 = vpop.f32.mrf.mxu2  ;;  %v1125_v4 = vpop.f32.mrf.mxu0 }
  0xa7   :  { %v1630_v63 = vpop.f32.mrf.mxu3  ;;  %v1294_v5 = vpop.f32.mrf.mxu1  ;;  %v1462_v11 = vadd.f32 %v1461_v62, %v1293_v60  ;;  %v489_v62 = vcvt.s32.f32 %v233_v49 }
  0xa8   :  { %v1295_v21 = vadd.f32 %v1294_v5, %v1125_v4  ;;  %v492_v4 = vcvt.s32.f32 %v236_v58 }
  0xa9   :  { %v1631_v20 = vadd.f32 %v1630_v63, %v1462_v11  ;;  %v486_v63 = vcvt.s32.f32 %v230_v50 }
  0xaa   :  { %v704_v15 = vpack.c.bf16 %v492_v4, %v488_v3  ;;  %v3388_v3 = vld [vmem:[%s4133_s0 + $0xc0] sm:$0xff] }
  0xab   :  { %v2369_v33 = vmul.f32 %v2052_v61, %v1631_v20  ;;  %v485_v61 = vcvt.s32.f32 %v229_v46  ;;  %v702_v10 = vpack.c.bf16 %v490_v0, %v486_v63  ;;  %v2435_v20 = vld [vmem:[%s4135_s3 + $0x10] sm:$0xff]  ;;  %v494_v46 = vcvt.s32.f32 %v238_v31 }
  0xad   :  { %v2497_v42 = vadd.f32 %v2433_v35, %v2369_v33  ;;  %v701_v9 = vpack.c.bf16 %v489_v62, %v485_v61  ;;  %v239_v33 = vunpack.c.2.s8 %v3332_v40  ;;  %v2005_v61 = vld [vmem:[%s4134_s2 + $0xa0] sm:$0xff] }
  0xae   :  { %v1463_v22 = vpop.f32.mrf.mxu2  ;;  %v1128_v27 = vpop.f32.mrf.mxu0  ;;  %2151 = vperm.xlu2 %3049, %v2005_v61  }
  0xaf   :  { %v1632_v23 = vpop.f32.mrf.mxu3  ;;  %v1464_v26 = vadd.f32 %v1463_v22, %v1295_v21  ;;  %v1297_v28 = vpop.f32.mrf.mxu1  ;;  %v2436_v21 = vld [vmem:[%s4135_s3 + $0x18] sm:$0xff] }
  0xb0   :  { %v1298_v43 = vadd.f32 %v1297_v28, %v1128_v27  ;;  %v237_v27 = vunpack.c.2.s8 %v3322_v37 }
  0xb1   :  { %v1633_v34 = vadd.f32 %v1632_v23, %v1464_v26  ;;  %1167 = vmatmul.bf16.gmra.mxu0 %v697_v24  ;;  %v2072_v26 = vpop.permute.xlu2 %2071 }
  0xb2   :  { %1336 = vmatmul.bf16.gmra.mxu1 %v698_v25 }
  0xb3   :  { %v2370_v38 = vmul.f32 %v2057_v32, %v1633_v34  ;;  %1505 = vmatmul.bf16.gmra.mxu2 %v699_v29  ;;  %v242_v32 = vunpack.c.3.s8 %v3327_v39  ;;  %v493_v39 = vcvt.s32.f32 %v237_v27 }
  0xb4   :  { %1674 = vmatmul.bf16.gmra.mxu3 %v700_v30  ;;  %v241_v30 = vunpack.c.3.s8 %v3322_v37 }
  0xb5   :  { %v2498_v44 = vadd.f32 %v2434_v36, %v2370_v38  ;;  %v243_v38 = vunpack.c.3.s8 %v3332_v40 }
  0xb6   :  { %v1466_v47 = vpop.f32.mrf.mxu2  ;;  %v1130_v54 = vpop.f32.mrf.mxu0 }
  0xb7   :  { %v1635_v48 = vpop.f32.mrf.mxu3  ;;  %v2858_v53 = vpack.c.bf16 %v2498_v44, %v2497_v42  ;;  %v1299_v55 = vpop.f32.mrf.mxu1  ;;  %v1467_v60 = vadd.f32 %v1466_v47, %v1298_v43  ;;  %v240_v42 = vunpack.c.2.s8 %v3337_v41  ;;  %v244_v43 = vunpack.c.3.s8 %v3337_v41  ;;  %v2007_v44 = vld [vmem:[%s4134_s2 + $0xb0] sm:$0xff] }
  0xb8   :  { %v1300_v6 = vadd.f32 %v1299_v55, %v1130_v54  ;;  %2161 = vperm.xlu1 %3048, %v2007_v44   ;;  %v498_v47 = vcvt.s32.f32 %v242_v32  ;;  %v499_v40 = vcvt.s32.f32 %v243_v38 }
  0xb9   :  { %2859 = vst [vmem:[%s4136_s4] sm:$0xff] %v2858_v53   ;;  %v1636_v5 = vadd.f32 %v1635_v48, %v1467_v60  ;;  %v495_v48 = vcvt.s32.f32 %v239_v33  ;;  %v496_v49 = vcvt.s32.f32 %v240_v42  ;;  %v500_v50 = vcvt.s32.f32 %v244_v43  ;;  %v2077_v62 = vpop.permute.xlu2 %2076 }
  0xba   :  { %v706_v55 = vpack.c.bf16 %v498_v47, %v494_v46 }
  0xbb   :  { %v2371_v18 = vmul.f32 %v2062_v45, %v1636_v5  ;;  %v497_v45 = vcvt.s32.f32 %v241_v30  ;;  %v707_v59 = vpack.c.bf16 %v499_v40, %v495_v48  ;;  %v708_v60 = vpack.c.bf16 %v500_v50, %v496_v49  ;;  %v3393_v5 = vld [vmem:[%s4133_s0 + $0xc8] sm:$0xff]  ;;  %v2087_v40 = vpop.permute.xlu1 %2086 }
  0xbc   :  { %v250_v16 = vunpack.c.1.s8 %v3393_v5  ;;  %v2010_v48 = vld [vmem:[%s4134_s2 + $0xc8] sm:$0xff]  ;;  %v258_v61 = vunpack.c.3.s8 %v3393_v5 }
  0xbd   :  { %v2499_v23 = vadd.f32 %v2435_v20, %v2371_v18  ;;  %v705_v54 = vpack.c.bf16 %v497_v45, %v493_v39 }
  0xbe   :  { %v1468_v7 = vpop.f32.mrf.mxu2  ;;  %v1133_v12 = vpop.f32.mrf.mxu0 }
  0xbf   :  { %v1637_v8 = vpop.f32.mrf.mxu3  ;;  %v1469_v11 = vadd.f32 %v1468_v7, %v1300_v6  ;;  %v1302_v13 = vpop.f32.mrf.mxu1  ;;  %v3398_v6 = vld [vmem:[%s4133_s0 + $0xd0] sm:$0xff]  ;;  %v3403_v7 = vld [vmem:[%s4133_s0 + $0xd8] sm:$0xff] }
  0xc0   :  { %v1303_v24 = vadd.f32 %v1302_v13, %v1133_v12  ;;  %2176 = vperm.xlu1 %3048, %v2010_v48  }
  0xc1   :  { %v1638_v19 = vadd.f32 %v1637_v8, %v1469_v11  ;;  %1172 = vmatmul.bf16.gmra.mxu0 %v701_v9  ;;  %v245_v11 = vunpack.c.0.s8 %v3388_v3 }
  0xc2   :  { %1341 = vmatmul.bf16.gmra.mxu1 %v702_v10 }
  0xc3   :  { %v2372_v22 = vmul.f32 %v2067_v17, %v1638_v19  ;;  %1510 = vmatmul.bf16.gmra.mxu2 %v703_v14  ;;  %v249_v14 = vunpack.c.1.s8 %v3388_v3  ;;  %v247_v17 = vunpack.c.0.s8 %v3398_v6 }
  0xc4   :  { %1679 = vmatmul.bf16.gmra.mxu3 %v704_v15  ;;  %v246_v15 = vunpack.c.0.s8 %v3393_v5 }
  0xc5   :  { %v2500_v25 = vadd.f32 %v2436_v21, %v2372_v22  ;;  %v251_v21 = vunpack.c.1.s8 %v3398_v6  ;;  %v248_v22 = vunpack.c.0.s8 %v3403_v7  ;;  %v505_v27 = vcvt.s32.f32 %v249_v14 }
  0xc6   :  { %v1471_v28 = vpop.f32.mrf.mxu2  ;;  %v1135_v35 = vpop.f32.mrf.mxu0  ;;  %v503_v30 = vcvt.s32.f32 %v247_v17 }
  0xc7   :  { %v1640_v29 = vpop.f32.mrf.mxu3  ;;  %v2863_v34 = vpack.c.bf16 %v2500_v25, %v2499_v23  ;;  %v1304_v36 = vpop.f32.mrf.mxu1  ;;  %v1472_v37 = vadd.f32 %v1471_v28, %v1303_v24  ;;  %v252_v23 = vunpack.c.1.s8 %v3403_v7  ;;  %v2009_v24 = vld [vmem:[%s4134_s2 + $0xc0] sm:$0xff]  ;;  %v502_v28 = vcvt.s32.f32 %v246_v15 }
  0xc8   :  { %v1305_v41 = vadd.f32 %v1304_v36, %v1135_v35  ;;  %2171 = vperm.xlu0 %3047, %v2009_v24   ;;  %v507_v31 = vcvt.s32.f32 %v251_v21  ;;  %v504_v32 = vcvt.s32.f32 %v248_v22  ;;  %v2082_v36 = vpop.permute.xlu0 %2081  ;;  %v2092_v17 = vpop.permute.xlu2 %2091 }
  0xc9   :  { %3015 = vst [vmem:[%s4136_s4 + $0x8] sm:$0xff] %v2863_v34   ;;  %v1641_v51 = vadd.f32 %v1640_v29, %v1472_v37  ;;  %v506_v29 = vcvt.s32.f32 %v250_v16  ;;  %v508_v33 = vcvt.s32.f32 %v252_v23 }
  0xca   :  { %v711_v46 = vpack.c.bf16 %v507_v31, %v503_v30  ;;  %v2441_v31 = vld [vmem:[%s4135_s3 + $0x40] sm:$0xff] }
  0xcb   :  { %v2373_v63 = vmul.f32 %v2072_v26, %v1641_v51  ;;  %v501_v26 = vcvt.s32.f32 %v245_v11  ;;  %v710_v44 = vpack.c.bf16 %v506_v29, %v502_v28  ;;  %v712_v47 = vpack.c.bf16 %v508_v33, %v504_v32  ;;  %v2439_v51 = vld [vmem:[%s4135_s3 + $0x30] sm:$0xff]  ;;  %v2442_v32 = vld [vmem:[%s4135_s3 + $0x48] sm:$0xff]  ;;  %v3454_v33 = vld [vmem:[%s4133_s0 + $0xe0] sm:$0xff] }
  0xcd   :  { %v2501_v8 = vadd.f32 %v2437_v1, %v2373_v63  ;;  %v709_v43 = vpack.c.bf16 %v505_v27, %v501_v26  ;;  %v2012_v27 = vld [vmem:[%s4134_s2 + $0xd8] sm:$0xff] }
  0xce   :  { %v1473_v52 = vpop.f32.mrf.mxu2  ;;  %v1138_v57 = vpop.f32.mrf.mxu0 }
  0xcf   :  { %v1642_v53 = vpop.f32.mrf.mxu3  ;;  %v1474_v56 = vadd.f32 %v1473_v52, %v1305_v41  ;;  %v1307_v58 = vpop.f32.mrf.mxu1  ;;  %v2440_v41 = vld [vmem:[%s4135_s3 + $0x38] sm:$0xff] }
  0xd0   :  { %v1308_v9 = vadd.f32 %v1307_v58, %v1138_v57  ;;  %v2097_v28 = vpop.permute.xlu0 %2096  ;;  %2186 = vperm.xlu0 %3047, %v2012_v27  }
  0xd1   :  { %v1643_v0 = vadd.f32 %v1642_v53, %v1474_v56  ;;  %1177 = vmatmul.bf16.gmra.mxu0 %v705_v54  ;;  %v253_v56 = vunpack.c.2.s8 %v3388_v3 }
  0xd2   :  { %1346 = vmatmul.bf16.gmra.mxu1 %v706_v55 }
  0xd3   :  { %v2374_v4 = vmul.f32 %v2077_v62, %v1643_v0  ;;  %1515 = vmatmul.bf16.gmra.mxu2 %v707_v59  ;;  %v257_v59 = vunpack.c.3.s8 %v3388_v3  ;;  %v255_v62 = vunpack.c.2.s8 %v3398_v6 }
  0xd4   :  { %1684 = vmatmul.bf16.gmra.mxu3 %v708_v60  ;;  %v254_v60 = vunpack.c.2.s8 %v3393_v5  ;;  %v509_v5 = vcvt.s32.f32 %v253_v56 }
  0xd5   :  { %v2502_v10 = vadd.f32 %v2438_v2, %v2374_v4  ;;  %v259_v2 = vunpack.c.3.s8 %v3398_v6  ;;  %v256_v4 = vunpack.c.2.s8 %v3403_v7 }
  0xd6   :  { %v1476_v12 = vpop.f32.mrf.mxu2  ;;  %v1140_v19 = vpop.f32.mrf.mxu0  ;;  %v510_v11 = vcvt.s32.f32 %v254_v60 }
  0xd7   :  { %v1645_v13 = vpop.f32.mrf.mxu3  ;;  %v2868_v18 = vpack.c.bf16 %v2502_v10, %v2501_v8  ;;  %v1309_v20 = vpop.f32.mrf.mxu1  ;;  %v1477_v25 = vadd.f32 %v1476_v12, %v1308_v9  ;;  %v260_v8 = vunpack.c.3.s8 %v3403_v7  ;;  %v2008_v9 = vld [vmem:[%s4134_s2 + $0xb8] sm:$0xff]  ;;  %v513_v10 = vcvt.s32.f32 %v257_v59 }
  0xd8   :  { %v1310_v35 = vadd.f32 %v1309_v20, %v1140_v19  ;;  %2166 = vperm.xlu2 %3049, %v2008_v9   ;;  %v514_v12 = vcvt.s32.f32 %v258_v61  ;;  %v515_v6 = vcvt.s32.f32 %v259_v2  ;;  %v512_v14 = vcvt.s32.f32 %v256_v4  ;;  %v2102_v2 = vpop.permute.xlu1 %2101 }
  0xd9   :  { %3016 = vst [vmem:[%s4136_s4 + $0x10] sm:$0xff] %v2868_v18   ;;  %v1646_v34 = vadd.f32 %v1645_v13, %v1477_v25  ;;  %v511_v13 = vcvt.s32.f32 %v255_v62  ;;  %v516_v15 = vcvt.s32.f32 %v260_v8  ;;  %v713_v20 = vpack.c.bf16 %v513_v10, %v509_v5 }
  0xda   :  { %v714_v21 = vpack.c.bf16 %v514_v12, %v510_v11 }
  0xdb   :  { %v2375_v49 = vmul.f32 %v2082_v36, %v1646_v34  ;;  %v715_v25 = vpack.c.bf16 %v515_v6, %v511_v13  ;;  %v716_v26 = vpack.c.bf16 %v516_v15, %v512_v14  ;;  %v3464_v36 = vld [vmem:[%s4133_s0 + $0xf0] sm:$0xff]  ;;  %v2107_v14 = vpop.permute.xlu2 %2106 }
  0xdc   :  { %v2011_v6 = vld [vmem:[%s4134_s2 + $0xd0] sm:$0xff] }
  0xdd   :  { %v2503_v53 = vadd.f32 %v2439_v51, %v2375_v49 }
  0xde   :  { %v1478_v38 = vpop.f32.mrf.mxu2  ;;  %v1143_v39 = vpop.f32.mrf.mxu0 }
  0xdf   :  { %v1647_v42 = vpop.f32.mrf.mxu3  ;;  %v1479_v37 = vadd.f32 %v1478_v38, %v1310_v35  ;;  %v1312_v45 = vpop.f32.mrf.mxu1  ;;  %v3459_v35 = vld [vmem:[%s4133_s0 + $0xe8] sm:$0xff]  ;;  %v3469_v38 = vld [vmem:[%s4133_s0 + $0xf8] sm:$0xff] }
  0xe0   :  { %v1313_v54 = vadd.f32 %v1312_v45, %v1143_v39  ;;  %v266_v48 = vunpack.c.1.s8 %v3459_v35  ;;  %2181 = vperm.xlu2 %3049, %v2011_v6   ;;  %v274_v27 = vunpack.c.3.s8 %v3459_v35 }
  0xe1   :  { %v1648_v50 = vadd.f32 %v1647_v42, %v1479_v37  ;;  %1182 = vmatmul.bf16.gmra.mxu0 %v709_v43  ;;  %v261_v37 = vunpack.c.0.s8 %v3454_v33 }
  0xe2   :  { %1351 = vmatmul.bf16.gmra.mxu1 %v710_v44  ;;  %v522_v59 = vcvt.s32.f32 %v266_v48 }
  0xe3   :  { %v2376_v52 = vmul.f32 %v2087_v40, %v1648_v50  ;;  %1520 = vmatmul.bf16.gmra.mxu2 %v711_v46  ;;  %v265_v46 = vunpack.c.1.s8 %v3454_v33  ;;  %v263_v40 = vunpack.c.0.s8 %v3464_v36  ;;  %v517_v56 = vcvt.s32.f32 %v261_v37 }
  0xe4   :  { %1689 = vmatmul.bf16.gmra.mxu3 %v712_v47  ;;  %v262_v47 = vunpack.c.0.s8 %v3459_v35 }
  0xe5   :  { %v2504_v55 = vadd.f32 %v2440_v41, %v2376_v52  ;;  %v267_v41 = vunpack.c.1.s8 %v3464_v36  ;;  %v264_v52 = vunpack.c.0.s8 %v3469_v38  ;;  %v519_v60 = vcvt.s32.f32 %v263_v40  ;;  %v2112_v40 = vpop.permute.xlu0 %2111 }
  0xe6   :  { %v1481_v57 = vpop.f32.mrf.mxu2  ;;  %v1145_v0 = vpop.f32.mrf.mxu0 }
  0xe7   :  { %v1650_v58 = vpop.f32.mrf.mxu3  ;;  %v2873_v63 = vpack.c.bf16 %v2504_v55, %v2503_v53  ;;  %v1314_v1 = vpop.f32.mrf.mxu1  ;;  %v1482_v3 = vadd.f32 %v1481_v57, %v1313_v54  ;;  %v268_v53 = vunpack.c.1.s8 %v3469_v38  ;;  %v2013_v54 = vld [vmem:[%s4134_s2 + $0xe0] sm:$0xff]  ;;  %v521_v57 = vcvt.s32.f32 %v265_v46 }
  0xe8   :  { %v1315_v7 = vadd.f32 %v1314_v1, %v1145_v0  ;;  %2191 = vperm.xlu1 %3048, %v2013_v54   ;;  %v523_v61 = vcvt.s32.f32 %v267_v41  ;;  %v520_v62 = vcvt.s32.f32 %v264_v52 }
  0xe9   :  { %3017 = vst [vmem:[%s4136_s4 + $0x18] sm:$0xff] %v2873_v63   ;;  %v1651_v16 = vadd.f32 %v1650_v58, %v1482_v3  ;;  %v518_v58 = vcvt.s32.f32 %v262_v47  ;;  %v524_v63 = vcvt.s32.f32 %v268_v53  ;;  %v717_v9 = vpack.c.bf16 %v521_v57, %v517_v56  ;;  %v2016_v57 = vld [vmem:[%s4134_s2 + $0xf8] sm:$0xff] }
  0xea   :  { %v719_v12 = vpack.c.bf16 %v523_v61, %v519_v60  ;;  %v2445_v61 = vld [vmem:[%s4135_s3 + $0x60] sm:$0xff] }
  0xeb   :  { %v2377_v29 = vmul.f32 %v2092_v17, %v1651_v16  ;;  %v718_v3 = vpack.c.bf16 %v522_v59, %v518_v58  ;;  %v720_v13 = vpack.c.bf16 %v524_v63, %v520_v62  ;;  %v2444_v17 = vld [vmem:[%s4135_s3 + $0x58] sm:$0xff]  ;;  %v2117_v58 = vpop.permute.xlu1 %2116  ;;  %v2446_v62 = vld [vmem:[%s4135_s3 + $0x68] sm:$0xff]  ;;  %v3520_v63 = vld [vmem:[%s4133_s0 + $0x100] sm:$0xff] }
  0xed   :  { %v2505_v42 = vadd.f32 %v2441_v31, %v2377_v29 }
  0xee   :  { %v1483_v18 = vpop.f32.mrf.mxu2  ;;  %v1148_v23 = vpop.f32.mrf.mxu0 }
  0xef   :  { %v1652_v19 = vpop.f32.mrf.mxu3  ;;  %v1484_v22 = vadd.f32 %v1483_v18, %v1315_v7  ;;  %v1317_v24 = vpop.f32.mrf.mxu1  ;;  %v2443_v7 = vld [vmem:[%s4135_s3 + $0x50] sm:$0xff] }
  0xf0   :  { %v1318_v43 = vadd.f32 %v1317_v24, %v1148_v23  ;;  %2206 = vperm.xlu1 %3048, %v2016_v57  }
  0xf1   :  { %v1653_v30 = vadd.f32 %v1652_v19, %v1484_v22  ;;  %1187 = vmatmul.bf16.gmra.mxu0 %v713_v20  ;;  %v269_v22 = vunpack.c.2.s8 %v3454_v33 }
  0xf2   :  { %1356 = vmatmul.bf16.gmra.mxu1 %v714_v21 }
  0xf3   :  { %v2378_v34 = vmul.f32 %v2097_v28, %v1653_v30  ;;  %1525 = vmatmul.bf16.gmra.mxu2 %v715_v25  ;;  %v273_v25 = vunpack.c.3.s8 %v3454_v33  ;;  %v271_v28 = vunpack.c.2.s8 %v3464_v36 }
  0xf4   :  { %1694 = vmatmul.bf16.gmra.mxu3 %v716_v26  ;;  %v270_v26 = vunpack.c.2.s8 %v3459_v35  ;;  %v525_v35 = vcvt.s32.f32 %v269_v22 }
  0xf5   :  { %v2506_v44 = vadd.f32 %v2442_v32, %v2378_v34  ;;  %v275_v32 = vunpack.c.3.s8 %v3464_v36  ;;  %v272_v34 = vunpack.c.2.s8 %v3469_v38 }
  0xf6   :  { %v1486_v39 = vpop.f32.mrf.mxu2  ;;  %v1150_v50 = vpop.f32.mrf.mxu0  ;;  %v526_v37 = vcvt.s32.f32 %v270_v26 }
  0xf7   :  { %v1655_v45 = vpop.f32.mrf.mxu3  ;;  %v2878_v49 = vpack.c.bf16 %v2506_v44, %v2505_v42  ;;  %v1319_v51 = vpop.f32.mrf.mxu1  ;;  %v1487_v55 = vadd.f32 %v1486_v39, %v1318_v43  ;;  %v276_v42 = vunpack.c.3.s8 %v3469_v38  ;;  %v2015_v43 = vld [vmem:[%s4134_s2 + $0xf0] sm:$0xff]  ;;  %v529_v44 = vcvt.s32.f32 %v273_v25 }
  0xf8   :  { %v1320_v1 = vadd.f32 %v1319_v51, %v1150_v50  ;;  %2201 = vperm.xlu0 %3047, %v2015_v43   ;;  %v530_v39 = vcvt.s32.f32 %v274_v27  ;;  %v531_v36 = vcvt.s32.f32 %v275_v32  ;;  %v528_v46 = vcvt.s32.f32 %v272_v34  ;;  %v2122_v34 = vpop.permute.xlu2 %2121 }
  0xf9   :  { %3018 = vst [vmem:[%s4136_s4 + $0x20] sm:$0xff] %v2878_v49   ;;  %v1656_v0 = vadd.f32 %v1655_v45, %v1487_v55  ;;  %v527_v45 = vcvt.s32.f32 %v271_v28  ;;  %v532_v47 = vcvt.s32.f32 %v276_v42  ;;  %v721_v51 = vpack.c.bf16 %v529_v44, %v525_v35 }
  0xfa   :  { %v722_v41 = vpack.c.bf16 %v530_v39, %v526_v37 }
  0xfb   :  { %v2379_v15 = vmul.f32 %v2102_v2, %v1656_v0  ;;  %v723_v55 = vpack.c.bf16 %v531_v36, %v527_v45  ;;  %v724_v56 = vpack.c.bf16 %v532_v47, %v528_v46  ;;  %v3530_v2 = vld [vmem:[%s4133_s0 + $0x110] sm:$0xff]  ;;  %v2021_v46 = vld [vmem:[%s4134_s2 + $0x120] sm:$0xff]  ;;  %v2127_v47 = vpop.permute.xlu0 %2126 }
  0xfd   :  { %v2507_v19 = vadd.f32 %v2443_v7, %v2379_v15 }
  0xfe   :  { %v1488_v4 = vpop.f32.mrf.mxu2  ;;  %v1153_v10 = vpop.f32.mrf.mxu0 }
  0xff   :  { %v1657_v8 = vpop.f32.mrf.mxu3  ;;  %v1489_v5 = vadd.f32 %v1488_v4, %v1320_v1  ;;  %v1322_v11 = vpop.f32.mrf.mxu1  ;;  %v3525_v1 = vld [vmem:[%s4133_s0 + $0x108] sm:$0xff]  ;;  %v3535_v4 = vld [vmem:[%s4133_s0 + $0x118] sm:$0xff] }
 0x100   :  { %v1323_v20 = vadd.f32 %v1322_v11, %v1153_v10  ;;  %v282_v6 = vunpack.c.1.s8 %v3525_v1  ;;  %v286_v57 = vunpack.c.2.s8 %v3525_v1 }
 0x101   :  { %v1658_v16 = vadd.f32 %v1657_v8, %v1489_v5  ;;  %1192 = vmatmul.bf16.gmra.mxu0 %v717_v9  ;;  %v277_v5 = vunpack.c.0.s8 %v3520_v63 }
 0x102   :  { %1361 = vmatmul.bf16.gmra.mxu1 %v718_v3  ;;  %v538_v26 = vcvt.s32.f32 %v282_v6 }
 0x103   :  { %v2380_v18 = vmul.f32 %v2107_v14, %v1658_v16  ;;  %1530 = vmatmul.bf16.gmra.mxu2 %v719_v12  ;;  %v281_v12 = vunpack.c.1.s8 %v3520_v63  ;;  %v279_v14 = vunpack.c.0.s8 %v3530_v2 }
 0x104   :  { %1699 = vmatmul.bf16.gmra.mxu3 %v720_v13  ;;  %v278_v13 = vunpack.c.0.s8 %v3525_v1 }
 0x105   :  { %v2508_v21 = vadd.f32 %v2444_v17, %v2380_v18  ;;  %v283_v17 = vunpack.c.1.s8 %v3530_v2  ;;  %v280_v18 = vunpack.c.0.s8 %v3535_v4  ;;  %v535_v27 = vcvt.s32.f32 %v279_v14 }
 0x106   :  { %v1491_v23 = vpop.f32.mrf.mxu2  ;;  %v1155_v30 = vpop.f32.mrf.mxu0  ;;  %v534_v25 = vcvt.s32.f32 %v278_v13 }
 0x107   :  { %v1660_v24 = vpop.f32.mrf.mxu3  ;;  %v2883_v29 = vpack.c.bf16 %v2508_v21, %v2507_v19  ;;  %v1324_v31 = vpop.f32.mrf.mxu1  ;;  %v1492_v33 = vadd.f32 %v1491_v23, %v1323_v20  ;;  %v284_v19 = vunpack.c.1.s8 %v3535_v4  ;;  %v2014_v20 = vld [vmem:[%s4134_s2 + $0xe8] sm:$0xff]  ;;  %v533_v23 = vcvt.s32.f32 %v277_v5 }
 0x108   :  { %v1325_v38 = vadd.f32 %v1324_v31, %v1155_v30  ;;  %v2018_v21 = vld [vmem:[%s4134_s2 + $0x108] sm:$0xff]  ;;  %2196 = vperm.xlu2 %3049, %v2014_v20   ;;  %v539_v28 = vcvt.s32.f32 %v283_v17  ;;  %v726_v35 = vpack.c.bf16 %v538_v26, %v534_v25  ;;  %v2017_v25 = vld [vmem:[%s4134_s2 + $0x100] sm:$0xff] }
 0x109   :  { %3019 = vst [vmem:[%s4136_s4 + $0x28] sm:$0xff] %v2883_v29   ;;  %v1661_v48 = vadd.f32 %v1660_v24, %v1492_v33  ;;  %2216 = vperm.xlu0 %3047, %v2018_v21   ;;  %v537_v24 = vcvt.s32.f32 %v281_v12  ;;  %v536_v29 = vcvt.s32.f32 %v280_v18  ;;  %v540_v30 = vcvt.s32.f32 %v284_v19  ;;  %v2022_v26 = vld [vmem:[%s4134_s2 + $0x128] sm:$0xff] }
 0x10a   :  { %v727_v45 = vpack.c.bf16 %v539_v28, %v535_v27  ;;  %v2027_v27 = vld [vmem:[%s4134_s2 + $0x150] sm:$0xff]  ;;  %v2137_v28 = vpop.permute.xlu2 %2136 }
 0x10b   :  { %v2381_v59 = vmul.f32 %v2112_v40, %v1661_v48  ;;  %v725_v33 = vpack.c.bf16 %v537_v24, %v533_v23  ;;  %v728_v36 = vpack.c.bf16 %v540_v30, %v536_v29  ;;  %v2447_v40 = vld [vmem:[%s4135_s3 + $0x70] sm:$0xff] }
 0x10d   :  { %v2509_v8 = vadd.f32 %v2445_v61, %v2381_v59  ;;  %v287_v59 = vunpack.c.2.s8 %v3530_v2 }
 0x10e   :  { %v1493_v49 = vpop.f32.mrf.mxu2  ;;  %v1158_v53 = vpop.f32.mrf.mxu0 }
 0x10f   :  { %v1662_v50 = vpop.f32.mrf.mxu3  ;;  %v1494_v52 = vadd.f32 %v1493_v49, %v1325_v38  ;;  %v1327_v54 = vpop.f32.mrf.mxu1  ;;  %v2448_v49 = vld [vmem:[%s4135_s3 + $0x78] sm:$0xff] }
 0x110   :  { %v1328_v9 = vadd.f32 %v1327_v54, %v1158_v53  ;;  %v285_v53 = vunpack.c.2.s8 %v3520_v63  ;;  %2211 = vperm.xlu2 %3049, %v2017_v25  }
 0x111   :  { %v1663_v60 = vadd.f32 %v1662_v50, %v1494_v52  ;;  %1197 = vmatmul.bf16.gmra.mxu0 %v721_v51  ;;  %2231 = vperm.xlu0 %3047, %v2021_v46  }
 0x112   :  { %1366 = vmatmul.bf16.gmra.mxu1 %v722_v41 }
 0x113   :  { %v2382_v0 = vmul.f32 %v2117_v58, %v1663_v60  ;;  %1535 = vmatmul.bf16.gmra.mxu2 %v723_v55  ;;  %v290_v58 = vunpack.c.3.s8 %v3525_v1 }
 0x114   :  { %1704 = vmatmul.bf16.gmra.mxu3 %v724_v56  ;;  %v289_v56 = vunpack.c.3.s8 %v3520_v63  ;;  %v2024_v63 = vld [vmem:[%s4134_s2 + $0x138] sm:$0xff] }
 0x115   :  { %v2510_v3 = vadd.f32 %v2446_v62, %v2382_v0  ;;  %v291_v0 = vunpack.c.3.s8 %v3530_v2  ;;  %v541_v2 = vcvt.s32.f32 %v285_v53 }
 0x116   :  { %v1496_v10 = vpop.f32.mrf.mxu2  ;;  %v1160_v16 = vpop.f32.mrf.mxu0  ;;  %v545_v5 = vcvt.s32.f32 %v289_v56 }
 0x117   :  { %v1665_v11 = vpop.f32.mrf.mxu3  ;;  %v2888_v15 = vpack.c.bf16 %v2510_v3, %v2509_v8  ;;  %v1329_v7 = vpop.f32.mrf.mxu1  ;;  %v1497_v22 = vadd.f32 %v1496_v10, %v1328_v9  ;;  %v288_v8 = vunpack.c.2.s8 %v3535_v4  ;;  %v292_v9 = vunpack.c.3.s8 %v3535_v4  ;;  %v2019_v3 = vld [vmem:[%s4134_s2 + $0x110] sm:$0xff] }
 0x118   :  { %v1330_v32 = vadd.f32 %v1329_v7, %v1160_v16  ;;  %2221 = vperm.xlu1 %3048, %v2019_v3   ;;  %v542_v10 = vcvt.s32.f32 %v286_v57  ;;  %v543_v4 = vcvt.s32.f32 %v287_v59  ;;  %v547_v12 = vcvt.s32.f32 %v291_v0  ;;  %v2132_v16 = vpop.permute.xlu1 %2131 }
 0x119   :  { %3020 = vst [vmem:[%s4136_s4 + $0x30] sm:$0xff] %v2888_v15   ;;  %v1666_v31 = vadd.f32 %v1665_v11, %v1497_v22  ;;  %2246 = vperm.xlu0 %3047, %v2024_v63   ;;  %v546_v11 = vcvt.s32.f32 %v290_v58  ;;  %v544_v13 = vcvt.s32.f32 %v288_v8  ;;  %v548_v6 = vcvt.s32.f32 %v292_v9  ;;  %v2142_v63 = vpop.permute.xlu0 %2141 }
 0x11a   :  { %v729_v18 = vpack.c.bf16 %v545_v5, %v541_v2  ;;  %v731_v23 = vpack.c.bf16 %v547_v12, %v543_v4 }
 0x11b   :  { %v2383_v48 = vmul.f32 %v2122_v34, %v1666_v31  ;;  %v730_v19 = vpack.c.bf16 %v546_v11, %v542_v10  ;;  %v732_v24 = vpack.c.bf16 %v548_v6, %v544_v13  ;;  %v2449_v31 = vld [vmem:[%s4135_s3 + $0x80] sm:$0xff] }
 0x11c   :  { %v3598_v34 = vld [vmem:[%s4133_s0 + $0x120] sm:$0xff] }
 0x11d   :  { %v2511_v51 = vadd.f32 %v2447_v40, %v2383_v48  ;;  %v301_v25 = vunpack.c.2.s8 %v3598_v34 }
 0x11e   :  { %v1498_v42 = vpop.f32.mrf.mxu2  ;;  %v1163_v37 = vpop.f32.mrf.mxu0 }
 0x11f   :  { %v1667_v43 = vpop.f32.mrf.mxu3  ;;  %v1499_v44 = vadd.f32 %v1498_v42, %v1330_v32  ;;  %v1332_v39 = vpop.f32.mrf.mxu1  ;;  %v2450_v32 = vld [vmem:[%s4135_s3 + $0x88] sm:$0xff] }
 0x120   :  { %v1333_v41 = vadd.f32 %v1332_v39, %v1163_v37  ;;  %2236 = vperm.xlu1 %3048, %v2022_v26  }
 0x121   :  { %v1668_v38 = vadd.f32 %v1667_v43, %v1499_v44  ;;  %1202 = vmatmul.bf16.gmra.mxu0 %v725_v33  ;;  %2261 = vperm.xlu0 %3047, %v2027_v27   ;;  %v3603_v43 = vld [vmem:[%s4133_s0 + $0x128] sm:$0xff]  ;;  %v3608_v33 = vld [vmem:[%s4133_s0 + $0x130] sm:$0xff] }
 0x122   :  { %1371 = vmatmul.bf16.gmra.mxu1 %v726_v35  ;;  %v3613_v35 = vld [vmem:[%s4133_s0 + $0x138] sm:$0xff]  ;;  %v294_v48 = vunpack.c.0.s8 %v3603_v43  ;;  %v295_v40 = vunpack.c.0.s8 %v3608_v33 }
 0x123   :  { %v2384_v50 = vmul.f32 %v2127_v47, %v1668_v38  ;;  %1540 = vmatmul.bf16.gmra.mxu2 %v727_v45  ;;  %v293_v45 = vunpack.c.0.s8 %v3598_v34  ;;  %v297_v47 = vunpack.c.1.s8 %v3598_v34  ;;  %v298_v38 = vunpack.c.1.s8 %v3603_v43 }
 0x124   :  { %1709 = vmatmul.bf16.gmra.mxu3 %v728_v36  ;;  %v300_v53 = vunpack.c.1.s8 %v3613_v35  ;;  %v550_v59 = vcvt.s32.f32 %v294_v48 }
 0x125   :  { %v2512_v52 = vadd.f32 %v2448_v49, %v2384_v50  ;;  %v549_v57 = vcvt.s32.f32 %v293_v45  ;;  %v553_v58 = vcvt.s32.f32 %v297_v47  ;;  %v308_v45 = vunpack.c.3.s8 %v3613_v35 }
 0x126   :  { %v1501_v54 = vpop.f32.mrf.mxu2  ;;  %v1165_v61 = vpop.f32.mrf.mxu0  ;;  %v556_v8 = vcvt.s32.f32 %v300_v53 }
 0x127   :  { %v1670_v55 = vpop.f32.mrf.mxu3  ;;  %v2893_v60 = vpack.c.bf16 %v2512_v52, %v2511_v51  ;;  %v1334_v62 = vpop.f32.mrf.mxu1  ;;  %v1502_v1 = vadd.f32 %v1501_v54, %v1333_v41  ;;  %v299_v41 = vunpack.c.1.s8 %v3608_v33  ;;  %v296_v52 = vunpack.c.0.s8 %v3613_v35  ;;  %v2025_v54 = vld [vmem:[%s4134_s2 + $0x140] sm:$0xff] }
 0x128   :  { %v1335_v15 = vadd.f32 %v1334_v62, %v1165_v61  ;;  %2251 = vperm.xlu1 %3048, %v2025_v54   ;;  %v551_v61 = vcvt.s32.f32 %v295_v40  ;;  %v733_v5 = vpack.c.bf16 %v553_v58, %v549_v57 }
 0x129   :  { %3021 = vst [vmem:[%s4136_s4 + $0x38] sm:$0xff] %v2893_v60   ;;  %v1671_v14 = vadd.f32 %v1670_v55, %v1502_v1  ;;  %v2030_v55 = vld [vmem:[%s4134_s2 + $0x168] sm:$0xff]  ;;  %v554_v60 = vcvt.s32.f32 %v298_v38  ;;  %v555_v62 = vcvt.s32.f32 %v299_v41  ;;  %v552_v0 = vcvt.s32.f32 %v296_v52  ;;  %v2152_v52 = vpop.permute.xlu2 %2151 }
 0x12a   :  { %2276 = vperm.xlu0 %3047, %v2030_v55  }
 0x12b   :  { %v2385_v29 = vmul.f32 %v2132_v16, %v1671_v14  ;;  %v734_v10 = vpack.c.bf16 %v554_v60, %v550_v59  ;;  %v735_v13 = vpack.c.bf16 %v555_v62, %v551_v61  ;;  %v736_v6 = vpack.c.bf16 %v556_v8, %v552_v0  ;;  %v2020_v14 = vld [vmem:[%s4134_s2 + $0x118] sm:$0xff]  ;;  %v2033_v16 = vld [vmem:[%s4134_s2 + $0x180] sm:$0xff]  ;;  %v2026_v62 = vld [vmem:[%s4134_s2 + $0x148] sm:$0xff] }
 0x12c   :  { %2226 = vperm.xlu2 %3049, %v2020_v14   ;;  %v2034_v0 = vld [vmem:[%s4134_s2 + $0x188] sm:$0xff]  ;;  %v2039_v8 = vld [vmem:[%s4134_s2 + $0x1b0] sm:$0xff] }
 0x12d   :  { %v2513_v44 = vadd.f32 %v2449_v31, %v2385_v29  ;;  %v302_v29 = vunpack.c.2.s8 %v3603_v43  ;;  %v303_v31 = vunpack.c.2.s8 %v3608_v33 }
 0x12e   :  { %v1503_v7 = vpop.f32.mrf.mxu2  ;;  %v1168_v21 = vpop.f32.mrf.mxu0 }
 0x12f   :  { %v1672_v17 = vpop.f32.mrf.mxu3  ;;  %v1504_v20 = vadd.f32 %v1503_v7, %v1335_v15  ;;  %v1337_v22 = vpop.f32.mrf.mxu1  ;;  %v2028_v15 = vld [vmem:[%s4134_s2 + $0x158] sm:$0xff]  ;;  %v558_v47 = vcvt.s32.f32 %v302_v29  ;;  %v559_v38 = vcvt.s32.f32 %v303_v31  ;;  %v2042_v29 = vld [vmem:[%s4134_s2 + $0x1c8] sm:$0xff] }
 0x130   :  { %v1338_v37 = vadd.f32 %v1337_v22, %v1168_v21  ;;  %v2147_v7 = vpop.permute.xlu1 %2146  ;;  %2266 = vperm.xlu1 %3048, %v2028_v15  }
 0x131   :  { %v1673_v30 = vadd.f32 %v1672_v17, %v1504_v20  ;;  %1207 = vmatmul.bf16.gmra.mxu0 %v729_v18  ;;  %v2452_v20 = vld [vmem:[%s4135_s3 + $0x98] sm:$0xff] }
 0x132   :  { %1376 = vmatmul.bf16.gmra.mxu1 %v730_v19  ;;  %2291 = vperm.xlu0 %3047, %v2033_v16   ;;  %v2451_v19 = vld [vmem:[%s4135_s3 + $0x90] sm:$0xff] }
 0x133   :  { %v2386_v42 = vmul.f32 %v2137_v28, %v1673_v30  ;;  %1545 = vmatmul.bf16.gmra.mxu2 %v731_v23  ;;  %v305_v28 = vunpack.c.3.s8 %v3598_v34  ;;  %v306_v30 = vunpack.c.3.s8 %v3603_v43  ;;  %v2031_v34 = vld [vmem:[%s4134_s2 + $0x170] sm:$0xff]  ;;  %v2036_v43 = vld [vmem:[%s4134_s2 + $0x198] sm:$0xff] }
 0x134   :  { %1714 = vmatmul.bf16.gmra.mxu3 %v732_v24 }
 0x135   :  { %v2514_v39 = vadd.f32 %v2450_v32, %v2386_v42  ;;  %v562_v48 = vcvt.s32.f32 %v306_v30 }
 0x136   :  { %v1506_v36 = vpop.f32.mrf.mxu2  ;;  %v1170_v50 = vpop.f32.mrf.mxu0 }
 0x137   :  { %v1675_v46 = vpop.f32.mrf.mxu3  ;;  %v2898_v49 = vpack.c.bf16 %v2514_v39, %v2513_v44  ;;  %v1339_v51 = vpop.f32.mrf.mxu1  ;;  %v1507_v56 = vadd.f32 %v1506_v36, %v1338_v37  ;;  %v307_v37 = vunpack.c.3.s8 %v3608_v33  ;;  %v304_v39 = vunpack.c.2.s8 %v3613_v35  ;;  %v2023_v36 = vld [vmem:[%s4134_s2 + $0x130] sm:$0xff] }
 0x138   :  { %v1340_v3 = vadd.f32 %v1339_v51, %v1170_v50  ;;  %2241 = vperm.xlu2 %3049, %v2023_v36   ;;  %2281 = vperm.xlu1 %3048, %v2031_v34   ;;  %v557_v35 = vcvt.s32.f32 %v301_v25  ;;  %v564_v50 = vcvt.s32.f32 %v308_v45 }
 0x139   :  { %3022 = vst [vmem:[%s4136_s4 + $0x40] sm:$0xff] %v2898_v49   ;;  %v1676_v9 = vadd.f32 %v1675_v46, %v1507_v56  ;;  %v561_v46 = vcvt.s32.f32 %v305_v28  ;;  %v563_v40 = vcvt.s32.f32 %v307_v37  ;;  %v560_v49 = vcvt.s32.f32 %v304_v39  ;;  %v2037_v28 = vld [vmem:[%s4134_s2 + $0x1a0] sm:$0xff] }
 0x13a   :  { %2306 = vperm.xlu0 %3047, %v2036_v43   ;;  %v738_v56 = vpack.c.bf16 %v562_v48, %v558_v47 }
 0x13b   :  { %v2387_v17 = vmul.f32 %v2142_v63, %v1676_v9  ;;  %v737_v55 = vpack.c.bf16 %v561_v46, %v557_v35  ;;  %v739_v60 = vpack.c.bf16 %v563_v40, %v559_v38  ;;  %v740_v61 = vpack.c.bf16 %v564_v50, %v560_v49  ;;  %v2157_v9 = vpop.permute.xlu0 %2156 }
 0x13d   :  { %v2515_v22 = vadd.f32 %v2451_v19, %v2387_v17 }
 0x13e   :  { %v1508_v1 = vpop.f32.mrf.mxu2  ;;  %v1173_v4 = vpop.f32.mrf.mxu0 }
 0x13f   :  { %v1677_v2 = vpop.f32.mrf.mxu3  ;;  %v1509_v11 = vadd.f32 %v1508_v1, %v1340_v3  ;;  %v1342_v12 = vpop.f32.mrf.mxu1  ;;  %v2453_v1 = vld [vmem:[%s4135_s3 + $0xa0] sm:$0xff] }
 0x140   :  { %v1343_v23 = vadd.f32 %v1342_v12, %v1173_v4  ;;  %2256 = vperm.xlu2 %3049, %v2026_v62   ;;  %2296 = vperm.xlu1 %3048, %v2034_v0   ;;  %v3695_v4 = vld [vmem:[%s4133_s0 + $0x150] sm:$0xff]  ;;  %v3700_v12 = vld [vmem:[%s4133_s0 + $0x158] sm:$0xff] }
 0x141   :  { %v1678_v18 = vadd.f32 %v1677_v2, %v1509_v11  ;;  %1212 = vmatmul.bf16.gmra.mxu0 %v733_v5  ;;  %v2454_v2 = vld [vmem:[%s4135_s3 + $0xa8] sm:$0xff]  ;;  %v3685_v5 = vld [vmem:[%s4133_s0 + $0x140] sm:$0xff]  ;;  %v312_v25 = vunpack.c.0.s8 %v3700_v12 }
 0x142   :  { %1381 = vmatmul.bf16.gmra.mxu1 %v734_v10  ;;  %2321 = vperm.xlu0 %3047, %v2039_v8   ;;  %v3690_v11 = vld [vmem:[%s4133_s0 + $0x148] sm:$0xff]  ;;  %v309_v15 = vunpack.c.0.s8 %v3685_v5  ;;  %v313_v17 = vunpack.c.1.s8 %v3685_v5  ;;  %v317_v0 = vunpack.c.2.s8 %v3685_v5 }
 0x143   :  { %v2388_v21 = vmul.f32 %v2147_v7, %v1678_v18  ;;  %1550 = vmatmul.bf16.gmra.mxu2 %v735_v13  ;;  %v310_v18 = vunpack.c.0.s8 %v3690_v11  ;;  %v314_v19 = vunpack.c.1.s8 %v3690_v11  ;;  %v568_v45 = vcvt.s32.f32 %v312_v25 }
 0x144   :  { %1719 = vmatmul.bf16.gmra.mxu3 %v736_v6  ;;  %v565_v31 = vcvt.s32.f32 %v309_v15  ;;  %v320_v15 = vunpack.c.2.s8 %v3700_v12 }
 0x145   :  { %v2516_v24 = vadd.f32 %v2452_v20, %v2388_v21  ;;  %v311_v20 = vunpack.c.0.s8 %v3695_v4 }
 0x146   :  { %v1511_v26 = vpop.f32.mrf.mxu2  ;;  %v1175_v42 = vpop.f32.mrf.mxu0 }
 0x147   :  { %v1680_v27 = vpop.f32.mrf.mxu3  ;;  %v2903_v32 = vpack.c.bf16 %v2516_v24, %v2515_v22  ;;  %v1344_v44 = vpop.f32.mrf.mxu1  ;;  %v1512_v33 = vadd.f32 %v1511_v26, %v1343_v23  ;;  %v315_v24 = vunpack.c.1.s8 %v3695_v4  ;;  %v316_v26 = vunpack.c.1.s8 %v3700_v12 }
 0x148   :  { %v1345_v41 = vadd.f32 %v1344_v44, %v1175_v42  ;;  %2311 = vperm.xlu1 %3048, %v2037_v28   ;;  %v566_v42 = vcvt.s32.f32 %v310_v18  ;;  %v570_v44 = vcvt.s32.f32 %v314_v19  ;;  %v567_v37 = vcvt.s32.f32 %v311_v20 }
 0x149   :  { %3023 = vst [vmem:[%s4136_s4 + $0x48] sm:$0xff] %v2903_v32   ;;  %v1681_v51 = vadd.f32 %v1680_v27, %v1512_v33  ;;  %v2029_v27 = vld [vmem:[%s4134_s2 + $0x160] sm:$0xff]  ;;  %v569_v32 = vcvt.s32.f32 %v313_v17  ;;  %v571_v39 = vcvt.s32.f32 %v315_v24  ;;  %v572_v36 = vcvt.s32.f32 %v316_v26  ;;  %v2162_v33 = vpop.permute.xlu1 %2161  ;;  %v2172_v26 = vpop.permute.xlu0 %2171 }
 0x14a   :  { %2271 = vperm.xlu2 %3049, %v2029_v27   ;;  %2336 = vperm.xlu0 %3047, %v2042_v29   ;;  %v742_v48 = vpack.c.bf16 %v570_v44, %v566_v42 }
 0x14b   :  { %v2389_v3 = vmul.f32 %v2152_v52, %v1681_v51  ;;  %v741_v47 = vpack.c.bf16 %v569_v32, %v565_v31  ;;  %v743_v50 = vpack.c.bf16 %v571_v39, %v567_v37  ;;  %v744_v51 = vpack.c.bf16 %v572_v36, %v568_v45  ;;  %v2040_v52 = vld [vmem:[%s4134_s2 + $0x1b8] sm:$0xff]  ;;  %v2038_v39 = vld [vmem:[%s4134_s2 + $0x1a8] sm:$0xff] }
 0x14c   :  { %v2046_v45 = vld [vmem:[%s4134_s2 + $0x1e8] sm:$0xff] }
 0x14d   :  { %v2517_v13 = vadd.f32 %v2453_v1, %v2389_v3  ;;  %v321_v3 = vunpack.c.3.s8 %v3685_v5  ;;  %v322_v1 = vunpack.c.3.s8 %v3690_v11  ;;  %v2043_v5 = vld [vmem:[%s4134_s2 + $0x1d0] sm:$0xff] }
 0x14e   :  { %v1513_v53 = vpop.f32.mrf.mxu2  ;;  %v1178_v58 = vpop.f32.mrf.mxu0 }
 0x14f   :  { %v1682_v54 = vpop.f32.mrf.mxu3  ;;  %v1514_v57 = vadd.f32 %v1513_v53, %v1345_v41  ;;  %v1347_v59 = vpop.f32.mrf.mxu1  ;;  %v2032_v41 = vld [vmem:[%s4134_s2 + $0x178] sm:$0xff]  ;;  %v2045_v53 = vld [vmem:[%s4134_s2 + $0x1e0] sm:$0xff]  ;;  %v577_v17 = vcvt.s32.f32 %v321_v3  ;;  %v578_v19 = vcvt.s32.f32 %v322_v1 }
 0x150   :  { %v1348_v6 = vadd.f32 %v1347_v59, %v1178_v58  ;;  %2326 = vperm.xlu1 %3048, %v2040_v52   ;;  %v2456_v58 = vld [vmem:[%s4135_s3 + $0xb8] sm:$0xff] }
 0x151   :  { %v1683_v63 = vadd.f32 %v1682_v54, %v1514_v57  ;;  %1217 = vmatmul.bf16.gmra.mxu0 %v737_v55  ;;  %v2167_v54 = vpop.permute.xlu2 %2166  ;;  %v2455_v57 = vld [vmem:[%s4135_s3 + $0xb0] sm:$0xff]  ;;  %v2177_v36 = vpop.permute.xlu1 %2176 }
 0x152   :  { %1386 = vmatmul.bf16.gmra.mxu1 %v738_v56  ;;  %2286 = vperm.xlu2 %3049, %v2032_v41  }
 0x153   :  { %v2390_v10 = vmul.f32 %v2157_v9, %v1683_v63  ;;  %1555 = vmatmul.bf16.gmra.mxu2 %v739_v60  ;;  %2351 = vperm.xlu0 %3047, %v2045_v53   ;;  %v318_v63 = vunpack.c.2.s8 %v3690_v11  ;;  %v2048_v11 = vld [vmem:[%s4134_s2 + $0x1f8] sm:$0xff] }
 0x154   :  { %1724 = vmatmul.bf16.gmra.mxu3 %v740_v61 }
 0x155   :  { %v2518_v14 = vadd.f32 %v2454_v2, %v2390_v10  ;;  %v319_v2 = vunpack.c.2.s8 %v3695_v4  ;;  %v574_v18 = vcvt.s32.f32 %v318_v63 }
 0x156   :  { %v1516_v16 = vpop.f32.mrf.mxu2  ;;  %v1180_v22 = vpop.f32.mrf.mxu0 }
 0x157   :  { %v1685_v7 = vpop.f32.mrf.mxu3  ;;  %v2908_v21 = vpack.c.bf16 %v2518_v14, %v2517_v13  ;;  %v1349_v23 = vpop.f32.mrf.mxu1  ;;  %v1517_v30 = vadd.f32 %v1516_v16, %v1348_v6  ;;  %v323_v14 = vunpack.c.3.s8 %v3695_v4  ;;  %v324_v16 = vunpack.c.3.s8 %v3700_v12 }
 0x158   :  { %v1350_v43 = vadd.f32 %v1349_v23, %v1180_v22  ;;  %2341 = vperm.xlu1 %3048, %v2043_v5   ;;  %v573_v12 = vcvt.s32.f32 %v317_v0  ;;  %v575_v20 = vcvt.s32.f32 %v319_v2  ;;  %v576_v22 = vcvt.s32.f32 %v320_v15 }
 0x159   :  { %3024 = vst [vmem:[%s4136_s4 + $0x50] sm:$0xff] %v2908_v21   ;;  %v1686_v34 = vadd.f32 %v1685_v7, %v1517_v30  ;;  %v2035_v7 = vld [vmem:[%s4134_s2 + $0x190] sm:$0xff]  ;;  %v579_v21 = vcvt.s32.f32 %v323_v14  ;;  %v580_v23 = vcvt.s32.f32 %v324_v16  ;;  %v746_v30 = vpack.c.bf16 %v578_v19, %v574_v18 }
 0x15a   :  { %2301 = vperm.xlu2 %3049, %v2035_v7   ;;  %v745_v29 = vpack.c.bf16 %v577_v17, %v573_v12  ;;  %v2182_v7 = vpop.permute.xlu2 %2181 }
 0x15b   :  { %v2391_v55 = vmul.f32 %v2162_v33, %v1686_v34  ;;  %2366 = vperm.xlu0 %3047, %v2048_v11   ;;  %v747_v44 = vpack.c.bf16 %v579_v21, %v575_v20  ;;  %v748_v37 = vpack.c.bf16 %v580_v23, %v576_v22  ;;  %v2457_v33 = vld [vmem:[%s4135_s3 + $0xc0] sm:$0xff]  ;;  %v2044_v22 = vld [vmem:[%s4134_s2 + $0x1d8] sm:$0xff]  ;;  %v2187_v23 = vpop.permute.xlu0 %2186 }
 0x15d   :  { %v2519_v60 = vadd.f32 %v2455_v57, %v2391_v55 }
 0x15e   :  { %v1518_v35 = vpop.f32.mrf.mxu2  ;;  %v1183_v40 = vpop.f32.mrf.mxu0 }
 0x15f   :  { %v1687_v46 = vpop.f32.mrf.mxu3  ;;  %v1519_v38 = vadd.f32 %v1518_v35, %v1350_v43  ;;  %v1352_v49 = vpop.f32.mrf.mxu1  ;;  %v2458_v35 = vld [vmem:[%s4135_s3 + $0xc8] sm:$0xff] }
 0x160   :  { %v1353_v61 = vadd.f32 %v1352_v49, %v1183_v40  ;;  %2356 = vperm.xlu1 %3048, %v2046_v45   ;;  %v3787_v40 = vld [vmem:[%s4133_s0 + $0x178] sm:$0xff] }
 0x161   :  { %v1688_v56 = vadd.f32 %v1687_v46, %v1519_v38  ;;  %1222 = vmatmul.bf16.gmra.mxu0 %v741_v47  ;;  %v3772_v46 = vld [vmem:[%s4133_s0 + $0x160] sm:$0xff]  ;;  %v3782_v38 = vld [vmem:[%s4133_s0 + $0x170] sm:$0xff]  ;;  %v332_v0 = vunpack.c.1.s8 %v3787_v40 }
 0x162   :  { %1391 = vmatmul.bf16.gmra.mxu1 %v742_v48  ;;  %2316 = vperm.xlu2 %3049, %v2038_v39   ;;  %v3777_v48 = vld [vmem:[%s4133_s0 + $0x168] sm:$0xff]  ;;  %v325_v41 = vunpack.c.0.s8 %v3772_v46  ;;  %v327_v57 = vunpack.c.0.s8 %v3782_v38 }
 0x163   :  { %v2392_v59 = vmul.f32 %v2167_v54, %v1688_v56  ;;  %1560 = vmatmul.bf16.gmra.mxu2 %v743_v50  ;;  %v329_v54 = vunpack.c.1.s8 %v3772_v46  ;;  %v326_v55 = vunpack.c.0.s8 %v3777_v48  ;;  %v330_v56 = vunpack.c.1.s8 %v3777_v48 }
 0x164   :  { %1729 = vmatmul.bf16.gmra.mxu3 %v744_v51  ;;  %v581_v3 = vcvt.s32.f32 %v325_v41  ;;  %v588_v14 = vcvt.s32.f32 %v332_v0  ;;  %v334_v39 = vunpack.c.2.s8 %v3777_v48  ;;  %v338_v45 = vunpack.c.3.s8 %v3777_v48 }
 0x165   :  { %v2520_v62 = vadd.f32 %v2456_v58, %v2392_v59  ;;  %v585_v63 = vcvt.s32.f32 %v329_v54  ;;  %v582_v1 = vcvt.s32.f32 %v326_v55  ;;  %v586_v2 = vcvt.s32.f32 %v330_v56 }
 0x166   :  { %v1521_v8 = vpop.f32.mrf.mxu2  ;;  %v1185_v13 = vpop.f32.mrf.mxu0  ;;  %v590_v41 = vcvt.s32.f32 %v334_v39 }
 0x167   :  { %v1690_v9 = vpop.f32.mrf.mxu3  ;;  %v2913_v10 = vpack.c.bf16 %v2520_v62, %v2519_v60  ;;  %v1354_v6 = vpop.f32.mrf.mxu1  ;;  %v1522_v4 = vadd.f32 %v1521_v8, %v1353_v61  ;;  %v331_v61 = vunpack.c.1.s8 %v3782_v38  ;;  %v328_v62 = vunpack.c.0.s8 %v3787_v40  ;;  %v2041_v8 = vld [vmem:[%s4134_s2 + $0x1c0] sm:$0xff] }
 0x168   :  { %v1355_v25 = vadd.f32 %v1354_v6, %v1185_v13  ;;  %v750_v12 = vpack.c.bf16 %v586_v2, %v582_v1 }
 0x169   :  { %3025 = vst [vmem:[%s4136_s4 + $0x58] sm:$0xff] %v2913_v10   ;;  %v1691_v24 = vadd.f32 %v1690_v9, %v1522_v4  ;;  %v583_v10 = vcvt.s32.f32 %v327_v57  ;;  %v587_v13 = vcvt.s32.f32 %v331_v61  ;;  %v584_v6 = vcvt.s32.f32 %v328_v62  ;;  %v2192_v57 = vpop.permute.xlu1 %2191 }
 0x16a   :  { %2331 = vperm.xlu2 %3049, %v2041_v8   ;;  %v749_v4 = vpack.c.bf16 %v585_v63, %v581_v3  ;;  %v2197_v63 = vpop.permute.xlu2 %2196 }
 0x16b   :  { %v2393_v34 = vmul.f32 %v2172_v26, %v1691_v24  ;;  %v751_v20 = vpack.c.bf16 %v587_v13, %v583_v10  ;;  %v752_v21 = vpack.c.bf16 %v588_v14, %v584_v6  ;;  %v2459_v26 = vld [vmem:[%s4135_s3 + $0xd0] sm:$0xff]  ;;  %v2461_v10 = vld [vmem:[%s4135_s3 + $0xe0] sm:$0xff]  ;;  %v2462_v13 = vld [vmem:[%s4135_s3 + $0xe8] sm:$0xff] }
 0x16c   :  { %v3835_v6 = vld [vmem:[%s4133_s0 + $0x180] sm:$0xff] }
 0x16d   :  { %v2521_v49 = vadd.f32 %v2457_v33, %v2393_v34 }
 0x16e   :  { %v1523_v27 = vpop.f32.mrf.mxu2  ;;  %v1188_v32 = vpop.f32.mrf.mxu0 }
 0x16f   :  { %v1692_v28 = vpop.f32.mrf.mxu3  ;;  %v1524_v31 = vadd.f32 %v1523_v27, %v1355_v25  ;;  %v1357_v42 = vpop.f32.mrf.mxu1  ;;  %v2460_v27 = vld [vmem:[%s4135_s3 + $0xd8] sm:$0xff] }
 0x170   :  { %v1358_v50 = vadd.f32 %v1357_v42, %v1188_v32  ;;  %v333_v32 = vunpack.c.2.s8 %v3772_v46 }
 0x171   :  { %v1693_v43 = vadd.f32 %v1692_v28, %v1524_v31  ;;  %1227 = vmatmul.bf16.gmra.mxu0 %v745_v29 }
 0x172   :  { %1396 = vmatmul.bf16.gmra.mxu1 %v746_v30  ;;  %2346 = vperm.xlu2 %3049, %v2044_v22   ;;  %v589_v48 = vcvt.s32.f32 %v333_v32 }
 0x173   :  { %v2394_v47 = vmul.f32 %v2177_v36, %v1693_v43  ;;  %1565 = vmatmul.bf16.gmra.mxu2 %v747_v44  ;;  %v335_v36 = vunpack.c.2.s8 %v3782_v38 }
 0x174   :  { %1734 = vmatmul.bf16.gmra.mxu3 %v748_v37  ;;  %v337_v37 = vunpack.c.3.s8 %v3772_v46 }
 0x175   :  { %v2522_v51 = vadd.f32 %v2458_v35, %v2394_v47  ;;  %v339_v35 = vunpack.c.3.s8 %v3782_v38  ;;  %v336_v47 = vunpack.c.2.s8 %v3787_v40 }
 0x176   :  { %v1526_v52 = vpop.f32.mrf.mxu2  ;;  %v1190_v59 = vpop.f32.mrf.mxu0 }
 0x177   :  { %v1695_v53 = vpop.f32.mrf.mxu3  ;;  %v2918_v58 = vpack.c.bf16 %v2522_v51, %v2521_v49  ;;  %v1359_v60 = vpop.f32.mrf.mxu1  ;;  %v1527_v9 = vadd.f32 %v1526_v52, %v1358_v50  ;;  %v340_v49 = vunpack.c.3.s8 %v3787_v40  ;;  %v2047_v50 = vld [vmem:[%s4134_s2 + $0x1f0] sm:$0xff]  ;;  %v593_v51 = vcvt.s32.f32 %v337_v37 }
 0x178   :  { %v1360_v16 = vadd.f32 %v1359_v60, %v1190_v59  ;;  %v594_v52 = vcvt.s32.f32 %v338_v45  ;;  %v595_v38 = vcvt.s32.f32 %v339_v35  ;;  %v592_v54 = vcvt.s32.f32 %v336_v47 }
 0x179   :  { %3026 = vst [vmem:[%s4136_s4 + $0x60] sm:$0xff] %v2918_v58   ;;  %v1696_v15 = vadd.f32 %v1695_v53, %v1527_v9  ;;  %v591_v53 = vcvt.s32.f32 %v335_v36  ;;  %v596_v55 = vcvt.s32.f32 %v340_v49  ;;  %v753_v60 = vpack.c.bf16 %v593_v51, %v589_v48 }
 0x17a   :  { %2361 = vperm.xlu2 %3049, %v2047_v50   ;;  %v754_v61 = vpack.c.bf16 %v594_v52, %v590_v41  ;;  %v2207_v52 = vpop.permute.xlu1 %2206 }
 0x17b   :  { %v2395_v24 = vmul.f32 %v2182_v7, %v1696_v15  ;;  %v755_v9 = vpack.c.bf16 %v595_v38, %v591_v53  ;;  %v756_v3 = vpack.c.bf16 %v596_v55, %v592_v54  ;;  %v3840_v15 = vld [vmem:[%s4133_s0 + $0x188] sm:$0xff]  ;;  %v3850_v7 = vld [vmem:[%s4133_s0 + $0x198] sm:$0xff]  ;;  %v2463_v54 = vld [vmem:[%s4135_s3 + $0xf0] sm:$0xff] }
 0x17c   :  { %v2464_v55 = vld [vmem:[%s4135_s3 + $0xf8] sm:$0xff] }
 0x17d   :  { %v2523_v29 = vadd.f32 %v2459_v26, %v2395_v24 }
 0x17e   :  { %v1528_v5 = vpop.f32.mrf.mxu2  ;;  %v1193_v18 = vpop.f32.mrf.mxu0 }
 0x17f   :  { %v1697_v11 = vpop.f32.mrf.mxu3  ;;  %v1529_v17 = vadd.f32 %v1528_v5, %v1360_v16  ;;  %v1362_v19 = vpop.f32.mrf.mxu1  ;;  %v3845_v16 = vld [vmem:[%s4133_s0 + $0x190] sm:$0xff] }
 0x180   :  { %v1363_v30 = vadd.f32 %v1362_v19, %v1193_v18  ;;  %v345_v19 = vunpack.c.1.s8 %v3835_v6  ;;  %v343_v22 = vunpack.c.0.s8 %v3845_v16  ;;  %v347_v26 = vunpack.c.1.s8 %v3845_v16 }
 0x181   :  { %v1698_v25 = vadd.f32 %v1697_v11, %v1529_v17  ;;  %1232 = vmatmul.bf16.gmra.mxu0 %v749_v4 }
 0x182   :  { %1401 = vmatmul.bf16.gmra.mxu1 %v750_v12  ;;  %v341_v12 = vunpack.c.0.s8 %v3835_v6  ;;  %v603_v37 = vcvt.s32.f32 %v347_v26 }
 0x183   :  { %v2396_v28 = vmul.f32 %v2187_v23, %v1698_v25  ;;  %1570 = vmatmul.bf16.gmra.mxu2 %v751_v20  ;;  %v342_v20 = vunpack.c.0.s8 %v3840_v15 }
 0x184   :  { %1739 = vmatmul.bf16.gmra.mxu3 %v752_v21  ;;  %v346_v21 = vunpack.c.1.s8 %v3840_v15 }
 0x185   :  { %v2524_v31 = vadd.f32 %v2460_v27, %v2396_v28  ;;  %v344_v27 = vunpack.c.0.s8 %v3850_v7  ;;  %v348_v28 = vunpack.c.1.s8 %v3850_v7  ;;  %v598_v32 = vcvt.s32.f32 %v342_v20 }
 0x186   :  { %v1531_v42 = vpop.f32.mrf.mxu2  ;;  %v1195_v43 = vpop.f32.mrf.mxu0 }
 0x187   :  { %v1700_v44 = vpop.f32.mrf.mxu3  ;;  %v2923_v34 = vpack.c.bf16 %v2524_v31, %v2523_v29  ;;  %v1364_v33 = vpop.f32.mrf.mxu1  ;;  %v1532_v46 = vadd.f32 %v1531_v42, %v1363_v30  ;;  %v597_v30 = vcvt.s32.f32 %v341_v12  ;;  %v601_v31 = vcvt.s32.f32 %v345_v19 }
 0x188   :  { %v1365_v40 = vadd.f32 %v1364_v33, %v1195_v43  ;;  %v602_v42 = vcvt.s32.f32 %v346_v21  ;;  %v600_v39 = vcvt.s32.f32 %v344_v27  ;;  %v604_v45 = vcvt.s32.f32 %v348_v28  ;;  %v2202_v43 = vpop.permute.xlu0 %2201 }
 0x189   :  { %3027 = vst [vmem:[%s4136_s4 + $0x68] sm:$0xff] %v2923_v34   ;;  %v1701_v56 = vadd.f32 %v1700_v44, %v1532_v46  ;;  %v599_v44 = vcvt.s32.f32 %v343_v22  ;;  %v757_v47 = vpack.c.bf16 %v601_v31, %v597_v30  ;;  %v2465_v31 = vld [vmem:[%s4135_s3 + $0x100] sm:$0xff] }
 0x18a   :  { %v758_v49 = vpack.c.bf16 %v602_v42, %v598_v32  ;;  %v760_v41 = vpack.c.bf16 %v604_v45, %v600_v39  ;;  %v2466_v42 = vld [vmem:[%s4135_s3 + $0x108] sm:$0xff]  ;;  %v3899_v45 = vld [vmem:[%s4133_s0 + $0x1b0] sm:$0xff] }
 0x18b   :  { %v2397_v1 = vmul.f32 %v2192_v57, %v1701_v56  ;;  %v759_v51 = vpack.c.bf16 %v603_v37, %v599_v44  ;;  %v3889_v44 = vld [vmem:[%s4133_s0 + $0x1a0] sm:$0xff]  ;;  %v3894_v39 = vld [vmem:[%s4133_s0 + $0x1a8] sm:$0xff] }
 0x18d   :  { %v2525_v5 = vadd.f32 %v2461_v10, %v2397_v1  ;;  %v352_v10 = vunpack.c.2.s8 %v3850_v7 }
 0x18e   :  { %v1533_v58 = vpop.f32.mrf.mxu2  ;;  %v1198_v0 = vpop.f32.mrf.mxu0 }
 0x18f   :  { %v1702_v59 = vpop.f32.mrf.mxu3  ;;  %v1534_v62 = vadd.f32 %v1533_v58, %v1365_v40  ;;  %v1367_v8 = vpop.f32.mrf.mxu1 }
 0x190   :  { %v1368_v11 = vadd.f32 %v1367_v8, %v1198_v0  ;;  %v350_v0 = vunpack.c.2.s8 %v3840_v15  ;;  %v354_v8 = vunpack.c.3.s8 %v3840_v15  ;;  %v2217_v32 = vpop.permute.xlu0 %2216 }
 0x191   :  { %v1703_v2 = vadd.f32 %v1702_v59, %v1534_v62  ;;  %1237 = vmatmul.bf16.gmra.mxu0 %v753_v60  ;;  %v349_v59 = vunpack.c.2.s8 %v3835_v6  ;;  %v353_v62 = vunpack.c.3.s8 %v3835_v6 }
 0x192   :  { %1406 = vmatmul.bf16.gmra.mxu1 %v754_v61  ;;  %v610_v15 = vcvt.s32.f32 %v354_v8 }
 0x193   :  { %v2398_v14 = vmul.f32 %v2197_v63, %v1703_v2  ;;  %1575 = vmatmul.bf16.gmra.mxu2 %v755_v9  ;;  %v351_v9 = vunpack.c.2.s8 %v3845_v16  ;;  %v355_v2 = vunpack.c.3.s8 %v3845_v16  ;;  %v2212_v16 = vpop.permute.xlu2 %2211 }
 0x194   :  { %1744 = vmatmul.bf16.gmra.mxu3 %v756_v3 }
 0x195   :  { %v2526_v4 = vadd.f32 %v2462_v13, %v2398_v14  ;;  %v356_v13 = vunpack.c.3.s8 %v3850_v7  ;;  %v605_v14 = vcvt.s32.f32 %v349_v59  ;;  %v611_v12 = vcvt.s32.f32 %v355_v2 }
 0x196   :  { %v1536_v17 = vpop.f32.mrf.mxu2  ;;  %v1200_v24 = vpop.f32.mrf.mxu0 }
 0x197   :  { %v1705_v18 = vpop.f32.mrf.mxu3  ;;  %v2928_v23 = vpack.c.bf16 %v2526_v4, %v2525_v5  ;;  %v1369_v25 = vpop.f32.mrf.mxu1  ;;  %v1537_v29 = vadd.f32 %v1536_v17, %v1368_v11  ;;  %v609_v5 = vcvt.s32.f32 %v353_v62  ;;  %v606_v11 = vcvt.s32.f32 %v350_v0 }
 0x198   :  { %v1370_v34 = vadd.f32 %v1369_v25, %v1200_v24  ;;  %v607_v4 = vcvt.s32.f32 %v351_v9  ;;  %v608_v17 = vcvt.s32.f32 %v352_v10 }
 0x199   :  { %3028 = vst [vmem:[%s4136_s4 + $0x70] sm:$0xff] %v2928_v23   ;;  %v1706_v36 = vadd.f32 %v1705_v18, %v1537_v29  ;;  %v612_v18 = vcvt.s32.f32 %v356_v13  ;;  %v761_v23 = vpack.c.bf16 %v609_v5, %v605_v14  ;;  %v762_v7 = vpack.c.bf16 %v610_v15, %v606_v11 }
 0x19a   :  { %v763_v27 = vpack.c.bf16 %v611_v12, %v607_v4 }
 0x19b   :  { %v2399_v53 = vmul.f32 %v2202_v43, %v1706_v36  ;;  %v764_v28 = vpack.c.bf16 %v612_v18, %v608_v17  ;;  %v3904_v36 = vld [vmem:[%s4133_s0 + $0x1b8] sm:$0xff]  ;;  %v2227_v12 = vpop.permute.xlu2 %2226  ;;  %v2467_v17 = vld [vmem:[%s4135_s3 + $0x110] sm:$0xff] }
 0x19c   :  { %v2468_v18 = vld [vmem:[%s4135_s3 + $0x118] sm:$0xff] }
 0x19d   :  { %v2527_v40 = vadd.f32 %v2463_v54, %v2399_v53  ;;  %v360_v54 = vunpack.c.0.s8 %v3904_v36 }
 0x19e   :  { %v1538_v33 = vpop.f32.mrf.mxu2  ;;  %v1203_v46 = vpop.f32.mrf.mxu0 }
 0x19f   :  { %v1707_v35 = vpop.f32.mrf.mxu3  ;;  %v1539_v50 = vadd.f32 %v1538_v33, %v1370_v34  ;;  %v1372_v48 = vpop.f32.mrf.mxu1  ;;  %v616_v62 = vcvt.s32.f32 %v360_v54 }
 0x1a0   :  { %v1373_v57 = vadd.f32 %v1372_v48, %v1203_v46  ;;  %v358_v46 = vunpack.c.0.s8 %v3894_v39  ;;  %v362_v48 = vunpack.c.1.s8 %v3894_v39 }
 0x1a1   :  { %v1708_v38 = vadd.f32 %v1707_v35, %v1539_v50  ;;  %1242 = vmatmul.bf16.gmra.mxu0 %v757_v47  ;;  %v357_v35 = vunpack.c.0.s8 %v3889_v44  ;;  %v361_v50 = vunpack.c.1.s8 %v3889_v44 }
 0x1a2   :  { %1411 = vmatmul.bf16.gmra.mxu1 %v758_v49  ;;  %v618_v59 = vcvt.s32.f32 %v362_v48 }
 0x1a3   :  { %v2400_v56 = vmul.f32 %v2207_v52, %v1708_v38  ;;  %1580 = vmatmul.bf16.gmra.mxu2 %v759_v51  ;;  %v359_v51 = vunpack.c.0.s8 %v3899_v45  ;;  %v363_v38 = vunpack.c.1.s8 %v3899_v45 }
 0x1a4   :  { %1749 = vmatmul.bf16.gmra.mxu3 %v760_v41 }
 0x1a5   :  { %v2528_v58 = vadd.f32 %v2464_v55, %v2400_v56  ;;  %v364_v55 = vunpack.c.1.s8 %v3904_v36 }
 0x1a6   :  { %v1541_v60 = vpop.f32.mrf.mxu2  ;;  %v1205_v63 = vpop.f32.mrf.mxu0 }
 0x1a7   :  { %v1710_v61 = vpop.f32.mrf.mxu3  ;;  %v2933_v3 = vpack.c.bf16 %v2528_v58, %v2527_v40  ;;  %v1374_v1 = vpop.f32.mrf.mxu1  ;;  %v1542_v6 = vadd.f32 %v1541_v60, %v1373_v57  ;;  %v613_v40 = vcvt.s32.f32 %v357_v35  ;;  %v617_v57 = vcvt.s32.f32 %v361_v50 }
 0x1a8   :  { %v1375_v20 = vadd.f32 %v1374_v1, %v1205_v63  ;;  %v614_v58 = vcvt.s32.f32 %v358_v46  ;;  %v615_v60 = vcvt.s32.f32 %v359_v51  ;;  %v620_v0 = vcvt.s32.f32 %v364_v55  ;;  %v2232_v55 = vpop.permute.xlu0 %2231 }
 0x1a9   :  { %3029 = vst [vmem:[%s4136_s4 + $0x78] sm:$0xff] %v2933_v3   ;;  %v1711_v19 = vadd.f32 %v1710_v61, %v1542_v6  ;;  %v619_v61 = vcvt.s32.f32 %v363_v38  ;;  %v2222_v3 = vpop.permute.xlu1 %2221  ;;  %v765_v2 = vpack.c.bf16 %v617_v57, %v613_v40 }
 0x1aa   :  { %v766_v10 = vpack.c.bf16 %v618_v59, %v614_v58  ;;  %v768_v11 = vpack.c.bf16 %v620_v0, %v616_v62  ;;  %v2469_v58 = vld [vmem:[%s4135_s3 + $0x120] sm:$0xff]  ;;  %v2470_v59 = vld [vmem:[%s4135_s3 + $0x128] sm:$0xff]  ;;  %v3953_v0 = vld [vmem:[%s4133_s0 + $0x1d0] sm:$0xff] }
 0x1ab   :  { %v2401_v29 = vmul.f32 %v2212_v16, %v1711_v19  ;;  %v767_v5 = vpack.c.bf16 %v619_v61, %v615_v60  ;;  %v3943_v60 = vld [vmem:[%s4133_s0 + $0x1c0] sm:$0xff]  ;;  %v3948_v62 = vld [vmem:[%s4133_s0 + $0x1c8] sm:$0xff] }
 0x1ad   :  { %v2529_v34 = vadd.f32 %v2465_v31, %v2401_v29  ;;  %v371_v31 = vunpack.c.3.s8 %v3899_v45 }
 0x1ae   :  { %v1543_v21 = vpop.f32.mrf.mxu2  ;;  %v1208_v25 = vpop.f32.mrf.mxu0 }
 0x1af   :  { %v1712_v22 = vpop.f32.mrf.mxu3  ;;  %v1544_v24 = vadd.f32 %v1543_v21, %v1375_v20  ;;  %v1377_v26 = vpop.f32.mrf.mxu1  ;;  %v627_v35 = vcvt.s32.f32 %v371_v31 }
 0x1b0   :  { %v1378_v33 = vadd.f32 %v1377_v26, %v1208_v25  ;;  %v366_v25 = vunpack.c.2.s8 %v3894_v39  ;;  %v370_v26 = vunpack.c.3.s8 %v3894_v39 }
 0x1b1   :  { %v1713_v30 = vadd.f32 %v1712_v22, %v1544_v24  ;;  %1247 = vmatmul.bf16.gmra.mxu0 %v761_v23  ;;  %v365_v22 = vunpack.c.2.s8 %v3889_v44  ;;  %v369_v24 = vunpack.c.3.s8 %v3889_v44  ;;  %v2237_v57 = vpop.permute.xlu1 %2236 }
 0x1b2   :  { %1416 = vmatmul.bf16.gmra.mxu1 %v762_v7  ;;  %v626_v39 = vcvt.s32.f32 %v370_v26 }
 0x1b3   :  { %v2402_v37 = vmul.f32 %v2217_v32, %v1713_v30  ;;  %1585 = vmatmul.bf16.gmra.mxu2 %v763_v27  ;;  %v367_v27 = vunpack.c.2.s8 %v3899_v45  ;;  %v368_v32 = vunpack.c.2.s8 %v3904_v36 }
 0x1b4   :  { %1754 = vmatmul.bf16.gmra.mxu3 %v764_v28 }
 0x1b5   :  { %v2530_v43 = vadd.f32 %v2466_v42, %v2402_v37  ;;  %v372_v42 = vunpack.c.3.s8 %v3904_v36  ;;  %v621_v37 = vcvt.s32.f32 %v365_v22 }
 0x1b6   :  { %v1546_v47 = vpop.f32.mrf.mxu2  ;;  %v1210_v52 = vpop.f32.mrf.mxu0 }
 0x1b7   :  { %v1715_v49 = vpop.f32.mrf.mxu3  ;;  %v2938_v41 = vpack.c.bf16 %v2530_v43, %v2529_v34  ;;  %v1379_v53 = vpop.f32.mrf.mxu1  ;;  %v1547_v56 = vadd.f32 %v1546_v47, %v1378_v33  ;;  %v625_v34 = vcvt.s32.f32 %v369_v24  ;;  %v622_v43 = vcvt.s32.f32 %v366_v25 }
 0x1b8   :  { %v1380_v9 = vadd.f32 %v1379_v53, %v1210_v52  ;;  %v623_v33 = vcvt.s32.f32 %v367_v27  ;;  %v624_v47 = vcvt.s32.f32 %v368_v32 }
 0x1b9   :  { %3030 = vst [vmem:[%s4136_s4 + $0x80] sm:$0xff] %v2938_v41   ;;  %v1716_v8 = vadd.f32 %v1715_v49, %v1547_v56  ;;  %v628_v49 = vcvt.s32.f32 %v372_v42  ;;  %v769_v51 = vpack.c.bf16 %v625_v34, %v621_v37  ;;  %v770_v41 = vpack.c.bf16 %v626_v39, %v622_v43  ;;  %v2242_v43 = vpop.permute.xlu2 %2241 }
 0x1ba   :  { %v771_v38 = vpack.c.bf16 %v627_v35, %v623_v33  ;;  %v2247_v35 = vpop.permute.xlu0 %2246 }
 0x1bb   :  { %v2403_v15 = vmul.f32 %v2222_v3, %v1716_v8  ;;  %v772_v54 = vpack.c.bf16 %v628_v49, %v624_v47  ;;  %v3958_v8 = vld [vmem:[%s4133_s0 + $0x1d8] sm:$0xff]  ;;  %v2471_v47 = vld [vmem:[%s4135_s3 + $0x130] sm:$0xff] }
 0x1bc   :  { %v2472_v49 = vld [vmem:[%s4135_s3 + $0x138] sm:$0xff] }
 0x1bd   :  { %v2531_v20 = vadd.f32 %v2467_v17, %v2403_v15  ;;  %v376_v17 = vunpack.c.0.s8 %v3958_v8 }
 0x1be   :  { %v1548_v63 = vpop.f32.mrf.mxu2  ;;  %v1213_v6 = vpop.f32.mrf.mxu0 }
 0x1bf   :  { %v1717_v1 = vpop.f32.mrf.mxu3  ;;  %v1549_v13 = vadd.f32 %v1548_v63, %v1380_v9  ;;  %v1382_v14 = vpop.f32.mrf.mxu1  ;;  %v632_v24 = vcvt.s32.f32 %v376_v17 }
 0x1c0   :  { %v1383_v21 = vadd.f32 %v1382_v14, %v1213_v6  ;;  %v374_v6 = vunpack.c.0.s8 %v3948_v62  ;;  %v378_v14 = vunpack.c.1.s8 %v3948_v62 }
 0x1c1   :  { %v1718_v4 = vadd.f32 %v1717_v1, %v1549_v13  ;;  %1252 = vmatmul.bf16.gmra.mxu0 %v765_v2  ;;  %v373_v1 = vunpack.c.0.s8 %v3943_v60  ;;  %v377_v13 = vunpack.c.1.s8 %v3943_v60 }
 0x1c2   :  { %1421 = vmatmul.bf16.gmra.mxu1 %v766_v10  ;;  %v634_v22 = vcvt.s32.f32 %v378_v14 }
 0x1c3   :  { %v2404_v19 = vmul.f32 %v2227_v12, %v1718_v4  ;;  %1590 = vmatmul.bf16.gmra.mxu2 %v767_v5  ;;  %v375_v5 = vunpack.c.0.s8 %v3953_v0  ;;  %v379_v12 = vunpack.c.1.s8 %v3953_v0 }
 0x1c4   :  { %1759 = vmatmul.bf16.gmra.mxu3 %v768_v11 }
 0x1c5   :  { %v2532_v16 = vadd.f32 %v2468_v18, %v2404_v19  ;;  %v380_v18 = vunpack.c.1.s8 %v3958_v8 }
 0x1c6   :  { %v1551_v23 = vpop.f32.mrf.mxu2  ;;  %v1215_v29 = vpop.f32.mrf.mxu0 }
 0x1c7   :  { %v1720_v7 = vpop.f32.mrf.mxu3  ;;  %v2943_v28 = vpack.c.bf16 %v2532_v16, %v2531_v20  ;;  %v1384_v30 = vpop.f32.mrf.mxu1  ;;  %v1552_v44 = vadd.f32 %v1551_v23, %v1383_v21  ;;  %v629_v20 = vcvt.s32.f32 %v373_v1  ;;  %v633_v16 = vcvt.s32.f32 %v377_v13 }
 0x1c8   :  { %v1385_v46 = vadd.f32 %v1384_v30, %v1215_v29  ;;  %v630_v21 = vcvt.s32.f32 %v374_v6  ;;  %v631_v23 = vcvt.s32.f32 %v375_v5  ;;  %v636_v25 = vcvt.s32.f32 %v380_v18  ;;  %v2252_v18 = vpop.permute.xlu1 %2251 }
 0x1c9   :  { %3031 = vst [vmem:[%s4136_s4 + $0x88] sm:$0xff] %v2943_v28   ;;  %v1721_v50 = vadd.f32 %v1720_v7, %v1552_v44  ;;  %v635_v7 = vcvt.s32.f32 %v379_v12  ;;  %v773_v30 = vpack.c.bf16 %v633_v16, %v629_v20  ;;  %v2257_v16 = vpop.permute.xlu2 %2256 }
 0x1ca   :  { %v774_v31 = vpack.c.bf16 %v634_v22, %v630_v21  ;;  %v776_v34 = vpack.c.bf16 %v636_v25, %v632_v24  ;;  %v2473_v21 = vld [vmem:[%s4135_s3 + $0x140] sm:$0xff]  ;;  %v2474_v22 = vld [vmem:[%s4135_s3 + $0x148] sm:$0xff]  ;;  %v4007_v25 = vld [vmem:[%s4133_s0 + $0x1f0] sm:$0xff] }
 0x1cb   :  { %v2405_v56 = vmul.f32 %v2232_v55, %v1721_v50  ;;  %v775_v37 = vpack.c.bf16 %v635_v7, %v631_v23  ;;  %v3997_v23 = vld [vmem:[%s4133_s0 + $0x1e0] sm:$0xff]  ;;  %v4002_v24 = vld [vmem:[%s4133_s0 + $0x1e8] sm:$0xff] }
 0x1cd   :  { %v2533_v9 = vadd.f32 %v2469_v58, %v2405_v56  ;;  %v384_v58 = vunpack.c.2.s8 %v3958_v8 }
 0x1ce   :  { %v1553_v45 = vpop.f32.mrf.mxu2  ;;  %v1218_v52 = vpop.f32.mrf.mxu0 }
 0x1cf   :  { %v1722_v48 = vpop.f32.mrf.mxu3  ;;  %v1554_v36 = vadd.f32 %v1553_v45, %v1385_v46  ;;  %v1387_v53 = vpop.f32.mrf.mxu1 }
 0x1d0   :  { %v1388_v63 = vadd.f32 %v1387_v53, %v1218_v52  ;;  %v385_v52 = vunpack.c.3.s8 %v3943_v60  ;;  %v382_v53 = vunpack.c.2.s8 %v3948_v62 }
 0x1d1   :  { %v1723_v40 = vadd.f32 %v1722_v48, %v1554_v36  ;;  %1257 = vmatmul.bf16.gmra.mxu0 %v769_v51  ;;  %v381_v51 = vunpack.c.2.s8 %v3943_v60 }
 0x1d2   :  { %1426 = vmatmul.bf16.gmra.mxu1 %v770_v41 }
 0x1d3   :  { %v2406_v61 = vmul.f32 %v2237_v57, %v1723_v40  ;;  %1595 = vmatmul.bf16.gmra.mxu2 %v771_v38  ;;  %v386_v38 = vunpack.c.3.s8 %v3948_v62  ;;  %v387_v57 = vunpack.c.3.s8 %v3953_v0 }
 0x1d4   :  { %1764 = vmatmul.bf16.gmra.mxu3 %v772_v54  ;;  %v383_v54 = vunpack.c.2.s8 %v3953_v0 }
 0x1d5   :  { %v2534_v3 = vadd.f32 %v2470_v59, %v2406_v61  ;;  %v388_v59 = vunpack.c.3.s8 %v3958_v8  ;;  %v637_v61 = vcvt.s32.f32 %v381_v51  ;;  %v642_v62 = vcvt.s32.f32 %v386_v38 }
 0x1d6   :  { %v1556_v2 = vpop.f32.mrf.mxu2  ;;  %v1220_v15 = vpop.f32.mrf.mxu0  ;;  %v643_v1 = vcvt.s32.f32 %v387_v57 }
 0x1d7   :  { %v1725_v10 = vpop.f32.mrf.mxu3  ;;  %v2948_v11 = vpack.c.bf16 %v2534_v3, %v2533_v9  ;;  %v1389_v4 = vpop.f32.mrf.mxu1  ;;  %v1557_v19 = vadd.f32 %v1556_v2, %v1388_v63  ;;  %v641_v9 = vcvt.s32.f32 %v385_v52  ;;  %v638_v3 = vcvt.s32.f32 %v382_v53 }
 0x1d8   :  { %v1390_v27 = vadd.f32 %v1389_v4, %v1220_v15  ;;  %v639_v63 = vcvt.s32.f32 %v383_v54  ;;  %v640_v2 = vcvt.s32.f32 %v384_v58 }
 0x1d9   :  { %3032 = vst [vmem:[%s4136_s4 + $0x90] sm:$0xff] %v2948_v11   ;;  %v1726_v26 = vadd.f32 %v1725_v10, %v1557_v19  ;;  %v644_v10 = vcvt.s32.f32 %v388_v59  ;;  %v777_v5 = vpack.c.bf16 %v641_v9, %v637_v61  ;;  %v778_v11 = vpack.c.bf16 %v642_v62, %v638_v3  ;;  %v2262_v3 = vpop.permute.xlu0 %2261 }
 0x1da   :  { %v779_v12 = vpack.c.bf16 %v643_v1, %v639_v63  ;;  %v2267_v1 = vpop.permute.xlu1 %2266 }
 0x1db   :  { %v2407_v39 = vmul.f32 %v2242_v43, %v1726_v26  ;;  %v780_v17 = vpack.c.bf16 %v644_v10, %v640_v2  ;;  %v4012_v26 = vld [vmem:[%s4133_s0 + $0x1f8] sm:$0xff]  ;;  %v2475_v2 = vld [vmem:[%s4135_s3 + $0x150] sm:$0xff] }
 0x1dc   :  { %v2476_v10 = vld [vmem:[%s4135_s3 + $0x158] sm:$0xff] }
 0x1dd   :  { %v2535_v46 = vadd.f32 %v2471_v47, %v2407_v39  ;;  %v392_v47 = vunpack.c.0.s8 %v4012_v26 }
 0x1de   :  { %v1558_v28 = vpop.f32.mrf.mxu2  ;;  %v1223_v42 = vpop.f32.mrf.mxu0 }
 0x1df   :  { %v1727_v29 = vpop.f32.mrf.mxu3  ;;  %v1559_v32 = vadd.f32 %v1558_v28, %v1390_v27  ;;  %v1392_v44 = vpop.f32.mrf.mxu1  ;;  %v648_v52 = vcvt.s32.f32 %v392_v47 }
 0x1e0   :  { %v1393_v48 = vadd.f32 %v1392_v44, %v1223_v42  ;;  %v393_v42 = vunpack.c.1.s8 %v3997_v23  ;;  %v390_v44 = vunpack.c.0.s8 %v4002_v24 }
 0x1e1   :  { %v1728_v33 = vadd.f32 %v1727_v29, %v1559_v32  ;;  %1262 = vmatmul.bf16.gmra.mxu0 %v773_v30  ;;  %v389_v30 = vunpack.c.0.s8 %v3997_v23 }
 0x1e2   :  { %1431 = vmatmul.bf16.gmra.mxu1 %v774_v31 }
 0x1e3   :  { %v2408_v50 = vmul.f32 %v2247_v35, %v1728_v33  ;;  %1600 = vmatmul.bf16.gmra.mxu2 %v775_v37  ;;  %v394_v37 = vunpack.c.1.s8 %v4002_v24  ;;  %v395_v35 = vunpack.c.1.s8 %v4007_v25 }
 0x1e4   :  { %1769 = vmatmul.bf16.gmra.mxu3 %v776_v34  ;;  %v391_v34 = vunpack.c.0.s8 %v4007_v25 }
 0x1e5   :  { %v2536_v45 = vadd.f32 %v2472_v49, %v2408_v50  ;;  %v396_v49 = vunpack.c.1.s8 %v4012_v26  ;;  %v650_v51 = vcvt.s32.f32 %v394_v37 }
 0x1e6   :  { %v1561_v41 = vpop.f32.mrf.mxu2  ;;  %v1225_v56 = vpop.f32.mrf.mxu0 }
 0x1e7   :  { %v1730_v36 = vpop.f32.mrf.mxu3  ;;  %v2953_v55 = vpack.c.bf16 %v2536_v45, %v2535_v46  ;;  %v1394_v40 = vpop.f32.mrf.mxu1  ;;  %v1562_v60 = vadd.f32 %v1561_v41, %v1393_v48  ;;  %v645_v46 = vcvt.s32.f32 %v389_v30  ;;  %v649_v45 = vcvt.s32.f32 %v393_v42 }
 0x1e8   :  { %v1395_v6 = vadd.f32 %v1394_v40, %v1225_v56  ;;  %v646_v48 = vcvt.s32.f32 %v390_v44  ;;  %v647_v41 = vcvt.s32.f32 %v391_v34  ;;  %v652_v53 = vcvt.s32.f32 %v396_v49  ;;  %v2272_v49 = vpop.permute.xlu2 %2271 }
 0x1e9   :  { %3033 = vst [vmem:[%s4136_s4 + $0x98] sm:$0xff] %v2953_v55   ;;  %v1731_v13 = vadd.f32 %v1730_v36, %v1562_v60  ;;  %v651_v36 = vcvt.s32.f32 %v395_v35  ;;  %v781_v40 = vpack.c.bf16 %v649_v45, %v645_v46  ;;  %v2277_v45 = vpop.permute.xlu0 %2276 }
 0x1ea   :  { %v782_v57 = vpack.c.bf16 %v650_v51, %v646_v48  ;;  %v784_v9 = vpack.c.bf16 %v652_v53, %v648_v52  ;;  %v2477_v48 = vld [vmem:[%s4135_s3 + $0x160] sm:$0xff]  ;;  %v2478_v51 = vld [vmem:[%s4135_s3 + $0x168] sm:$0xff] }
 0x1eb   :  { %v2409_v19 = vmul.f32 %v2252_v18, %v1731_v13  ;;  %v783_v61 = vpack.c.bf16 %v651_v36, %v647_v41 }
 0x1ed   :  { %v2537_v27 = vadd.f32 %v2473_v21, %v2409_v19  ;;  %v400_v21 = vunpack.c.2.s8 %v4012_v26 }
 0x1ee   :  { %v1563_v0 = vpop.f32.mrf.mxu2  ;;  %v1228_v15 = vpop.f32.mrf.mxu0 }
 0x1ef   :  { %v1732_v14 = vpop.f32.mrf.mxu3  ;;  %v1564_v8 = vadd.f32 %v1563_v0, %v1395_v6  ;;  %v1397_v4 = vpop.f32.mrf.mxu1 }
 0x1f0   :  { %v1398_v29 = vadd.f32 %v1397_v4, %v1228_v15  ;;  %v401_v15 = vunpack.c.3.s8 %v3997_v23  ;;  %v398_v4 = vunpack.c.2.s8 %v4002_v24 }
 0x1f1   :  { %v1733_v20 = vadd.f32 %v1732_v14, %v1564_v8  ;;  %1267 = vmatmul.bf16.gmra.mxu0 %v777_v5  ;;  %v397_v5 = vunpack.c.2.s8 %v3997_v23 }
 0x1f2   :  { %1436 = vmatmul.bf16.gmra.mxu1 %v778_v11 }
 0x1f3   :  { %v2410_v7 = vmul.f32 %v2257_v16, %v1733_v20  ;;  %1605 = vmatmul.bf16.gmra.mxu2 %v779_v12  ;;  %v402_v12 = vunpack.c.3.s8 %v4002_v24  ;;  %v403_v16 = vunpack.c.3.s8 %v4007_v25 }
 0x1f4   :  { %1774 = vmatmul.bf16.gmra.mxu3 %v780_v17  ;;  %v399_v17 = vunpack.c.2.s8 %v4007_v25 }
 0x1f5   :  { %v2538_v28 = vadd.f32 %v2474_v22, %v2410_v7  ;;  %v404_v22 = vunpack.c.3.s8 %v4012_v26  ;;  %v653_v7 = vcvt.s32.f32 %v397_v5  ;;  %v658_v24 = vcvt.s32.f32 %v402_v12 }
 0x1f6   :  { %v1566_v31 = vpop.f32.mrf.mxu2  ;;  %v1230_v39 = vpop.f32.mrf.mxu0  ;;  %v659_v30 = vcvt.s32.f32 %v403_v16 }
 0x1f7   :  { %v1735_v32 = vpop.f32.mrf.mxu3  ;;  %v2958_v43 = vpack.c.bf16 %v2538_v28, %v2537_v27  ;;  %v1399_v33 = vpop.f32.mrf.mxu1  ;;  %v1567_v50 = vadd.f32 %v1566_v31, %v1398_v29  ;;  %v657_v27 = vcvt.s32.f32 %v401_v15  ;;  %v654_v28 = vcvt.s32.f32 %v398_v4 }
 0x1f8   :  { %v1400_v54 = vadd.f32 %v1399_v33, %v1230_v39  ;;  %v655_v29 = vcvt.s32.f32 %v399_v17  ;;  %v656_v31 = vcvt.s32.f32 %v400_v21 }
 0x1f9   :  { %3034 = vst [vmem:[%s4136_s4 + $0xa0] sm:$0xff] %v2958_v43   ;;  %v1736_v38 = vadd.f32 %v1735_v32, %v1567_v50  ;;  %v660_v32 = vcvt.s32.f32 %v404_v22  ;;  %v785_v34 = vpack.c.bf16 %v657_v27, %v653_v7  ;;  %v786_v43 = vpack.c.bf16 %v658_v24, %v654_v28  ;;  %v2292_v27 = vpop.permute.xlu0 %2291 }
 0x1fa   :  { %v787_v35 = vpack.c.bf16 %v659_v30, %v655_v29  ;;  %v2481_v30 = vld [vmem:[%s4135_s3 + $0x180] sm:$0xff] }
 0x1fb   :  { %v2411_v62 = vmul.f32 %v2262_v3, %v1736_v38  ;;  %v788_v47 = vpack.c.bf16 %v660_v32, %v656_v31  ;;  %v2482_v31 = vld [vmem:[%s4135_s3 + $0x188] sm:$0xff] }
 0x1fd   :  { %v2539_v6 = vadd.f32 %v2475_v2, %v2411_v62 }
 0x1fe   :  { %v1568_v55 = vpop.f32.mrf.mxu2  ;;  %v1233_v59 = vpop.f32.mrf.mxu0 }
 0x1ff   :  { %v1737_v56 = vpop.f32.mrf.mxu3  ;;  %v1569_v58 = vadd.f32 %v1568_v55, %v1400_v54  ;;  %v1402_v60 = vpop.f32.mrf.mxu1 }
 0x200   :  { %v1403_v14 = vadd.f32 %v1402_v60, %v1233_v59 }
 0x201   :  { %v1738_v63 = vadd.f32 %v1737_v56, %v1569_v58  ;;  %1272 = vmatmul.bf16.gmra.mxu0 %v781_v40 }
 0x202   :  { %1441 = vmatmul.bf16.gmra.mxu1 %v782_v57 }
 0x203   :  { %v2412_v13 = vmul.f32 %v2267_v1, %v1738_v63  ;;  %1610 = vmatmul.bf16.gmra.mxu2 %v783_v61  ;;  %v2282_v63 = vpop.permute.xlu1 %2281 }
 0x204   :  { %1779 = vmatmul.bf16.gmra.mxu3 %v784_v9 }
 0x205   :  { %v2540_v0 = vadd.f32 %v2476_v10, %v2412_v13  ;;  %v2287_v10 = vpop.permute.xlu2 %2286  ;;  %v2479_v13 = vld [vmem:[%s4135_s3 + $0x170] sm:$0xff] }
 0x206   :  { %v1571_v11 = vpop.f32.mrf.mxu2  ;;  %v1235_v19 = vpop.f32.mrf.mxu0 }
 0x207   :  { %v1740_v8 = vpop.f32.mrf.mxu3  ;;  %v2963_v18 = vpack.c.bf16 %v2540_v0, %v2539_v6  ;;  %v1404_v20 = vpop.f32.mrf.mxu1  ;;  %v1572_v23 = vadd.f32 %v1571_v11, %v1403_v14  ;;  %v2480_v6 = vld [vmem:[%s4135_s3 + $0x178] sm:$0xff] }
 0x208   :  { %v1405_v44 = vadd.f32 %v1404_v20, %v1235_v19 }
 0x209   :  { %3035 = vst [vmem:[%s4136_s4 + $0xa8] sm:$0xff] %v2963_v18   ;;  %v1741_v42 = vadd.f32 %v1740_v8, %v1572_v23 }
 0x20b   :  { %v2413_v50 = vmul.f32 %v2272_v49, %v1741_v42  ;;  %v2297_v29 = vpop.permute.xlu1 %2296 }
 0x20d   :  { %v2541_v36 = vadd.f32 %v2477_v48, %v2413_v50 }
 0x20e   :  { %v1573_v25 = vpop.f32.mrf.mxu2  ;;  %v1238_v39 = vpop.f32.mrf.mxu0 }
 0x20f   :  { %v1742_v37 = vpop.f32.mrf.mxu3  ;;  %v1574_v26 = vadd.f32 %v1573_v25, %v1405_v44  ;;  %v1407_v33 = vpop.f32.mrf.mxu1 }
 0x210   :  { %v1408_v53 = vadd.f32 %v1407_v33, %v1238_v39 }
 0x211   :  { %v1743_v46 = vadd.f32 %v1742_v37, %v1574_v26  ;;  %1277 = vmatmul.bf16.gmra.mxu0 %v785_v34 }
 0x212   :  { %1446 = vmatmul.bf16.gmra.mxu1 %v786_v43 }
 0x213   :  { %v2414_v41 = vmul.f32 %v2277_v45, %v1743_v46  ;;  %1615 = vmatmul.bf16.gmra.mxu2 %v787_v35 }
 0x214   :  { %1784 = vmatmul.bf16.gmra.mxu3 %v788_v47 }
 0x215   :  { %v2542_v52 = vadd.f32 %v2478_v51, %v2414_v41  ;;  %v2302_v51 = vpop.permute.xlu2 %2301 }
 0x216   :  { %v1576_v38 = vpop.f32.mrf.mxu2  ;;  %v1240_v56 = vpop.f32.mrf.mxu0 }
 0x217   :  { %v1745_v54 = vpop.f32.mrf.mxu3  ;;  %v2968_v55 = vpack.c.bf16 %v2542_v52, %v2541_v36  ;;  %v1409_v40 = vpop.f32.mrf.mxu1  ;;  %v1577_v57 = vadd.f32 %v1576_v38, %v1408_v53  ;;  %v2483_v53 = vld [vmem:[%s4135_s3 + $0x190] sm:$0xff]  ;;  %v2484_v38 = vld [vmem:[%s4135_s3 + $0x198] sm:$0xff] }
 0x218   :  { %v1410_v59 = vadd.f32 %v1409_v40, %v1240_v56  ;;  %v2307_v52 = vpop.permute.xlu0 %2306 }
 0x219   :  { %3036 = vst [vmem:[%s4136_s4 + $0xb0] sm:$0xff] %v2968_v55   ;;  %v1746_v58 = vadd.f32 %v1745_v54, %v1577_v57 }
 0x21b   :  { %v2415_v1 = vmul.f32 %v2282_v63, %v1746_v58 }
 0x21d   :  { %v2543_v14 = vadd.f32 %v2479_v13, %v2415_v1 }
 0x21e   :  { %v1578_v60 = vpop.f32.mrf.mxu2  ;;  %v1243_v3 = vpop.f32.mrf.mxu0 }
 0x21f   :  { %v1747_v61 = vpop.f32.mrf.mxu3  ;;  %v1579_v9 = vadd.f32 %v1578_v60, %v1410_v59  ;;  %v1412_v62 = vpop.f32.mrf.mxu1 }
 0x220   :  { %v1413_v11 = vadd.f32 %v1412_v62, %v1243_v3 }
 0x221   :  { %v1748_v2 = vadd.f32 %v1747_v61, %v1579_v9 }
 0x223   :  { %v2416_v0 = vmul.f32 %v2287_v10, %v1748_v2 }
 0x225   :  { %v2544_v5 = vadd.f32 %v2480_v6, %v2416_v0  ;;  %v2312_v6 = vpop.permute.xlu1 %2311 }
 0x226   :  { %v1581_v8 = vpop.f32.mrf.mxu2  ;;  %v1245_v12 = vpop.f32.mrf.mxu0 }
 0x227   :  { %v1750_v15 = vpop.f32.mrf.mxu3  ;;  %v2973_v4 = vpack.c.bf16 %v2544_v5, %v2543_v14  ;;  %v1414_v17 = vpop.f32.mrf.mxu1  ;;  %v1582_v18 = vadd.f32 %v1581_v8, %v1413_v11  ;;  %v2485_v11 = vld [vmem:[%s4135_s3 + $0x1a0] sm:$0xff]  ;;  %v2486_v8 = vld [vmem:[%s4135_s3 + $0x1a8] sm:$0xff] }
 0x228   :  { %v1415_v20 = vadd.f32 %v1414_v17, %v1245_v12  ;;  %v2317_v5 = vpop.permute.xlu2 %2316 }
 0x229   :  { %3037 = vst [vmem:[%s4136_s4 + $0xb8] sm:$0xff] %v2973_v4   ;;  %v1751_v19 = vadd.f32 %v1750_v15, %v1582_v18 }
 0x22b   :  { %v2417_v28 = vmul.f32 %v2292_v27, %v1751_v19 }
 0x22d   :  { %v2545_v42 = vadd.f32 %v2481_v30, %v2417_v28 }
 0x22e   :  { %v1583_v16 = vpop.f32.mrf.mxu2  ;;  %v1248_v23 = vpop.f32.mrf.mxu0 }
 0x22f   :  { %v1752_v21 = vpop.f32.mrf.mxu3  ;;  %v1584_v22 = vadd.f32 %v1583_v16, %v1415_v20  ;;  %v1417_v7 = vpop.f32.mrf.mxu1 }
 0x230   :  { %v1418_v25 = vadd.f32 %v1417_v7, %v1248_v23 }
 0x231   :  { %v1753_v24 = vadd.f32 %v1752_v21, %v1584_v22 }
 0x233   :  { %v2418_v32 = vmul.f32 %v2297_v29, %v1753_v24 }
 0x235   :  { %v2546_v44 = vadd.f32 %v2482_v31, %v2418_v32  ;;  %v2322_v31 = vpop.permute.xlu0 %2321 }
 0x236   :  { %v1586_v37 = vpop.f32.mrf.mxu2  ;;  %v1250_v26 = vpop.f32.mrf.mxu0 }
 0x237   :  { %v1755_v34 = vpop.f32.mrf.mxu3  ;;  %v2978_v43 = vpack.c.bf16 %v2546_v44, %v2545_v42  ;;  %v1419_v39 = vpop.f32.mrf.mxu1  ;;  %v1587_v33 = vadd.f32 %v1586_v37, %v1418_v25  ;;  %v2487_v25 = vld [vmem:[%s4135_s3 + $0x1b0] sm:$0xff]  ;;  %v2488_v37 = vld [vmem:[%s4135_s3 + $0x1b8] sm:$0xff] }
 0x238   :  { %v1420_v47 = vadd.f32 %v1419_v39, %v1250_v26  ;;  %v2327_v44 = vpop.permute.xlu1 %2326 }
 0x239   :  { %3038 = vst [vmem:[%s4136_s4 + $0xc0] sm:$0xff] %v2978_v43   ;;  %v1756_v35 = vadd.f32 %v1755_v34, %v1587_v33 }
 0x23b   :  { %v2419_v41 = vmul.f32 %v2302_v51, %v1756_v35 }
 0x23d   :  { %v2547_v55 = vadd.f32 %v2483_v53, %v2419_v41 }
 0x23e   :  { %v1588_v49 = vpop.f32.mrf.mxu2  ;;  %v1253_v45 = vpop.f32.mrf.mxu0 }
 0x23f   :  { %v1757_v50 = vpop.f32.mrf.mxu3  ;;  %v1589_v46 = vadd.f32 %v1588_v49, %v1420_v47  ;;  %v1422_v48 = vpop.f32.mrf.mxu1 }
 0x240   :  { %v1423_v40 = vadd.f32 %v1422_v48, %v1253_v45 }
 0x241   :  { %v1758_v36 = vadd.f32 %v1757_v50, %v1589_v46 }
 0x243   :  { %v2420_v54 = vmul.f32 %v2307_v52, %v1758_v36 }
 0x245   :  { %v2548_v56 = vadd.f32 %v2484_v38, %v2420_v54  ;;  %v2332_v38 = vpop.permute.xlu2 %2331 }
 0x246   :  { %v1591_v57 = vpop.f32.mrf.mxu2  ;;  %v1255_v60 = vpop.f32.mrf.mxu0 }
 0x247   :  { %v1760_v58 = vpop.f32.mrf.mxu3  ;;  %v2983_v59 = vpack.c.bf16 %v2548_v56, %v2547_v55  ;;  %v1424_v61 = vpop.f32.mrf.mxu1  ;;  %v1592_v9 = vadd.f32 %v1591_v57, %v1423_v40  ;;  %v2489_v40 = vld [vmem:[%s4135_s3 + $0x1c0] sm:$0xff]  ;;  %v2490_v57 = vld [vmem:[%s4135_s3 + $0x1c8] sm:$0xff] }
 0x248   :  { %v1425_v62 = vadd.f32 %v1424_v61, %v1255_v60  ;;  %v2337_v56 = vpop.permute.xlu0 %2336 }
 0x249   :  { %3039 = vst [vmem:[%s4136_s4 + $0xc8] sm:$0xff] %v2983_v59   ;;  %v1761_v3 = vadd.f32 %v1760_v58, %v1592_v9 }
 0x24b   :  { %v2421_v0 = vmul.f32 %v2312_v6, %v1761_v3 }
 0x24d   :  { %v2549_v4 = vadd.f32 %v2485_v11, %v2421_v0 }
 0x24e   :  { %v1593_v63 = vpop.f32.mrf.mxu2  ;;  %v1258_v10 = vpop.f32.mrf.mxu0 }
 0x24f   :  { %v1762_v1 = vpop.f32.mrf.mxu3  ;;  %v1594_v2 = vadd.f32 %v1593_v63, %v1425_v62  ;;  %v1427_v13 = vpop.f32.mrf.mxu1 }
 0x250   :  { %v1428_v17 = vadd.f32 %v1427_v13, %v1258_v10 }
 0x251   :  { %v1763_v14 = vadd.f32 %v1762_v1, %v1594_v2 }
 0x253   :  { %v2422_v15 = vmul.f32 %v2317_v5, %v1763_v14 }
 0x255   :  { %v2550_v12 = vadd.f32 %v2486_v8, %v2422_v15  ;;  %v2342_v8 = vpop.permute.xlu1 %2341 }
 0x256   :  { %v1596_v18 = vpop.f32.mrf.mxu2  ;;  %v1260_v16 = vpop.f32.mrf.mxu0 }
 0x257   :  { %v1765_v19 = vpop.f32.mrf.mxu3  ;;  %v2988_v20 = vpack.c.bf16 %v2550_v12, %v2549_v4  ;;  %v1429_v21 = vpop.f32.mrf.mxu1  ;;  %v1597_v22 = vadd.f32 %v1596_v18, %v1428_v17  ;;  %v2491_v17 = vld [vmem:[%s4135_s3 + $0x1d0] sm:$0xff]  ;;  %v2492_v18 = vld [vmem:[%s4135_s3 + $0x1d8] sm:$0xff] }
 0x258   :  { %v1430_v7 = vadd.f32 %v1429_v21, %v1260_v16  ;;  %v2347_v12 = vpop.permute.xlu2 %2346 }
 0x259   :  { %3040 = vst [vmem:[%s4136_s4 + $0xd0] sm:$0xff] %v2988_v20   ;;  %v1766_v23 = vadd.f32 %v1765_v19, %v1597_v22 }
 0x25b   :  { %v2423_v32 = vmul.f32 %v2322_v31, %v1766_v23 }
 0x25d   :  { %v2551_v43 = vadd.f32 %v2487_v25, %v2423_v32 }
 0x25e   :  { %v1598_v27 = vpop.f32.mrf.mxu2  ;;  %v1263_v29 = vpop.f32.mrf.mxu0 }
 0x25f   :  { %v1767_v28 = vpop.f32.mrf.mxu3  ;;  %v1599_v24 = vadd.f32 %v1598_v27, %v1430_v7  ;;  %v1432_v30 = vpop.f32.mrf.mxu1 }
 0x260   :  { %v1433_v39 = vadd.f32 %v1432_v30, %v1263_v29 }
 0x261   :  { %v1768_v42 = vadd.f32 %v1767_v28, %v1599_v24 }
 0x263   :  { %v2424_v34 = vmul.f32 %v2327_v44, %v1768_v42  ;;  %v2352_v42 = vpop.permute.xlu0 %2351 }
 0x265   :  { %v2552_v26 = vadd.f32 %v2488_v37, %v2424_v34 }
 0x266   :  { %v1601_v33 = vpop.f32.mrf.mxu2  ;;  %v1265_v49 = vpop.f32.mrf.mxu0 }
 0x267   :  { %v1770_v35 = vpop.f32.mrf.mxu3  ;;  %v2993_v47 = vpack.c.bf16 %v2552_v26, %v2551_v43  ;;  %v1434_v50 = vpop.f32.mrf.mxu1  ;;  %v1602_v46 = vadd.f32 %v1601_v33, %v1433_v39  ;;  %v2493_v39 = vld [vmem:[%s4135_s3 + $0x1e0] sm:$0xff]  ;;  %v2494_v33 = vld [vmem:[%s4135_s3 + $0x1e8] sm:$0xff] }
 0x268   :  { %v1435_v48 = vadd.f32 %v1434_v50, %v1265_v49  ;;  %v2357_v26 = vpop.permute.xlu1 %2356 }
 0x269   :  { %3041 = vst [vmem:[%s4136_s4 + $0xd8] sm:$0xff] %v2993_v47   ;;  %v1771_v45 = vadd.f32 %v1770_v35, %v1602_v46 }
 0x26b   :  { %v2425_v54 = vmul.f32 %v2332_v38, %v1771_v45 }
 0x26d   :  { %v2553_v59 = vadd.f32 %v2489_v40, %v2425_v54 }
 0x26e   :  { %v1603_v51 = vpop.f32.mrf.mxu2  ;;  %v1268_v52 = vpop.f32.mrf.mxu0 }
 0x26f   :  { %v1772_v41 = vpop.f32.mrf.mxu3  ;;  %v1604_v36 = vadd.f32 %v1603_v51, %v1435_v48  ;;  %v1437_v53 = vpop.f32.mrf.mxu1 }
 0x270   :  { %v1438_v61 = vadd.f32 %v1437_v53, %v1268_v52 }
 0x271   :  { %v1773_v55 = vadd.f32 %v1772_v41, %v1604_v36 }
 0x273   :  { %v2426_v58 = vmul.f32 %v2337_v56, %v1773_v55  ;;  %v2362_v55 = vpop.permute.xlu2 %2361 }
 0x275   :  { %v2554_v60 = vadd.f32 %v2490_v57, %v2426_v58  ;;  %v2367_v58 = vpop.permute.xlu0 %2366 }
 0x276   :  { %v1606_v9 = vpop.f32.mrf.mxu2  ;;  %v1270_v63 = vpop.f32.mrf.mxu0 }
 0x277   :  { %v1775_v3 = vpop.f32.mrf.mxu3  ;;  %v2998_v62 = vpack.c.bf16 %v2554_v60, %v2553_v59  ;;  %v1439_v1 = vpop.f32.mrf.mxu1  ;;  %v1607_v2 = vadd.f32 %v1606_v9, %v1438_v61  ;;  %v2495_v59 = vld [vmem:[%s4135_s3 + $0x1f0] sm:$0xff]  ;;  %v2496_v60 = vld [vmem:[%s4135_s3 + $0x1f8] sm:$0xff] }
 0x278   :  { %v1440_v13 = vadd.f32 %v1439_v1, %v1270_v63 }
 0x279   :  { %3042 = vst [vmem:[%s4136_s4 + $0xe0] sm:$0xff] %v2998_v62   ;;  %v1776_v10 = vadd.f32 %v1775_v3, %v1607_v2 }
 0x27b   :  { %v2427_v15 = vmul.f32 %v2342_v8, %v1776_v10 }
 0x27d   :  { %v2555_v20 = vadd.f32 %v2491_v17, %v2427_v15 }
 0x27e   :  { %v1608_v6 = vpop.f32.mrf.mxu2  ;;  %v1273_v5 = vpop.f32.mrf.mxu0 }
 0x27f   :  { %v1777_v0 = vpop.f32.mrf.mxu3  ;;  %v1609_v14 = vadd.f32 %v1608_v6, %v1440_v13  ;;  %v1442_v11 = vpop.f32.mrf.mxu1 }
 0x280   :  { %v1443_v21 = vadd.f32 %v1442_v11, %v1273_v5 }
 0x281   :  { %v1778_v4 = vadd.f32 %v1777_v0, %v1609_v14 }
 0x283   :  { %v2428_v19 = vmul.f32 %v2347_v12, %v1778_v4 }
 0x285   :  { %v2556_v16 = vadd.f32 %v2492_v18, %v2428_v19 }
 0x286   :  { %v1611_v22 = vpop.f32.mrf.mxu2  ;;  %v1275_v27 = vpop.f32.mrf.mxu0 }
 0x287   :  { %v1780_v23 = vpop.f32.mrf.mxu3  ;;  %v3003_v7 = vpack.c.bf16 %v2556_v16, %v2555_v20  ;;  %v1444_v28 = vpop.f32.mrf.mxu1  ;;  %v1612_v24 = vadd.f32 %v1611_v22, %v1443_v21 }
 0x288   :  { %v1445_v30 = vadd.f32 %v1444_v28, %v1275_v27 }
 0x289   :  { %3043 = vst [vmem:[%s4136_s4 + $0xe8] sm:$0xff] %v3003_v7   ;;  %v1781_v29 = vadd.f32 %v1780_v23, %v1612_v24 }
 0x28b   :  { %v2429_v34 = vmul.f32 %v2352_v42, %v1781_v29 }
 0x28d   :  { %v2557_v47 = vadd.f32 %v2493_v39, %v2429_v34 }
 0x28e   :  { %v1613_v31 = vpop.f32.mrf.mxu2  ;;  %v1278_v25 = vpop.f32.mrf.mxu0 }
 0x28f   :  { %v1782_v32 = vpop.f32.mrf.mxu3  ;;  %v1614_v44 = vadd.f32 %v1613_v31, %v1445_v30  ;;  %v1447_v37 = vpop.f32.mrf.mxu1 }
 0x290   :  { %v1448_v50 = vadd.f32 %v1447_v37, %v1278_v25 }
 0x291   :  { %v1783_v43 = vadd.f32 %v1782_v32, %v1614_v44 }
 0x293   :  { %v2430_v35 = vmul.f32 %v2357_v26, %v1783_v43 }
 0x295   :  { %v2558_v49 = vadd.f32 %v2494_v33, %v2430_v35 }
 0x296   :  { %v1616_v46 = vpop.f32.mrf.mxu2  ;;  %v1280_v41 = vpop.f32.mrf.mxu0 }
 0x297   :  { %v1785_v45 = vpop.f32.mrf.mxu3  ;;  %v3008_v48 = vpack.c.bf16 %v2558_v49, %v2557_v47  ;;  %v1617_v51 = vadd.f32 %v1616_v46, %v1448_v50  ;;  %v1449_v36 = vpop.f32.mrf.mxu1 }
 0x298   :  { %v1450_v53 = vadd.f32 %v1449_v36, %v1280_v41 }
 0x299   :  { %3044 = vst [vmem:[%s4136_s4 + $0xf0] sm:$0xff] %v3008_v48   ;;  %v1786_v52 = vadd.f32 %v1785_v45, %v1617_v51 }
 0x29b   :  { %v2431_v40 = vmul.f32 %v2362_v55, %v1786_v52 }
 0x29d   :  { %v2559_v9 = vadd.f32 %v2495_v59, %v2431_v40 }
 0x29e   :  { %v1618_v38 = vpop.f32.mrf.mxu2 }
 0x29f   :  { %v1619_v54 = vadd.f32 %v1618_v38, %v1450_v53  ;;  %v1787_v56 = vpop.f32.mrf.mxu3 }
 0x2a1   :  { %v1788_v57 = vadd.f32 %v1787_v56, %v1619_v54 }
 0x2a3   :  { %v2432_v61 = vmul.f32 %v2367_v58, %v1788_v57 }
 0x2a5   :  { %v2560_v3 = vadd.f32 %v2496_v60, %v2432_v61 }
 0x2a7   :  { %v3013_v62 = vpack.c.bf16 %v2560_v3, %v2559_v9 }
 0x2a9   :  { %3045 = vst [vmem:[%s4136_s4 + $0xf8] sm:$0xff] %v3013_v62  }

</bundles_post_ra>
